<compile_context>
chip_gen: v5e
topology: v5e:2x2
jax: 0.10.0
libtpu: 0.0.40
codegen_flags: <defaults>
</compile_context>

<pallas_src>
import jax
import jax.numpy as jnp
from jax import lax
from jax.experimental import pallas as pl
from jax.experimental.pallas import tpu as pltpu


# Flattened-grid geometry for the fused conv kernel (see header comment).
GW = 11          # width of the flattened parity grids (10 valid cols + 1 junk)
R1 = 109         # conv1 rows computed per parity grid (valid rows <= 108)
R2 = 97          # conv2 rows computed (valid rows <= 96)
R3 = 73          # conv3 rows computed (valid rows <= 72)


# ---------------------------------------------------------------------------
# Pallas kernel 1: conv1 + conv2 + conv3 fully fused, one batch element per
# grid step.  Only unit-stride 2-D ref slices, small matmuls, adds and ReLUs.
# ---------------------------------------------------------------------------
def _conv_stack_kernel(xs_ref, w1_ref, b1_ref, w2_ref, b2_ref, w3_ref, b3_ref,
                       o_ref, a1_ref, a2_ref, a3_ref):
    # ---- conv1: produce the four parity grids (each R1 x 32) ----------------
    # xs_ref block: (1, 4, 121, 64); w1_ref: (4, 64, 32) indexed by p*2+q.
    for hr in range(2):
        for wr in range(2):
            acc = None
            for p in range(2):
                for q in range(2):
                    a, u0 = (hr + p) % 2, (hr + p) // 2
                    c, v0 = (wr + q) % 2, (wr + q) // 2
                    off = u0 * GW + v0
                    lhs = xs_ref[0, a * 2 + c, off:off + R1, :]       # (R1, 64)
                    term = jnp.dot(lhs, w1_ref[p * 2 + q],
                                   preferred_element_type=jnp.float32)
                    acc = term if acc is None else acc + term
            a1_ref[hr * 2 + wr] = jnp.maximum(acc + b1_ref[...], 0.0)

    # ---- conv2: 16 shifted matmuls over the parity grids --------------------
    # a1_ref: (4, R1, 32); w2_ref: (16, 32, 64) indexed by kh*4+kw.
    acc2 = None
    for hr in range(2):
        for wr in range(2):
            for p2 in range(2):
                for q2 in range(2):
                    off = p2 * GW + q2
                    lhs = a1_ref[hr * 2 + wr, off:off + R2, :]        # (R2, 32)
                    kh, kw = 2 * p2 + hr, 2 * q2 + wr
                    term = jnp.dot(lhs, w2_ref[kh * 4 + kw],
                                   preferred_element_type=jnp.float32)
                    acc2 = term if acc2 is None else acc2 + term
    a2_ref[...] = jnp.maximum(acc2 + b2_ref[...], 0.0)                # (R2, 64)

    # ---- conv3: 9 shifted matmuls -------------------------------------------
    # a2_ref: (R2, 64); w3_ref: (9, 64, 64) indexed by kh*3+kw.
    acc3 = None
    for kh in range(3):
        for kw in range(3):
            off = kh * GW + kw
            lhs = a2_ref[off:off + R3, :]                             # (R3, 64)
            term = jnp.dot(lhs, w3_ref[kh * 3 + kw],
                           preferred_element_type=jnp.float32)
            acc3 = term if acc3 is None else acc3 + term
    a3_ref[...] = jnp.maximum(acc3 + b3_ref[...], 0.0)                # (R3, 64)

    # ---- gather the 49 valid rows (7 runs of 7 on the 11-wide grid) ---------
    for u in range(7):
        o_ref[0, 7 * u:7 * u + 7, :] = a3_ref[GW * u:GW * u + 7, :]


def conv_stack(xs, w1s, b1, w2s, b2, w3s, b3):
    """xs: (B, 4, 121, 64) prepared input -> (B, 49, 64) conv3 activations."""
    B = xs.shape[0]
    return pl.pallas_call(
        _conv_stack_kernel,
        out_shape=jax.ShapeDtypeStruct((B, 49, 64), jnp.float32),
        grid_spec=pltpu.PrefetchScalarGridSpec(
            num_scalar_prefetch=0,
            grid=(B,),
            in_specs=[
                pl.BlockSpec((1, 4, 121, 64), lambda b: (b, 0, 0, 0)),
                pl.BlockSpec((4, 64, 32), lambda b: (0, 0, 0)),
                pl.BlockSpec((1, 32), lambda b: (0, 0)),
                pl.BlockSpec((16, 32, 64), lambda b: (0, 0, 0)),
                pl.BlockSpec((1, 64), lambda b: (0, 0)),
                pl.BlockSpec((9, 64, 64), lambda b: (0, 0, 0)),
                pl.BlockSpec((1, 64), lambda b: (0, 0)),
            ],
            out_specs=pl.BlockSpec((1, 49, 64), lambda b: (b, 0, 0)),
            scratch_shapes=[
                pltpu.VMEM((4, R1, 32), jnp.float32),   # conv1 parity grids
                pltpu.VMEM((R2, 64), jnp.float32),      # conv2 output
                pltpu.VMEM((R3, 64), jnp.float32),      # conv3 output
            ],
        ),
        compiler_params=pltpu.CompilerParams(
            # One batch element per step; on v7x each TensorCore takes one.
            dimension_semantics=("parallel",),
        ),
    )(xs, w1s, b1, w2s, b2, w3s, b3)


# ---------------------------------------------------------------------------
# Pallas kernel 2: fused fc (3136 -> 512, ReLU, bf16 weight) + head (512 -> 4).
# ---------------------------------------------------------------------------
def _fc_head_kernel(x_ref, w1_ref, b1_ref, w2_ref, b2_ref, o_ref):
    x = x_ref[...].astype(jnp.bfloat16)                    # tiny (B, 3136) cast
    h = jnp.dot(x, w1_ref[...], preferred_element_type=jnp.float32)
    h = jnp.maximum(h + b1_ref[...], 0.0)
    q = jnp.dot(h, w2_ref[...], preferred_element_type=jnp.float32)
    o_ref[...] = (q + b2_ref[...]).astype(o_ref.dtype)


def fc_head(x, w1, b1_2d, w2, b2_2d):
    M, K = x.shape
    K2, H = w1.shape
    H2, N = w2.shape
    assert K == K2 and H == H2
    # bf16 fc weight: ~3.2 MB; even double-buffered this fits v5e's 16 MiB
    # default scoped VMEM, so no vmem_limit / Buffered(1) override is needed.
    # TODO(synk): on v7x, split N=512 across the 2 TensorCores (2-step parallel
    #             grid) and combine the head outside if that extra launch pays.
    # TODO(synk): P10 cross-call prefetch of w1 during the conv kernel would
    #             hide the remaining fc-weight DMA entirely.
    return pl.pallas_call(
        _fc_head_kernel,
        out_shape=jax.ShapeDtypeStruct((M, N), jnp.float32),
        grid_spec=pltpu.PrefetchScalarGridSpec(
            num_scalar_prefetch=0,
            grid=(1,),
            in_specs=[
                pl.BlockSpec((M, K), lambda i: (0, 0)),
                pl.BlockSpec((K, H), lambda i: (0, 0)),
                pl.BlockSpec((1, H), lambda i: (0, 0)),
                pl.BlockSpec((H, N), lambda i: (0, 0)),
                pl.BlockSpec((1, N), lambda i: (0, 0)),
            ],
            out_specs=pl.BlockSpec((M, N), lambda i: (0, 0)),
        ),
        compiler_params=pltpu.CompilerParams(
            dimension_semantics=("arbitrary",),
        ),
    )(x, w1, b1_2d, w2, b2_2d)


# ---------------------------------------------------------------------------
# Input preparation: NCHW -> space-to-depth(4) -> parity split -> flattened
# parity grids.  Pure re-layout of the small input (no im2col amplification);
# XLA fuses this into one tiny transpose kernel.
# ---------------------------------------------------------------------------
def prep_input(x_nchw):
    B = x_nchw.shape[0]
    x = jnp.transpose(x_nchw, (0, 2, 3, 1))                         # (B,84,84,4)
    x = x.reshape(B, 21, 4, 21, 4, 4).transpose(0, 1, 3, 2, 4, 5)   # (B,21,21,4,4,4)
    x = x.reshape(B, 21, 21, 64)                                    # s2d, k=hr*16+wr*4+ic
    x = jnp.pad(x, ((0, 0), (0, 1), (0, 1), (0, 0)))                # (B,22,22,64)
    x = x.reshape(B, 11, 2, 11, 2, 64).transpose(0, 2, 4, 1, 3, 5)  # (B,2,2,11,11,64)
    return x.reshape(B, 4, 121, 64)                                 # [b, a*2+c, u*11+v, k]


# ---------------------------------------------------------------------------
# Parameters: PyTorch-style init, then a ONE-TIME layout transform.
# ---------------------------------------------------------------------------
def init_params(key):
    def uniform(key, shape, fan_in):
        bound = 1.0 / (fan_in ** 0.5)
        return jax.random.uniform(
            key, shape, dtype=jnp.float32, minval=-bound, maxval=bound
        )

    keys = jax.random.split(key, 10)
    return {
        "conv1_w": uniform(keys[0], (32, 4, 8, 8), 4 * 8 * 8),
        "conv1_b": uniform(keys[1], (32,), 4 * 8 * 8),
        "conv2_w": uniform(keys[2], (64, 32, 4, 4), 32 * 4 * 4),
        "conv2_b": uniform(keys[3], (64,), 32 * 4 * 4),
        "conv3_w": uniform(keys[4], (64, 64, 3, 3), 64 * 3 * 3),
        "conv3_b": uniform(keys[5], (64,), 64 * 3 * 3),
        "fc_w": uniform(keys[6], (512, 3136), 3136),
        "fc_b": uniform(keys[7], (512,), 3136),
        "head_w": uniform(keys[8], (4, 512), 512),
        "head_b": uniform(keys[9], (4,), 512),
    }


def prepare_params(params):
    """One-time weight layout transform (outside the forward)."""
    def conv_prep(w):  # (OC, IC, KH, KW) -> (KH*KW, IC, OC), index kh*KW+kw
        oc, ic, kh, kw = w.shape
        return w.transpose(2, 3, 1, 0).reshape(kh * kw, ic, oc)

    # conv1 weight matched to the space-to-depth(4) channel order k=hr*16+wr*4+ic
    # and split by the 2x2 block offsets (p, q): -> (4, 64, 32), index p*2+q.
    w1 = params["conv1_w"].transpose(2, 3, 1, 0)        # (8,8,4,32) [kh,kw,ic,oc]
    w1 = w1.reshape(2, 4, 2, 4, 4, 32)                  # [p,hr,q,wr,ic,oc]
    w1 = w1.transpose(0, 2, 1, 3, 4, 5).reshape(4, 64, 32)

    # fc weight: permute columns from PyTorch's (c,h,w) flatten to our (h,w,c)
    # flatten, transpose, and store in bf16 (the fc is purely DMA-bound).
    fc_w = (
        params["fc_w"].reshape(512, 64, 7, 7)
        .transpose(0, 2, 3, 1)
        .reshape(512, 3136)
        .T
    ).astype(jnp.bfloat16)                              # (3136, 512) bf16

    return {
        "c1_w": w1,                              "c1_b": params["conv1_b"].reshape(1, -1),
        "c2_w": conv_prep(params["conv2_w"]),    "c2_b": params["conv2_b"].reshape(1, -1),
        "c3_w": conv_prep(params["conv3_w"]),    "c3_b": params["conv3_b"].reshape(1, -1),
        "fc_w": fc_w,                            "fc_b": params["fc_b"].reshape(1, -1),
        "head_w": params["head_w"].T,            "head_b": params["head_b"].reshape(1, -1),
    }


# ---------------------------------------------------------------------------
# Forward pass (matches DQN.forward).
# ---------------------------------------------------------------------------
def dqn_forward(prep, x_nchw):
    xs = prep_input(x_nchw)                                       # (B,4,121,64)
    a3 = conv_stack(xs, prep["c1_w"], prep["c1_b"],
                    prep["c2_w"], prep["c2_b"],
                    prep["c3_w"], prep["c3_b"])                   # (B,49,64)
    flat = a3.reshape(a3.shape[0], -1)                            # (B,3136), free
    return fc_head(flat, prep["fc_w"], prep["fc_b"],
                   prep["head_w"], prep["head_b"])                # (B,4)


# ---------------------------------------------------------------------------
# Pure-JAX reference (PyTorch NCHW semantics) for the correctness check.
# ---------------------------------------------------------------------------
def dqn_reference(params, x):
    def conv(x, w, b, s):
        y = lax.conv_general_dilated(
            x, w, window_strides=(s, s), padding="VALID",
            dimension_numbers=("NCHW", "OIHW", "NCHW"),
            precision=lax.Precision.HIGHEST,
        )
        return jax.nn.relu(y + b[None, :, None, None])

    x = conv(x, params["conv1_w"], params["conv1_b"], 4)
    x = conv(x, params["conv2_w"], params["conv2_b"], 2)
    x = conv(x, params["conv3_w"], params["conv3_b"], 1)
    flat = x.reshape(x.shape[0], -1)
    h = jax.nn.relu(
        jnp.dot(flat, params["fc_w"].T, precision=lax.Precision.HIGHEST)
        + params["fc_b"]
    )
    return (jnp.dot(h, params["head_w"].T, precision=lax.Precision.HIGHEST)
            + params["head_b"])


if __name__ == "__main__":
    key = jax.random.PRNGKey(0)
    pkey, xkey = jax.random.split(key)
    params = init_params(pkey)
    prep = prepare_params(params)          # one-time weight layout transform

    # 84x84 input is required so conv3 flattens to 3136 (the fc layer fan-in).
    x = jax.random.normal(xkey, (2, 4, 84, 84), dtype=jnp.float32)

    q = jax.jit(dqn_forward)(prep, x)
    jax.block_until_ready(q)
    assert q.shape == (2, 4)

    q_ref = jax.jit(dqn_reference)(params, x)
    jax.block_until_ready(q_ref)
    # Tolerance covers the bf16 fc weight (error ~1e-3); an all-f32 path
    # would pass ~1e-5.
    assert bool(jnp.allclose(q, q_ref, rtol=1e-2, atol=1e-2)), "mismatch vs reference"

    print("KERNEL_OK")
</pallas_src>

<mosaic_0001>
module attributes {stable_mosaic.version = 11 : i64} {
  func.func @_conv_stack_kernel(%arg0: i32, %arg1: memref<1x4x121x64xf32, #tpu.memory_space<vmem>>, %arg2: memref<4x64x32xf32, #tpu.memory_space<vmem>>, %arg3: memref<1x32xf32, #tpu.memory_space<vmem>>, %arg4: memref<16x32x64xf32, #tpu.memory_space<vmem>>, %arg5: memref<1x64xf32, #tpu.memory_space<vmem>>, %arg6: memref<9x64x64xf32, #tpu.memory_space<vmem>>, %arg7: memref<1x64xf32, #tpu.memory_space<vmem>>, %arg8: memref<1x49x64xf32, #tpu.memory_space<vmem>>, %arg9: memref<4x109x32xf32, #tpu.memory_space<vmem>>, %arg10: memref<97x64xf32, #tpu.memory_space<vmem>>, %arg11: memref<73x64xf32, #tpu.memory_space<vmem>>) attributes {dimension_semantics = [#tpu.dimension_semantics<parallel>], iteration_bounds = array<i64: 2>, scalar_prefetch = 0 : i64, scratch_operands = 3 : i64, tpu.core_type = #tpu.core_type<tc>, window_params = [{transform_indices = @transform_0, window_bounds = array<i64: 1, 4, 121, 64>}, {pipeline_mode = #tpu.pipeline_mode<synchronous>, transform_indices = @transform_1, window_bounds = array<i64: 4, 64, 32>}, {pipeline_mode = #tpu.pipeline_mode<synchronous>, transform_indices = @transform_2, window_bounds = array<i64: 1, 32>}, {pipeline_mode = #tpu.pipeline_mode<synchronous>, transform_indices = @transform_3, window_bounds = array<i64: 16, 32, 64>}, {pipeline_mode = #tpu.pipeline_mode<synchronous>, transform_indices = @transform_4, window_bounds = array<i64: 1, 64>}, {pipeline_mode = #tpu.pipeline_mode<synchronous>, transform_indices = @transform_5, window_bounds = array<i64: 9, 64, 64>}, {pipeline_mode = #tpu.pipeline_mode<synchronous>, transform_indices = @transform_6, window_bounds = array<i64: 1, 64>}, {transform_indices = @transform_7, window_bounds = array<i64: 1, 49, 64>}]} {
    %c0 = arith.constant 0 : index
    %c0_0 = arith.constant 0 : index
    %c0_1 = arith.constant 0 : index
    %c0_2 = arith.constant 0 : index
    %0 = vector.load %arg1[%c0, %c0_0, %c0_1, %c0_2] : memref<1x4x121x64xf32, #tpu.memory_space<vmem>>, vector<1x1x109x64xf32>
    %1 = vector.shape_cast %0 : vector<1x1x109x64xf32> to vector<109x64xf32>
    %c0_3 = arith.constant 0 : index
    %c0_4 = arith.constant 0 : index
    %c0_5 = arith.constant 0 : index
    %2 = vector.load %arg2[%c0_3, %c0_4, %c0_5] : memref<4x64x32xf32, #tpu.memory_space<vmem>>, vector<1x64x32xf32>
    %3 = vector.shape_cast %2 : vector<1x64x32xf32> to vector<64x32xf32>
    %cst = arith.constant dense<0.000000e+00> : vector<109x32xf32>
    %4 = tpu.matmul %1, %3, %cst {dimension_numbers = #tpu.dot_dimension_numbers<[1], [0], [0], [1], [0, 0, 1, 1], [], []>} : vector<109x64xf32>, vector<64x32xf32>, vector<109x32xf32> -> vector<109x32xf32>
    %c0_6 = arith.constant 0 : index
    %c1 = arith.constant 1 : index
    %c0_7 = arith.constant 0 : index
    %c0_8 = arith.constant 0 : index
    %5 = vector.load %arg1[%c0_6, %c1, %c0_7, %c0_8] : memref<1x4x121x64xf32, #tpu.memory_space<vmem>>, vector<1x1x109x64xf32>
    %6 = vector.shape_cast %5 : vector<1x1x109x64xf32> to vector<109x64xf32>
    %c1_9 = arith.constant 1 : index
    %c0_10 = arith.constant 0 : index
    %c0_11 = arith.constant 0 : index
    %7 = vector.load %arg2[%c1_9, %c0_10, %c0_11] : memref<4x64x32xf32, #tpu.memory_space<vmem>>, vector<1x64x32xf32>
    %8 = vector.shape_cast %7 : vector<1x64x32xf32> to vector<64x32xf32>
    %cst_12 = arith.constant dense<0.000000e+00> : vector<109x32xf32>
    %9 = tpu.matmul %6, %8, %cst_12 {dimension_numbers = #tpu.dot_dimension_numbers<[1], [0], [0], [1], [0, 0, 1, 1], [], []>} : vector<109x64xf32>, vector<64x32xf32>, vector<109x32xf32> -> vector<109x32xf32>
    %10 = arith.addf %4, %9 : vector<109x32xf32>
    %c0_13 = arith.constant 0 : index
    %c2 = arith.constant 2 : index
    %c0_14 = arith.constant 0 : index
    %c0_15 = arith.constant 0 : index
    %11 = vector.load %arg1[%c0_13, %c2, %c0_14, %c0_15] : memref<1x4x121x64xf32, #tpu.memory_space<vmem>>, vector<1x1x109x64xf32>
    %12 = vector.shape_cast %11 : vector<1x1x109x64xf32> to vector<109x64xf32>
    %c2_16 = arith.constant 2 : index
    %c0_17 = arith.constant 0 : index
    %c0_18 = arith.constant 0 : index
    %13 = vector.load %arg2[%c2_16, %c0_17, %c0_18] : memref<4x64x32xf32, #tpu.memory_space<vmem>>, vector<1x64x32xf32>
    %14 = vector.shape_cast %13 : vector<1x64x32xf32> to vector<64x32xf32>
    %cst_19 = arith.constant dense<0.000000e+00> : vector<109x32xf32>
    %15 = tpu.matmul %12, %14, %cst_19 {dimension_numbers = #tpu.dot_dimension_numbers<[1], [0], [0], [1], [0, 0, 1, 1], [], []>} : vector<109x64xf32>, vector<64x32xf32>, vector<109x32xf32> -> vector<109x32xf32>
    %16 = arith.addf %10, %15 : vector<109x32xf32>
    %c0_20 = arith.constant 0 : index
    %c3 = arith.constant 3 : index
    %c0_21 = arith.constant 0 : index
    %c0_22 = arith.constant 0 : index
    %17 = vector.load %arg1[%c0_20, %c3, %c0_21, %c0_22] : memref<1x4x121x64xf32, #tpu.memory_space<vmem>>, vector<1x1x109x64xf32>
    %18 = vector.shape_cast %17 : vector<1x1x109x64xf32> to vector<109x64xf32>
    %c3_23 = arith.constant 3 : index
    %c0_24 = arith.constant 0 : index
    %c0_25 = arith.constant 0 : index
    %19 = vector.load %arg2[%c3_23, %c0_24, %c0_25] : memref<4x64x32xf32, #tpu.memory_space<vmem>>, vector<1x64x32xf32>
    %20 = vector.shape_cast %19 : vector<1x64x32xf32> to vector<64x32xf32>
    %cst_26 = arith.constant dense<0.000000e+00> : vector<109x32xf32>
    %21 = tpu.matmul %18, %20, %cst_26 {dimension_numbers = #tpu.dot_dimension_numbers<[1], [0], [0], [1], [0, 0, 1, 1], [], []>} : vector<109x64xf32>, vector<64x32xf32>, vector<109x32xf32> -> vector<109x32xf32>
    %22 = arith.addf %16, %21 : vector<109x32xf32>
    %c0_27 = arith.constant 0 : index
    %c0_28 = arith.constant 0 : index
    %23 = vector.load %arg3[%c0_27, %c0_28] : memref<1x32xf32, #tpu.memory_space<vmem>>, vector<1x32xf32>
    %24 = vector.broadcast %23 : vector<1x32xf32> to vector<109x32xf32>
    %25 = arith.addf %22, %24 : vector<109x32xf32>
    %cst_29 = arith.constant 0.000000e+00 : f32
    %26 = vector.broadcast %cst_29 : f32 to vector<109x32xf32>
    %27 = arith.maximumf %25, %26 : vector<109x32xf32>
    %c0_30 = arith.constant 0 : index
    %c0_31 = arith.constant 0 : index
    %c0_32 = arith.constant 0 : index
    %28 = vector.load %arg9[%c0_30, %c0_31, %c0_32] : memref<4x109x32xf32, #tpu.memory_space<vmem>>, vector<1x109x32xf32>
    %29 = vector.shape_cast %28 : vector<1x109x32xf32> to vector<109x32xf32>
    %30 = vector.shape_cast %27 : vector<109x32xf32> to vector<1x109x32xf32>
    tpu.vector_store %arg9[%c0_30, %c0_31, %c0_32], %30 {strides = array<i32>} : memref<4x109x32xf32, #tpu.memory_space<vmem>>, vector<1x109x32xf32>,
    %c0_33 = arith.constant 0 : index
    %c1_34 = arith.constant 1 : index
    %c0_35 = arith.constant 0 : index
    %c0_36 = arith.constant 0 : index
    %31 = vector.load %arg1[%c0_33, %c1_34, %c0_35, %c0_36] : memref<1x4x121x64xf32, #tpu.memory_space<vmem>>, vector<1x1x109x64xf32>
    %32 = vector.shape_cast %31 : vector<1x1x109x64xf32> to vector<109x64xf32>
    %c0_37 = arith.constant 0 : index
    %c0_38 = arith.constant 0 : index
    %c0_39 = arith.constant 0 : index
    %33 = vector.load %arg2[%c0_37, %c0_38, %c0_39] : memref<4x64x32xf32, #tpu.memory_space<vmem>>, vector<1x64x32xf32>
    %34 = vector.shape_cast %33 : vector<1x64x32xf32> to vector<64x32xf32>
    %cst_40 = arith.constant dense<0.000000e+00> : vector<109x32xf32>
    %35 = tpu.matmul %32, %34, %cst_40 {dimension_numbers = #tpu.dot_dimension_numbers<[1], [0], [0], [1], [0, 0, 1, 1], [], []>} : vector<109x64xf32>, vector<64x32xf32>, vector<109x32xf32> -> vector<109x32xf32>
    %c0_41 = arith.constant 0 : index
    %c0_42 = arith.constant 0 : index
    %c1_43 = arith.constant 1 : index
    %c0_44 = arith.constant 0 : index
    %36 = vector.load %arg1[%c0_41, %c0_42, %c1_43, %c0_44] : memref<1x4x121x64xf32, #tpu.memory_space<vmem>>, vector<1x1x109x64xf32>
    %37 = vector.shape_cast %36 : vector<1x1x109x64xf32> to vector<109x64xf32>
    %c1_45 = arith.constant 1 : index
    %c0_46 = arith.constant 0 : index
    %c0_47 = arith.constant 0 : index
    %38 = vector.load %arg2[%c1_45, %c0_46, %c0_47] : memref<4x64x32xf32, #tpu.memory_space<vmem>>, vector<1x64x32xf32>
    %39 = vector.shape_cast %38 : vector<1x64x32xf32> to vector<64x32xf32>
    %cst_48 = arith.constant dense<0.000000e+00> : vector<109x32xf32>
    %40 = tpu.matmul %37, %39, %cst_48 {dimension_numbers = #tpu.dot_dimension_numbers<[1], [0], [0], [1], [0, 0, 1, 1], [], []>} : vector<109x64xf32>, vector<64x32xf32>, vector<109x32xf32> -> vector<109x32xf32>
    %41 = arith.addf %35, %40 : vector<109x32xf32>
    %c0_49 = arith.constant 0 : index
    %c3_50 = arith.constant 3 : index
    %c0_51 = arith.constant 0 : index
    %c0_52 = arith.constant 0 : index
    %42 = vector.load %arg1[%c0_49, %c3_50, %c0_51, %c0_52] : memref<1x4x121x64xf32, #tpu.memory_space<vmem>>, vector<1x1x109x64xf32>
    %43 = vector.shape_cast %42 : vector<1x1x109x64xf32> to vector<109x64xf32>
    %c2_53 = arith.constant 2 : index
    %c0_54 = arith.constant 0 : index
    %c0_55 = arith.constant 0 : index
    %44 = vector.load %arg2[%c2_53, %c0_54, %c0_55] : memref<4x64x32xf32, #tpu.memory_space<vmem>>, vector<1x64x32xf32>
    %45 = vector.shape_cast %44 : vector<1x64x32xf32> to vector<64x32xf32>
    %cst_56 = arith.constant dense<0.000000e+00> : vector<109x32xf32>
    %46 = tpu.matmul %43, %45, %cst_56 {dimension_numbers = #tpu.dot_dimension_numbers<[1], [0], [0], [1], [0, 0, 1, 1], [], []>} : vector<109x64xf32>, vector<64x32xf32>, vector<109x32xf32> -> vector<109x32xf32>
    %47 = arith.addf %41, %46 : vector<109x32xf32>
    %c0_57 = arith.constant 0 : index
    %c2_58 = arith.constant 2 : index
    %c1_59 = arith.constant 1 : index
    %c0_60 = arith.constant 0 : index
    %48 = vector.load %arg1[%c0_57, %c2_58, %c1_59, %c0_60] : memref<1x4x121x64xf32, #tpu.memory_space<vmem>>, vector<1x1x109x64xf32>
    %49 = vector.shape_cast %48 : vector<1x1x109x64xf32> to vector<109x64xf32>
    %c3_61 = arith.constant 3 : index
    %c0_62 = arith.constant 0 : index
    %c0_63 = arith.constant 0 : index
    %50 = vector.load %arg2[%c3_61, %c0_62, %c0_63] : memref<4x64x32xf32, #tpu.memory_space<vmem>>, vector<1x64x32xf32>
    %51 = vector.shape_cast %50 : vector<1x64x32xf32> to vector<64x32xf32>
    %cst_64 = arith.constant dense<0.000000e+00> : vector<109x32xf32>
    %52 = tpu.matmul %49, %51, %cst_64 {dimension_numbers = #tpu.dot_dimension_numbers<[1], [0], [0], [1], [0, 0, 1, 1], [], []>} : vector<109x64xf32>, vector<64x32xf32>, vector<109x32xf32> -> vector<109x32xf32>
    %53 = arith.addf %47, %52 : vector<109x32xf32>
    %c0_65 = arith.constant 0 : index
    %c0_66 = arith.constant 0 : index
    %54 = vector.load %arg3[%c0_65, %c0_66] : memref<1x32xf32, #tpu.memory_space<vmem>>, vector<1x32xf32>
    %55 = vector.broadcast %54 : vector<1x32xf32> to vector<109x32xf32>
    %56 = arith.addf %53, %55 : vector<109x32xf32>
    %cst_67 = arith.constant 0.000000e+00 : f32
    %57 = vector.broadcast %cst_67 : f32 to vector<109x32xf32>
    %58 = arith.maximumf %56, %57 : vector<109x32xf32>
    %c1_68 = arith.constant 1 : index
    %c0_69 = arith.constant 0 : index
    %c0_70 = arith.constant 0 : index
    %59 = vector.load %arg9[%c1_68, %c0_69, %c0_70] : memref<4x109x32xf32, #tpu.memory_space<vmem>>, vector<1x109x32xf32>
    %60 = vector.shape_cast %59 : vector<1x109x32xf32> to vector<109x32xf32>
    %61 = vector.shape_cast %58 : vector<109x32xf32> to vector<1x109x32xf32>
    tpu.vector_store %arg9[%c1_68, %c0_69, %c0_70], %61 {strides = array<i32>} : memref<4x109x32xf32, #tpu.memory_space<vmem>>, vector<1x109x32xf32>,
    %c0_71 = arith.constant 0 : index
    %c2_72 = arith.constant 2 : index
    %c0_73 = arith.constant 0 : index
    %c0_74 = arith.constant 0 : index
    %62 = vector.load %arg1[%c0_71, %c2_72, %c0_73, %c0_74] : memref<1x4x121x64xf32, #tpu.memory_space<vmem>>, vector<1x1x109x64xf32>
    %63 = vector.shape_cast %62 : vector<1x1x109x64xf32> to vector<109x64xf32>
    %c0_75 = arith.constant 0 : index
    %c0_76 = arith.constant 0 : index
    %c0_77 = arith.constant 0 : index
    %64 = vector.load %arg2[%c0_75, %c0_76, %c0_77] : memref<4x64x32xf32, #tpu.memory_space<vmem>>, vector<1x64x32xf32>
    %65 = vector.shape_cast %64 : vector<1x64x32xf32> to vector<64x32xf32>
    %cst_78 = arith.constant dense<0.000000e+00> : vector<109x32xf32>
    %66 = tpu.matmul %63, %65, %cst_78 {dimension_numbers = #tpu.dot_dimension_numbers<[1], [0], [0], [1], [0, 0, 1, 1], [], []>} : vector<109x64xf32>, vector<64x32xf32>, vector<109x32xf32> -> vector<109x32xf32>
    %c0_79 = arith.constant 0 : index
    %c3_80 = arith.constant 3 : index
    %c0_81 = arith.constant 0 : index
    %c0_82 = arith.constant 0 : index
    %67 = vector.load %arg1[%c0_79, %c3_80, %c0_81, %c0_82] : memref<1x4x121x64xf32, #tpu.memory_space<vmem>>, vector<1x1x109x64xf32>
    %68 = vector.shape_cast %67 : vector<1x1x109x64xf32> to vector<109x64xf32>
    %c1_83 = arith.constant 1 : index
    %c0_84 = arith.constant 0 : index
    %c0_85 = arith.constant 0 : index
    %69 = vector.load %arg2[%c1_83, %c0_84, %c0_85] : memref<4x64x32xf32, #tpu.memory_space<vmem>>, vector<1x64x32xf32>
    %70 = vector.shape_cast %69 : vector<1x64x32xf32> to vector<64x32xf32>
    %cst_86 = arith.constant dense<0.000000e+00> : vector<109x32xf32>
    %71 = tpu.matmul %68, %70, %cst_86 {dimension_numbers = #tpu.dot_dimension_numbers<[1], [0], [0], [1], [0, 0, 1, 1], [], []>} : vector<109x64xf32>, vector<64x32xf32>, vector<109x32xf32> -> vector<109x32xf32>
    %72 = arith.addf %66, %71 : vector<109x32xf32>
    %c0_87 = arith.constant 0 : index
    %c0_88 = arith.constant 0 : index
    %c11 = arith.constant 11 : index
    %c0_89 = arith.constant 0 : index
    %73 = vector.load %arg1[%c0_87, %c0_88, %c11, %c0_89] : memref<1x4x121x64xf32, #tpu.memory_space<vmem>>, vector<1x1x109x64xf32>
    %74 = vector.shape_cast %73 : vector<1x1x109x64xf32> to vector<109x64xf32>
    %c2_90 = arith.constant 2 : index
    %c0_91 = arith.constant 0 : index
    %c0_92 = arith.constant 0 : index
    %75 = vector.load %arg2[%c2_90, %c0_91, %c0_92] : memref<4x64x32xf32, #tpu.memory_space<vmem>>, vector<1x64x32xf32>
    %76 = vector.shape_cast %75 : vector<1x64x32xf32> to vector<64x32xf32>
    %cst_93 = arith.constant dense<0.000000e+00> : vector<109x32xf32>
    %77 = tpu.matmul %74, %76, %cst_93 {dimension_numbers = #tpu.dot_dimension_numbers<[1], [0], [0], [1], [0, 0, 1, 1], [], []>} : vector<109x64xf32>, vector<64x32xf32>, vector<109x32xf32> -> vector<109x32xf32>
    %78 = arith.addf %72, %77 : vector<109x32xf32>
    %c0_94 = arith.constant 0 : index
    %c1_95 = arith.constant 1 : index
    %c11_96 = arith.constant 11 : index
    %c0_97 = arith.constant 0 : index
    %79 = vector.load %arg1[%c0_94, %c1_95, %c11_96, %c0_97] : memref<1x4x121x64xf32, #tpu.memory_space<vmem>>, vector<1x1x109x64xf32>
    %80 = vector.shape_cast %79 : vector<1x1x109x64xf32> to vector<109x64xf32>
    %c3_98 = arith.constant 3 : index
    %c0_99 = arith.constant 0 : index
    %c0_100 = arith.constant 0 : index
    %81 = vector.load %arg2[%c3_98, %c0_99, %c0_100] : memref<4x64x32xf32, #tpu.memory_space<vmem>>, vector<1x64x32xf32>
    %82 = vector.shape_cast %81 : vector<1x64x32xf32> to vector<64x32xf32>
    %cst_101 = arith.constant dense<0.000000e+00> : vector<109x32xf32>
    %83 = tpu.matmul %80, %82, %cst_101 {dimension_numbers = #tpu.dot_dimension_numbers<[1], [0], [0], [1], [0, 0, 1, 1], [], []>} : vector<109x64xf32>, vector<64x32xf32>, vector<109x32xf32> -> vector<109x32xf32>
    %84 = arith.addf %78, %83 : vector<109x32xf32>
    %c0_102 = arith.constant 0 : index
    %c0_103 = arith.constant 0 : index
    %85 = vector.load %arg3[%c0_102, %c0_103] : memref<1x32xf32, #tpu.memory_space<vmem>>, vector<1x32xf32>
    %86 = vector.broadcast %85 : vector<1x32xf32> to vector<109x32xf32>
    %87 = arith.addf %84, %86 : vector<109x32xf32>
    %cst_104 = arith.constant 0.000000e+00 : f32
    %88 = vector.broadcast %cst_104 : f32 to vector<109x32xf32>
    %89 = arith.maximumf %87, %88 : vector<109x32xf32>
    %c2_105 = arith.constant 2 : index
    %c0_106 = arith.constant 0 : index
    %c0_107 = arith.constant 0 : index
    %90 = vector.load %arg9[%c2_105, %c0_106, %c0_107] : memref<4x109x32xf32, #tpu.memory_space<vmem>>, vector<1x109x32xf32>
    %91 = vector.shape_cast %90 : vector<1x109x32xf32> to vector<109x32xf32>
    %92 = vector.shape_cast %89 : vector<109x32xf32> to vector<1x109x32xf32>
    tpu.vector_store %arg9[%c2_105, %c0_106, %c0_107], %92 {strides = array<i32>} : memref<4x109x32xf32, #tpu.memory_space<vmem>>, vector<1x109x32xf32>,
    %c0_108 = arith.constant 0 : index
    %c3_109 = arith.constant 3 : index
    %c0_110 = arith.constant 0 : index
    %c0_111 = arith.constant 0 : index
    %93 = vector.load %arg1[%c0_108, %c3_109, %c0_110, %c0_111] : memref<1x4x121x64xf32, #tpu.memory_space<vmem>>, vector<1x1x109x64xf32>
    %94 = vector.shape_cast %93 : vector<1x1x109x64xf32> to vector<109x64xf32>
    %c0_112 = arith.constant 0 : index
    %c0_113 = arith.constant 0 : index
    %c0_114 = arith.constant 0 : index
    %95 = vector.load %arg2[%c0_112, %c0_113, %c0_114] : memref<4x64x32xf32, #tpu.memory_space<vmem>>, vector<1x64x32xf32>
    %96 = vector.shape_cast %95 : vector<1x64x32xf32> to vector<64x32xf32>
    %cst_115 = arith.constant dense<0.000000e+00> : vector<109x32xf32>
    %97 = tpu.matmul %94, %96, %cst_115 {dimension_numbers = #tpu.dot_dimension_numbers<[1], [0], [0], [1], [0, 0, 1, 1], [], []>} : vector<109x64xf32>, vector<64x32xf32>, vector<109x32xf32> -> vector<109x32xf32>
    %c0_116 = arith.constant 0 : index
    %c2_117 = arith.constant 2 : index
    %c1_118 = arith.constant 1 : index
    %c0_119 = arith.constant 0 : index
    %98 = vector.load %arg1[%c0_116, %c2_117, %c1_118, %c0_119] : memref<1x4x121x64xf32, #tpu.memory_space<vmem>>, vector<1x1x109x64xf32>
    %99 = vector.shape_cast %98 : vector<1x1x109x64xf32> to vector<109x64xf32>
    %c1_120 = arith.constant 1 : index
    %c0_121 = arith.constant 0 : index
    %c0_122 = arith.constant 0 : index
    %100 = vector.load %arg2[%c1_120, %c0_121, %c0_122] : memref<4x64x32xf32, #tpu.memory_space<vmem>>, vector<1x64x32xf32>
    %101 = vector.shape_cast %100 : vector<1x64x32xf32> to vector<64x32xf32>
    %cst_123 = arith.constant dense<0.000000e+00> : vector<109x32xf32>
    %102 = tpu.matmul %99, %101, %cst_123 {dimension_numbers = #tpu.dot_dimension_numbers<[1], [0], [0], [1], [0, 0, 1, 1], [], []>} : vector<109x64xf32>, vector<64x32xf32>, vector<109x32xf32> -> vector<109x32xf32>
    %103 = arith.addf %97, %102 : vector<109x32xf32>
    %c0_124 = arith.constant 0 : index
    %c1_125 = arith.constant 1 : index
    %c11_126 = arith.constant 11 : index
    %c0_127 = arith.constant 0 : index
    %104 = vector.load %arg1[%c0_124, %c1_125, %c11_126, %c0_127] : memref<1x4x121x64xf32, #tpu.memory_space<vmem>>, vector<1x1x109x64xf32>
    %105 = vector.shape_cast %104 : vector<1x1x109x64xf32> to vector<109x64xf32>
    %c2_128 = arith.constant 2 : index
    %c0_129 = arith.constant 0 : index
    %c0_130 = arith.constant 0 : index
    %106 = vector.load %arg2[%c2_128, %c0_129, %c0_130] : memref<4x64x32xf32, #tpu.memory_space<vmem>>, vector<1x64x32xf32>
    %107 = vector.shape_cast %106 : vector<1x64x32xf32> to vector<64x32xf32>
    %cst_131 = arith.constant dense<0.000000e+00> : vector<109x32xf32>
    %108 = tpu.matmul %105, %107, %cst_131 {dimension_numbers = #tpu.dot_dimension_numbers<[1], [0], [0], [1], [0, 0, 1, 1], [], []>} : vector<109x64xf32>, vector<64x32xf32>, vector<109x32xf32> -> vector<109x32xf32>
    %109 = arith.addf %103, %108 : vector<109x32xf32>
    %c0_132 = arith.constant 0 : index
    %c0_133 = arith.constant 0 : index
    %c12 = arith.constant 12 : index
    %c0_134 = arith.constant 0 : index
    %110 = vector.load %arg1[%c0_132, %c0_133, %c12, %c0_134] : memref<1x4x121x64xf32, #tpu.memory_space<vmem>>, vector<1x1x109x64xf32>
    %111 = vector.shape_cast %110 : vector<1x1x109x64xf32> to vector<109x64xf32>
    %c3_135 = arith.constant 3 : index
    %c0_136 = arith.constant 0 : index
    %c0_137 = arith.constant 0 : index
    %112 = vector.load %arg2[%c3_135, %c0_136, %c0_137] : memref<4x64x32xf32, #tpu.memory_space<vmem>>, vector<1x64x32xf32>
    %113 = vector.shape_cast %112 : vector<1x64x32xf32> to vector<64x32xf32>
    %cst_138 = arith.constant dense<0.000000e+00> : vector<109x32xf32>
    %114 = tpu.matmul %111, %113, %cst_138 {dimension_numbers = #tpu.dot_dimension_numbers<[1], [0], [0], [1], [0, 0, 1, 1], [], []>} : vector<109x64xf32>, vector<64x32xf32>, vector<109x32xf32> -> vector<109x32xf32>
    %115 = arith.addf %109, %114 : vector<109x32xf32>
    %c0_139 = arith.constant 0 : index
    %c0_140 = arith.constant 0 : index
    %116 = vector.load %arg3[%c0_139, %c0_140] : memref<1x32xf32, #tpu.memory_space<vmem>>, vector<1x32xf32>
    %117 = vector.broadcast %116 : vector<1x32xf32> to vector<109x32xf32>
    %118 = arith.addf %115, %117 : vector<109x32xf32>
    %cst_141 = arith.constant 0.000000e+00 : f32
    %119 = vector.broadcast %cst_141 : f32 to vector<109x32xf32>
    %120 = arith.maximumf %118, %119 : vector<109x32xf32>
    %c3_142 = arith.constant 3 : index
    %c0_143 = arith.constant 0 : index
    %c0_144 = arith.constant 0 : index
    %121 = vector.load %arg9[%c3_142, %c0_143, %c0_144] : memref<4x109x32xf32, #tpu.memory_space<vmem>>, vector<1x109x32xf32>
    %122 = vector.shape_cast %121 : vector<1x109x32xf32> to vector<109x32xf32>
    %123 = vector.shape_cast %120 : vector<109x32xf32> to vector<1x109x32xf32>
    tpu.vector_store %arg9[%c3_142, %c0_143, %c0_144], %123 {strides = array<i32>} : memref<4x109x32xf32, #tpu.memory_space<vmem>>, vector<1x109x32xf32>,
    %c0_145 = arith.constant 0 : index
    %c0_146 = arith.constant 0 : index
    %c0_147 = arith.constant 0 : index
    %124 = vector.load %arg9[%c0_145, %c0_146, %c0_147] : memref<4x109x32xf32, #tpu.memory_space<vmem>>, vector<1x97x32xf32>
    %125 = vector.shape_cast %124 : vector<1x97x32xf32> to vector<97x32xf32>
    %c0_148 = arith.constant 0 : index
    %c0_149 = arith.constant 0 : index
    %c0_150 = arith.constant 0 : index
    %126 = vector.load %arg4[%c0_148, %c0_149, %c0_150] : memref<16x32x64xf32, #tpu.memory_space<vmem>>, vector<1x32x64xf32>
    %127 = vector.shape_cast %126 : vector<1x32x64xf32> to vector<32x64xf32>
    %cst_151 = arith.constant dense<0.000000e+00> : vector<97x64xf32>
    %128 = tpu.matmul %125, %127, %cst_151 {dimension_numbers = #tpu.dot_dimension_numbers<[1], [0], [0], [1], [0, 0, 1, 1], [], []>} : vector<97x32xf32>, vector<32x64xf32>, vector<97x64xf32> -> vector<97x64xf32>
    %c0_152 = arith.constant 0 : index
    %c1_153 = arith.constant 1 : index
    %c0_154 = arith.constant 0 : index
    %129 = vector.load %arg9[%c0_152, %c1_153, %c0_154] : memref<4x109x32xf32, #tpu.memory_space<vmem>>, vector<1x97x32xf32>
    %130 = vector.shape_cast %129 : vector<1x97x32xf32> to vector<97x32xf32>
    %c2_155 = arith.constant 2 : index
    %c0_156 = arith.constant 0 : index
    %c0_157 = arith.constant 0 : index
    %131 = vector.load %arg4[%c2_155, %c0_156, %c0_157] : memref<16x32x64xf32, #tpu.memory_space<vmem>>, vector<1x32x64xf32>
    %132 = vector.shape_cast %131 : vector<1x32x64xf32> to vector<32x64xf32>
    %cst_158 = arith.constant dense<0.000000e+00> : vector<97x64xf32>
    %133 = tpu.matmul %130, %132, %cst_158 {dimension_numbers = #tpu.dot_dimension_numbers<[1], [0], [0], [1], [0, 0, 1, 1], [], []>} : vector<97x32xf32>, vector<32x64xf32>, vector<97x64xf32> -> vector<97x64xf32>
    %134 = arith.addf %128, %133 : vector<97x64xf32>
    %c0_159 = arith.constant 0 : index
    %c11_160 = arith.constant 11 : index
    %c0_161 = arith.constant 0 : index
    %135 = vector.load %arg9[%c0_159, %c11_160, %c0_161] : memref<4x109x32xf32, #tpu.memory_space<vmem>>, vector<1x97x32xf32>
    %136 = vector.shape_cast %135 : vector<1x97x32xf32> to vector<97x32xf32>
    %c8 = arith.constant 8 : index
    %c0_162 = arith.constant 0 : index
    %c0_163 = arith.constant 0 : index
    %137 = vector.load %arg4[%c8, %c0_162, %c0_163] : memref<16x32x64xf32, #tpu.memory_space<vmem>>, vector<1x32x64xf32>
    %138 = vector.shape_cast %137 : vector<1x32x64xf32> to vector<32x64xf32>
    %cst_164 = arith.constant dense<0.000000e+00> : vector<97x64xf32>
    %139 = tpu.matmul %136, %138, %cst_164 {dimension_numbers = #tpu.dot_dimension_numbers<[1], [0], [0], [1], [0, 0, 1, 1], [], []>} : vector<97x32xf32>, vector<32x64xf32>, vector<97x64xf32> -> vector<97x64xf32>
    %140 = arith.addf %134, %139 : vector<97x64xf32>
    %c0_165 = arith.constant 0 : index
    %c12_166 = arith.constant 12 : index
    %c0_167 = arith.constant 0 : index
    %141 = vector.load %arg9[%c0_165, %c12_166, %c0_167] : memref<4x109x32xf32, #tpu.memory_space<vmem>>, vector<1x97x32xf32>
    %142 = vector.shape_cast %141 : vector<1x97x32xf32> to vector<97x32xf32>
    %c10 = arith.constant 10 : index
    %c0_168 = arith.constant 0 : index
    %c0_169 = arith.constant 0 : index
    %143 = vector.load %arg4[%c10, %c0_168, %c0_169] : memref<16x32x64xf32, #tpu.memory_space<vmem>>, vector<1x32x64xf32>
    %144 = vector.shape_cast %143 : vector<1x32x64xf32> to vector<32x64xf32>
    %cst_170 = arith.constant dense<0.000000e+00> : vector<97x64xf32>
    %145 = tpu.matmul %142, %144, %cst_170 {dimension_numbers = #tpu.dot_dimension_numbers<[1], [0], [0], [1], [0, 0, 1, 1], [], []>} : vector<97x32xf32>, vector<32x64xf32>, vector<97x64xf32> -> vector<97x64xf32>
    %146 = arith.addf %140, %145 : vector<97x64xf32>
    %c1_171 = arith.constant 1 : index
    %c0_172 = arith.constant 0 : index
    %c0_173 = arith.constant 0 : index
    %147 = vector.load %arg9[%c1_171, %c0_172, %c0_173] : memref<4x109x32xf32, #tpu.memory_space<vmem>>, vector<1x97x32xf32>
    %148 = vector.shape_cast %147 : vector<1x97x32xf32> to vector<97x32xf32>
    %c1_174 = arith.constant 1 : index
    %c0_175 = arith.constant 0 : index
    %c0_176 = arith.constant 0 : index
    %149 = vector.load %arg4[%c1_174, %c0_175, %c0_176] : memref<16x32x64xf32, #tpu.memory_space<vmem>>, vector<1x32x64xf32>
    %150 = vector.shape_cast %149 : vector<1x32x64xf32> to vector<32x64xf32>
    %cst_177 = arith.constant dense<0.000000e+00> : vector<97x64xf32>
    %151 = tpu.matmul %148, %150, %cst_177 {dimension_numbers = #tpu.dot_dimension_numbers<[1], [0], [0], [1], [0, 0, 1, 1], [], []>} : vector<97x32xf32>, vector<32x64xf32>, vector<97x64xf32> -> vector<97x64xf32>
    %152 = arith.addf %146, %151 : vector<97x64xf32>
    %c1_178 = arith.constant 1 : index
    %c1_179 = arith.constant 1 : index
    %c0_180 = arith.constant 0 : index
    %153 = vector.load %arg9[%c1_178, %c1_179, %c0_180] : memref<4x109x32xf32, #tpu.memory_space<vmem>>, vector<1x97x32xf32>
    %154 = vector.shape_cast %153 : vector<1x97x32xf32> to vector<97x32xf32>
    %c3_181 = arith.constant 3 : index
    %c0_182 = arith.constant 0 : index
    %c0_183 = arith.constant 0 : index
    %155 = vector.load %arg4[%c3_181, %c0_182, %c0_183] : memref<16x32x64xf32, #tpu.memory_space<vmem>>, vector<1x32x64xf32>
    %156 = vector.shape_cast %155 : vector<1x32x64xf32> to vector<32x64xf32>
    %cst_184 = arith.constant dense<0.000000e+00> : vector<97x64xf32>
    %157 = tpu.matmul %154, %156, %cst_184 {dimension_numbers = #tpu.dot_dimension_numbers<[1], [0], [0], [1], [0, 0, 1, 1], [], []>} : vector<97x32xf32>, vector<32x64xf32>, vector<97x64xf32> -> vector<97x64xf32>
    %158 = arith.addf %152, %157 : vector<97x64xf32>
    %c1_185 = arith.constant 1 : index
    %c11_186 = arith.constant 11 : index
    %c0_187 = arith.constant 0 : index
    %159 = vector.load %arg9[%c1_185, %c11_186, %c0_187] : memref<4x109x32xf32, #tpu.memory_space<vmem>>, vector<1x97x32xf32>
    %160 = vector.shape_cast %159 : vector<1x97x32xf32> to vector<97x32xf32>
    %c9 = arith.constant 9 : index
    %c0_188 = arith.constant 0 : index
    %c0_189 = arith.constant 0 : index
    %161 = vector.load %arg4[%c9, %c0_188, %c0_189] : memref<16x32x64xf32, #tpu.memory_space<vmem>>, vector<1x32x64xf32>
    %162 = vector.shape_cast %161 : vector<1x32x64xf32> to vector<32x64xf32>
    %cst_190 = arith.constant dense<0.000000e+00> : vector<97x64xf32>
    %163 = tpu.matmul %160, %162, %cst_190 {dimension_numbers = #tpu.dot_dimension_numbers<[1], [0], [0], [1], [0, 0, 1, 1], [], []>} : vector<97x32xf32>, vector<32x64xf32>, vector<97x64xf32> -> vector<97x64xf32>
    %164 = arith.addf %158, %163 : vector<97x64xf32>
    %c1_191 = arith.constant 1 : index
    %c12_192 = arith.constant 12 : index
    %c0_193 = arith.constant 0 : index
    %165 = vector.load %arg9[%c1_191, %c12_192, %c0_193] : memref<4x109x32xf32, #tpu.memory_space<vmem>>, vector<1x97x32xf32>
    %166 = vector.shape_cast %165 : vector<1x97x32xf32> to vector<97x32xf32>
    %c11_194 = arith.constant 11 : index
    %c0_195 = arith.constant 0 : index
    %c0_196 = arith.constant 0 : index
    %167 = vector.load %arg4[%c11_194, %c0_195, %c0_196] : memref<16x32x64xf32, #tpu.memory_space<vmem>>, vector<1x32x64xf32>
    %168 = vector.shape_cast %167 : vector<1x32x64xf32> to vector<32x64xf32>
    %cst_197 = arith.constant dense<0.000000e+00> : vector<97x64xf32>
    %169 = tpu.matmul %166, %168, %cst_197 {dimension_numbers = #tpu.dot_dimension_numbers<[1], [0], [0], [1], [0, 0, 1, 1], [], []>} : vector<97x32xf32>, vector<32x64xf32>, vector<97x64xf32> -> vector<97x64xf32>
    %170 = arith.addf %164, %169 : vector<97x64xf32>
    %c2_198 = arith.constant 2 : index
    %c0_199 = arith.constant 0 : index
    %c0_200 = arith.constant 0 : index
    %171 = vector.load %arg9[%c2_198, %c0_199, %c0_200] : memref<4x109x32xf32, #tpu.memory_space<vmem>>, vector<1x97x32xf32>
    %172 = vector.shape_cast %171 : vector<1x97x32xf32> to vector<97x32xf32>
    %c4 = arith.constant 4 : index
    %c0_201 = arith.constant 0 : index
    %c0_202 = arith.constant 0 : index
    %173 = vector.load %arg4[%c4, %c0_201, %c0_202] : memref<16x32x64xf32, #tpu.memory_space<vmem>>, vector<1x32x64xf32>
    %174 = vector.shape_cast %173 : vector<1x32x64xf32> to vector<32x64xf32>
    %cst_203 = arith.constant dense<0.000000e+00> : vector<97x64xf32>
    %175 = tpu.matmul %172, %174, %cst_203 {dimension_numbers = #tpu.dot_dimension_numbers<[1], [0], [0], [1], [0, 0, 1, 1], [], []>} : vector<97x32xf32>, vector<32x64xf32>, vector<97x64xf32> -> vector<97x64xf32>
    %176 = arith.addf %170, %175 : vector<97x64xf32>
    %c2_204 = arith.constant 2 : index
    %c1_205 = arith.constant 1 : index
    %c0_206 = arith.constant 0 : index
    %177 = vector.load %arg9[%c2_204, %c1_205, %c0_206] : memref<4x109x32xf32, #tpu.memory_space<vmem>>, vector<1x97x32xf32>
    %178 = vector.shape_cast %177 : vector<1x97x32xf32> to vector<97x32xf32>
    %c6 = arith.constant 6 : index
    %c0_207 = arith.constant 0 : index
    %c0_208 = arith.constant 0 : index
    %179 = vector.load %arg4[%c6, %c0_207, %c0_208] : memref<16x32x64xf32, #tpu.memory_space<vmem>>, vector<1x32x64xf32>
    %180 = vector.shape_cast %179 : vector<1x32x64xf32> to vector<32x64xf32>
    %cst_209 = arith.constant dense<0.000000e+00> : vector<97x64xf32>
    %181 = tpu.matmul %178, %180, %cst_209 {dimension_numbers = #tpu.dot_dimension_numbers<[1], [0], [0], [1], [0, 0, 1, 1], [], []>} : vector<97x32xf32>, vector<32x64xf32>, vector<97x64xf32> -> vector<97x64xf32>
    %182 = arith.addf %176, %181 : vector<97x64xf32>
    %c2_210 = arith.constant 2 : index
    %c11_211 = arith.constant 11 : index
    %c0_212 = arith.constant 0 : index
    %183 = vector.load %arg9[%c2_210, %c11_211, %c0_212] : memref<4x109x32xf32, #tpu.memory_space<vmem>>, vector<1x97x32xf32>
    %184 = vector.shape_cast %183 : vector<1x97x32xf32> to vector<97x32xf32>
    %c12_213 = arith.constant 12 : index
    %c0_214 = arith.constant 0 : index
    %c0_215 = arith.constant 0 : index
    %185 = vector.load %arg4[%c12_213, %c0_214, %c0_215] : memref<16x32x64xf32, #tpu.memory_space<vmem>>, vector<1x32x64xf32>
    %186 = vector.shape_cast %185 : vector<1x32x64xf32> to vector<32x64xf32>
    %cst_216 = arith.constant dense<0.000000e+00> : vector<97x64xf32>
    %187 = tpu.matmul %184, %186, %cst_216 {dimension_numbers = #tpu.dot_dimension_numbers<[1], [0], [0], [1], [0, 0, 1, 1], [], []>} : vector<97x32xf32>, vector<32x64xf32>, vector<97x64xf32> -> vector<97x64xf32>
    %188 = arith.addf %182, %187 : vector<97x64xf32>
    %c2_217 = arith.constant 2 : index
    %c12_218 = arith.constant 12 : index
    %c0_219 = arith.constant 0 : index
    %189 = vector.load %arg9[%c2_217, %c12_218, %c0_219] : memref<4x109x32xf32, #tpu.memory_space<vmem>>, vector<1x97x32xf32>
    %190 = vector.shape_cast %189 : vector<1x97x32xf32> to vector<97x32xf32>
    %c14 = arith.constant 14 : index
    %c0_220 = arith.constant 0 : index
    %c0_221 = arith.constant 0 : index
    %191 = vector.load %arg4[%c14, %c0_220, %c0_221] : memref<16x32x64xf32, #tpu.memory_space<vmem>>, vector<1x32x64xf32>
    %192 = vector.shape_cast %191 : vector<1x32x64xf32> to vector<32x64xf32>
    %cst_222 = arith.constant dense<0.000000e+00> : vector<97x64xf32>
    %193 = tpu.matmul %190, %192, %cst_222 {dimension_numbers = #tpu.dot_dimension_numbers<[1], [0], [0], [1], [0, 0, 1, 1], [], []>} : vector<97x32xf32>, vector<32x64xf32>, vector<97x64xf32> -> vector<97x64xf32>
    %194 = arith.addf %188, %193 : vector<97x64xf32>
    %c3_223 = arith.constant 3 : index
    %c0_224 = arith.constant 0 : index
    %c0_225 = arith.constant 0 : index
    %195 = vector.load %arg9[%c3_223, %c0_224, %c0_225] : memref<4x109x32xf32, #tpu.memory_space<vmem>>, vector<1x97x32xf32>
    %196 = vector.shape_cast %195 : vector<1x97x32xf32> to vector<97x32xf32>
    %c5 = arith.constant 5 : index
    %c0_226 = arith.constant 0 : index
    %c0_227 = arith.constant 0 : index
    %197 = vector.load %arg4[%c5, %c0_226, %c0_227] : memref<16x32x64xf32, #tpu.memory_space<vmem>>, vector<1x32x64xf32>
    %198 = vector.shape_cast %197 : vector<1x32x64xf32> to vector<32x64xf32>
    %cst_228 = arith.constant dense<0.000000e+00> : vector<97x64xf32>
    %199 = tpu.matmul %196, %198, %cst_228 {dimension_numbers = #tpu.dot_dimension_numbers<[1], [0], [0], [1], [0, 0, 1, 1], [], []>} : vector<97x32xf32>, vector<32x64xf32>, vector<97x64xf32> -> vector<97x64xf32>
    %200 = arith.addf %194, %199 : vector<97x64xf32>
    %c3_229 = arith.constant 3 : index
    %c1_230 = arith.constant 1 : index
    %c0_231 = arith.constant 0 : index
    %201 = vector.load %arg9[%c3_229, %c1_230, %c0_231] : memref<4x109x32xf32, #tpu.memory_space<vmem>>, vector<1x97x32xf32>
    %202 = vector.shape_cast %201 : vector<1x97x32xf32> to vector<97x32xf32>
    %c7 = arith.constant 7 : index
    %c0_232 = arith.constant 0 : index
    %c0_233 = arith.constant 0 : index
    %203 = vector.load %arg4[%c7, %c0_232, %c0_233] : memref<16x32x64xf32, #tpu.memory_space<vmem>>, vector<1x32x64xf32>
    %204 = vector.shape_cast %203 : vector<1x32x64xf32> to vector<32x64xf32>
    %cst_234 = arith.constant dense<0.000000e+00> : vector<97x64xf32>
    %205 = tpu.matmul %202, %204, %cst_234 {dimension_numbers = #tpu.dot_dimension_numbers<[1], [0], [0], [1], [0, 0, 1, 1], [], []>} : vector<97x32xf32>, vector<32x64xf32>, vector<97x64xf32> -> vector<97x64xf32>
    %206 = arith.addf %200, %205 : vector<97x64xf32>
    %c3_235 = arith.constant 3 : index
    %c11_236 = arith.constant 11 : index
    %c0_237 = arith.constant 0 : index
    %207 = vector.load %arg9[%c3_235, %c11_236, %c0_237] : memref<4x109x32xf32, #tpu.memory_space<vmem>>, vector<1x97x32xf32>
    %208 = vector.shape_cast %207 : vector<1x97x32xf32> to vector<97x32xf32>
    %c13 = arith.constant 13 : index
    %c0_238 = arith.constant 0 : index
    %c0_239 = arith.constant 0 : index
    %209 = vector.load %arg4[%c13, %c0_238, %c0_239] : memref<16x32x64xf32, #tpu.memory_space<vmem>>, vector<1x32x64xf32>
    %210 = vector.shape_cast %209 : vector<1x32x64xf32> to vector<32x64xf32>
    %cst_240 = arith.constant dense<0.000000e+00> : vector<97x64xf32>
    %211 = tpu.matmul %208, %210, %cst_240 {dimension_numbers = #tpu.dot_dimension_numbers<[1], [0], [0], [1], [0, 0, 1, 1], [], []>} : vector<97x32xf32>, vector<32x64xf32>, vector<97x64xf32> -> vector<97x64xf32>
    %212 = arith.addf %206, %211 : vector<97x64xf32>
    %c3_241 = arith.constant 3 : index
    %c12_242 = arith.constant 12 : index
    %c0_243 = arith.constant 0 : index
    %213 = vector.load %arg9[%c3_241, %c12_242, %c0_243] : memref<4x109x32xf32, #tpu.memory_space<vmem>>, vector<1x97x32xf32>
    %214 = vector.shape_cast %213 : vector<1x97x32xf32> to vector<97x32xf32>
    %c15 = arith.constant 15 : index
    %c0_244 = arith.constant 0 : index
    %c0_245 = arith.constant 0 : index
    %215 = vector.load %arg4[%c15, %c0_244, %c0_245] : memref<16x32x64xf32, #tpu.memory_space<vmem>>, vector<1x32x64xf32>
    %216 = vector.shape_cast %215 : vector<1x32x64xf32> to vector<32x64xf32>
    %cst_246 = arith.constant dense<0.000000e+00> : vector<97x64xf32>
    %217 = tpu.matmul %214, %216, %cst_246 {dimension_numbers = #tpu.dot_dimension_numbers<[1], [0], [0], [1], [0, 0, 1, 1], [], []>} : vector<97x32xf32>, vector<32x64xf32>, vector<97x64xf32> -> vector<97x64xf32>
    %218 = arith.addf %212, %217 : vector<97x64xf32>
    %c0_247 = arith.constant 0 : index
    %c0_248 = arith.constant 0 : index
    %219 = vector.load %arg5[%c0_247, %c0_248] : memref<1x64xf32, #tpu.memory_space<vmem>>, vector<1x64xf32>
    %220 = vector.broadcast %219 : vector<1x64xf32> to vector<97x64xf32>
    %221 = arith.addf %218, %220 : vector<97x64xf32>
    %cst_249 = arith.constant 0.000000e+00 : f32
    %222 = vector.broadcast %cst_249 : f32 to vector<97x64xf32>
    %223 = arith.maximumf %221, %222 : vector<97x64xf32>
    %c0_250 = arith.constant 0 : index
    %c0_251 = arith.constant 0 : index
    %224 = vector.load %arg10[%c0_250, %c0_251] : memref<97x64xf32, #tpu.memory_space<vmem>>, vector<97x64xf32>
    tpu.vector_store %arg10[%c0_250, %c0_251], %223 {strides = array<i32>} : memref<97x64xf32, #tpu.memory_space<vmem>>, vector<97x64xf32>,
    %c0_252 = arith.constant 0 : index
    %c0_253 = arith.constant 0 : index
    %225 = vector.load %arg10[%c0_252, %c0_253] : memref<97x64xf32, #tpu.memory_space<vmem>>, vector<73x64xf32>
    %c0_254 = arith.constant 0 : index
    %c0_255 = arith.constant 0 : index
    %c0_256 = arith.constant 0 : index
    %226 = vector.load %arg6[%c0_254, %c0_255, %c0_256] : memref<9x64x64xf32, #tpu.memory_space<vmem>>, vector<1x64x64xf32>
    %227 = vector.shape_cast %226 : vector<1x64x64xf32> to vector<64x64xf32>
    %cst_257 = arith.constant dense<0.000000e+00> : vector<73x64xf32>
    %228 = tpu.matmul %225, %227, %cst_257 {dimension_numbers = #tpu.dot_dimension_numbers<[1], [0], [0], [1], [0, 0, 1, 1], [], []>} : vector<73x64xf32>, vector<64x64xf32>, vector<73x64xf32> -> vector<73x64xf32>
    %c1_258 = arith.constant 1 : index
    %c0_259 = arith.constant 0 : index
    %229 = vector.load %arg10[%c1_258, %c0_259] : memref<97x64xf32, #tpu.memory_space<vmem>>, vector<73x64xf32>
    %c1_260 = arith.constant 1 : index
    %c0_261 = arith.constant 0 : index
    %c0_262 = arith.constant 0 : index
    %230 = vector.load %arg6[%c1_260, %c0_261, %c0_262] : memref<9x64x64xf32, #tpu.memory_space<vmem>>, vector<1x64x64xf32>
    %231 = vector.shape_cast %230 : vector<1x64x64xf32> to vector<64x64xf32>
    %cst_263 = arith.constant dense<0.000000e+00> : vector<73x64xf32>
    %232 = tpu.matmul %229, %231, %cst_263 {dimension_numbers = #tpu.dot_dimension_numbers<[1], [0], [0], [1], [0, 0, 1, 1], [], []>} : vector<73x64xf32>, vector<64x64xf32>, vector<73x64xf32> -> vector<73x64xf32>
    %233 = arith.addf %228, %232 : vector<73x64xf32>
    %c2_264 = arith.constant 2 : index
    %c0_265 = arith.constant 0 : index
    %234 = vector.load %arg10[%c2_264, %c0_265] : memref<97x64xf32, #tpu.memory_space<vmem>>, vector<73x64xf32>
    %c2_266 = arith.constant 2 : index
    %c0_267 = arith.constant 0 : index
    %c0_268 = arith.constant 0 : index
    %235 = vector.load %arg6[%c2_266, %c0_267, %c0_268] : memref<9x64x64xf32, #tpu.memory_space<vmem>>, vector<1x64x64xf32>
    %236 = vector.shape_cast %235 : vector<1x64x64xf32> to vector<64x64xf32>
    %cst_269 = arith.constant dense<0.000000e+00> : vector<73x64xf32>
    %237 = tpu.matmul %234, %236, %cst_269 {dimension_numbers = #tpu.dot_dimension_numbers<[1], [0], [0], [1], [0, 0, 1, 1], [], []>} : vector<73x64xf32>, vector<64x64xf32>, vector<73x64xf32> -> vector<73x64xf32>
    %238 = arith.addf %233, %237 : vector<73x64xf32>
    %c11_270 = arith.constant 11 : index
    %c0_271 = arith.constant 0 : index
    %239 = vector.load %arg10[%c11_270, %c0_271] : memref<97x64xf32, #tpu.memory_space<vmem>>, vector<73x64xf32>
    %c3_272 = arith.constant 3 : index
    %c0_273 = arith.constant 0 : index
    %c0_274 = arith.constant 0 : index
    %240 = vector.load %arg6[%c3_272, %c0_273, %c0_274] : memref<9x64x64xf32, #tpu.memory_space<vmem>>, vector<1x64x64xf32>
    %241 = vector.shape_cast %240 : vector<1x64x64xf32> to vector<64x64xf32>
    %cst_275 = arith.constant dense<0.000000e+00> : vector<73x64xf32>
    %242 = tpu.matmul %239, %241, %cst_275 {dimension_numbers = #tpu.dot_dimension_numbers<[1], [0], [0], [1], [0, 0, 1, 1], [], []>} : vector<73x64xf32>, vector<64x64xf32>, vector<73x64xf32> -> vector<73x64xf32>
    %243 = arith.addf %238, %242 : vector<73x64xf32>
    %c12_276 = arith.constant 12 : index
    %c0_277 = arith.constant 0 : index
    %244 = vector.load %arg10[%c12_276, %c0_277] : memref<97x64xf32, #tpu.memory_space<vmem>>, vector<73x64xf32>
    %c4_278 = arith.constant 4 : index
    %c0_279 = arith.constant 0 : index
    %c0_280 = arith.constant 0 : index
    %245 = vector.load %arg6[%c4_278, %c0_279, %c0_280] : memref<9x64x64xf32, #tpu.memory_space<vmem>>, vector<1x64x64xf32>
    %246 = vector.shape_cast %245 : vector<1x64x64xf32> to vector<64x64xf32>
    %cst_281 = arith.constant dense<0.000000e+00> : vector<73x64xf32>
    %247 = tpu.matmul %244, %246, %cst_281 {dimension_numbers = #tpu.dot_dimension_numbers<[1], [0], [0], [1], [0, 0, 1, 1], [], []>} : vector<73x64xf32>, vector<64x64xf32>, vector<73x64xf32> -> vector<73x64xf32>
    %248 = arith.addf %243, %247 : vector<73x64xf32>
    %c13_282 = arith.constant 13 : index
    %c0_283 = arith.constant 0 : index
    %249 = vector.load %arg10[%c13_282, %c0_283] : memref<97x64xf32, #tpu.memory_space<vmem>>, vector<73x64xf32>
    %c5_284 = arith.constant 5 : index
    %c0_285 = arith.constant 0 : index
    %c0_286 = arith.constant 0 : index
    %250 = vector.load %arg6[%c5_284, %c0_285, %c0_286] : memref<9x64x64xf32, #tpu.memory_space<vmem>>, vector<1x64x64xf32>
    %251 = vector.shape_cast %250 : vector<1x64x64xf32> to vector<64x64xf32>
    %cst_287 = arith.constant dense<0.000000e+00> : vector<73x64xf32>
    %252 = tpu.matmul %249, %251, %cst_287 {dimension_numbers = #tpu.dot_dimension_numbers<[1], [0], [0], [1], [0, 0, 1, 1], [], []>} : vector<73x64xf32>, vector<64x64xf32>, vector<73x64xf32> -> vector<73x64xf32>
    %253 = arith.addf %248, %252 : vector<73x64xf32>
    %c22 = arith.constant 22 : index
    %c0_288 = arith.constant 0 : index
    %254 = vector.load %arg10[%c22, %c0_288] : memref<97x64xf32, #tpu.memory_space<vmem>>, vector<73x64xf32>
    %c6_289 = arith.constant 6 : index
    %c0_290 = arith.constant 0 : index
    %c0_291 = arith.constant 0 : index
    %255 = vector.load %arg6[%c6_289, %c0_290, %c0_291] : memref<9x64x64xf32, #tpu.memory_space<vmem>>, vector<1x64x64xf32>
    %256 = vector.shape_cast %255 : vector<1x64x64xf32> to vector<64x64xf32>
    %cst_292 = arith.constant dense<0.000000e+00> : vector<73x64xf32>
    %257 = tpu.matmul %254, %256, %cst_292 {dimension_numbers = #tpu.dot_dimension_numbers<[1], [0], [0], [1], [0, 0, 1, 1], [], []>} : vector<73x64xf32>, vector<64x64xf32>, vector<73x64xf32> -> vector<73x64xf32>
    %258 = arith.addf %253, %257 : vector<73x64xf32>
    %c23 = arith.constant 23 : index
    %c0_293 = arith.constant 0 : index
    %259 = vector.load %arg10[%c23, %c0_293] : memref<97x64xf32, #tpu.memory_space<vmem>>, vector<73x64xf32>
    %c7_294 = arith.constant 7 : index
    %c0_295 = arith.constant 0 : index
    %c0_296 = arith.constant 0 : index
    %260 = vector.load %arg6[%c7_294, %c0_295, %c0_296] : memref<9x64x64xf32, #tpu.memory_space<vmem>>, vector<1x64x64xf32>
    %261 = vector.shape_cast %260 : vector<1x64x64xf32> to vector<64x64xf32>
    %cst_297 = arith.constant dense<0.000000e+00> : vector<73x64xf32>
    %262 = tpu.matmul %259, %261, %cst_297 {dimension_numbers = #tpu.dot_dimension_numbers<[1], [0], [0], [1], [0, 0, 1, 1], [], []>} : vector<73x64xf32>, vector<64x64xf32>, vector<73x64xf32> -> vector<73x64xf32>
    %263 = arith.addf %258, %262 : vector<73x64xf32>
    %c24 = arith.constant 24 : index
    %c0_298 = arith.constant 0 : index
    %264 = vector.load %arg10[%c24, %c0_298] : memref<97x64xf32, #tpu.memory_space<vmem>>, vector<73x64xf32>
    %c8_299 = arith.constant 8 : index
    %c0_300 = arith.constant 0 : index
    %c0_301 = arith.constant 0 : index
    %265 = vector.load %arg6[%c8_299, %c0_300, %c0_301] : memref<9x64x64xf32, #tpu.memory_space<vmem>>, vector<1x64x64xf32>
    %266 = vector.shape_cast %265 : vector<1x64x64xf32> to vector<64x64xf32>
    %cst_302 = arith.constant dense<0.000000e+00> : vector<73x64xf32>
    %267 = tpu.matmul %264, %266, %cst_302 {dimension_numbers = #tpu.dot_dimension_numbers<[1], [0], [0], [1], [0, 0, 1, 1], [], []>} : vector<73x64xf32>, vector<64x64xf32>, vector<73x64xf32> -> vector<73x64xf32>
    %268 = arith.addf %263, %267 : vector<73x64xf32>
    %c0_303 = arith.constant 0 : index
    %c0_304 = arith.constant 0 : index
    %269 = vector.load %arg7[%c0_303, %c0_304] : memref<1x64xf32, #tpu.memory_space<vmem>>, vector<1x64xf32>
    %270 = vector.broadcast %269 : vector<1x64xf32> to vector<73x64xf32>
    %271 = arith.addf %268, %270 : vector<73x64xf32>
    %cst_305 = arith.constant 0.000000e+00 : f32
    %272 = vector.broadcast %cst_305 : f32 to vector<73x64xf32>
    %273 = arith.maximumf %271, %272 : vector<73x64xf32>
    %c0_306 = arith.constant 0 : index
    %c0_307 = arith.constant 0 : index
    %274 = vector.load %arg11[%c0_306, %c0_307] : memref<73x64xf32, #tpu.memory_space<vmem>>, vector<73x64xf32>
    tpu.vector_store %arg11[%c0_306, %c0_307], %273 {strides = array<i32>} : memref<73x64xf32, #tpu.memory_space<vmem>>, vector<73x64xf32>,
    %c0_308 = arith.constant 0 : index
    %c0_309 = arith.constant 0 : index
    %275 = vector.load %arg11[%c0_308, %c0_309] : memref<73x64xf32, #tpu.memory_space<vmem>>, vector<7x64xf32>
    %c0_310 = arith.constant 0 : index
    %c0_311 = arith.constant 0 : index
    %c0_312 = arith.constant 0 : index
    %276 = vector.load %arg8[%c0_310, %c0_311, %c0_312] : memref<1x49x64xf32, #tpu.memory_space<vmem>>, vector<1x7x64xf32>
    %277 = vector.shape_cast %276 : vector<1x7x64xf32> to vector<7x64xf32>
    %278 = vector.shape_cast %275 : vector<7x64xf32> to vector<1x7x64xf32>
    tpu.vector_store %arg8[%c0_310, %c0_311, %c0_312], %278 {strides = array<i32>} : memref<1x49x64xf32, #tpu.memory_space<vmem>>, vector<1x7x64xf32>,
    %c11_313 = arith.constant 11 : index
    %c0_314 = arith.constant 0 : index
    %279 = vector.load %arg11[%c11_313, %c0_314] : memref<73x64xf32, #tpu.memory_space<vmem>>, vector<7x64xf32>
    %c0_315 = arith.constant 0 : index
    %c7_316 = arith.constant 7 : index
    %c0_317 = arith.constant 0 : index
    %280 = vector.load %arg8[%c0_315, %c7_316, %c0_317] : memref<1x49x64xf32, #tpu.memory_space<vmem>>, vector<1x7x64xf32>
    %281 = vector.shape_cast %280 : vector<1x7x64xf32> to vector<7x64xf32>
    %282 = vector.shape_cast %279 : vector<7x64xf32> to vector<1x7x64xf32>
    tpu.vector_store %arg8[%c0_315, %c7_316, %c0_317], %282 {strides = array<i32>} : memref<1x49x64xf32, #tpu.memory_space<vmem>>, vector<1x7x64xf32>,
    %c22_318 = arith.constant 22 : index
    %c0_319 = arith.constant 0 : index
    %283 = vector.load %arg11[%c22_318, %c0_319] : memref<73x64xf32, #tpu.memory_space<vmem>>, vector<7x64xf32>
    %c0_320 = arith.constant 0 : index
    %c14_321 = arith.constant 14 : index
    %c0_322 = arith.constant 0 : index
    %284 = vector.load %arg8[%c0_320, %c14_321, %c0_322] : memref<1x49x64xf32, #tpu.memory_space<vmem>>, vector<1x7x64xf32>
    %285 = vector.shape_cast %284 : vector<1x7x64xf32> to vector<7x64xf32>
    %286 = vector.shape_cast %283 : vector<7x64xf32> to vector<1x7x64xf32>
    tpu.vector_store %arg8[%c0_320, %c14_321, %c0_322], %286 {strides = array<i32>} : memref<1x49x64xf32, #tpu.memory_space<vmem>>, vector<1x7x64xf32>,
    %c33 = arith.constant 33 : index
    %c0_323 = arith.constant 0 : index
    %287 = vector.load %arg11[%c33, %c0_323] : memref<73x64xf32, #tpu.memory_space<vmem>>, vector<7x64xf32>
    %c0_324 = arith.constant 0 : index
    %c21 = arith.constant 21 : index
    %c0_325 = arith.constant 0 : index
    %288 = vector.load %arg8[%c0_324, %c21, %c0_325] : memref<1x49x64xf32, #tpu.memory_space<vmem>>, vector<1x7x64xf32>
    %289 = vector.shape_cast %288 : vector<1x7x64xf32> to vector<7x64xf32>
    %290 = vector.shape_cast %287 : vector<7x64xf32> to vector<1x7x64xf32>
    tpu.vector_store %arg8[%c0_324, %c21, %c0_325], %290 {strides = array<i32>} : memref<1x49x64xf32, #tpu.memory_space<vmem>>, vector<1x7x64xf32>,
    %c44 = arith.constant 44 : index
    %c0_326 = arith.constant 0 : index
    %291 = vector.load %arg11[%c44, %c0_326] : memref<73x64xf32, #tpu.memory_space<vmem>>, vector<7x64xf32>
    %c0_327 = arith.constant 0 : index
    %c28 = arith.constant 28 : index
    %c0_328 = arith.constant 0 : index
    %292 = vector.load %arg8[%c0_327, %c28, %c0_328] : memref<1x49x64xf32, #tpu.memory_space<vmem>>, vector<1x7x64xf32>
    %293 = vector.shape_cast %292 : vector<1x7x64xf32> to vector<7x64xf32>
    %294 = vector.shape_cast %291 : vector<7x64xf32> to vector<1x7x64xf32>
    tpu.vector_store %arg8[%c0_327, %c28, %c0_328], %294 {strides = array<i32>} : memref<1x49x64xf32, #tpu.memory_space<vmem>>, vector<1x7x64xf32>,
    %c55 = arith.constant 55 : index
    %c0_329 = arith.constant 0 : index
    %295 = vector.load %arg11[%c55, %c0_329] : memref<73x64xf32, #tpu.memory_space<vmem>>, vector<7x64xf32>
    %c0_330 = arith.constant 0 : index
    %c35 = arith.constant 35 : index
    %c0_331 = arith.constant 0 : index
    %296 = vector.load %arg8[%c0_330, %c35, %c0_331] : memref<1x49x64xf32, #tpu.memory_space<vmem>>, vector<1x7x64xf32>
    %297 = vector.shape_cast %296 : vector<1x7x64xf32> to vector<7x64xf32>
    %298 = vector.shape_cast %295 : vector<7x64xf32> to vector<1x7x64xf32>
    tpu.vector_store %arg8[%c0_330, %c35, %c0_331], %298 {strides = array<i32>} : memref<1x49x64xf32, #tpu.memory_space<vmem>>, vector<1x7x64xf32>,
    %c66 = arith.constant 66 : index
    %c0_332 = arith.constant 0 : index
    %299 = vector.load %arg11[%c66, %c0_332] : memref<73x64xf32, #tpu.memory_space<vmem>>, vector<7x64xf32>
    %c0_333 = arith.constant 0 : index
    %c42 = arith.constant 42 : index
    %c0_334 = arith.constant 0 : index
    %300 = vector.load %arg8[%c0_333, %c42, %c0_334] : memref<1x49x64xf32, #tpu.memory_space<vmem>>, vector<1x7x64xf32>
    %301 = vector.shape_cast %300 : vector<1x7x64xf32> to vector<7x64xf32>
    %302 = vector.shape_cast %299 : vector<7x64xf32> to vector<1x7x64xf32>
    tpu.vector_store %arg8[%c0_333, %c42, %c0_334], %302 {strides = array<i32>} : memref<1x49x64xf32, #tpu.memory_space<vmem>>, vector<1x7x64xf32>,
    return
  }
  func.func @transform_0(%arg0: i32) -> (i32, i32, i32, i32) {
    %c0_i32 = arith.constant 0 : i32
    %c0_i32_0 = arith.constant 0 : i32
    %c0_i32_1 = arith.constant 0 : i32
    %c0_i32_2 = arith.constant 0 : i32
    return %arg0, %c0_i32, %c0_i32_0, %c0_i32_1 : i32, i32, i32, i32
  }
  func.func @transform_1(%arg0: i32) -> (i32, i32, i32) {
    %c0_i32 = arith.constant 0 : i32
    %c0_i32_0 = arith.constant 0 : i32
    %c0_i32_1 = arith.constant 0 : i32
    %c0_i32_2 = arith.constant 0 : i32
    return %c0_i32, %c0_i32_0, %c0_i32_1 : i32, i32, i32
  }
  func.func @transform_2(%arg0: i32) -> (i32, i32) {
    %c0_i32 = arith.constant 0 : i32
    %c0_i32_0 = arith.constant 0 : i32
    %c0_i32_1 = arith.constant 0 : i32
    return %c0_i32, %c0_i32_0 : i32, i32
  }
  func.func @transform_3(%arg0: i32) -> (i32, i32, i32) {
    %c0_i32 = arith.constant 0 : i32
    %c0_i32_0 = arith.constant 0 : i32
    %c0_i32_1 = arith.constant 0 : i32
    %c0_i32_2 = arith.constant 0 : i32
    return %c0_i32, %c0_i32_0, %c0_i32_1 : i32, i32, i32
  }
  func.func @transform_4(%arg0: i32) -> (i32, i32) {
    %c0_i32 = arith.constant 0 : i32
    %c0_i32_0 = arith.constant 0 : i32
    %c0_i32_1 = arith.constant 0 : i32
    return %c0_i32, %c0_i32_0 : i32, i32
  }
  func.func @transform_5(%arg0: i32) -> (i32, i32, i32) {
    %c0_i32 = arith.constant 0 : i32
    %c0_i32_0 = arith.constant 0 : i32
    %c0_i32_1 = arith.constant 0 : i32
    %c0_i32_2 = arith.constant 0 : i32
    return %c0_i32, %c0_i32_0, %c0_i32_1 : i32, i32, i32
  }
  func.func @transform_6(%arg0: i32) -> (i32, i32) {
    %c0_i32 = arith.constant 0 : i32
    %c0_i32_0 = arith.constant 0 : i32
    %c0_i32_1 = arith.constant 0 : i32
    return %c0_i32, %c0_i32_0 : i32, i32
  }
  func.func @transform_7(%arg0: i32) -> (i32, i32, i32) {
    %c0_i32 = arith.constant 0 : i32
    %c0_i32_0 = arith.constant 0 : i32
    %c0_i32_1 = arith.constant 0 : i32
    return %arg0, %c0_i32, %c0_i32_0 : i32, i32, i32
  }
}

module attributes {stable_mosaic.version = 11 : i64} {
  func.func @_fc_head_kernel(%arg0: i32, %arg1: memref<2x3136xf32, #tpu.memory_space<vmem>>, %arg2: memref<3136x512xbf16, #tpu.memory_space<vmem>>, %arg3: memref<1x512xf32, #tpu.memory_space<vmem>>, %arg4: memref<512x4xf32, #tpu.memory_space<vmem>>, %arg5: memref<1x4xf32, #tpu.memory_space<vmem>>, %arg6: memref<2x4xf32, #tpu.memory_space<vmem>>) attributes {dimension_semantics = [#tpu.dimension_semantics<arbitrary>], iteration_bounds = array<i64: 1>, scalar_prefetch = 0 : i64, scratch_operands = 0 : i64, tpu.core_type = #tpu.core_type<tc>, window_params = [{pipeline_mode = #tpu.pipeline_mode<synchronous>, transform_indices = @transform_0, window_bounds = array<i64: 2, 3136>}, {pipeline_mode = #tpu.pipeline_mode<synchronous>, transform_indices = @transform_1, window_bounds = array<i64: 3136, 512>}, {pipeline_mode = #tpu.pipeline_mode<synchronous>, transform_indices = @transform_2, window_bounds = array<i64: 1, 512>}, {pipeline_mode = #tpu.pipeline_mode<synchronous>, transform_indices = @transform_3, window_bounds = array<i64: 512, 4>}, {pipeline_mode = #tpu.pipeline_mode<synchronous>, transform_indices = @transform_4, window_bounds = array<i64: 1, 4>}, {pipeline_mode = #tpu.pipeline_mode<synchronous>, transform_indices = @transform_5, window_bounds = array<i64: 2, 4>}]} {
    %c0 = arith.constant 0 : index
    %c0_0 = arith.constant 0 : index
    %0 = vector.load %arg1[%c0, %c0_0] : memref<2x3136xf32, #tpu.memory_space<vmem>>, vector<2x3136xf32>
    %1 = arith.truncf %0 : vector<2x3136xf32> to vector<2x3136xbf16>
    %c0_1 = arith.constant 0 : index
    %c0_2 = arith.constant 0 : index
    %2 = vector.load %arg2[%c0_1, %c0_2] : memref<3136x512xbf16, #tpu.memory_space<vmem>>, vector<3136x512xbf16>
    %cst = arith.constant dense<0.000000e+00> : vector<2x512xf32>
    %3 = tpu.matmul %1, %2, %cst {dimension_numbers = #tpu.dot_dimension_numbers<[1], [0], [0], [1], [0, 0, 1, 1], [], []>} : vector<2x3136xbf16>, vector<3136x512xbf16>, vector<2x512xf32> -> vector<2x512xf32>
    %c0_3 = arith.constant 0 : index
    %c0_4 = arith.constant 0 : index
    %4 = vector.load %arg3[%c0_3, %c0_4] : memref<1x512xf32, #tpu.memory_space<vmem>>, vector<1x512xf32>
    %5 = vector.broadcast %4 : vector<1x512xf32> to vector<2x512xf32>
    %6 = arith.addf %3, %5 : vector<2x512xf32>
    %cst_5 = arith.constant 0.000000e+00 : f32
    %7 = vector.broadcast %cst_5 : f32 to vector<2x512xf32>
    %8 = arith.maximumf %6, %7 : vector<2x512xf32>
    %c0_6 = arith.constant 0 : index
    %c0_7 = arith.constant 0 : index
    %9 = vector.load %arg4[%c0_6, %c0_7] : memref<512x4xf32, #tpu.memory_space<vmem>>, vector<512x4xf32>
    %cst_8 = arith.constant dense<0.000000e+00> : vector<2x4xf32>
    %10 = tpu.matmul %8, %9, %cst_8 {dimension_numbers = #tpu.dot_dimension_numbers<[1], [0], [0], [1], [0, 0, 1, 1], [], []>} : vector<2x512xf32>, vector<512x4xf32>, vector<2x4xf32> -> vector<2x4xf32>
    %c0_9 = arith.constant 0 : index
    %c0_10 = arith.constant 0 : index
    %11 = vector.load %arg5[%c0_9, %c0_10] : memref<1x4xf32, #tpu.memory_space<vmem>>, vector<1x4xf32>
    %12 = vector.broadcast %11 : vector<1x4xf32> to vector<2x4xf32>
    %13 = arith.addf %10, %12 : vector<2x4xf32>
    %c0_11 = arith.constant 0 : index
    %c0_12 = arith.constant 0 : index
    %14 = vector.load %arg6[%c0_11, %c0_12] : memref<2x4xf32, #tpu.memory_space<vmem>>, vector<2x4xf32>
    tpu.vector_store %arg6[%c0_11, %c0_12], %13 {strides = array<i32>} : memref<2x4xf32, #tpu.memory_space<vmem>>, vector<2x4xf32>,
    return
  }
  func.func @transform_0(%arg0: i32) -> (i32, i32) {
    %c0_i32 = arith.constant 0 : i32
    %c0_i32_0 = arith.constant 0 : i32
    %c0_i32_1 = arith.constant 0 : i32
    return %c0_i32, %c0_i32_0 : i32, i32
  }
  func.func @transform_1(%arg0: i32) -> (i32, i32) {
    %c0_i32 = arith.constant 0 : i32
    %c0_i32_0 = arith.constant 0 : i32
    %c0_i32_1 = arith.constant 0 : i32
    return %c0_i32, %c0_i32_0 : i32, i32
  }
  func.func @transform_2(%arg0: i32) -> (i32, i32) {
    %c0_i32 = arith.constant 0 : i32
    %c0_i32_0 = arith.constant 0 : i32
    %c0_i32_1 = arith.constant 0 : i32
    return %c0_i32, %c0_i32_0 : i32, i32
  }
  func.func @transform_3(%arg0: i32) -> (i32, i32) {
    %c0_i32 = arith.constant 0 : i32
    %c0_i32_0 = arith.constant 0 : i32
    %c0_i32_1 = arith.constant 0 : i32
    return %c0_i32, %c0_i32_0 : i32, i32
  }
  func.func @transform_4(%arg0: i32) -> (i32, i32) {
    %c0_i32 = arith.constant 0 : i32
    %c0_i32_0 = arith.constant 0 : i32
    %c0_i32_1 = arith.constant 0 : i32
    return %c0_i32, %c0_i32_0 : i32, i32
  }
  func.func @transform_5(%arg0: i32) -> (i32, i32) {
    %c0_i32 = arith.constant 0 : i32
    %c0_i32_0 = arith.constant 0 : i32
    %c0_i32_1 = arith.constant 0 : i32
    return %c0_i32, %c0_i32_0 : i32, i32
  }
}

</mosaic_0001>

<bundles_post_ra>
// kernel: dqn_forward.2
= control target key start
LH: loop header
LB: loop body
LE: loop exit
PB: predicated region body
PF: predicated region fallthrough
CT: control target
= control target key end

     0   :  { %s6633_s24 = smov 0   ;;  %s9041_s0 = inlined_call_operand.vmem [shape: f32[2,4,121,64], index: 0, kind: input, shape index: {}]   ;;  %s9042_s1 = inlined_call_operand.vmem [shape: f32[4,64,32], index: 1, kind: input, shape index: {}]   ;;  %s9043_s2 = inlined_call_operand.vmem [shape: f32[1,32], index: 2, kind: input, shape index: {}]   ;;  %s9044_s3 = inlined_call_operand.vmem [shape: f32[16,32,64], index: 3, kind: input, shape index: {}]   ;;  %s9045_s4 = inlined_call_operand.vmem [shape: f32[1,64], index: 4, kind: input, shape index: {}]   ;;  %s9046_s5 = inlined_call_operand.vmem [shape: f32[9,64,64], index: 5, kind: input, shape index: {}]   ;;  %s9047_s6 = inlined_call_operand.vmem [shape: f32[1,64], index: 6, kind: input, shape index: {}]   ;;  %s9048_s7 = inlined_call_operand.vmem [shape: f32[2,49,64], index: 7, kind: output, shape index: {}]  }
   0x1 LB: > { %s5625_s25 = sadd.s32 4294967295, %s6591_s24   ;;  %p5629_p0 = scmp.ge.s32.totalorder %s6591_s24, 1  ;;  %s6591_s24 = sphi %s6633_s24, %s17_s24  }
   0x2   : > { %p237_p1 = scmp.lt.s32.totalorder %s6591_s24, 3 }
   0x4   : > { %p238_p2 = pnand %p5629_p0, %p237_p1 }
   0x6   : > { %241 = sbr.rel (%p238_p2) target bundleno = 1339 (0x53b), region = 48 }
   0xb   : > { %v6644_v0 = vld [vmem:[%s9042_s1 + $0x78] sm:$0xff]  ;;  %v6649_v1 = vld [vmem:[%s9042_s1 + $0x70] sm:$0xff]  ;;  %p269_p3 = scmp.lt.s32.totalorder %s5625_s25, 1  ;;  %v6658_v2 = vld [vmem:[%s9042_s1 + $0x68] sm:$0xff]  ;;  %vm325_vm0 = vcmask 523264   ;;  %vm838_vm1 = vcmask 261120  }
   0xc   : > { %376 = vmatpush.msra.mxu0 %v6644_v0  ;;  %6546 = vmatpush.msra.mxu1 %v6644_v0  ;;  %v6667_v3 = vld [vmem:[%s9042_s1 + $0x60] sm:$0xff]  ;;  %v6678_v4 = vld [vmem:[%s9042_s1 + $0x58] sm:$0xff]  ;;  %v6687_v5 = vld [vmem:[%s9042_s1 + $0x50] sm:$0xff]  ;;  %vm852_vm2 = vcmask 258048   ;;  %vm4586_vm3 = vcmask 516096   ;;  %vm5556_vm4 = vcmask 522240  }
   0xd   : > { %6547 = vmatpush.msra.mxu2 %v6644_v0  ;;  %6548 = vmatpush.msra.mxu3 %v6644_v0  ;;  %s9070_s25 = smov (!%p269_p3, %s5625_s25), 1  ;;  %v6697_v6 = vld [vmem:[%s9042_s1 + $0x48] sm:$0xff]  ;;  %v6711_v7 = vld [vmem:[%s9042_s1 + $0x40] sm:$0xff]  ;;  %v6726_v10 = vld [vmem:[%s9042_s1 + $0x38] sm:$0xff] }
   0xe   : > { %377 = vmatpush.msra.mxu0 %v6649_v1  ;;  %6549 = vmatpush.msra.mxu1 %v6649_v1  ;;  %s6545_s15 = sshll.u32 %s9070_s25, 9  ;;  %v6737_v13 = vld [vmem:[%s9042_s1 + $0xb8] sm:$0xff]  ;;  %v6753_v15 = vld [vmem:[%s9042_s1 + $0x30] sm:$0xff]  ;;  %v6774_v18 = vld [vmem:[%s9042_s1 + $0xa8] sm:$0xff]  ;;  %s6570_s29 = smul.u32 56, %s9070_s25 }
   0xf   : > { %6550 = vmatpush.msra.mxu2 %v6649_v1  ;;  %6551 = vmatpush.msra.mxu3 %v6649_v1  ;;  %s6704_s20 = scalar_lea.vmem %s9041_s0, %s6545_s15  ;;  %v6744_v14 = vld [vmem:[%s9042_s1 + $0xf8] sm:$0xff]  ;;  %v6761_v16 = vld [vmem:[%s9042_s1 + $0xb0] sm:$0xff]  ;;  %v6779_v19 = vld [vmem:[%s9042_s1 + $0x28] sm:$0xff] }
  0x10   : > { %378 = vmatpush.msra.mxu0 %v6658_v2  ;;  %6552 = vmatpush.msra.mxu1 %v6658_v2  ;;  %v6718_v8 = vld [vmem:[%s6704_s20 + $0x80] sm:$0xff]  ;;  %v6721_v9 = vld [vmem:[%s6704_s20 + $0xb8] sm:$0xff]  ;;  %v6731_v11 = vld [vmem:[%s6704_s20 + $0xd0] sm:$0xff]  ;;  %s8999_s9 = scalar_lea.vmem %s9048_s7, %s6570_s29 }
  0x11   : > { %6553 = vmatpush.msra.mxu2 %v6658_v2  ;;  %6554 = vmatpush.msra.mxu3 %v6658_v2  ;;  %v5645_v12 = vld [vmem:[%s6704_s20 + $0xe0] sm:$0xff]  ;;  %v6768_v17 = vld [vmem:[%s9042_s1 + $0xf0] sm:$0xff]  ;;  %v6787_v20 = vld [vmem:[%s9042_s1 + $0xe8] sm:$0xff] }
  0x12   : > { %379 = vmatpush.msra.mxu0 %v6667_v3  ;;  %6555 = vmatpush.msra.mxu1 %v6667_v3  ;;  %v6793_v21 = vld [vmem:[%s9042_s1 + $0xa0] sm:$0xff]  ;;  %v6796_v22 = vld [vmem:[%s6704_s20 + $0x88] sm:$0xff]  ;;  %v6811_v25 = vld [vmem:[%s6704_s20 + $0xd8] sm:$0xff] }
  0x13   : > { %6556 = vmatpush.msra.mxu2 %v6667_v3  ;;  %6557 = vmatpush.msra.mxu3 %v6667_v3  ;;  %v6804_v23 = vld [vmem:[%s9042_s1 + $0xe0] sm:$0xff]  ;;  %v5646_v26 = vld [vmem:[%s6704_s20 + $0xe8] sm:$0x1f]  ;;  %v6826_v28 = vld [vmem:[%s9042_s1 + $0x98] sm:$0xff] }
  0x14   : > { %380 = vmatpush.msra.mxu0 %v6678_v4  ;;  %6558 = vmatpush.msra.mxu1 %v6678_v4  ;;  %v6807_v24 = vld [vmem:[%s6704_s20 + $0xc0] sm:$0xff]  ;;  %v6834_v29 = vld [vmem:[%s9042_s1 + $0xd8] sm:$0xff]  ;;  %v6842_v30 = vld [vmem:[%s9042_s1 + $0x90] sm:$0xff] }
  0x15   : > { %6559 = vmatpush.msra.mxu2 %v6678_v4  ;;  %6560 = vmatpush.msra.mxu3 %v6678_v4  ;;  %v6821_v27 = vld [vmem:[%s9042_s1 + $0x20] sm:$0xff]  ;;  %v6847_v31 = vld [vmem:[%s9042_s1 + $0x18] sm:$0xff]  ;;  %v6854_v32 = vld [vmem:[%s9042_s1 + $0xd0] sm:$0xff] }
  0x16   : > { %381 = vmatpush.msra.mxu0 %v6687_v5  ;;  %6561 = vmatpush.msra.mxu1 %v6687_v5  ;;  %v6860_v33 = vld [vmem:[%s9042_s1 + $0x88] sm:$0xff]  ;;  %v6865_v34 = vld [vmem:[%s9042_s1 + $0x10] sm:$0xff]  ;;  %v6882_v37 = vld [vmem:[%s9042_s1 + $0x80] sm:$0xff] }
  0x17   : > { %6562 = vmatpush.msra.mxu2 %v6687_v5  ;;  %6563 = vmatpush.msra.mxu3 %v6687_v5  ;;  %v6873_v35 = vld [vmem:[%s9042_s1 + $0xc8] sm:$0xff]  ;;  %v6876_v36 = vld [vmem:[%s6704_s20 + $0x90] sm:$0xff]  ;;  %v6893_v39 = vld [vmem:[%s9042_s1 + $0xc0] sm:$0xff] }
  0x18   : > { %382 = vmatpush.msra.mxu0 %v6697_v6  ;;  %6564 = vmatpush.msra.mxu1 %v6697_v6  ;;  %v6885_v38 = vld [vmem:[%s6704_s20 + $0xc8] sm:$0xff]  ;;  %v6896_v40 = vld [vmem:[%s6704_s20 + $0x100] sm:$0xff]  ;;  %v6927_v44 = vld [vmem:[%s6704_s20 + $0x98] sm:$0xff] }
  0x19   : > { %6565 = vmatpush.msra.mxu2 %v6697_v6  ;;  %6566 = vmatpush.msra.mxu3 %v6697_v6  ;;  %v6902_v41 = vld [vmem:[%s6704_s20 + $0x180] sm:$0xff]  ;;  %v6907_v42 = vld [vmem:[%s9042_s1 + $0x8] sm:$0xff]  ;;  %v5685_v50 = vld [vmem:[%s6704_s20 + $0x110] sm:$0xff] }
  0x1a   : > { %383 = vmatpush.msra.mxu0 %v6711_v7  ;;  %6567 = vmatpush.msra.mxu1 %v6711_v7  ;;  %v6918_v43 = vld [vmem:[%s9042_s1] sm:$0xff]  ;;  %v5684_v46 = vld [vmem:[%s6704_s20 + $0x108] sm:$0xff]  ;;  %v6965_v51 = vld [vmem:[%s6704_s20 + $0x190] sm:$0xff] }
  0x1b   : > { %6568 = vmatpush.msra.mxu2 %v6711_v7  ;;  %6569 = vmatpush.msra.mxu3 %v6711_v7  ;;  %v279_v45 = vld [vmem:[%s6704_s20] sm:$0xff]  ;;  %v6939_v47 = vld [vmem:[%s6704_s20 + $0x188] sm:$0xff]  ;;  %v281_v53 = vld [vmem:[%s6704_s20 + $0x10] sm:$0xff] }
  0x1c   : > { %5655 = vmatmul.msk.f32.vlgmr.msra.gmra.mxu0 %vm325_vm0, %v6718_v8  ;;  %5662 = vmatmul.msk.f32.vlgmr.msra.gmra.mxu1 %vm325_vm0, %v6721_v9  ;;  %v6952_v48 = vld [vmem:[%s6704_s20 + $0xa0] sm:$0xff]  ;;  %v280_v49 = vld [vmem:[%s6704_s20 + $0x8] sm:$0xff]  ;;  %v5686_v54 = vld [vmem:[%s6704_s20 + $0x118] sm:$0xff] }
  0x1d   : > { %5665 = vmatmul.msk.f32.vlgmr.msra.gmra.mxu2 %vm325_vm0, %v6731_v11  ;;  %5667 = vmatmul.msk.f32.vlgmr.msra.gmra.mxu3 %vm325_vm0, %v5645_v12  ;;  %v6978_v52 = vld [vmem:[%s6704_s20 + $0xa8] sm:$0xff]  ;;  %v6991_v55 = vld [vmem:[%s6704_s20 + $0x198] sm:$0xff]  ;;  %v7004_v56 = vld [vmem:[%s6704_s20 + $0xb0] sm:$0xff] }
  0x1e   : > { %477 = vmatpush.msrb.mxu1 %v6726_v10  ;;  %602 = vmatpush.msrb.mxu2 %v6737_v13  ;;  %v282_v57 = vld [vmem:[%s6704_s20 + $0x18] sm:$0xff]  ;;  %v5687_v58 = vld [vmem:[%s6704_s20 + $0x120] sm:$0xff]  ;;  %v5688_v62 = vld [vmem:[%s6704_s20 + $0x128] sm:$0xff] }
  0x1f   : > { %741 = vmatpush.msrb.mxu3 %v6744_v14  ;;  %948 = vmatpush.msrb.mxu0 %v6644_v0  ;;  %v7017_v59 = vld [vmem:[%s6704_s20 + $0x1a0] sm:$0xff]  ;;  %v7039_v63 = vld [vmem:[%s6704_s20 + $0x1a8] sm:$0xff]  ;;  %v286_v12 = vld [vmem:[%s6704_s20 + $0x38] sm:$0xff] }
  0x20   : > { %478 = vmatpush.msrb.mxu1 %v6753_v15  ;;  %603 = vmatpush.msrb.mxu2 %v6761_v16  ;;  %v876_v60 = vld [vmem:[%s6704_s20 + $0x1] sm:$0xff] }
  0x21   : > { %742 = vmatpush.msrb.mxu3 %v6768_v17  ;;  %949 = vmatpush.msrb.mxu0 %v6649_v1  ;;  %v283_v61 = vld [vmem:[%s6704_s20 + $0x20] sm:$0xff] }
  0x22   : > { %604 = vmatpush.msrb.mxu2 %v6774_v18  ;;  %479 = vmatpush.msrb.mxu1 %v6779_v19 }
  0x23   : > { %743 = vmatpush.msrb.mxu3 %v6787_v20  ;;  %950 = vmatpush.msrb.mxu0 %v6658_v2 }
  0x24   : > { %605 = vmatpush.msrb.mxu2 %v6793_v21  ;;  %5656 = vmatmul.msk.f32.gmra.mxu0 %vm325_vm0, %v6796_v22 }
  0x25   : > { %744 = vmatpush.msrb.mxu3 %v6804_v23  ;;  %5663 = vmatmul.msk.f32.gmra.mxu1 %vm325_vm0, %v6807_v24 }
  0x26   : > { %5666 = vmatmul.msk.f32.gmra.mxu2 %vm325_vm0, %v6811_v25  ;;  %5668 = vmatmul.msk.f32.gmra.mxu3 %vm325_vm0, %v5646_v26  ;;  %v882_v26 = vld [vmem:[%s6704_s20 + $0x31] sm:$0xff] }
  0x27   : > { %480 = vmatpush.msrb.mxu1 %v6821_v27  ;;  %606 = vmatpush.msrb.mxu2 %v6826_v28 }
  0x28   : > { %745 = vmatpush.msrb.mxu3 %v6834_v29  ;;  %951 = vmatpush.msrb.mxu0 %v6667_v3 }
  0x29   : > { %607 = vmatpush.msrb.mxu2 %v6842_v30  ;;  %481 = vmatpush.msrb.mxu1 %v6847_v31 }
  0x2a   : > { %746 = vmatpush.msrb.mxu3 %v6854_v32  ;;  %952 = vmatpush.msrb.mxu0 %v6678_v4 }
  0x2b   : > { %608 = vmatpush.msrb.mxu2 %v6860_v33  ;;  %482 = vmatpush.msrb.mxu1 %v6865_v34 }
  0x2c   : > { %747 = vmatpush.msrb.mxu3 %v6873_v35  ;;  %5657 = vmatmul.msk.f32.gmra.mxu0 %vm325_vm0, %v6876_v36 }
  0x2d   : > { %609 = vmatpush.msrb.mxu2 %v6882_v37  ;;  %5664 = vmatmul.msk.f32.gmra.mxu1 %vm325_vm0, %v6885_v38 }
  0x2e   : > { %748 = vmatpush.msrb.mxu3 %v6893_v39  ;;  %5705 = vmatmul.msk.f32.vlgmr.msrb.gmra.mxu2 %vm325_vm0, %v6896_v40 }
  0x2f   : > { %5741 = vmatmul.msk.f32.vlgmr.msrb.gmra.mxu3 %vm325_vm0, %v6902_v41  ;;  %483 = vmatpush.msrb.mxu1 %v6907_v42 }
  0x30   : > { %1172 = vmatpush.msra.mxu2 %v6737_v13  ;;  %1309 = vmatpush.msra.mxu3 %v6744_v14 }
  0x31   : > { %484 = vmatpush.msrb.mxu1 %v6918_v43  ;;  %953 = vmatpush.msrb.mxu0 %v6687_v5 }
  0x32   : > { %1173 = vmatpush.msra.mxu2 %v6761_v16  ;;  %1310 = vmatpush.msra.mxu3 %v6768_v17 }
  0x33   : > { %1049 = vmatpush.msra.mxu1 %v6726_v10  ;;  %954 = vmatpush.msrb.mxu0 %v6697_v6 }
  0x34   : > { %5658 = vmatmul.msk.f32.gmra.mxu0 %vm325_vm0, %v6927_v44  ;;  %1174 = vmatpush.msra.mxu2 %v6774_v18 }
  0x35   : > { %1050 = vmatpush.msra.mxu1 %v6753_v15  ;;  %1311 = vmatpush.msra.mxu3 %v6787_v20 }
  0x36   : > { %5669 = vmatmul.msk.f32.vlgmr.msrb.gmra.mxu1 %vm325_vm0, %v279_v45  ;;  %5706 = vmatmul.msk.f32.gmra.mxu2 %vm325_vm0, %v5684_v46  ;;  %v885_v45 = vld [vmem:[%s6704_s20 + $0x49] sm:$0xff] }
  0x37   : > { %5742 = vmatmul.msk.f32.gmra.mxu3 %vm325_vm0, %v6939_v47  ;;  %1051 = vmatpush.msra.mxu1 %v6779_v19  ;;  %v292_v46 = vld [vmem:[%s6704_s20 + $0x68] sm:$0x1f] }
  0x38   : > { %955 = vmatpush.msrb.mxu0 %v6711_v7  ;;  %1175 = vmatpush.msra.mxu2 %v6793_v21 }
  0x39   : > { %1312 = vmatpush.msra.mxu3 %v6804_v23  ;;  %1052 = vmatpush.msra.mxu1 %v6821_v27 }
  0x3a   : > { %1176 = vmatpush.msra.mxu2 %v6826_v28  ;;  %1515 = vmatpush.msra.mxu0 %v6644_v0  ;;  %v877_v0 = vld [vmem:[%s6704_s20 + $0x9] sm:$0xff] }
  0x3b   : > { %1313 = vmatpush.msra.mxu3 %v6834_v29  ;;  %1053 = vmatpush.msra.mxu1 %v6847_v31 }
  0x3c   : > { %5659 = vmatmul.msk.f32.gmra.mxu0 %vm325_vm0, %v6952_v48  ;;  %1177 = vmatpush.msra.mxu2 %v6842_v30 }
  0x3d   : > { %1314 = vmatpush.msra.mxu3 %v6854_v32  ;;  %1054 = vmatpush.msra.mxu1 %v6865_v34 }
  0x3e   : > { %5670 = vmatmul.msk.f32.gmra.mxu1 %vm325_vm0, %v280_v49  ;;  %5707 = vmatmul.msk.f32.gmra.mxu2 %vm325_vm0, %v5685_v50  ;;  %v7141_v49 = vld [vmem:[%s6704_s20 + $0x101] sm:$0xff] }
  0x3f   : > { %5743 = vmatmul.msk.f32.gmra.mxu3 %vm325_vm0, %v6965_v51  ;;  %1178 = vmatpush.msra.mxu2 %v6860_v33 }
  0x40   : > { %1315 = vmatpush.msra.mxu3 %v6873_v35  ;;  %1055 = vmatpush.msra.mxu1 %v6907_v42 }
  0x41   : > { %1179 = vmatpush.msra.mxu2 %v6882_v37  ;;  %1516 = vmatpush.msra.mxu0 %v6649_v1  ;;  %v284_v1 = vld [vmem:[%s6704_s20 + $0x28] sm:$0xff] }
  0x42   : > { %1316 = vmatpush.msra.mxu3 %v6893_v39  ;;  %1056 = vmatpush.msra.mxu1 %v6918_v43 }
  0x43   : > { %1739 = vmatpush.msrb.mxu2 %v6737_v13  ;;  %1517 = vmatpush.msra.mxu0 %v6658_v2  ;;  %v5689_v2 = vld [vmem:[%s6704_s20 + $0x130] sm:$0xff]  ;;  %v5691_v13 = vld [vmem:[%s6704_s20 + $0x140] sm:$0xff] }
  0x44   : > { %1876 = vmatpush.msrb.mxu3 %v6744_v14  ;;  %5660 = vmatmul.msk.f32.gmra.mxu0 %vm325_vm0, %v6978_v52  ;;  %v7076_v14 = vld [vmem:[%s6704_s20 + $0x1c0] sm:$0xff] }
  0x45   : > { %1616 = vmatpush.msrb.mxu1 %v6726_v10  ;;  %1740 = vmatpush.msrb.mxu2 %v6761_v16  ;;  %v879_v10 = vld [vmem:[%s6704_s20 + $0x19] sm:$0xff] }
  0x46   : > { %5671 = vmatmul.msk.f32.gmra.mxu1 %vm325_vm0, %v281_v53  ;;  %5708 = vmatmul.msk.f32.gmra.mxu2 %vm325_vm0, %v5686_v54  ;;  %v287_v16 = vld [vmem:[%s6704_s20 + $0x40] sm:$0xff] }
  0x47   : > { %1877 = vmatpush.msrb.mxu3 %v6768_v17  ;;  %1617 = vmatpush.msrb.mxu1 %v6753_v15  ;;  %v880_v15 = vld [vmem:[%s6704_s20 + $0x21] sm:$0xff] }
  0x48   : > { %5744 = vmatmul.msk.f32.gmra.mxu3 %vm325_vm0, %v6991_v55  ;;  %1741 = vmatpush.msrb.mxu2 %v6774_v18  ;;  %v5692_v17 = vld [vmem:[%s6704_s20 + $0x148] sm:$0xff] }
  0x49   : > { %1878 = vmatpush.msrb.mxu3 %v6787_v20  ;;  %1618 = vmatpush.msrb.mxu1 %v6779_v19  ;;  %v7087_v18 = vld [vmem:[%s6704_s20 + $0x1c8] sm:$0xff] }
  0x4a   : > { %1518 = vmatpush.msra.mxu0 %v6667_v3  ;;  %1742 = vmatpush.msrb.mxu2 %v6793_v21  ;;  %v7054_v3 = vld [vmem:[%s6704_s20 + $0x1b0] sm:$0xff]  ;;  %v288_v20 = vld [vmem:[%s6704_s20 + $0x48] sm:$0xff] }
  0x4b   : > { %1879 = vmatpush.msrb.mxu3 %v6804_v23  ;;  %1619 = vmatpush.msrb.mxu1 %v6821_v27  ;;  %v881_v19 = vld [vmem:[%s6704_s20 + $0x29] sm:$0xff] }
  0x4c   : > { %5661 = vmatmul.msk.f32.gmra.mxu0 %vm325_vm0, %v7004_v56  ;;  %1743 = vmatpush.msrb.mxu2 %v6826_v28  ;;  %v5693_v21 = vld [vmem:[%s6704_s20 + $0x150] sm:$0xff]  ;;  %v5694_v28 = vld [vmem:[%s6704_s20 + $0x158] sm:$0xff] }
  0x4d   : > { %1519 = vmatpush.msra.mxu0 %v6678_v4  ;;  %1880 = vmatpush.msrb.mxu3 %v6834_v29  ;;  %v878_v4 = vld [vmem:[%s6704_s20 + $0x11] sm:$0xff] }
  0x4e   : > { %5672 = vmatmul.msk.f32.gmra.mxu1 %vm325_vm0, %v282_v57  ;;  %5709 = vmatmul.msk.f32.gmra.mxu2 %vm325_vm0, %v5687_v58  ;;  %v7098_v23 = vld [vmem:[%s6704_s20 + $0x1d0] sm:$0xff]  ;;  %v7109_v29 = vld [vmem:[%s6704_s20 + $0x1d8] sm:$0xff] }
  0x4f   : > { %1520 = vmatpush.msra.mxu0 %v6687_v5  ;;  %1620 = vmatpush.msrb.mxu1 %v6847_v31  ;;  %v285_v5 = vld [vmem:[%s6704_s20 + $0x30] sm:$0xff]  ;;  %v290_v31 = vld [vmem:[%s6704_s20 + $0x58] sm:$0xff] }
  0x50   : > { %5745 = vmatmul.msk.f32.gmra.mxu3 %vm325_vm0, %v7017_v59  ;;  %1744 = vmatpush.msrb.mxu2 %v6842_v30  ;;  %v289_v27 = vld [vmem:[%s6704_s20 + $0x50] sm:$0xff]  ;;  %v883_v30 = vld [vmem:[%s6704_s20 + $0x39] sm:$0xff] }
  0x51   : > { %1521 = vmatpush.msra.mxu0 %v6697_v6  ;;  %1881 = vmatpush.msrb.mxu3 %v6854_v32  ;;  %v5690_v6 = vld [vmem:[%s6704_s20 + $0x138] sm:$0xff]  ;;  %v5695_v32 = vld [vmem:[%s6704_s20 + $0x160] sm:$0xff] }
  0x52   : > { %1621 = vmatpush.msrb.mxu1 %v6865_v34  ;;  %1745 = vmatpush.msrb.mxu2 %v6860_v33  ;;  %v7120_v33 = vld [vmem:[%s6704_s20 + $0x1e0] sm:$0xff]  ;;  %v886_v57 = vld [vmem:[%s6704_s20 + $0x51] sm:$0xff] }
  0x53   : > { %1522 = vmatpush.msra.mxu0 %v6711_v7  ;;  %1882 = vmatpush.msrb.mxu3 %v6873_v35  ;;  %v7065_v7 = vld [vmem:[%s6704_s20 + $0x1b8] sm:$0xff]  ;;  %v884_v34 = vld [vmem:[%s6704_s20 + $0x41] sm:$0xff] }
  0x54   : > { %5777 = vmatmul.msk.f32.vlgmr.msrb.gmra.mxu0 %vm325_vm0, %v876_v60  ;;  %1622 = vmatpush.msrb.mxu1 %v6907_v42  ;;  %v291_v35 = vld [vmem:[%s6704_s20 + $0x60] sm:$0xff]  ;;  %v7157_v60 = vld [vmem:[%s6704_s20 + $0x109] sm:$0xff] }
  0x55   : > { %1746 = vmatpush.msrb.mxu2 %v6882_v37  ;;  %1883 = vmatpush.msrb.mxu3 %v6893_v39  ;;  %v5696_v37 = vld [vmem:[%s6704_s20 + $0x168] sm:$0x1f] }
  0x56   : > { %5673 = vmatmul.msk.f32.gmra.mxu1 %vm325_vm0, %v283_v61  ;;  %5710 = vmatmul.msk.f32.gmra.mxu2 %vm325_vm0, %v5688_v62  ;;  %v5732_v39 = vld [vmem:[%s6704_s20 + $0x1e8] sm:$0x1f] }
  0x57   : > { %1623 = vmatpush.msrb.mxu1 %v6918_v43 }
  0x58   : > { %5746 = vmatmul.msk.f32.gmra.mxu3 %vm325_vm0, %v7039_v63 }
  0x5c   : > { %5778 = vmatmul.msk.f32.gmra.mxu0 %vm325_vm0, %v877_v0  ;;  %v887_v0 = vld [vmem:[%s6704_s20 + $0x59] sm:$0xff] }
  0x5e   : > { %5674 = vmatmul.msk.f32.gmra.mxu1 %vm325_vm0, %v284_v1  ;;  %5711 = vmatmul.msk.f32.gmra.mxu2 %vm325_vm0, %v5689_v2 }
  0x60   : > { %5747 = vmatmul.msk.f32.gmra.mxu3 %vm325_vm0, %v7054_v3 }
  0x64   : > { %5779 = vmatmul.msk.f32.gmra.mxu0 %vm325_vm0, %v878_v4  ;;  %v7174_v4 = vld [vmem:[%s6704_s20 + $0x111] sm:$0xff] }
  0x66   : > { %5675 = vmatmul.msk.f32.gmra.mxu1 %vm325_vm0, %v285_v5  ;;  %5712 = vmatmul.msk.f32.gmra.mxu2 %vm325_vm0, %v5690_v6  ;;  %v888_v5 = vld [vmem:[%s6704_s20 + $0x61] sm:$0xff] }
  0x68   : > { %5748 = vmatmul.msk.f32.gmra.mxu3 %vm325_vm0, %v7065_v7 }
  0x6c   : > { %5780 = vmatmul.msk.f32.gmra.mxu0 %vm325_vm0, %v879_v10 }
  0x6e   : > { %5676 = vmatmul.msk.f32.gmra.mxu1 %vm325_vm0, %v286_v12  ;;  %5713 = vmatmul.msk.f32.gmra.mxu2 %vm325_vm0, %v5691_v13 }
  0x70   : > { %5749 = vmatmul.msk.f32.gmra.mxu3 %vm325_vm0, %v7076_v14 }
  0x74   : > { %5781 = vmatmul.msk.f32.gmra.mxu0 %vm325_vm0, %v880_v15  ;;  %v7185_v15 = vld [vmem:[%s6704_s20 + $0x119] sm:$0xff] }
  0x76   : > { %5677 = vmatmul.msk.f32.gmra.mxu1 %vm325_vm0, %v287_v16  ;;  %5714 = vmatmul.msk.f32.gmra.mxu2 %vm325_vm0, %v5692_v17  ;;  %v7192_v16 = vld [vmem:[%s9043_s2] ss:$0 sm:$0xff] }
  0x78   : > { %5750 = vmatmul.msk.f32.gmra.mxu3 %vm325_vm0, %v7087_v18 }
  0x7c   : > { %5782 = vmatmul.msk.f32.gmra.mxu0 %vm325_vm0, %v881_v19 }
  0x7e   : > { %5678 = vmatmul.msk.f32.gmra.mxu1 %vm325_vm0, %v288_v20  ;;  %5715 = vmatmul.msk.f32.gmra.mxu2 %vm325_vm0, %v5693_v21  ;;  %v889_v20 = vld [vmem:[%s6704_s20 + $0x69] sm:$0x1f] }
  0x80   : > { %5751 = vmatmul.msk.f32.gmra.mxu3 %vm325_vm0, %v7098_v23 }
  0x84   : > { %5783 = vmatmul.msk.f32.gmra.mxu0 %vm325_vm0, %v882_v26 }
  0x86   : > { %5679 = vmatmul.msk.f32.gmra.mxu1 %vm325_vm0, %v289_v27  ;;  %5716 = vmatmul.msk.f32.gmra.mxu2 %vm325_vm0, %v5694_v28 }
  0x88   : > { %5752 = vmatmul.msk.f32.gmra.mxu3 %vm325_vm0, %v7109_v29 }
  0x8c   : > { %5784 = vmatmul.msk.f32.gmra.mxu0 %vm325_vm0, %v883_v30 }
  0x8e   : > { %5680 = vmatmul.msk.f32.gmra.mxu1 %vm325_vm0, %v290_v31  ;;  %5717 = vmatmul.msk.f32.gmra.mxu2 %vm325_vm0, %v5695_v32  ;;  %v7202_v31 = vld [vmem:[%s6704_s20 + $0x121] sm:$0xff] }
  0x90   : > { %5753 = vmatmul.msk.f32.gmra.mxu3 %vm325_vm0, %v7120_v33 }
  0x94   : > { %5785 = vmatmul.msk.f32.gmra.mxu0 %vm325_vm0, %v884_v34 }
  0x96   : > { %5681 = vmatmul.msk.f32.gmra.mxu1 %vm325_vm0, %v291_v35  ;;  %5718 = vmatmul.msk.f32.gmra.mxu2 %vm325_vm0, %v5696_v37 }
  0x98   : > { %5754 = vmatmul.msk.f32.gmra.mxu3 %vm325_vm0, %v5732_v39 }
  0x99   : > { %v385_v42 = vpop.f32.mrf.mxu0  ;;  %v7135_v43 = vpop.f32.mrf.mxu1 }
  0x9c   : > { %5786 = vmatmul.msk.f32.gmra.mxu0 %vm325_vm0, %v885_v45 }
  0x9e   : > { %5682 = vmatmul.msk.f32.gmra.mxu1 %vm325_vm0, %v292_v46  ;;  %5827 = vmatmul.msk.f32.vlgmr.msra.gmra.mxu2 %vm325_vm0, %v6902_v41 }
  0xa0   : > { %5863 = vmatmul.msk.f32.vlgmr.msra.gmra.mxu3 %vm325_vm0, %v7141_v49  ;;  %v7148_v50 = vpop.f32.mrf.mxu2  ;;  %v7150_v53 = vpop.f32.mrf.mxu3 }
  0xa1   : > { %v388_v54 = vpop.f32.mrf.mxu0 }
  0xa2   : > { %v7153_v58 = vpop.f32.mrf.mxu1 }
  0xa4   : > { %5787 = vmatmul.msk.f32.gmra.mxu0 %vm325_vm0, %v886_v57 }
  0xa6   : > { %5791 = vmatmul.msk.f32.vlgmr.msra.gmra.mxu1 %vm325_vm0, %v6718_v8  ;;  %5828 = vmatmul.msk.f32.gmra.mxu2 %vm325_vm0, %v6939_v47 }
  0xa8   : > { %5864 = vmatmul.msk.f32.gmra.mxu3 %vm325_vm0, %v7157_v60 }
  0xa9   : > { %v7165_v61 = vpop.f32.mrf.mxu2  ;;  %v7167_v62 = vpop.f32.mrf.mxu3 }
  0xaa   : > { %v391_v1 = vpop.f32.mrf.mxu0  ;;  %v7170_v2 = vpop.f32.mrf.mxu1 }
  0xac   : > { %5788 = vmatmul.msk.f32.gmra.mxu0 %vm325_vm0, %v887_v0 }
  0xae   : > { %5792 = vmatmul.msk.f32.gmra.mxu1 %vm325_vm0, %v6796_v22  ;;  %5829 = vmatmul.msk.f32.gmra.mxu2 %vm325_vm0, %v6965_v51 }
  0xb0   : > { %5865 = vmatmul.msk.f32.gmra.mxu3 %vm325_vm0, %v7174_v4 }
  0xb1   : > { %v611_v8 = vpop.f32.mrf.mxu2 }
  0xb2   : > { %v750_v6 = vpop.f32.mrf.mxu3  ;;  %v394_v10 = vpop.f32.mrf.mxu0 }
  0xb3   : > { %v486_v12 = vpop.f32.mrf.mxu1 }
  0xb4   : > { %v487_v13 = vadd.f32 %v486_v12, %v385_v42  ;;  %5789 = vmatmul.msk.f32.gmra.mxu0 %vm325_vm0, %v888_v5 }
  0xb6   : > { %5793 = vmatmul.msk.f32.gmra.mxu1 %vm325_vm0, %v6876_v36  ;;  %v653_v22 = vadd.f32 %v611_v8, %v487_v13  ;;  %5830 = vmatmul.msk.f32.gmra.mxu2 %vm325_vm0, %v6991_v55 }
  0xb8   : > { %5866 = vmatmul.msk.f32.gmra.mxu3 %vm325_vm0, %v7185_v15  ;;  %v792_v17 = vadd.f32 %v750_v6, %v653_v22 }
  0xb9   : > { %v614_v19 = vpop.f32.mrf.mxu2 }
  0xba   : > { %v810_v21 = vadd.f32 %v7192_v16, %v792_v17  ;;  %v753_v26 = vpop.f32.mrf.mxu3  ;;  %v397_v36 = vpop.f32.mrf.mxu0 }
  0xbb   : > { %v489_v27 = vpop.f32.mrf.mxu1 }
  0xbc   : > { %v824_v28 = vmax.f32 %v810_v21, 0.0  ;;  %v490_v30 = vadd.f32 %v489_v27, %v388_v54  ;;  %5790 = vmatmul.msk.f32.gmra.mxu0 %vm325_vm0, %v889_v20 }
  0xbe   : > { %5794 = vmatmul.msk.f32.gmra.mxu1 %vm325_vm0, %v6927_v44  ;;  %839 = vst.msk [vmem:[#allocation2] sm:$0xff] %vm838_vm1, %v824_v28  ;;  %v654_v32 = vadd.f32 %v614_v19, %v490_v30  ;;  %5831 = vmatmul.msk.f32.gmra.mxu2 %vm325_vm0, %v7017_v59  ;;  %v7213_v44 = vld [vmem:[%s6704_s20 + $0x129] sm:$0xff] }
  0xc0   : > { %5867 = vmatmul.msk.f32.gmra.mxu3 %vm325_vm0, %v7202_v31  ;;  %v793_v34 = vadd.f32 %v753_v26, %v654_v32 }
  0xc1   : > { %v617_v35 = vpop.f32.mrf.mxu2 }
  0xc2   : > { %v811_v37 = vadd.f32 %v7192_v16, %v793_v34  ;;  %v756_v39 = vpop.f32.mrf.mxu3  ;;  %v400_v42 = vpop.f32.mrf.mxu0 }
  0xc3   : > { %v492_v45 = vpop.f32.mrf.mxu1 }
  0xc4   : > { %v825_v46 = vmax.f32 %v811_v37, 0.0  ;;  %v493_v54 = vadd.f32 %v492_v45, %v391_v1  ;;  %5913 = vmatmul.msk.f32.vlgmr.msra.gmra.mxu0 %vm325_vm0, %v6902_v41 }
  0xc6   : > { %5795 = vmatmul.msk.f32.gmra.mxu1 %vm325_vm0, %v6952_v48  ;;  %840 = vst.msk [vmem:[#allocation2 + $0x8] sm:$0xff] %vm838_vm1, %v825_v46  ;;  %v655_v57 = vadd.f32 %v617_v35, %v493_v54  ;;  %5832 = vmatmul.msk.f32.gmra.mxu2 %vm325_vm0, %v7039_v63  ;;  %v7226_v48 = vld [vmem:[%s6704_s20 + $0x131] sm:$0xff] }
  0xc8   : > { %5868 = vmatmul.msk.f32.gmra.mxu3 %vm325_vm0, %v7213_v44  ;;  %v794_v0 = vadd.f32 %v756_v39, %v655_v57 }
  0xc9   : > { %v620_v1 = vpop.f32.mrf.mxu2 }
  0xca   : > { %v812_v8 = vadd.f32 %v7192_v16, %v794_v0  ;;  %v403_v6 = vpop.f32.mrf.mxu0 }
  0xcb   : > { %v759_v5 = vpop.f32.mrf.mxu3  ;;  %v495_v12 = vpop.f32.mrf.mxu1 }
  0xcc   : > { %v826_v41 = vmax.f32 %v812_v8, 0.0  ;;  %v496_v13 = vadd.f32 %v495_v12, %v394_v10  ;;  %5914 = vmatmul.msk.f32.gmra.mxu0 %vm325_vm0, %v6939_v47 }
  0xce   : > { %5796 = vmatmul.msk.f32.gmra.mxu1 %vm325_vm0, %v6978_v52  ;;  %841 = vst.msk [vmem:[#allocation2 + $0x10] sm:$0xff] %vm838_vm1, %v826_v41  ;;  %v656_v22 = vadd.f32 %v620_v1, %v496_v13  ;;  %5833 = vmatmul.msk.f32.gmra.mxu2 %vm325_vm0, %v7054_v3  ;;  %v7241_v52 = vld [vmem:[%s6704_s20 + $0x139] sm:$0xff] }
  0xd0   : > { %5869 = vmatmul.msk.f32.gmra.mxu3 %vm325_vm0, %v7226_v48  ;;  %v795_v17 = vadd.f32 %v759_v5, %v656_v22 }
  0xd1   : > { %v623_v10 = vpop.f32.mrf.mxu2 }
  0xd2   : > { %v813_v19 = vadd.f32 %v7192_v16, %v795_v17  ;;  %v7238_v21 = vpop.f32.mrf.mxu0 }
  0xd3   : > { %v762_v20 = vpop.f32.mrf.mxu3  ;;  %v498_v47 = vpop.f32.mrf.mxu1 }
  0xd4   : > { %v827_v26 = vmax.f32 %v813_v19, 0.0  ;;  %v499_v27 = vadd.f32 %v498_v47, %v397_v36  ;;  %5915 = vmatmul.msk.f32.gmra.mxu0 %vm325_vm0, %v6965_v51 }
  0xd6   : > { %5797 = vmatmul.msk.f32.gmra.mxu1 %vm325_vm0, %v7004_v56  ;;  %842 = vst.msk [vmem:[#allocation2 + $0x18] sm:$0xff] %vm838_vm1, %v827_v26  ;;  %v657_v28 = vadd.f32 %v623_v10, %v499_v27  ;;  %5834 = vmatmul.msk.f32.gmra.mxu2 %vm325_vm0, %v7065_v7  ;;  %v7256_v56 = vld [vmem:[%s6704_s20 + $0x141] sm:$0xff]  ;;  %v7287_v10 = vld [vmem:[%s6704_s20 + $0x151] sm:$0xff] }
  0xd8   : > { %5870 = vmatmul.msk.f32.gmra.mxu3 %vm325_vm0, %v7241_v52  ;;  %v796_v30 = vadd.f32 %v762_v20, %v657_v28 }
  0xd9   : > { %v626_v36 = vpop.f32.mrf.mxu2 }
  0xda   : > { %v814_v32 = vadd.f32 %v7192_v16, %v796_v30  ;;  %v7253_v35 = vpop.f32.mrf.mxu0  ;;  %v7303_v30 = vld [vmem:[%s6704_s20 + $0x159] sm:$0xff] }
  0xdb   : > { %v765_v34 = vpop.f32.mrf.mxu3  ;;  %v501_v51 = vpop.f32.mrf.mxu1 }
  0xdc   : > { %v828_v37 = vmax.f32 %v814_v32, 0.0  ;;  %v502_v39 = vadd.f32 %v501_v51, %v400_v42  ;;  %5916 = vmatmul.msk.f32.gmra.mxu0 %vm325_vm0, %v6991_v55  ;;  %v6084_v32 = vld [vmem:[%s9042_s1 + $0xb8] sm:$0xff] }
  0xdd   : > { %2306 = vmatpush.msra.mxu2 %v6084_v32 }
  0xde   : > { %5798 = vmatmul.msk.f32.gmra.mxu1 %vm325_vm0, %v6721_v9  ;;  %843 = vst.msk [vmem:[#allocation2 + $0x20] sm:$0xff] %vm838_vm1, %v828_v37  ;;  %v658_v45 = vadd.f32 %v626_v36, %v502_v39  ;;  %5835 = vmatmul.msk.f32.gmra.mxu2 %vm325_vm0, %v7076_v14  ;;  %v7271_v9 = vld [vmem:[%s6704_s20 + $0x149] sm:$0xff] }
  0xe0   : > { %5871 = vmatmul.msk.f32.gmra.mxu3 %vm325_vm0, %v7256_v56  ;;  %v797_v46 = vadd.f32 %v765_v34, %v658_v45 }
  0xe1   : > { %v629_v42 = vpop.f32.mrf.mxu2 }
  0xe2   : > { %v815_v54 = vadd.f32 %v7192_v16, %v797_v46  ;;  %v7268_v0 = vpop.f32.mrf.mxu0  ;;  %v7322_v46 = vld [vmem:[%s6704_s20 + $0x161] sm:$0xff] }
  0xe3   : > { %v768_v57 = vpop.f32.mrf.mxu3  ;;  %v504_v55 = vpop.f32.mrf.mxu1 }
  0xe4   : > { %v829_v1 = vmax.f32 %v815_v54, 0.0  ;;  %v505_v8 = vadd.f32 %v504_v55, %v403_v6  ;;  %5917 = vmatmul.msk.f32.gmra.mxu0 %vm325_vm0, %v7017_v59  ;;  %v6106_v54 = vld [vmem:[%s9042_s1 + $0xf8] sm:$0xff] }
  0xe5   : > { %2443 = vmatpush.msra.mxu3 %v6106_v54  ;;  %v6029_v54 = vld [vmem:[%s9042_s1 + $0x50] sm:$0xff] }
  0xe6   : > { %5799 = vmatmul.msk.f32.gmra.mxu1 %vm325_vm0, %v6807_v24  ;;  %844 = vst.msk [vmem:[#allocation2 + $0x28] sm:$0xff] %vm838_vm1, %v829_v1  ;;  %v659_v5 = vadd.f32 %v629_v42, %v505_v8  ;;  %5836 = vmatmul.msk.f32.gmra.mxu2 %vm325_vm0, %v7087_v18 }
  0xe8   : > { %5872 = vmatmul.msk.f32.gmra.mxu3 %vm325_vm0, %v7271_v9  ;;  %v798_v12 = vadd.f32 %v768_v57, %v659_v5  ;;  %v5767_v5 = vld [vmem:[%s6704_s20 + $0xe0] sm:$0xff] }
  0xe9   : > { %v632_v6 = vpop.f32.mrf.mxu2 }
  0xea   : > { %v816_v41 = vadd.f32 %v7192_v16, %v798_v12  ;;  %v7283_v22 = vpop.f32.mrf.mxu0 }
  0xeb   : > { %v771_v13 = vpop.f32.mrf.mxu3  ;;  %v507_v59 = vpop.f32.mrf.mxu1 }
  0xec   : > { %v830_v17 = vmax.f32 %v816_v41, 0.0  ;;  %v508_v24 = vadd.f32 %v507_v59, %v7135_v43  ;;  %5918 = vmatmul.msk.f32.gmra.mxu0 %vm325_vm0, %v7039_v63  ;;  %v5854_v59 = vld [vmem:[%s6704_s20 + $0x169] sm:$0x1f] }
  0xee   : > { %5800 = vmatmul.msk.f32.gmra.mxu1 %vm325_vm0, %v6885_v38  ;;  %845 = vst.msk [vmem:[#allocation2 + $0x30] sm:$0xff] %vm838_vm1, %v830_v17  ;;  %v660_v19 = vadd.f32 %v632_v6, %v508_v24  ;;  %5837 = vmatmul.msk.f32.gmra.mxu2 %vm325_vm0, %v7098_v23  ;;  %v5818_v6 = vld [vmem:[%s6704_s20 + $0x1e8] sm:$0x1f]  ;;  %v6083_v24 = vld [vmem:[%s9042_s1 + $0xb0] sm:$0xff] }
  0xef   : > { %2307 = vmatpush.msra.mxu2 %v6083_v24 }
  0xf0   : > { %5873 = vmatmul.msk.f32.gmra.mxu3 %vm325_vm0, %v7287_v10  ;;  %v799_v20 = vadd.f32 %v771_v13, %v660_v19 }
  0xf1   : > { %v635_v43 = vpop.f32.mrf.mxu2 }
  0xf2   : > { %v817_v47 = vadd.f32 %v7192_v16, %v799_v20  ;;  %v7299_v27 = vpop.f32.mrf.mxu0 }
  0xf3   : > { %v774_v26 = vpop.f32.mrf.mxu3  ;;  %v510_v63 = vpop.f32.mrf.mxu1 }
  0xf4   : > { %v831_v28 = vmax.f32 %v817_v47, 0.0  ;;  %v511_v38 = vadd.f32 %v510_v63, %v7153_v58  ;;  %5919 = vmatmul.msk.f32.gmra.mxu0 %vm325_vm0, %v7054_v3  ;;  %v5768_v63 = vld [vmem:[%s6704_s20 + $0xe8] sm:$0x1f] }
  0xf6   : > { %5801 = vmatmul.msk.f32.gmra.mxu1 %vm325_vm0, %v6731_v11  ;;  %846 = vst.msk [vmem:[#allocation2 + $0x38] sm:$0xff] %vm838_vm1, %v831_v28  ;;  %v661_v36 = vadd.f32 %v635_v43, %v511_v38  ;;  %5838 = vmatmul.msk.f32.gmra.mxu2 %vm325_vm0, %v7109_v29  ;;  %v1667_v38 = vld [vmem:[%s6704_s20 + $0xb] sm:$0xff] }
  0xf8   : > { %5874 = vmatmul.msk.f32.gmra.mxu3 %vm325_vm0, %v7303_v30  ;;  %v800_v58 = vadd.f32 %v774_v26, %v661_v36  ;;  %v6032_v36 = vld [vmem:[%s9042_s1 + $0x68] sm:$0xff] }
  0xf9   : > { %v638_v3 = vpop.f32.mrf.mxu2 }
  0xfa   : > { %v818_v34 = vadd.f32 %v7192_v16, %v800_v58  ;;  %v7318_v11 = vpop.f32.mrf.mxu0 }
  0xfb   : > { %v777_v51 = vpop.f32.mrf.mxu3  ;;  %v513_v37 = vpop.f32.mrf.mxu1 }
  0xfc   : > { %v832_v39 = vmax.f32 %v818_v34, 0.0  ;;  %v514_v45 = vadd.f32 %v513_v37, %v7170_v2  ;;  %5920 = vmatmul.msk.f32.gmra.mxu0 %vm325_vm0, %v7065_v7  ;;  %v6034_v2 = vld [vmem:[%s9042_s1 + $0x78] sm:$0xff]  ;;  %v6031_v34 = vld [vmem:[%s9042_s1 + $0x60] sm:$0xff] }
  0xfd   : > { %2082 = vmatpush.msrb.mxu0 %v6034_v2 }
  0xfe   : > { %5802 = vmatmul.msk.f32.gmra.mxu1 %vm325_vm0, %v6811_v25  ;;  %847 = vst.msk [vmem:[#allocation2 + $0x40] sm:$0xff] %vm838_vm1, %v832_v39  ;;  %v662_v42 = vadd.f32 %v638_v3, %v514_v45  ;;  %5839 = vmatmul.msk.f32.gmra.mxu2 %vm325_vm0, %v7120_v33  ;;  %v2009_v25 = vld [vmem:[%s9042_s1 + $0x38] sm:$0xff]  ;;  %v7376_v3 = vld [vmem:[%s6704_s20 + $0x8b] sm:$0xff] }
  0xff   : > { %2183 = vmatpush.msra.mxu1 %v2009_v25 }
 0x100   : > { %5875 = vmatmul.msk.f32.gmra.mxu3 %vm325_vm0, %v7322_v46  ;;  %v801_v7 = vadd.f32 %v777_v51, %v662_v42 }
 0x101   : > { %v641_v57 = vpop.f32.mrf.mxu2 }
 0x102   : > { %v819_v55 = vadd.f32 %v7192_v16, %v801_v7  ;;  %v7343_v8 = vpop.f32.mrf.mxu0  ;;  %v1668_v7 = vld [vmem:[%s6704_s20 + $0x13] sm:$0xff] }
 0x103   : > { %v780_v1 = vpop.f32.mrf.mxu3  ;;  %v516_v12 = vpop.f32.mrf.mxu1 }
 0x104   : > { %v833_v41 = vmax.f32 %v819_v55, 0.0  ;;  %v517_v13 = vadd.f32 %v516_v12, %v7148_v50  ;;  %5921 = vmatmul.msk.f32.gmra.mxu0 %vm325_vm0, %v7076_v14  ;;  %v6033_v50 = vld [vmem:[%s9042_s1 + $0x70] sm:$0xff] }
 0x105   : > { %v6105_v14 = vld [vmem:[%s9042_s1 + $0xf0] sm:$0xff]  ;;  %2083 = vmatpush.msrb.mxu0 %v6033_v50  ;;  %v5878_v50 = vld [vmem:[%s6704_s20 + $0x108] sm:$0xff] }
 0x106   : > { %5803 = vmatmul.msk.f32.gmra.mxu1 %vm325_vm0, %v5767_v5  ;;  %848 = vst.msk [vmem:[#allocation2 + $0x48] sm:$0xff] %vm838_vm1, %v833_v41  ;;  %v663_v17 = vadd.f32 %v641_v57, %v517_v13  ;;  %5840 = vmatmul.msk.f32.gmra.mxu2 %vm325_vm0, %v5818_v6  ;;  %v6028_v5 = vld [vmem:[%s9042_s1 + $0x48] sm:$0xff]  ;;  %v6027_v41 = vld [vmem:[%s9042_s1 + $0x40] sm:$0xff] }
 0x107   : > { %2444 = vmatpush.msra.mxu3 %v6105_v14  ;;  %2084 = vmatpush.msrb.mxu0 %v6032_v36 }
 0x108   : > { %5876 = vmatmul.msk.f32.gmra.mxu3 %vm325_vm0, %v5854_v59  ;;  %v802_v19 = vadd.f32 %v780_v1, %v663_v17  ;;  %v7403_v1 = vld [vmem:[%s6704_s20 + $0x93] sm:$0xff] }
 0x109   : > { %v644_v20 = vpop.f32.mrf.mxu2  ;;  %2085 = vmatpush.msrb.mxu0 %v6031_v34  ;;  %v1670_v34 = vld [vmem:[%s6704_s20 + $0x23] sm:$0xff] }
 0x10a   : > { %v820_v43 = vadd.f32 %v7192_v16, %v802_v19  ;;  %v7365_v26 = vpop.f32.mrf.mxu0  ;;  %v1669_v19 = vld [vmem:[%s6704_s20 + $0x1b] sm:$0xff] }
 0x10b   : > { %v783_v47 = vpop.f32.mrf.mxu3  ;;  %v519_v28 = vpop.f32.mrf.mxu1 }
 0x10c   : > { %v834_v32 = vmax.f32 %v820_v43, 0.0  ;;  %v520_v58 = vadd.f32 %v519_v28, %v7165_v61  ;;  %5922 = vmatmul.msk.f32.gmra.mxu0 %vm325_vm0, %v7087_v18  ;;  %v2008_v61 = vld [vmem:[%s9042_s1 + $0x30] sm:$0xff]  ;;  %v6030_v18 = vld [vmem:[%s9042_s1 + $0x58] sm:$0xff] }
 0x10d   : > { %2184 = vmatpush.msra.mxu1 %v2008_v61  ;;  %2086 = vmatpush.msrb.mxu0 %v6030_v18  ;;  %v7451_v18 = vld [vmem:[%s6704_s20 + $0xa3] sm:$0xff] }
 0x10e   : > { %5804 = vmatmul.msk.f32.gmra.mxu1 %vm325_vm0, %v5768_v63  ;;  %849 = vst.msk [vmem:[#allocation2 + $0x50] sm:$0xff] %vm838_vm1, %v834_v32  ;;  %v664_v51 = vadd.f32 %v644_v20, %v520_v58  ;;  %5949 = vmatmul.msk.f32.vlgmr.msrb.gmra.mxu2 %vm325_vm0, %v1667_v38 }
 0x10f   : > { %2087 = vmatpush.msrb.mxu0 %v6029_v54  ;;  %v5904_v54 = vld [vmem:[%s6704_s20 + $0x1e8] sm:$0x1f] }
 0x110   : > { %5985 = vmatmul.msk.f32.vlgmr.msrb.gmra.mxu3 %vm325_vm0, %v7376_v3  ;;  %v803_v37 = vadd.f32 %v783_v47, %v664_v51  ;;  %v7435_v47 = vld [vmem:[%s6704_s20 + $0x9b] sm:$0xff] }
 0x111   : > { %v647_v39 = vpop.f32.mrf.mxu2  ;;  %2088 = vmatpush.msrb.mxu0 %v6028_v5 }
 0x112   : > { %v821_v45 = vadd.f32 %v7192_v16, %v803_v37  ;;  %v7393_v2 = vpop.f32.mrf.mxu0 }
 0x113   : > { %v786_v42 = vpop.f32.mrf.mxu3  ;;  %v522_v25 = vpop.f32.mrf.mxu1  ;;  %2089 = vmatpush.msrb.mxu0 %v6027_v41  ;;  %v6080_v41 = vld [vmem:[%s9042_s1 + $0x98] sm:$0xff] }
 0x114   : > { %v835_v57 = vmax.f32 %v821_v45, 0.0  ;;  %v523_v55 = vadd.f32 %v522_v25, %v7150_v53  ;;  %5923 = vmatmul.msk.f32.gmra.mxu0 %vm325_vm0, %v7098_v23  ;;  %v6082_v23 = vld [vmem:[%s9042_s1 + $0xa8] sm:$0xff] }
 0x115   : > { %v2007_v53 = vld [vmem:[%s9042_s1 + $0x28] sm:$0xff]  ;;  %2308 = vmatpush.msra.mxu2 %v6082_v23 }
 0x116   : > { %5927 = vmatmul.msk.f32.vlgmr.msrb.gmra.mxu1 %vm325_vm0, %v6896_v40  ;;  %850 = vst.msk [vmem:[#allocation2 + $0x58] sm:$0xff] %vm838_vm1, %v835_v57  ;;  %v665_v12 = vadd.f32 %v647_v39, %v523_v55  ;;  %5950 = vmatmul.msk.f32.gmra.mxu2 %vm325_vm0, %v1668_v7  ;;  %v6104_v40 = vld [vmem:[%s9042_s1 + $0xe8] sm:$0xff]  ;;  %v2006_v39 = vld [vmem:[%s9042_s1 + $0x20] sm:$0xff]  ;;  %v5880_v55 = vld [vmem:[%s6704_s20 + $0x118] sm:$0xff] }
 0x117   : > { %2445 = vmatpush.msra.mxu3 %v6104_v40  ;;  %2185 = vmatpush.msra.mxu1 %v2007_v53  ;;  %v7481_v53 = vld [vmem:[%s6704_s20 + $0xab] sm:$0xff] }
 0x118   : > { %5986 = vmatmul.msk.f32.gmra.mxu3 %vm325_vm0, %v7403_v1  ;;  %v804_v6 = vadd.f32 %v786_v42, %v665_v12  ;;  %v1671_v12 = vld [vmem:[%s6704_s20 + $0x2b] sm:$0xff] }
 0x119   : > { %v650_v13 = vpop.f32.mrf.mxu2  ;;  %2186 = vmatpush.msra.mxu1 %v2006_v39  ;;  %v7520_v39 = vld [vmem:[%s6704_s20 + $0xbb] sm:$0xff] }
 0x11a   : > { %v822_v59 = vadd.f32 %v7192_v16, %v804_v6  ;;  %v7427_v24 = vpop.f32.mrf.mxu0 }
 0x11b   : > { %v789_v17 = vpop.f32.mrf.mxu3  ;;  %v525_v14 = vpop.f32.mrf.mxu1 }
 0x11c   : > { %v836_v20 = vmax.f32 %v822_v59, 0.0  ;;  %v526_v43 = vadd.f32 %v525_v14, %v7167_v62  ;;  %5924 = vmatmul.msk.f32.gmra.mxu0 %vm325_vm0, %v7109_v29  ;;  %v5879_v29 = vld [vmem:[%s6704_s20 + $0x110] sm:$0xff]  ;;  %v5881_v14 = vld [vmem:[%s6704_s20 + $0x120] sm:$0xff] }
 0x11e   : > { %5928 = vmatmul.msk.f32.gmra.mxu1 %vm325_vm0, %v5878_v50  ;;  %851 = vst.msk [vmem:[#allocation2 + $0x60] sm:$0xff] %vm838_vm1, %v836_v20  ;;  %v666_v63 = vadd.f32 %v650_v13, %v526_v43  ;;  %5951 = vmatmul.msk.f32.gmra.mxu2 %vm325_vm0, %v1669_v19  ;;  %v1672_v20 = vld [vmem:[%s6704_s20 + $0x33] sm:$0xff] }
 0x120   : > { %5987 = vmatmul.msk.f32.gmra.mxu3 %vm325_vm0, %v7435_v47  ;;  %v805_v28 = vadd.f32 %v789_v17, %v666_v63 }
 0x121   : > { %v1181_v38 = vpop.f32.mrf.mxu2 }
 0x122   : > { %v823_v62 = vadd.f32 %v7192_v16, %v805_v28  ;;  %v7443_v32 = vpop.f32.mrf.mxu0  ;;  %v7456_v16 = vld [vmem:[%s9043_s2] ss:$0 sm:$0xff]  ;;  %v7498_v28 = vld [vmem:[%s6704_s20 + $0xb3] sm:$0xff] }
 0x123   : > { %v1318_v36 = vpop.f32.mrf.mxu3  ;;  %v1058_v58 = vpop.f32.mrf.mxu1 }
 0x124   : > { %v837_v51 = vmax.f32 %v823_v62, 0.0  ;;  %v1059_v61 = vadd.f32 %v1058_v58, %v7238_v21  ;;  %5925 = vmatmul.msk.f32.gmra.mxu0 %vm325_vm0, %v7120_v33  ;;  %v6081_v33 = vld [vmem:[%s9042_s1 + $0xa0] sm:$0xff]  ;;  %v6102_v62 = vld [vmem:[%s9042_s1 + $0xd8] sm:$0xff] }
 0x125   : > { %v6103_v21 = vld [vmem:[%s9042_s1 + $0xe0] sm:$0xff]  ;;  %2309 = vmatpush.msra.mxu2 %v6081_v33 }
 0x126   : > { %5929 = vmatmul.msk.f32.gmra.mxu1 %vm325_vm0, %v5879_v29  ;;  %853 = vst.msk [vmem:[#allocation2 + $0x68] sm:$0x1f] %vm852_vm2, %v837_v51  ;;  %v1223_v37 = vadd.f32 %v1181_v38, %v1059_v61  ;;  %5952 = vmatmul.msk.f32.gmra.mxu2 %vm325_vm0, %v1670_v34  ;;  %v5882_v51 = vld [vmem:[%s6704_s20 + $0x128] sm:$0xff] }
 0x127   : > { %2446 = vmatpush.msra.mxu3 %v6103_v21  ;;  %2310 = vmatpush.msra.mxu2 %v6080_v41  ;;  %v7542_v41 = vld [vmem:[%s6704_s20 + $0xc3] sm:$0xff] }
 0x128   : > { %5988 = vmatmul.msk.f32.gmra.mxu3 %vm325_vm0, %v7451_v18  ;;  %v1360_v45 = vadd.f32 %v1318_v36, %v1223_v37  ;;  %v1673_v37 = vld [vmem:[%s6704_s20 + $0x3b] sm:$0xff] }
 0x129   : > { %v1184_v42 = vpop.f32.mrf.mxu2  ;;  %2447 = vmatpush.msra.mxu3 %v6102_v62  ;;  %v7561_v62 = vld [vmem:[%s6704_s20 + $0xcb] sm:$0xff] }
 0x12a   : > { %v1378_v25 = vadd.f32 %v7456_v16, %v1360_v45  ;;  %v7474_v57 = vpop.f32.mrf.mxu0 }
 0x12b   : > { %v1321_v7 = vpop.f32.mrf.mxu3  ;;  %v1061_v5 = vpop.f32.mrf.mxu1 }
 0x12c   : > { %v1392_v23 = vmax.f32 %v1378_v25, 0.0  ;;  %v1062_v40 = vadd.f32 %v1061_v5, %v7253_v35  ;;  %5926 = vmatmul.msk.f32.gmra.mxu0 %vm325_vm0, %v5904_v54  ;;  %v5883_v5 = vld [vmem:[%s6704_s20 + $0x130] sm:$0xff] }
 0x12e   : > { %5930 = vmatmul.msk.f32.gmra.mxu1 %vm325_vm0, %v5880_v55  ;;  %1407 = vst.msk [vmem:[#allocation2 + $0x70] sm:$0xff] %vm838_vm1, %v1392_v23  ;;  %v1224_v6 = vadd.f32 %v1184_v42, %v1062_v40  ;;  %5953 = vmatmul.msk.f32.gmra.mxu2 %vm325_vm0, %v1671_v12  ;;  %v6079_v42 = vld [vmem:[%s9042_s1 + $0x90] sm:$0xff]  ;;  %v1674_v23 = vld [vmem:[%s6704_s20 + $0x43] sm:$0xff] }
 0x12f   : > { %2311 = vmatpush.msra.mxu2 %v6079_v42 }
 0x130   : > { %5989 = vmatmul.msk.f32.gmra.mxu3 %vm325_vm0, %v7481_v53  ;;  %v1361_v35 = vadd.f32 %v1321_v7, %v1224_v6 }
 0x131   : > { %v1187_v13 = vpop.f32.mrf.mxu2 }
 0x132   : > { %v1379_v59 = vadd.f32 %v7456_v16, %v1361_v35  ;;  %v7492_v50 = vpop.f32.mrf.mxu0 }
 0x133   : > { %v1324_v17 = vpop.f32.mrf.mxu3  ;;  %v1064_v19 = vpop.f32.mrf.mxu1 }
 0x134   : > { %v1393_v43 = vmax.f32 %v1379_v59, 0.0  ;;  %v1065_v63 = vadd.f32 %v1064_v19, %v7268_v0  ;;  %6035 = vmatmul.msk.f32.vlgmr.msrb.gmra.mxu0 %vm325_vm0, %v7141_v49  ;;  %v2005_v0 = vld [vmem:[%s9042_s1 + $0x18] sm:$0xff] }
 0x135   : > { %2187 = vmatpush.msra.mxu1 %v2005_v0  ;;  %v5884_v19 = vld [vmem:[%s6704_s20 + $0x138] sm:$0xff] }
 0x136   : > { %5931 = vmatmul.msk.f32.gmra.mxu1 %vm325_vm0, %v5881_v14  ;;  %1408 = vst.msk [vmem:[#allocation2 + $0x78] sm:$0xff] %vm838_vm1, %v1393_v43  ;;  %v1225_v38 = vadd.f32 %v1187_v13, %v1065_v63  ;;  %5954 = vmatmul.msk.f32.gmra.mxu2 %vm325_vm0, %v1672_v20  ;;  %v2004_v13 = vld [vmem:[%s9042_s1 + $0x10] sm:$0xff] }
 0x137   : > { %2188 = vmatpush.msra.mxu1 %v2004_v13  ;;  %v1675_v43 = vld [vmem:[%s6704_s20 + $0x4b] sm:$0xff]  ;;  %v6077_v13 = vld [vmem:[%s9042_s1 + $0x80] sm:$0xff] }
 0x138   : > { %5990 = vmatmul.msk.f32.gmra.mxu3 %vm325_vm0, %v7498_v28  ;;  %v1362_v49 = vadd.f32 %v1324_v17, %v1225_v38 }
 0x139   : > { %v1190_v36 = vpop.f32.mrf.mxu2 }
 0x13a   : > { %v1380_v29 = vadd.f32 %v7456_v16, %v1362_v49  ;;  %v7514_v34 = vpop.f32.mrf.mxu0  ;;  %v6078_v49 = vld [vmem:[%s9042_s1 + $0x88] sm:$0xff] }
 0x13b   : > { %v1327_v58 = vpop.f32.mrf.mxu3  ;;  %v1067_v61 = vpop.f32.mrf.mxu1  ;;  %2312 = vmatpush.msra.mxu2 %v6078_v49 }
 0x13c   : > { %v1394_v33 = vmax.f32 %v1380_v29, 0.0  ;;  %v1068_v21 = vadd.f32 %v1067_v61, %v7283_v22  ;;  %6036 = vmatmul.msk.f32.gmra.mxu0 %vm325_vm0, %v7157_v60  ;;  %v6101_v22 = vld [vmem:[%s9042_s1 + $0xd0] sm:$0xff] }
 0x13d   : > { %2448 = vmatpush.msra.mxu3 %v6101_v22  ;;  %v7586_v22 = vld [vmem:[%s6704_s20 + $0xd3] sm:$0xff]  ;;  %2313 = vmatpush.msra.mxu2 %v6077_v13 }
 0x13e   : > { %5932 = vmatmul.msk.f32.gmra.mxu1 %vm325_vm0, %v5882_v51  ;;  %1409 = vst.msk [vmem:[#allocation2 + $0x80] sm:$0xff] %vm838_vm1, %v1394_v33  ;;  %v1226_v45 = vadd.f32 %v1190_v36, %v1068_v21  ;;  %5955 = vmatmul.msk.f32.gmra.mxu2 %vm325_vm0, %v1673_v37  ;;  %v5885_v37 = vld [vmem:[%s6704_s20 + $0x140] sm:$0xff]  ;;  %v1676_v21 = vld [vmem:[%s6704_s20 + $0x53] sm:$0xff] }
 0x13f   : > { %v1680_v13 = vld [vmem:[%s6704_s20 + $0x73] sm:$0x1f] }
 0x140   : > { %5991 = vmatmul.msk.f32.gmra.mxu3 %vm325_vm0, %v7520_v39  ;;  %v1363_v60 = vadd.f32 %v1327_v58, %v1226_v45 }
 0x141   : > { %v1193_v54 = vpop.f32.mrf.mxu2 }
 0x142   : > { %v1381_v25 = vadd.f32 %v7456_v16, %v1363_v60  ;;  %v7536_v55 = vpop.f32.mrf.mxu0 }
 0x143   : > { %v1330_v7 = vpop.f32.mrf.mxu3  ;;  %v1070_v12 = vpop.f32.mrf.mxu1 }
 0x144   : > { %v1395_v40 = vmax.f32 %v1381_v25, 0.0  ;;  %v1071_v6 = vadd.f32 %v1070_v12, %v7299_v27  ;;  %6037 = vmatmul.msk.f32.gmra.mxu0 %vm325_vm0, %v7174_v4  ;;  %v5886_v12 = vld [vmem:[%s6704_s20 + $0x148] sm:$0xff] }
 0x146   : > { %5933 = vmatmul.msk.f32.gmra.mxu1 %vm325_vm0, %v5883_v5  ;;  %1410 = vst.msk [vmem:[#allocation2 + $0x88] sm:$0xff] %vm838_vm1, %v1395_v40  ;;  %v1227_v35 = vadd.f32 %v1193_v54, %v1071_v6  ;;  %5956 = vmatmul.msk.f32.gmra.mxu2 %vm325_vm0, %v1674_v23  ;;  %v1677_v23 = vld [vmem:[%s6704_s20 + $0x5b] sm:$0xff] }
 0x148   : > { %5992 = vmatmul.msk.f32.gmra.mxu3 %vm325_vm0, %v7542_v41  ;;  %v1364_v27 = vadd.f32 %v1330_v7, %v1227_v35  ;;  %v7602_v35 = vld [vmem:[%s6704_s20 + $0xdb] sm:$0xff] }
 0x149   : > { %v1196_v59 = vpop.f32.mrf.mxu2 }
 0x14a   : > { %v1382_v4 = vadd.f32 %v7456_v16, %v1364_v27  ;;  %v7555_v14 = vpop.f32.mrf.mxu0  ;;  %v6099_v27 = vld [vmem:[%s9042_s1 + $0xc0] sm:$0xff] }
 0x14b   : > { %v1333_v17 = vpop.f32.mrf.mxu3  ;;  %v1073_v20 = vpop.f32.mrf.mxu1 }
 0x14c   : > { %v1396_v63 = vmax.f32 %v1382_v4, 0.0  ;;  %v1074_v38 = vadd.f32 %v1073_v20, %v7318_v11  ;;  %6038 = vmatmul.msk.f32.gmra.mxu0 %vm325_vm0, %v7185_v15  ;;  %v6100_v11 = vld [vmem:[%s9042_s1 + $0xc8] sm:$0xff] }
 0x14d   : > { %v2003_v15 = vld [vmem:[%s9042_s1 + $0x8] sm:$0xff]  ;;  %2449 = vmatpush.msra.mxu3 %v6100_v11 }
 0x14e   : > { %5934 = vmatmul.msk.f32.gmra.mxu1 %vm325_vm0, %v5884_v19  ;;  %1411 = vst.msk [vmem:[#allocation2 + $0x90] sm:$0xff] %vm838_vm1, %v1396_v63  ;;  %v1228_v0 = vadd.f32 %v1196_v59, %v1074_v38  ;;  %5957 = vmatmul.msk.f32.gmra.mxu2 %vm325_vm0, %v1675_v43  ;;  %v5887_v43 = vld [vmem:[%s6704_s20 + $0x150] sm:$0xff]  ;;  %v1678_v38 = vld [vmem:[%s6704_s20 + $0x63] sm:$0xff] }
 0x14f   : > { %2189 = vmatpush.msra.mxu1 %v2003_v15  ;;  %2450 = vmatpush.msra.mxu3 %v6099_v27  ;;  %v7627_v11 = vld [vmem:[%s6704_s20 + $0xe3] sm:$0xff] }
 0x150   : > { %5993 = vmatmul.msk.f32.gmra.mxu3 %vm325_vm0, %v7561_v62  ;;  %v1365_v36 = vadd.f32 %v1333_v17, %v1228_v0 }
 0x151   : > { %v1199_v29 = vpop.f32.mrf.mxu2 }
 0x152   : > { %v1383_v58 = vadd.f32 %v7456_v16, %v1365_v36  ;;  %v7580_v61 = vpop.f32.mrf.mxu0  ;;  %v6154_v36 = vld [vmem:[%s9044_s3 + $0x118] sm:$0xff] }
 0x153   : > { %v1336_v51 = vpop.f32.mrf.mxu3  ;;  %v1076_v33 = vpop.f32.mrf.mxu1  ;;  %2849 = vmatpush.msrb.mxu2 %v6154_v36 }
 0x154   : > { %v1397_v45 = vmax.f32 %v1383_v58, 0.0  ;;  %v1077_v42 = vadd.f32 %v1076_v33, %v7343_v8  ;;  %6039 = vmatmul.msk.f32.gmra.mxu0 %vm325_vm0, %v7202_v31 }
 0x156   : > { %5935 = vmatmul.msk.f32.gmra.mxu1 %vm325_vm0, %v5885_v37  ;;  %1412 = vst.msk [vmem:[#allocation2 + $0x98] sm:$0xff] %vm838_vm1, %v1397_v45  ;;  %v1229_v60 = vadd.f32 %v1199_v29, %v1077_v42  ;;  %5958 = vmatmul.msk.f32.gmra.mxu2 %vm325_vm0, %v1676_v21  ;;  %v5888_v37 = vld [vmem:[%s6704_s20 + $0x158] sm:$0xff]  ;;  %v1679_v21 = vld [vmem:[%s6704_s20 + $0x6b] sm:$0xff] }
 0x158   : > { %5994 = vmatmul.msk.f32.gmra.mxu3 %vm325_vm0, %v7586_v22  ;;  %v1366_v54 = vadd.f32 %v1336_v51, %v1229_v60  ;;  %v7646_v60 = vld [vmem:[%s6704_s20 + $0xeb] sm:$0xff] }
 0x159   : > { %v1202_v25 = vpop.f32.mrf.mxu2 }
 0x15a   : > { %v1384_v8 = vadd.f32 %v7456_v16, %v1366_v54  ;;  %v7596_v5 = vpop.f32.mrf.mxu0 }
 0x15b   : > { %v1339_v7 = vpop.f32.mrf.mxu3  ;;  %v1079_v31 = vpop.f32.mrf.mxu1 }
 0x15c   : > { %v1398_v40 = vmax.f32 %v1384_v8, 0.0  ;;  %v1080_v6 = vadd.f32 %v1079_v31, %v7365_v26  ;;  %6040 = vmatmul.msk.f32.gmra.mxu0 %vm325_vm0, %v7213_v44  ;;  %v2002_v44 = vld [vmem:[%s9042_s1] sm:$0xff] }
 0x15d   : > { %2190 = vmatpush.msra.mxu1 %v2002_v44  ;;  %v5976_v44 = vld [vmem:[%s6704_s20 + $0xf3] sm:$0x1f] }
 0x15e   : > { %5936 = vmatmul.msk.f32.gmra.mxu1 %vm325_vm0, %v5886_v12  ;;  %1413 = vst.msk [vmem:[#allocation2 + $0xa0] sm:$0xff] %vm838_vm1, %v1398_v40  ;;  %v1230_v26 = vadd.f32 %v1202_v25, %v1080_v6  ;;  %5959 = vmatmul.msk.f32.gmra.mxu2 %vm325_vm0, %v1677_v23  ;;  %v6124_v25 = vld [vmem:[%s9044_s3 + $0x58] sm:$0xff]  ;;  %v5889_v40 = vld [vmem:[%s6704_s20 + $0x160] sm:$0xff] }
 0x15f   : > { %2641 = vmatpush.msra.mxu0 %v6124_v25  ;;  %v2570_v25 = vld [vmem:[%s9044_s3 + $0x10] sm:$0xff] }
 0x160   : > { %5995 = vmatmul.msk.f32.gmra.mxu3 %vm325_vm0, %v7602_v35  ;;  %v1367_v59 = vadd.f32 %v1339_v7, %v1230_v26 }
 0x161   : > { %v1205_v4 = vpop.f32.mrf.mxu2 }
 0x162   : > { %v1385_v17 = vadd.f32 %v7456_v16, %v1367_v59  ;;  %v7621_v20 = vpop.f32.mrf.mxu0 }
 0x163   : > { %v1342_v19 = vpop.f32.mrf.mxu3  ;;  %v1082_v63 = vpop.f32.mrf.mxu1 }
 0x164   : > { %v1399_v0 = vmax.f32 %v1385_v17, 0.0  ;;  %v1083_v49 = vadd.f32 %v1082_v63, %v7393_v2  ;;  %6041 = vmatmul.msk.f32.gmra.mxu0 %vm325_vm0, %v7226_v48  ;;  %v5890_v63 = vld [vmem:[%s6704_s20 + $0x168] sm:$0x1f] }
 0x166   : > { %5937 = vmatmul.msk.f32.gmra.mxu1 %vm325_vm0, %v5887_v43  ;;  %1414 = vst.msk [vmem:[#allocation2 + $0xa8] sm:$0xff] %vm838_vm1, %v1399_v0  ;;  %v1231_v15 = vadd.f32 %v1205_v4, %v1083_v49  ;;  %5960 = vmatmul.msk.f32.gmra.mxu2 %vm325_vm0, %v1678_v38  ;;  %v2371_v49 = vld [vmem:[%s6704_s20 + $0xc] sm:$0xff] }
 0x168   : > { %5996 = vmatmul.msk.f32.gmra.mxu3 %vm325_vm0, %v7627_v11  ;;  %v1368_v2 = vadd.f32 %v1342_v19, %v1231_v15 }
 0x169   : > { %v1208_v29 = vpop.f32.mrf.mxu2 }
 0x16a   : > { %v1386_v48 = vadd.f32 %v7456_v16, %v1368_v2  ;;  %v7640_v51 = vpop.f32.mrf.mxu0 }
 0x16b   : > { %v1345_v58 = vpop.f32.mrf.mxu3  ;;  %v1085_v33 = vpop.f32.mrf.mxu1 }
 0x16c   : > { %v1400_v45 = vmax.f32 %v1386_v48, 0.0  ;;  %v1086_v42 = vadd.f32 %v1085_v33, %v7427_v24  ;;  %6042 = vmatmul.msk.f32.gmra.mxu0 %vm325_vm0, %v7241_v52  ;;  %v6171_v24 = vld [vmem:[%s9044_s3 + $0x158] sm:$0xff] }
 0x16d   : > { %v2571_v52 = vld [vmem:[%s9044_s3 + $0x18] sm:$0xff]  ;;  %2975 = vmatpush.msrb.mxu3 %v6171_v24 }
 0x16e   : > { %5938 = vmatmul.msk.f32.gmra.mxu1 %vm325_vm0, %v5888_v37  ;;  %1415 = vst.msk [vmem:[#allocation2 + $0xb0] sm:$0xff] %vm838_vm1, %v1400_v45  ;;  %v1232_v54 = vadd.f32 %v1208_v29, %v1086_v42  ;;  %5961 = vmatmul.msk.f32.gmra.mxu2 %vm325_vm0, %v1679_v21  ;;  %v2372_v45 = vld [vmem:[%s6704_s20 + $0x14] sm:$0xff]  ;;  %v6121_v42 = vld [vmem:[%s9044_s3 + $0x40] sm:$0xff] }
 0x16f   : > { %2736 = vmatpush.msrb.mxu1 %v2571_v52 }
 0x170   : > { %5997 = vmatmul.msk.f32.gmra.mxu3 %vm325_vm0, %v7646_v60  ;;  %v1369_v8 = vadd.f32 %v1345_v58, %v1232_v54  ;;  %v5999_v58 = vld [vmem:[%s6704_s20 + $0x180] sm:$0xff] }
 0x171   : > { %v1211_v7 = vpop.f32.mrf.mxu2  ;;  %2737 = vmatpush.msrb.mxu1 %v2570_v25  ;;  %v6169_v25 = vld [vmem:[%s9044_s3 + $0x148] sm:$0xff] }
 0x172   : > { %v1387_v12 = vadd.f32 %v7456_v16, %v1369_v8  ;;  %v7665_v23 = vpop.f32.mrf.mxu0 }
 0x173   : > { %v1348_v31 = vpop.f32.mrf.mxu3  ;;  %v1088_v6 = vpop.f32.mrf.mxu1 }
 0x174   : > { %v1401_v27 = vmax.f32 %v1387_v12, 0.0  ;;  %v1089_v26 = vadd.f32 %v1088_v6, %v7443_v32  ;;  %6043 = vmatmul.msk.f32.gmra.mxu0 %vm325_vm0, %v7256_v56  ;;  %v6000_v12 = vld [vmem:[%s6704_s20 + $0x188] sm:$0xff] }
 0x176   : > { %5939 = vmatmul.msk.f32.gmra.mxu1 %vm325_vm0, %v5889_v40  ;;  %1416 = vst.msk [vmem:[#allocation2 + $0xb8] sm:$0xff] %vm838_vm1, %v1401_v27  ;;  %v1233_v59 = vadd.f32 %v1211_v7, %v1089_v26  ;;  %5962 = vmatmul.msk.f32.gmra.mxu2 %vm325_vm0, %v1680_v13  ;;  %v2373_v13 = vld [vmem:[%s6704_s20 + $0x1c] sm:$0xff] }
 0x178   : > { %5998 = vmatmul.msk.f32.gmra.mxu3 %vm325_vm0, %v5976_v44  ;;  %v1370_v4 = vadd.f32 %v1348_v31, %v1233_v59 }
 0x179   : > { %v1214_v17 = vpop.f32.mrf.mxu2 }
 0x17a   : > { %v1388_v19 = vadd.f32 %v7456_v16, %v1370_v4  ;;  %v7678_v32 = vpop.f32.mrf.mxu0 }
 0x17b   : > { %v1351_v43 = vpop.f32.mrf.mxu3  ;;  %v1091_v38 = vpop.f32.mrf.mxu1 }
 0x17c   : > { %v1402_v56 = vmax.f32 %v1388_v19, 0.0  ;;  %v1092_v0 = vadd.f32 %v1091_v38, %v7474_v57  ;;  %6044 = vmatmul.msk.f32.gmra.mxu0 %vm325_vm0, %v7271_v9  ;;  %v6123_v57 = vld [vmem:[%s9044_s3 + $0x50] sm:$0xff] }
 0x17d   : > { %2642 = vmatpush.msra.mxu0 %v6123_v57 }
 0x17e   : > { %5940 = vmatmul.msk.f32.gmra.mxu1 %vm325_vm0, %v5890_v63  ;;  %1417 = vst.msk [vmem:[#allocation2 + $0xc0] sm:$0xff] %vm838_vm1, %v1402_v56  ;;  %v1234_v15 = vadd.f32 %v1214_v17, %v1092_v0  ;;  %6085 = vmatmul.msk.f32.vlgmr.msra.gmra.mxu2 %vm325_vm0, %v7376_v3  ;;  %v6122_v3 = vld [vmem:[%s9044_s3 + $0x48] sm:$0xff]  ;;  %v7747_v63 = vld [vmem:[%s9043_s2] ss:$0 sm:$0xff] }
 0x17f   : > { %2643 = vmatpush.msra.mxu0 %v6122_v3 }
 0x180   : > { %6107 = vmatmul.msk.f32.vlgmr.msra.gmra.mxu3 %vm325_vm0, %v2371_v49  ;;  %v1371_v36 = vadd.f32 %v1351_v43, %v1234_v15  ;;  %v6002_v15 = vld [vmem:[%s6704_s20 + $0x198] sm:$0xff] }
 0x181   : > { %v1217_v2 = vpop.f32.mrf.mxu2  ;;  %2644 = vmatpush.msra.mxu0 %v6121_v42  ;;  %v2572_v42 = vld [vmem:[#allocation2 + $0x1] sm:$0xff] }
 0x182   : > { %v1389_v9 = vadd.f32 %v7456_v16, %v1371_v36  ;;  %v7694_v48 = vpop.f32.mrf.mxu0 }
 0x183   : > { %v1354_v29 = vpop.f32.mrf.mxu3  ;;  %v1094_v37 = vpop.f32.mrf.mxu1 }
 0x184   : > { %v1403_v33 = vmax.f32 %v1389_v9, 0.0  ;;  %v1095_v21 = vadd.f32 %v1094_v37, %v7492_v50  ;;  %6045 = vmatmul.msk.f32.gmra.mxu0 %vm325_vm0, %v7287_v10  ;;  %v6153_v50 = vld [vmem:[%s9044_s3 + $0x110] sm:$0xff] }
 0x185   : > { %v6170_v10 = vld [vmem:[%s9044_s3 + $0x150] sm:$0xff]  ;;  %2850 = vmatpush.msrb.mxu2 %v6153_v50 }
 0x186   : > { %6049 = vmatmul.msk.f32.vlgmr.msra.gmra.mxu1 %vm325_vm0, %v5999_v58  ;;  %1418 = vst.msk [vmem:[#allocation2 + $0xc8] sm:$0xff] %vm838_vm1, %v1403_v33  ;;  %v1235_v54 = vadd.f32 %v1217_v2, %v1095_v21  ;;  %6086 = vmatmul.msk.f32.gmra.mxu2 %vm325_vm0, %v7403_v1  ;;  %v2375_v9 = vld [vmem:[%s6704_s20 + $0x2c] sm:$0xff]  ;;  %v6003_v21 = vld [vmem:[%s6704_s20 + $0x1a0] sm:$0xff]  ;;  %v2376_v50 = vld [vmem:[%s6704_s20 + $0x34] sm:$0xff] }
 0x187   : > { %2976 = vmatpush.msrb.mxu3 %v6170_v10 }
 0x188   : > { %6108 = vmatmul.msk.f32.gmra.mxu3 %vm325_vm0, %v2372_v45  ;;  %v1372_v24 = vadd.f32 %v1354_v29, %v1235_v54  ;;  %v6152_v29 = vld [vmem:[%s9044_s3 + $0x108] sm:$0xff] }
 0x189   : > { %v1220_v1 = vpop.f32.mrf.mxu2  ;;  %2851 = vmatpush.msrb.mxu2 %v6152_v29  ;;  %2977 = vmatpush.msrb.mxu3 %v6169_v25  ;;  %v6151_v29 = vld [vmem:[%s9044_s3 + $0x100] sm:$0xff] }
 0x18a   : > { %v1390_v52 = vadd.f32 %v7456_v16, %v1372_v24  ;;  %v7722_v7 = vpop.f32.mrf.mxu0 }
 0x18b   : > { %v1357_v8 = vpop.f32.mrf.mxu3  ;;  %v1097_v31 = vpop.f32.mrf.mxu1  ;;  %2852 = vmatpush.msrb.mxu2 %v6151_v29 }
 0x18c   : > { %v1404_v40 = vmax.f32 %v1390_v52, 0.0  ;;  %v1098_v6 = vadd.f32 %v1097_v31, %v7514_v34  ;;  %6046 = vmatmul.msk.f32.gmra.mxu0 %vm325_vm0, %v7303_v30  ;;  %v6001_v30 = vld [vmem:[%s6704_s20 + $0x190] sm:$0xff] }
 0x18e   : > { %6050 = vmatmul.msk.f32.gmra.mxu1 %vm325_vm0, %v6000_v12  ;;  %1419 = vst.msk [vmem:[#allocation2 + $0xd0] sm:$0xff] %vm838_vm1, %v1404_v40  ;;  %v1236_v27 = vadd.f32 %v1220_v1, %v1098_v6  ;;  %6087 = vmatmul.msk.f32.gmra.mxu2 %vm325_vm0, %v7435_v47  ;;  %v2374_v47 = vld [vmem:[%s6704_s20 + $0x24] sm:$0xff] }
 0x18f   : > { %v2573_v40 = vld [vmem:[#allocation2 + $0x9] sm:$0xff] }
 0x190   : > { %6109 = vmatmul.msk.f32.gmra.mxu3 %vm325_vm0, %v2373_v13  ;;  %v1373_v26 = vadd.f32 %v1357_v8, %v1236_v27  ;;  %v2377_v27 = vld [vmem:[%s6704_s20 + $0x3c] sm:$0xff] }
 0x191   : > { %v1748_v44 = vpop.f32.mrf.mxu2 }
 0x192   : > { %v1391_v59 = vadd.f32 %v7456_v16, %v1373_v26  ;;  %v7735_v4 = vpop.f32.mrf.mxu0 }
 0x193   : > { %v1885_v34 = vpop.f32.mrf.mxu3  ;;  %v1625_v17 = vpop.f32.mrf.mxu1 }
 0x194   : > { %v1405_v19 = vmax.f32 %v1391_v59, 0.0  ;;  %v1626_v43 = vadd.f32 %v1625_v17, %v7536_v55  ;;  %6047 = vmatmul.msk.f32.gmra.mxu0 %vm325_vm0, %v7322_v46  ;;  %v6026_v46 = vld [vmem:[%s6704_s20 + $0x169] sm:$0x1f]  ;;  %v6005_v17 = vld [vmem:[%s6704_s20 + $0x1b0] sm:$0xff] }
 0x196   : > { %6051 = vmatmul.msk.f32.gmra.mxu1 %vm325_vm0, %v6001_v30  ;;  %1420 = vst.msk [vmem:[#allocation2 + $0xd8] sm:$0x1f] %vm852_vm2, %v1405_v19  ;;  %v1790_v16 = vadd.f32 %v1748_v44, %v1626_v43  ;;  %6088 = vmatmul.msk.f32.gmra.mxu2 %vm325_vm0, %v7451_v18  ;;  %v2574_v43 = vld [vmem:[#allocation2 + $0x11] sm:$0xff] }
 0x198   : > { %6110 = vmatmul.msk.f32.gmra.mxu3 %vm325_vm0, %v2374_v47  ;;  %v1927_v55 = vadd.f32 %v1885_v34, %v1790_v16 }
 0x199   : > { %v1751_v38 = vpop.f32.mrf.mxu2 }
 0x19a   : > { %v1945_v56 = vadd.f32 %v7747_v63, %v1927_v55  ;;  %v7754_v49 = vpop.f32.mrf.mxu0  ;;  %v2378_v55 = vld [vmem:[%s6704_s20 + $0x44] sm:$0xff] }
 0x19b   : > { %v1888_v0 = vpop.f32.mrf.mxu3  ;;  %v1628_v36 = vpop.f32.mrf.mxu1 }
 0x19c   : > { %v1959_v2 = vmax.f32 %v1945_v56, 0.0  ;;  %v1629_v57 = vadd.f32 %v1628_v36, %v7555_v14  ;;  %6048 = vmatmul.msk.f32.gmra.mxu0 %vm325_vm0, %v6026_v46 }
 0x19e   : > { %6052 = vmatmul.msk.f32.gmra.mxu1 %vm325_vm0, %v6002_v15  ;;  %1974 = vst.msk [vmem:[#allocation2 + $0xe0] sm:$0xff] %vm838_vm1, %v1959_v2  ;;  %v1791_v18 = vadd.f32 %v1751_v38, %v1629_v57  ;;  %6089 = vmatmul.msk.f32.gmra.mxu2 %vm325_vm0, %v7481_v53  ;;  %v6006_v15 = vld [vmem:[%s6704_s20 + $0x1b8] sm:$0xff] }
 0x19f   : > { %v2575_v2 = vld [vmem:[#allocation2 + $0x19] sm:$0xff] }
 0x1a0   : > { %6111 = vmatmul.msk.f32.gmra.mxu3 %vm325_vm0, %v2375_v9  ;;  %v1928_v14 = vadd.f32 %v1888_v0, %v1791_v18  ;;  %v2379_v18 = vld [vmem:[%s6704_s20 + $0x4c] sm:$0xff] }
 0x1a1   : > { %v1754_v58 = vpop.f32.mrf.mxu2 }
 0x1a2   : > { %v1946_v37 = vadd.f32 %v7747_v63, %v1928_v14  ;;  %v7769_v33 = vpop.f32.mrf.mxu0  ;;  %v2568_v14 = vld [vmem:[%s9044_s3] sm:$0xff] }
 0x1a3   : > { %v1891_v3 = vpop.f32.mrf.mxu3  ;;  %v1631_v45 = vpop.f32.mrf.mxu1 }
 0x1a4   : > { %v1960_v54 = vmax.f32 %v1946_v37, 0.0  ;;  %v1632_v53 = vadd.f32 %v1631_v45, %v7580_v61  ;;  %6125 = vmatmul.msk.f32.vlgmr.msra.gmra.mxu0 %vm838_vm1, %v2572_v42  ;;  %v2569_v61 = vld [vmem:[%s9044_s3 + $0x8] sm:$0xff]  ;;  %v6007_v45 = vld [vmem:[%s6704_s20 + $0x1c0] sm:$0xff] }
 0x1a5   : > { %2738 = vmatpush.msrb.mxu1 %v2569_v61 }
 0x1a6   : > { %6053 = vmatmul.msk.f32.gmra.mxu1 %vm325_vm0, %v6003_v21  ;;  %1975 = vst.msk [vmem:[#allocation2 + $0xe8] sm:$0xff] %vm838_vm1, %v1960_v54  ;;  %v1792_v10 = vadd.f32 %v1754_v58, %v1632_v53  ;;  %6090 = vmatmul.msk.f32.gmra.mxu2 %vm325_vm0, %v7498_v28  ;;  %v6004_v28 = vld [vmem:[%s6704_s20 + $0x1a8] sm:$0xff] }
 0x1a7   : > { %2739 = vmatpush.msrb.mxu1 %v2568_v14  ;;  %v2576_v54 = vld [vmem:[#allocation2 + $0x21] sm:$0xff] }
 0x1a8   : > { %6112 = vmatmul.msk.f32.gmra.mxu3 %vm325_vm0, %v2376_v50  ;;  %v1929_v24 = vadd.f32 %v1891_v3, %v1792_v10  ;;  %v2380_v10 = vld [vmem:[%s6704_s20 + $0x54] sm:$0xff] }
 0x1a9   : > { %v1757_v1 = vpop.f32.mrf.mxu2 }
 0x1aa   : > { %v1947_v52 = vadd.f32 %v7747_v63, %v1929_v24  ;;  %v7787_v12 = vpop.f32.mrf.mxu0 }
 0x1ab   : > { %v1894_v8 = vpop.f32.mrf.mxu3  ;;  %v1634_v31 = vpop.f32.mrf.mxu1 }
 0x1ac   : > { %v1961_v6 = vmax.f32 %v1947_v52, 0.0  ;;  %v1635_v13 = vadd.f32 %v1634_v31, %v7596_v5  ;;  %6126 = vmatmul.msk.f32.gmra.mxu0 %vm838_vm1, %v2573_v40  ;;  %v2577_v31 = vld [vmem:[#allocation2 + $0x29] sm:$0xff] }
 0x1ae   : > { %6054 = vmatmul.msk.f32.gmra.mxu1 %vm325_vm0, %v6004_v28  ;;  %1976 = vst.msk [vmem:[#allocation2 + $0xf0] sm:$0xff] %vm838_vm1, %v1961_v6  ;;  %v1793_v26 = vadd.f32 %v1757_v1, %v1635_v13  ;;  %6091 = vmatmul.msk.f32.gmra.mxu2 %vm325_vm0, %v7520_v39  ;;  %v2381_v13 = vld [vmem:[%s6704_s20 + $0x5c] sm:$0xff] }
 0x1b0   : > { %6113 = vmatmul.msk.f32.gmra.mxu3 %vm325_vm0, %v2377_v27  ;;  %v1930_v44 = vadd.f32 %v1894_v8, %v1793_v26  ;;  %v6008_v8 = vld [vmem:[%s6704_s20 + $0x1c8] sm:$0xff] }
 0x1b1   : > { %v1760_v59 = vpop.f32.mrf.mxu2 }
 0x1b2   : > { %v1948_v34 = vadd.f32 %v7747_v63, %v1930_v44  ;;  %v7799_v5 = vpop.f32.mrf.mxu0 }
 0x1b3   : > { %v1897_v30 = vpop.f32.mrf.mxu3  ;;  %v1637_v19 = vpop.f32.mrf.mxu1 }
 0x1b4   : > { %v1962_v47 = vmax.f32 %v1948_v34, 0.0  ;;  %v1638_v16 = vadd.f32 %v1637_v19, %v7621_v20  ;;  %6127 = vmatmul.msk.f32.gmra.mxu0 %vm838_vm1, %v2574_v43  ;;  %v6009_v34 = vld [vmem:[%s6704_s20 + $0x1d0] sm:$0xff] }
 0x1b6   : > { %6055 = vmatmul.msk.f32.gmra.mxu1 %vm325_vm0, %v6005_v17  ;;  %1977 = vst.msk [vmem:[#allocation2 + $0xf8] sm:$0xff] %vm838_vm1, %v1962_v47  ;;  %v1794_v39 = vadd.f32 %v1760_v59, %v1638_v16  ;;  %6092 = vmatmul.msk.f32.gmra.mxu2 %vm325_vm0, %v7542_v41  ;;  %v2578_v17 = vld [vmem:[#allocation2 + $0x31] sm:$0xff]  ;;  %v2382_v47 = vld [vmem:[%s6704_s20 + $0x64] sm:$0xff] }
 0x1b7   : > { %v6222_v16 = vld [vmem:[%s9044_s3 + $0x138] sm:$0xff] }
 0x1b8   : > { %6114 = vmatmul.msk.f32.gmra.mxu3 %vm325_vm0, %v2378_v55  ;;  %v1931_v38 = vadd.f32 %v1897_v30, %v1794_v39  ;;  %3353 = vmatpush.msra.mxu2 %v6222_v16  ;;  %v2907_v16 = vld [vmem:[#allocation2 + $0x14] sm:$0xff] }
 0x1b9   : > { %v1763_v46 = vpop.f32.mrf.mxu2 }
 0x1ba   : > { %v1949_v56 = vadd.f32 %v7747_v63, %v1931_v38  ;;  %v7811_v20 = vpop.f32.mrf.mxu0 }
 0x1bb   : > { %v1900_v0 = vpop.f32.mrf.mxu3  ;;  %v1640_v36 = vpop.f32.mrf.mxu1 }
 0x1bc   : > { %v1963_v57 = vmax.f32 %v1949_v56, 0.0  ;;  %v1641_v9 = vadd.f32 %v1640_v36, %v7640_v51  ;;  %6128 = vmatmul.msk.f32.gmra.mxu0 %vm838_vm1, %v2575_v2  ;;  %v6168_v51 = vld [vmem:[%s9044_s3 + $0x140] sm:$0xff]  ;;  %v6010_v56 = vld [vmem:[%s6704_s20 + $0x1d8] sm:$0xff]  ;;  %v2383_v2 = vld [vmem:[%s6704_s20 + $0x6c] sm:$0xff] }
 0x1bd   : > { %2978 = vmatpush.msrb.mxu3 %v6168_v51 }
 0x1be   : > { %6056 = vmatmul.msk.f32.gmra.mxu1 %vm325_vm0, %v6006_v15  ;;  %1978 = vst.msk [vmem:[#allocation2 + $0x100] sm:$0xff] %vm838_vm1, %v1963_v57  ;;  %v1795_v41 = vadd.f32 %v1763_v46, %v1641_v9  ;;  %6093 = vmatmul.msk.f32.gmra.mxu2 %vm325_vm0, %v7561_v62  ;;  %v2579_v15 = vld [vmem:[#allocation2 + $0x39] sm:$0xff] }
 0x1bf   : > { %v6188_v9 = vld [vmem:[%s9044_s3 + $0x38] sm:$0xff] }
 0x1c0   : > { %6115 = vmatmul.msk.f32.gmra.mxu3 %vm325_vm0, %v2379_v18  ;;  %v1932_v58 = vadd.f32 %v1900_v0, %v1795_v41  ;;  %v6205_v18 = vld [vmem:[%s9044_s3 + $0x78] sm:$0xff]  ;;  %3101 = vmatpush.msrb.mxu0 %v6188_v9 }
 0x1c1   : > { %v1766_v62 = vpop.f32.mrf.mxu2  ;;  %3227 = vmatpush.msra.mxu1 %v6205_v18  ;;  %v2782_v18 = vld [vmem:[#allocation2 + $0x1b] sm:$0xff] }
 0x1c2   : > { %v1950_v37 = vadd.f32 %v7747_v63, %v1932_v58  ;;  %v7832_v21 = vpop.f32.mrf.mxu0  ;;  %v6011_v58 = vld [vmem:[%s6704_s20 + $0x1e0] sm:$0xff] }
 0x1c3   : > { %v1903_v3 = vpop.f32.mrf.mxu3  ;;  %v1643_v42 = vpop.f32.mrf.mxu1 }
 0x1c4   : > { %v1964_v53 = vmax.f32 %v1950_v37, 0.0  ;;  %v1644_v50 = vadd.f32 %v1643_v42, %v7665_v23  ;;  %6129 = vmatmul.msk.f32.gmra.mxu0 %vm838_vm1, %v2576_v54  ;;  %v6076_v37 = vld [vmem:[%s6704_s20 + $0xf3] sm:$0x1f] }
 0x1c5   : > { %v2384_v54 = vld [vmem:[%s6704_s20 + $0x74] sm:$0x1f] }
 0x1c6   : > { %6057 = vmatmul.msk.f32.gmra.mxu1 %vm325_vm0, %v6007_v45  ;;  %1979 = vst.msk [vmem:[#allocation2 + $0x108] sm:$0xff] %vm838_vm1, %v1964_v53  ;;  %v1796_v25 = vadd.f32 %v1766_v62, %v1644_v50  ;;  %6094 = vmatmul.msk.f32.gmra.mxu2 %vm325_vm0, %v7586_v22 }
 0x1c8   : > { %6116 = vmatmul.msk.f32.gmra.mxu3 %vm325_vm0, %v2380_v10  ;;  %v1933_v61 = vadd.f32 %v1903_v3, %v1796_v25  ;;  %v2580_v3 = vld [vmem:[#allocation2 + $0x41] sm:$0xff]  ;;  %v6187_v25 = vld [vmem:[%s9044_s3 + $0x30] sm:$0xff] }
 0x1c9   : > { %v1769_v24 = vpop.f32.mrf.mxu2  ;;  %3102 = vmatpush.msrb.mxu0 %v6187_v25 }
 0x1ca   : > { %v1951_v1 = vadd.f32 %v7747_v63, %v1933_v61  ;;  %v7844_v23 = vpop.f32.mrf.mxu0 }
 0x1cb   : > { %v1906_v52 = vpop.f32.mrf.mxu3  ;;  %v1646_v28 = vpop.f32.mrf.mxu1 }
 0x1cc   : > { %v1965_v40 = vmax.f32 %v1951_v1, 0.0  ;;  %v1647_v6 = vadd.f32 %v1646_v28, %v7678_v32  ;;  %6130 = vmatmul.msk.f32.gmra.mxu0 %vm838_vm1, %v2577_v31  ;;  %v6012_v1 = vld [vmem:[%s6704_s20 + $0x1e8] sm:$0x1f] }
 0x1cd   : > { %v6186_v28 = vld [vmem:[%s9044_s3 + $0x28] sm:$0xff] }
 0x1ce   : > { %6058 = vmatmul.msk.f32.gmra.mxu1 %vm325_vm0, %v6008_v8  ;;  %1980 = vst.msk [vmem:[#allocation2 + $0x110] sm:$0xff] %vm838_vm1, %v1965_v40  ;;  %v1797_v22 = vadd.f32 %v1769_v24, %v1647_v6  ;;  %6095 = vmatmul.msk.f32.gmra.mxu2 %vm325_vm0, %v7602_v35  ;;  %v2581_v8 = vld [vmem:[#allocation2 + $0x49] sm:$0xff] }
 0x1cf   : > { %v2780_v6 = vld [vmem:[#allocation2 + $0xb] sm:$0xff]  ;;  %3103 = vmatpush.msrb.mxu0 %v6186_v28 }
 0x1d0   : > { %6117 = vmatmul.msk.f32.gmra.mxu3 %vm325_vm0, %v2381_v13  ;;  %v1934_v27 = vadd.f32 %v1906_v52, %v1797_v22  ;;  %v6185_v13 = vld [vmem:[%s9044_s3 + $0x20] sm:$0xff] }
 0x1d1   : > { %v1772_v26 = vpop.f32.mrf.mxu2  ;;  %3104 = vmatpush.msrb.mxu0 %v6185_v13  ;;  %v2910_v13 = vld [vmem:[#allocation2 + $0x2c] sm:$0xff] }
 0x1d2   : > { %v1952_v44 = vadd.f32 %v7747_v63, %v1934_v27  ;;  %v7856_v32 = vpop.f32.mrf.mxu0  ;;  %v2906_v27 = vld [vmem:[#allocation2 + $0xc] sm:$0xff] }
 0x1d3   : > { %v1909_v59 = vpop.f32.mrf.mxu3  ;;  %v1649_v30 = vpop.f32.mrf.mxu1 }
 0x1d4   : > { %v1966_v19 = vmax.f32 %v1952_v44, 0.0  ;;  %v1650_v43 = vadd.f32 %v1649_v30, %v7694_v48  ;;  %6131 = vmatmul.msk.f32.gmra.mxu0 %vm838_vm1, %v2578_v17  ;;  %v2582_v17 = vld [vmem:[#allocation2 + $0x51] sm:$0xff] }
 0x1d6   : > { %6059 = vmatmul.msk.f32.gmra.mxu1 %vm325_vm0, %v6009_v34  ;;  %1981 = vst.msk [vmem:[#allocation2 + $0x118] sm:$0xff] %vm838_vm1, %v1966_v19  ;;  %v1798_v35 = vadd.f32 %v1772_v26, %v1650_v43  ;;  %6096 = vmatmul.msk.f32.gmra.mxu2 %vm325_vm0, %v7627_v11 }
 0x1d8   : > { %6118 = vmatmul.msk.f32.gmra.mxu3 %vm325_vm0, %v2382_v47  ;;  %v1935_v48 = vadd.f32 %v1909_v59, %v1798_v35  ;;  %v2555_v47 = vld [vmem:[#allocation2] sm:$0xff]  ;;  %v2781_v35 = vld [vmem:[#allocation2 + $0x13] sm:$0xff] }
 0x1d9   : > { %v1775_v55 = vpop.f32.mrf.mxu2 }
 0x1da   : > { %v1953_v39 = vadd.f32 %v7747_v63, %v1935_v48  ;;  %v7871_v46 = vpop.f32.mrf.mxu0 }
 0x1db   : > { %v1912_v38 = vpop.f32.mrf.mxu3  ;;  %v1652_v0 = vpop.f32.mrf.mxu1 }
 0x1dc   : > { %v1967_v36 = vmax.f32 %v1953_v39, 0.0  ;;  %v1653_v11 = vadd.f32 %v1652_v0, %v7722_v7  ;;  %6132 = vmatmul.msk.f32.gmra.mxu0 %vm838_vm1, %v2579_v15  ;;  %v6239_v7 = vld [vmem:[%s9044_s3 + $0x178] sm:$0xff]  ;;  %v6204_v39 = vld [vmem:[%s9044_s3 + $0x70] sm:$0xff] }
 0x1dd   : > { %3479 = vmatpush.msra.mxu3 %v6239_v7  ;;  %3228 = vmatpush.msra.mxu1 %v6204_v39  ;;  %v2556_v7 = vld [vmem:[#allocation2 + $0x8] sm:$0xff] }
 0x1de   : > { %6060 = vmatmul.msk.f32.gmra.mxu1 %vm325_vm0, %v6010_v56  ;;  %1982 = vst.msk [vmem:[#allocation2 + $0x120] sm:$0xff] %vm838_vm1, %v1967_v36  ;;  %v1799_v57 = vadd.f32 %v1775_v55, %v1653_v11  ;;  %6097 = vmatmul.msk.f32.gmra.mxu2 %vm325_vm0, %v7646_v60  ;;  %v6221_v55 = vld [vmem:[%s9044_s3 + $0x130] sm:$0xff] }
 0x1df   : > { %3354 = vmatpush.msra.mxu2 %v6221_v55 }
 0x1e0   : > { %6119 = vmatmul.msk.f32.gmra.mxu3 %vm325_vm0, %v2383_v2  ;;  %v1936_v41 = vadd.f32 %v1912_v38, %v1799_v57  ;;  %v2583_v2 = vld [vmem:[#allocation2 + $0x59] sm:$0xff] }
 0x1e1   : > { %v1778_v60 = vpop.f32.mrf.mxu2 }
 0x1e2   : > { %v1954_v29 = vadd.f32 %v7747_v63, %v1936_v41  ;;  %v7892_v14 = vpop.f32.mrf.mxu0 }
 0x1e3   : > { %v1915_v51 = vpop.f32.mrf.mxu3  ;;  %v1655_v62 = vpop.f32.mrf.mxu1 }
 0x1e4   : > { %v1968_v45 = vmax.f32 %v1954_v29, 0.0  ;;  %v1656_v42 = vadd.f32 %v1655_v62, %v7735_v4  ;;  %6133 = vmatmul.msk.f32.gmra.mxu0 %vm838_vm1, %v2580_v3  ;;  %v2584_v3 = vld [vmem:[#allocation2 + $0x61] sm:$0x1] }
 0x1e6   : > { %6061 = vmatmul.msk.f32.gmra.mxu1 %vm325_vm0, %v6011_v58  ;;  %1983 = vst.msk [vmem:[#allocation2 + $0x128] sm:$0xff] %vm838_vm1, %v1968_v45  ;;  %v1800_v53 = vadd.f32 %v1778_v60, %v1656_v42  ;;  %6098 = vmatmul.msk.f32.gmra.mxu2 %vm325_vm0, %v6076_v37  ;;  %v2908_v60 = vld [vmem:[#allocation2 + $0x1c] sm:$0xff] }
 0x1e8   : > { %6120 = vmatmul.msk.f32.gmra.mxu3 %vm325_vm0, %v2384_v54  ;;  %v1937_v50 = vadd.f32 %v1915_v51, %v1800_v53  ;;  %v2557_v54 = vld [vmem:[#allocation2 + $0x10] sm:$0xff]  ;;  %v2783_v53 = vld [vmem:[#allocation2 + $0x23] sm:$0xff] }
 0x1e9   : > { %v1781_v10 = vpop.f32.mrf.mxu2 }
 0x1ea   : > { %v1955_v4 = vadd.f32 %v7747_v63, %v1937_v50  ;;  %v7907_v24 = vpop.f32.mrf.mxu0 }
 0x1eb   : > { %v1918_v61 = vpop.f32.mrf.mxu3  ;;  %v1658_v52 = vpop.f32.mrf.mxu1 }
 0x1ec   : > { %v1969_v31 = vmax.f32 %v1955_v4, 0.0  ;;  %v1659_v40 = vadd.f32 %v1658_v52, %v7754_v49  ;;  %6134 = vmatmul.msk.f32.gmra.mxu0 %vm838_vm1, %v2581_v8  ;;  %v3032_v8 = vld [vmem:[#allocation2 + $0x70] sm:$0xff] }
 0x1ee   : > { %6062 = vmatmul.msk.f32.gmra.mxu1 %vm325_vm0, %v6012_v1  ;;  %1984 = vst.msk [vmem:[#allocation2 + $0x130] sm:$0xff] %vm838_vm1, %v1969_v31  ;;  %v1801_v22 = vadd.f32 %v1781_v10, %v1659_v40  ;;  %6155 = vmatmul.msk.f32.vlgmr.msrb.gmra.mxu2 %vm838_vm1, %v2780_v6  ;;  %v2909_v10 = vld [vmem:[#allocation2 + $0x24] sm:$0xff]  ;;  %v2558_v40 = vld [vmem:[#allocation2 + $0x18] sm:$0xff] }
 0x1ef   : > { %v2784_v6 = vld [vmem:[#allocation2 + $0x2b] sm:$0xff] }
 0x1f0   : > { %6172 = vmatmul.msk.f32.vlgmr.msrb.gmra.mxu3 %vm838_vm1, %v2906_v27  ;;  %v1938_v49 = vadd.f32 %v1918_v61, %v1801_v22  ;;  %v6220_v27 = vld [vmem:[%s9044_s3 + $0x128] sm:$0xff] }
 0x1f1   : > { %v1784_v26 = vpop.f32.mrf.mxu2  ;;  %3355 = vmatpush.msra.mxu2 %v6220_v27  ;;  %v2914_v27 = vld [vmem:[#allocation2 + $0x4c] sm:$0xff] }
 0x1f2   : > { %v1956_v44 = vadd.f32 %v7747_v63, %v1938_v49  ;;  %v7923_v34 = vpop.f32.mrf.mxu0  ;;  %v6203_v49 = vld [vmem:[%s9044_s3 + $0x68] sm:$0xff] }
 0x1f3   : > { %v1921_v59 = vpop.f32.mrf.mxu3  ;;  %v1661_v30 = vpop.f32.mrf.mxu1  ;;  %3229 = vmatpush.msra.mxu1 %v6203_v49 }
 0x1f4   : > { %v1970_v19 = vmax.f32 %v1956_v44, 0.0  ;;  %v1662_v43 = vadd.f32 %v1661_v30, %v7769_v33  ;;  %6135 = vmatmul.msk.f32.gmra.mxu0 %vm838_vm1, %v2582_v17  ;;  %v6238_v33 = vld [vmem:[%s9044_s3 + $0x170] sm:$0xff] }
 0x1f5   : > { %3480 = vmatpush.msra.mxu3 %v6238_v33  ;;  %v2911_v33 = vld [vmem:[#allocation2 + $0x34] sm:$0xff] }
 0x1f6   : > { %6138 = vmatmul.msk.f32.vlgmr.msrb.gmra.mxu1 %vm838_vm1, %v2555_v47  ;;  %1985 = vst.msk [vmem:[#allocation2 + $0x138] sm:$0xff] %vm838_vm1, %v1970_v19  ;;  %v1802_v48 = vadd.f32 %v1784_v26, %v1662_v43  ;;  %6156 = vmatmul.msk.f32.gmra.mxu2 %vm838_vm1, %v2781_v35  ;;  %v3033_v43 = vld [vmem:[#allocation2 + $0x78] sm:$0xff] }
 0x1f8   : > { %6173 = vmatmul.msk.f32.gmra.mxu3 %vm838_vm1, %v2907_v16  ;;  %v1939_v38 = vadd.f32 %v1921_v59, %v1802_v48  ;;  %v2559_v16 = vld [vmem:[#allocation2 + $0x20] sm:$0xff]  ;;  %v2785_v48 = vld [vmem:[#allocation2 + $0x33] sm:$0xff] }
 0x1f9   : > { %v1787_v56 = vpop.f32.mrf.mxu2 }
 0x1fa   : > { %v1957_v0 = vadd.f32 %v7747_v63, %v1939_v38  ;;  %v7941_v36 = vpop.f32.mrf.mxu0 }
 0x1fb   : > { %v1924_v15 = vpop.f32.mrf.mxu3  ;;  %v1664_v11 = vpop.f32.mrf.mxu1 }
 0x1fc   : > { %v1971_v57 = vmax.f32 %v1957_v0, 0.0  ;;  %v1665_v9 = vadd.f32 %v1664_v11, %v7787_v12  ;;  %6136 = vmatmul.msk.f32.gmra.mxu0 %vm838_vm1, %v2583_v2  ;;  %v3034_v11 = vld [vmem:[#allocation2 + $0x80] sm:$0xff] }
 0x1fe   : > { %6139 = vmatmul.msk.f32.gmra.mxu1 %vm838_vm1, %v2556_v7  ;;  %1986 = vst.msk [vmem:[#allocation2 + $0x140] sm:$0xff] %vm838_vm1, %v1971_v57  ;;  %v1803_v41 = vadd.f32 %v1787_v56, %v1665_v9  ;;  %6157 = vmatmul.msk.f32.gmra.mxu2 %vm838_vm1, %v2782_v18  ;;  %v2560_v9 = vld [vmem:[#allocation2 + $0x28] sm:$0xff]  ;;  %v2786_v7 = vld [vmem:[#allocation2 + $0x3b] sm:$0xff] }
 0x200   : > { %6174 = vmatmul.msk.f32.gmra.mxu3 %vm838_vm1, %v2908_v60  ;;  %v1940_v29 = vadd.f32 %v1924_v15, %v1803_v41  ;;  %v2912_v41 = vld [vmem:[#allocation2 + $0x3c] sm:$0xff] }
 0x201   : > { %v2315_v51 = vpop.f32.mrf.mxu2 }
 0x202   : > { %v1958_v58 = vadd.f32 %v7747_v63, %v1940_v29  ;;  %v7950_v12 = vpop.f32.mrf.mxu0  ;;  %v7959_v63 = vld [vmem:[%s9043_s2] ss:$0 sm:$0xff] }
 0x203   : > { %v2452_v62 = vpop.f32.mrf.mxu3  ;;  %v2192_v37 = vpop.f32.mrf.mxu1 }
 0x204   : > { %v1972_v45 = vmax.f32 %v1958_v58, 0.0  ;;  %v2193_v42 = vadd.f32 %v2192_v37, %v7799_v5  ;;  %6137 = vmatmul.msk.f32.gmra.mxu0 %vm838_vm1, %v2584_v3  ;;  %v3035_v37 = vld [vmem:[#allocation2 + $0x88] sm:$0xff] }
 0x206   : > { %6140 = vmatmul.msk.f32.gmra.mxu1 %vm838_vm1, %v2557_v54  ;;  %1987 = vst.msk [vmem:[#allocation2 + $0x148] sm:$0x1f] %vm852_vm2, %v1972_v45  ;;  %v2357_v50 = vadd.f32 %v2315_v51, %v2193_v42  ;;  %6158 = vmatmul.msk.f32.gmra.mxu2 %vm838_vm1, %v2783_v53  ;;  %v2561_v42 = vld [vmem:[#allocation2 + $0x30] sm:$0xff]  ;;  %v2787_v54 = vld [vmem:[#allocation2 + $0x43] sm:$0xff] }
 0x208   : > { %6175 = vmatmul.msk.f32.gmra.mxu3 %vm838_vm1, %v2909_v10  ;;  %v2494_v5 = vadd.f32 %v2452_v62, %v2357_v50  ;;  %v2913_v50 = vld [vmem:[#allocation2 + $0x44] sm:$0xff] }
 0x209   : > { %v2318_v25 = vpop.f32.mrf.mxu2  ;;  %v6219_v10 = vld [vmem:[%s9044_s3 + $0x120] sm:$0xff] }
 0x20a   : > { %v2512_v4 = vadd.f32 %v7959_v63, %v2494_v5  ;;  %v7964_v1 = vpop.f32.mrf.mxu0  ;;  %3356 = vmatpush.msra.mxu2 %v6219_v10  ;;  %v6256_v10 = vld [vmem:[%s9044_s3 + $0x98] sm:$0xff] }
 0x20b   : > { %v2455_v61 = vpop.f32.mrf.mxu3  ;;  %v2195_v52 = vpop.f32.mrf.mxu1  ;;  %3605 = vmatpush.msra.mxu0 %v6256_v10 }
 0x20c   : > { %v2526_v28 = vmax.f32 %v2512_v4, 0.0  ;;  %v2196_v31 = vadd.f32 %v2195_v52, %v7811_v20  ;;  %6189 = vmatmul.msk.f32.vlgmr.msrb.gmra.mxu0 %vm838_vm1, %v3032_v8  ;;  %v6237_v20 = vld [vmem:[%s9044_s3 + $0x168] sm:$0xff] }
 0x20d   : > { %3481 = vmatpush.msra.mxu3 %v6237_v20  ;;  %v6202_v20 = vld [vmem:[%s9044_s3 + $0x60] sm:$0xff] }
 0x20e   : > { %6141 = vmatmul.msk.f32.gmra.mxu1 %vm838_vm1, %v2558_v40  ;;  %2541 = vst.msk [vmem:[#allocation2 + $0x150] sm:$0xff] %vm838_vm1, %v2526_v28  ;;  %v2358_v22 = vadd.f32 %v2318_v25, %v2196_v31  ;;  %6159 = vmatmul.msk.f32.gmra.mxu2 %vm838_vm1, %v2784_v6  ;;  %v3036_v28 = vld [vmem:[#allocation2 + $0x90] sm:$0xff]  ;;  %v2562_v6 = vld [vmem:[#allocation2 + $0x38] sm:$0xff] }
 0x20f   : > { %3230 = vmatpush.msra.mxu1 %v6202_v20  ;;  %v2918_v20 = vld [vmem:[#allocation2 + $0x6c] sm:$0x1] }
 0x210   : > { %6176 = vmatmul.msk.f32.gmra.mxu3 %vm838_vm1, %v2910_v13  ;;  %v2495_v26 = vadd.f32 %v2455_v61, %v2358_v22  ;;  %v2788_v13 = vld [vmem:[#allocation2 + $0x4b] sm:$0xff] }
 0x211   : > { %v2321_v44 = vpop.f32.mrf.mxu2 }
 0x212   : > { %v2513_v59 = vadd.f32 %v7959_v63, %v2495_v26  ;;  %v7982_v17 = vpop.f32.mrf.mxu0 }
 0x213   : > { %v2458_v30 = vpop.f32.mrf.mxu3  ;;  %v2198_v19 = vpop.f32.mrf.mxu1 }
 0x214   : > { %v2527_v47 = vmax.f32 %v2513_v59, 0.0  ;;  %v2199_v35 = vadd.f32 %v2198_v19, %v7832_v21  ;;  %6190 = vmatmul.msk.f32.gmra.mxu0 %vm838_vm1, %v3033_v43  ;;  %v3037_v19 = vld [vmem:[#allocation2 + $0x98] sm:$0xff] }
 0x216   : > { %6142 = vmatmul.msk.f32.gmra.mxu1 %vm838_vm1, %v2559_v16  ;;  %2542 = vst.msk [vmem:[#allocation2 + $0x158] sm:$0xff] %vm838_vm1, %v2527_v47  ;;  %v2359_v55 = vadd.f32 %v2321_v44, %v2199_v35  ;;  %6160 = vmatmul.msk.f32.gmra.mxu2 %vm838_vm1, %v2785_v48  ;;  %v2563_v35 = vld [vmem:[#allocation2 + $0x40] sm:$0xff]  ;;  %v2789_v16 = vld [vmem:[#allocation2 + $0x53] sm:$0xff] }
 0x218   : > { %6177 = vmatmul.msk.f32.gmra.mxu3 %vm838_vm1, %v2911_v33  ;;  %v2496_v39 = vadd.f32 %v2458_v30, %v2359_v55  ;;  %v2915_v55 = vld [vmem:[#allocation2 + $0x54] sm:$0xff] }
 0x219   : > { %v2324_v38 = vpop.f32.mrf.mxu2 }
 0x21a   : > { %v2514_v56 = vadd.f32 %v7959_v63, %v2496_v39  ;;  %v7991_v21 = vpop.f32.mrf.mxu0 }
 0x21b   : > { %v2461_v0 = vpop.f32.mrf.mxu3  ;;  %v2201_v15 = vpop.f32.mrf.mxu1 }
 0x21c   : > { %v2528_v2 = vmax.f32 %v2514_v56, 0.0  ;;  %v2202_v57 = vadd.f32 %v2201_v15, %v7844_v23  ;;  %6191 = vmatmul.msk.f32.gmra.mxu0 %vm838_vm1, %v3034_v11  ;;  %v3038_v15 = vld [vmem:[#allocation2 + $0xa0] sm:$0xff] }
 0x21e   : > { %6143 = vmatmul.msk.f32.gmra.mxu1 %vm838_vm1, %v2560_v9  ;;  %2543 = vst.msk [vmem:[#allocation2 + $0x160] sm:$0xff] %vm838_vm1, %v2528_v2  ;;  %v2360_v18 = vadd.f32 %v2324_v38, %v2202_v57  ;;  %6161 = vmatmul.msk.f32.gmra.mxu2 %vm838_vm1, %v2786_v7  ;;  %v2564_v57 = vld [vmem:[#allocation2 + $0x48] sm:$0xff]  ;;  %v2790_v9 = vld [vmem:[#allocation2 + $0x5b] sm:$0xff] }
 0x220   : > { %6178 = vmatmul.msk.f32.gmra.mxu3 %vm838_vm1, %v2912_v41  ;;  %v2497_v60 = vadd.f32 %v2461_v0, %v2360_v18  ;;  %v2916_v18 = vld [vmem:[#allocation2 + $0x5c] sm:$0xff] }
 0x221   : > { %v2327_v29 = vpop.f32.mrf.mxu2  ;;  %v6290_v41 = vld [vmem:[%s9044_s3 + $0x198] sm:$0xff] }
 0x222   : > { %v2515_v51 = vadd.f32 %v7959_v63, %v2497_v60  ;;  %v8000_v23 = vpop.f32.mrf.mxu0  ;;  %3857 = vmatpush.msrb.mxu2 %v6290_v41 }
 0x223   : > { %v2464_v58 = vpop.f32.mrf.mxu3  ;;  %v2204_v62 = vpop.f32.mrf.mxu1 }
 0x224   : > { %v2529_v3 = vmax.f32 %v2515_v51, 0.0  ;;  %v2205_v45 = vadd.f32 %v2204_v62, %v7856_v32  ;;  %6192 = vmatmul.msk.f32.gmra.mxu0 %vm838_vm1, %v3035_v37  ;;  %v6236_v32 = vld [vmem:[%s9044_s3 + $0x160] sm:$0xff]  ;;  %v3039_v37 = vld [vmem:[#allocation2 + $0xa8] sm:$0xff] }
 0x225   : > { %3482 = vmatpush.msra.mxu3 %v6236_v32  ;;  %v6273_v32 = vld [vmem:[%s9044_s3 + $0xd8] sm:$0xff] }
 0x226   : > { %6144 = vmatmul.msk.f32.gmra.mxu1 %vm838_vm1, %v2561_v42  ;;  %2544 = vst.msk [vmem:[#allocation2 + $0x168] sm:$0xff] %vm838_vm1, %v2529_v3  ;;  %v2361_v53 = vadd.f32 %v2327_v29, %v2205_v45  ;;  %6162 = vmatmul.msk.f32.gmra.mxu2 %vm838_vm1, %v2787_v54  ;;  %v2565_v42 = vld [vmem:[#allocation2 + $0x50] sm:$0xff]  ;;  %v2791_v54 = vld [vmem:[#allocation2 + $0x63] sm:$0xff] }
 0x227   : > { %3731 = vmatpush.msrb.mxu1 %v6273_v32  ;;  %v3286_v32 = vld [vmem:[#allocation2 + $0x8b] sm:$0xff] }
 0x228   : > { %6179 = vmatmul.msk.f32.gmra.mxu3 %vm838_vm1, %v2913_v50  ;;  %v2498_v5 = vadd.f32 %v2464_v58, %v2361_v53  ;;  %v2917_v53 = vld [vmem:[#allocation2 + $0x64] sm:$0xff] }
 0x229   : > { %v2330_v25 = vpop.f32.mrf.mxu2 }
 0x22a   : > { %v2516_v4 = vadd.f32 %v7959_v63, %v2498_v5  ;;  %v8015_v52 = vpop.f32.mrf.mxu0 }
 0x22b   : > { %v2467_v61 = vpop.f32.mrf.mxu3  ;;  %v2207_v8 = vpop.f32.mrf.mxu1 }
 0x22c   : > { %v2530_v31 = vmax.f32 %v2516_v4, 0.0  ;;  %v2208_v40 = vadd.f32 %v2207_v8, %v7871_v46  ;;  %6193 = vmatmul.msk.f32.gmra.mxu0 %vm838_vm1, %v3036_v28 }
 0x22e   : > { %6145 = vmatmul.msk.f32.gmra.mxu1 %vm838_vm1, %v2562_v6  ;;  %2545 = vst.msk [vmem:[#allocation2 + $0x170] sm:$0xff] %vm838_vm1, %v2530_v31  ;;  %v2362_v22 = vadd.f32 %v2330_v25, %v2208_v40  ;;  %6163 = vmatmul.msk.f32.gmra.mxu2 %vm838_vm1, %v2788_v13  ;;  %v3040_v31 = vld [vmem:[#allocation2 + $0xb0] sm:$0xff]  ;;  %v2566_v13 = vld [vmem:[#allocation2 + $0x58] sm:$0xff] }
 0x230   : > { %6180 = vmatmul.msk.f32.gmra.mxu3 %vm838_vm1, %v2914_v27  ;;  %v2499_v46 = vadd.f32 %v2467_v61, %v2362_v22  ;;  %v2792_v22 = vld [vmem:[#allocation2 + $0x6b] sm:$0x1] }
 0x231   : > { %v2333_v49 = vpop.f32.mrf.mxu2 }
 0x232   : > { %v2517_v26 = vadd.f32 %v7959_v63, %v2499_v46  ;;  %v8027_v59 = vpop.f32.mrf.mxu0 }
 0x233   : > { %v2470_v44 = vpop.f32.mrf.mxu3  ;;  %v2210_v30 = vpop.f32.mrf.mxu1 }
 0x234   : > { %v2531_v43 = vmax.f32 %v2517_v26, 0.0  ;;  %v2211_v47 = vadd.f32 %v2210_v30, %v7892_v14  ;;  %6194 = vmatmul.msk.f32.gmra.mxu0 %vm838_vm1, %v3037_v19  ;;  %v3041_v19 = vld [vmem:[#allocation2 + $0xb8] sm:$0xff] }
 0x236   : > { %6146 = vmatmul.msk.f32.gmra.mxu1 %vm838_vm1, %v2563_v35  ;;  %2546 = vst.msk [vmem:[#allocation2 + $0x178] sm:$0xff] %vm838_vm1, %v2531_v43  ;;  %v2363_v48 = vadd.f32 %v2333_v49, %v2211_v47  ;;  %6164 = vmatmul.msk.f32.gmra.mxu2 %vm838_vm1, %v2789_v16  ;;  %v6255_v43 = vld [vmem:[%s9044_s3 + $0x90] sm:$0xff]  ;;  %v2567_v16 = vld [vmem:[#allocation2 + $0x60] sm:$0x1] }
 0x237   : > { %3606 = vmatpush.msra.mxu0 %v6255_v43 }
 0x238   : > { %6181 = vmatmul.msk.f32.gmra.mxu3 %vm838_vm1, %v2915_v55  ;;  %v2500_v33 = vadd.f32 %v2470_v44, %v2363_v48  ;;  %v3284_v48 = vld [vmem:[#allocation2 + $0x7b] sm:$0xff]  ;;  %v6254_v55 = vld [vmem:[%s9044_s3 + $0x88] sm:$0xff] }
 0x239   : > { %v2336_v39 = vpop.f32.mrf.mxu2  ;;  %3607 = vmatpush.msra.mxu0 %v6254_v55 }
 0x23a   : > { %v2518_v38 = vadd.f32 %v7959_v63, %v2500_v33  ;;  %v8036_v14 = vpop.f32.mrf.mxu0 }
 0x23b   : > { %v2473_v56 = vpop.f32.mrf.mxu3  ;;  %v2213_v0 = vpop.f32.mrf.mxu1 }
 0x23c   : > { %v2532_v11 = vmax.f32 %v2518_v38, 0.0  ;;  %v2214_v2 = vadd.f32 %v2213_v0, %v7907_v24  ;;  %6195 = vmatmul.msk.f32.gmra.mxu0 %vm838_vm1, %v3038_v15  ;;  %v6253_v38 = vld [vmem:[%s9044_s3 + $0x80] sm:$0xff]  ;;  %v6272_v0 = vld [vmem:[%s9044_s3 + $0xd0] sm:$0xff] }
 0x23d   : > { %3608 = vmatpush.msra.mxu0 %v6253_v38  ;;  %3732 = vmatpush.msrb.mxu1 %v6272_v0  ;;  %v3414_v38 = vld [vmem:[#allocation2 + $0x9c] sm:$0xff] }
 0x23e   : > { %6147 = vmatmul.msk.f32.gmra.mxu1 %vm838_vm1, %v2564_v57  ;;  %2547 = vst.msk [vmem:[#allocation2 + $0x180] sm:$0xff] %vm838_vm1, %v2532_v11  ;;  %v2364_v7 = vadd.f32 %v2336_v39, %v2214_v2  ;;  %6165 = vmatmul.msk.f32.gmra.mxu2 %vm838_vm1, %v2790_v9  ;;  %v3410_v39 = vld [vmem:[#allocation2 + $0x7c] sm:$0xff] }
 0x240   : > { %6182 = vmatmul.msk.f32.gmra.mxu3 %vm838_vm1, %v2916_v18  ;;  %v2501_v24 = vadd.f32 %v2473_v56, %v2364_v7  ;;  %v6306_v56 = vld [vmem:[%s9044_s3 + $0x1d0] sm:$0xff]  ;;  %v3042_v18 = vld [vmem:[#allocation2 + $0xc0] sm:$0xff] }
 0x241   : > { %v2339_v60 = vpop.f32.mrf.mxu2 }
 0x242   : > { %v2519_v29 = vadd.f32 %v7959_v63, %v2501_v24  ;;  %v8048_v58 = vpop.f32.mrf.mxu0 }
 0x243   : > { %v2476_v51 = vpop.f32.mrf.mxu3  ;;  %v2216_v62 = vpop.f32.mrf.mxu1 }
 0x244   : > { %v2533_v3 = vmax.f32 %v2519_v29, 0.0  ;;  %v2217_v45 = vadd.f32 %v2216_v62, %v7923_v34  ;;  %6196 = vmatmul.msk.f32.gmra.mxu0 %vm838_vm1, %v3039_v37  ;;  %v6307_v34 = vld [vmem:[%s9044_s3 + $0x1d8] sm:$0xff]  ;;  %v3285_v29 = vld [vmem:[#allocation2 + $0x83] sm:$0xff] }
 0x245   : > { %3983 = vmatpush.msrb.mxu3 %v6307_v34  ;;  %v3411_v62 = vld [vmem:[#allocation2 + $0x84] sm:$0xff]  ;;  %v3159_v34 = vld [vmem:[#allocation2 + $0x79] sm:$0xff] }
 0x246   : > { %6148 = vmatmul.msk.f32.gmra.mxu1 %vm838_vm1, %v2565_v42  ;;  %2548 = vst.msk [vmem:[#allocation2 + $0x188] sm:$0xff] %vm838_vm1, %v2533_v3  ;;  %v2365_v50 = vadd.f32 %v2339_v60, %v2217_v45  ;;  %6166 = vmatmul.msk.f32.gmra.mxu2 %vm838_vm1, %v2791_v54  ;;  %v3158_v60 = vld [vmem:[#allocation2 + $0x71] sm:$0xff] }
 0x247   : > { %3984 = vmatpush.msrb.mxu3 %v6306_v56 }
 0x248   : > { %6183 = vmatmul.msk.f32.gmra.mxu3 %vm838_vm1, %v2917_v53  ;;  %v2502_v5 = vadd.f32 %v2476_v51, %v2365_v50  ;;  %v3043_v53 = vld [vmem:[#allocation2 + $0xc8] sm:$0xff] }
 0x249   : > { %v2342_v25 = vpop.f32.mrf.mxu2 }
 0x24a   : > { %v2520_v4 = vadd.f32 %v7959_v63, %v2502_v5  ;;  %v8066_v8 = vpop.f32.mrf.mxu0 }
 0x24b   : > { %v2479_v61 = vpop.f32.mrf.mxu3  ;;  %v2219_v28 = vpop.f32.mrf.mxu1 }
 0x24c   : > { %v2534_v40 = vmax.f32 %v2520_v4, 0.0  ;;  %v2220_v6 = vadd.f32 %v2219_v28, %v7941_v36  ;;  %6197 = vmatmul.msk.f32.gmra.mxu0 %vm838_vm1, %v3040_v31 }
 0x24e   : > { %6149 = vmatmul.msk.f32.gmra.mxu1 %vm838_vm1, %v2566_v13  ;;  %2549 = vst.msk [vmem:[#allocation2 + $0x190] sm:$0xff] %vm838_vm1, %v2534_v40  ;;  %v2366_v27 = vadd.f32 %v2342_v25, %v2220_v6  ;;  %6167 = vmatmul.msk.f32.gmra.mxu2 %vm838_vm1, %v2792_v22  ;;  %v3412_v25 = vld [vmem:[#allocation2 + $0x8c] sm:$0xff] }
 0x24f   : > { %v3044_v6 = vld [vmem:[#allocation2 + $0xd0] sm:$0x1] }
 0x250   : > { %6184 = vmatmul.msk.f32.gmra.mxu3 %vm838_vm1, %v2918_v20  ;;  %v2503_v46 = vadd.f32 %v2479_v61, %v2366_v27  ;;  %v3160_v27 = vld [vmem:[#allocation2 + $0x81] sm:$0xff]  ;;  %v3287_v20 = vld [vmem:[#allocation2 + $0x93] sm:$0xff] }
 0x251   : > { %v2345_v49 = vpop.f32.mrf.mxu2 }
 0x252   : > { %v2521_v26 = vadd.f32 %v7959_v63, %v2503_v46  ;;  %v8075_v36 = vpop.f32.mrf.mxu0 }
 0x253   : > { %v2482_v44 = vpop.f32.mrf.mxu3  ;;  %v2222_v30 = vpop.f32.mrf.mxu1 }
 0x254   : > { %v2535_v47 = vmax.f32 %v2521_v26, 0.0  ;;  %v2223_v35 = vadd.f32 %v2222_v30, %v7950_v12  ;;  %6198 = vmatmul.msk.f32.gmra.mxu0 %vm838_vm1, %v3041_v19  ;;  %v6289_v12 = vld [vmem:[%s9044_s3 + $0x190] sm:$0xff]  ;;  %v6288_v26 = vld [vmem:[%s9044_s3 + $0x188] sm:$0xff] }
 0x255   : > { %3858 = vmatpush.msrb.mxu2 %v6289_v12  ;;  %v3288_v12 = vld [vmem:[#allocation2 + $0x9b] sm:$0xff] }
 0x256   : > { %6150 = vmatmul.msk.f32.gmra.mxu1 %vm838_vm1, %v2567_v16  ;;  %2550 = vst.msk [vmem:[#allocation2 + $0x198] sm:$0xff] %vm838_vm1, %v2535_v47  ;;  %v2367_v33 = vadd.f32 %v2345_v49, %v2223_v35  ;;  %6223 = vmatmul.msk.f32.vlgmr.msra.gmra.mxu2 %vm838_vm1, %v3284_v48  ;;  %v3413_v49 = vld [vmem:[#allocation2 + $0x94] sm:$0xff]  ;;  %v6271_v35 = vld [vmem:[%s9044_s3 + $0xc8] sm:$0xff]  ;;  %v3536_v48 = vld [vmem:[#allocation2 + $0xe0] sm:$0xff] }
 0x257   : > { %3859 = vmatpush.msrb.mxu2 %v6288_v26  ;;  %3733 = vmatpush.msrb.mxu1 %v6271_v35  ;;  %v3165_v26 = vld [vmem:[#allocation2 + $0xa9] sm:$0xff] }
 0x258   : > { %6240 = vmatmul.msk.f32.vlgmr.msra.gmra.mxu3 %vm838_vm1, %v3410_v39  ;;  %v2504_v15 = vadd.f32 %v2482_v44, %v2367_v33  ;;  %v3161_v39 = vld [vmem:[#allocation2 + $0x89] sm:$0xff] }
 0x259   : > { %v2348_v11 = vpop.f32.mrf.mxu2 }
 0x25a   : > { %v2522_v2 = vadd.f32 %v7959_v63, %v2504_v15  ;;  %v8102_v9 = vpop.f32.mrf.mxu0 }
 0x25b   : > { %v2485_v57 = vpop.f32.mrf.mxu3  ;;  %v2225_v7 = vpop.f32.mrf.mxu1 }
 0x25c   : > { %v2536_v41 = vmax.f32 %v2522_v2, 0.0  ;;  %v2226_v24 = vadd.f32 %v2225_v7, %v7964_v1  ;;  %6199 = vmatmul.msk.f32.gmra.mxu0 %vm838_vm1, %v3042_v18  ;;  %v3537_v2 = vld [vmem:[#allocation2 + $0xe8] sm:$0xff]  ;;  %v3162_v7 = vld [vmem:[#allocation2 + $0x91] sm:$0xff] }
 0x25d   : > { %v3289_v18 = vld [vmem:[#allocation2 + $0xa3] sm:$0xff] }
 0x25e   : > { %6206 = vmatmul.msk.f32.vlgmr.msra.gmra.mxu1 %vm838_vm1, %v3158_v60  ;;  %2551 = vst.msk [vmem:[#allocation2 + $0x1a0] sm:$0xff] %vm838_vm1, %v2536_v41  ;;  %v2368_v51 = vadd.f32 %v2348_v11, %v2226_v24  ;;  %6224 = vmatmul.msk.f32.gmra.mxu2 %vm838_vm1, %v3285_v29  ;;  %v3415_v24 = vld [vmem:[#allocation2 + $0xa4] sm:$0xff] }
 0x260   : > { %6241 = vmatmul.msk.f32.gmra.mxu3 %vm838_vm1, %v3411_v62  ;;  %v2505_v37 = vadd.f32 %v2485_v57, %v2368_v51 }
 0x261   : > { %v2351_v3 = vpop.f32.mrf.mxu2 }
 0x262   : > { %v2523_v45 = vadd.f32 %v7959_v63, %v2505_v37  ;;  %v8111_v1 = vpop.f32.mrf.mxu0 }
 0x263   : > { %v2488_v42 = vpop.f32.mrf.mxu3  ;;  %v2228_v54 = vpop.f32.mrf.mxu1 }
 0x264   : > { %v2537_v50 = vmax.f32 %v2523_v45, 0.0  ;;  %v2229_v10 = vadd.f32 %v2228_v54, %v7982_v17  ;;  %6200 = vmatmul.msk.f32.gmra.mxu0 %vm838_vm1, %v3043_v53  ;;  %v3163_v45 = vld [vmem:[#allocation2 + $0x99] sm:$0xff]  ;;  %v3416_v53 = vld [vmem:[#allocation2 + $0xac] sm:$0xff] }
 0x266   : > { %6207 = vmatmul.msk.f32.gmra.mxu1 %vm838_vm1, %v3159_v34  ;;  %2552 = vst.msk [vmem:[#allocation2 + $0x1a8] sm:$0xff] %vm838_vm1, %v2537_v50  ;;  %v2369_v5 = vadd.f32 %v2351_v3, %v2229_v10  ;;  %6225 = vmatmul.msk.f32.gmra.mxu2 %vm838_vm1, %v3286_v32  ;;  %v6287_v50 = vld [vmem:[%s9044_s3 + $0x180] sm:$0xff] }
 0x267   : > { %3860 = vmatpush.msrb.mxu2 %v6287_v50  ;;  %v6304_v32 = vld [vmem:[%s9044_s3 + $0x1c0] sm:$0xff] }
 0x268   : > { %6242 = vmatmul.msk.f32.gmra.mxu3 %vm838_vm1, %v3412_v25  ;;  %v2506_v4 = vadd.f32 %v2488_v42, %v2369_v5  ;;  %v3290_v42 = vld [vmem:[#allocation2 + $0xab] sm:$0xff] }
 0x269   : > { %v2354_v61 = vpop.f32.mrf.mxu2 }
 0x26a   : > { %v2524_v28 = vadd.f32 %v7959_v63, %v2506_v4  ;;  %v8120_v17 = vpop.f32.mrf.mxu0  ;;  %v3539_v4 = vld [vmem:[#allocation2 + $0xf8] sm:$0xff] }
 0x26b   : > { %v2491_v31 = vpop.f32.mrf.mxu3  ;;  %v2231_v40 = vpop.f32.mrf.mxu1 }
 0x26c   : > { %v2538_v13 = vmax.f32 %v2524_v28, 0.0  ;;  %v2232_v22 = vadd.f32 %v2231_v40, %v7991_v21  ;;  %6201 = vmatmul.msk.f32.gmra.mxu0 %vm838_vm1, %v3044_v6  ;;  %v6305_v21 = vld [vmem:[%s9044_s3 + $0x1c8] sm:$0xff]  ;;  %v3417_v6 = vld [vmem:[#allocation2 + $0xb4] sm:$0xff] }
 0x26d   : > { %3985 = vmatpush.msrb.mxu3 %v6305_v21  ;;  %v3164_v28 = vld [vmem:[#allocation2 + $0xa1] sm:$0xff] }
 0x26e   : > { %6208 = vmatmul.msk.f32.gmra.mxu1 %vm838_vm1, %v3160_v27  ;;  %2553 = vst.msk [vmem:[#allocation2 + $0x1b0] sm:$0xff] %vm838_vm1, %v2538_v13  ;;  %v2370_v46 = vadd.f32 %v2354_v61, %v2232_v22  ;;  %6226 = vmatmul.msk.f32.gmra.mxu2 %vm838_vm1, %v3287_v20  ;;  %v6270_v13 = vld [vmem:[%s9044_s3 + $0xc0] sm:$0xff] }
 0x26f   : > { %3986 = vmatpush.msrb.mxu3 %v6304_v32  ;;  %3734 = vmatpush.msrb.mxu1 %v6270_v13  ;;  %v3169_v13 = vld [vmem:[#allocation2 + $0xc9] sm:$0xff] }
 0x270   : > { %6243 = vmatmul.msk.f32.gmra.mxu3 %vm838_vm1, %v3413_v49  ;;  %v2507_v44 = vadd.f32 %v2491_v31, %v2370_v46  ;;  %v3291_v31 = vld [vmem:[#allocation2 + $0xb3] sm:$0xff]  ;;  %v3540_v46 = vld [vmem:[#allocation2 + $0x100] sm:$0xff] }
 0x271   : > { %v2854_v30 = vpop.f32.mrf.mxu2 }
 0x272   : > { %v2525_v19 = vadd.f32 %v7959_v63, %v2507_v44  ;;  %v8135_v47 = vpop.f32.mrf.mxu0  ;;  %v3292_v44 = vld [vmem:[#allocation2 + $0xbb] sm:$0xff] }
 0x273   : > { %v2980_v43 = vpop.f32.mrf.mxu3  ;;  %v2741_v16 = vpop.f32.mrf.mxu1 }
 0x274   : > { %v2539_v55 = vmax.f32 %v2525_v19, 0.0  ;;  %v2742_v33 = vadd.f32 %v2741_v16, %v8000_v23  ;;  %6257 = vmatmul.msk.f32.vlgmr.msra.gmra.mxu0 %vm838_vm1, %v3536_v48  ;;  %v3418_v19 = vld [vmem:[#allocation2 + $0xbc] sm:$0xff] }
 0x276   : > { %6209 = vmatmul.msk.f32.gmra.mxu1 %vm838_vm1, %v3161_v39  ;;  %2554 = vst.msk [vmem:[#allocation2 + $0x1b8] sm:$0x1f] %vm852_vm2, %v2539_v55  ;;  %v2893_v63 = vadd.f32 %v2854_v30, %v2742_v33  ;;  %6227 = vmatmul.msk.f32.gmra.mxu2 %vm838_vm1, %v3288_v12  ;;  %v3166_v33 = vld [vmem:[#allocation2 + $0xb1] sm:$0xff]  ;;  %v3293_v39 = vld [vmem:[#allocation2 + $0xc3] sm:$0xff] }
 0x278   : > { %6244 = vmatmul.msk.f32.gmra.mxu3 %vm838_vm1, %v3414_v38  ;;  %v8146_v56 = vadd.f32 %v2980_v43, %v2893_v63  ;;  %v3419_v63 = vld [vmem:[#allocation2 + $0xc4] sm:$0xff] }
 0x279   : > { %v2857_v0 = vpop.f32.mrf.mxu2 }
 0x27a   : > { %v8148_v11 = vpop.f32.mrf.mxu0 }
 0x27b   : > { %v2983_v15 = vpop.f32.mrf.mxu3  ;;  %v2744_v23 = vpop.f32.mrf.mxu1 }
 0x27c   : > { %v2745_v57 = vadd.f32 %v2744_v23, %v8015_v52  ;;  %6258 = vmatmul.msk.f32.gmra.mxu0 %vm838_vm1, %v3537_v2  ;;  %v3538_v52 = vld [vmem:[#allocation2 + $0xf0] sm:$0xff] }
 0x27e   : > { %6210 = vmatmul.msk.f32.gmra.mxu1 %vm838_vm1, %v3162_v7  ;;  %v2894_v41 = vadd.f32 %v2857_v0, %v2745_v57  ;;  %6228 = vmatmul.msk.f32.gmra.mxu2 %vm838_vm1, %v3289_v18  ;;  %v3542_v57 = vld [vmem:[#allocation2 + $0x110] sm:$0xff]  ;;  %v3167_v18 = vld [vmem:[#allocation2 + $0xb9] sm:$0xff] }
 0x280   : > { %6245 = vmatmul.msk.f32.gmra.mxu3 %vm838_vm1, %v3415_v24  ;;  %v8155_v60 = vadd.f32 %v2983_v15, %v2894_v41  ;;  %v3294_v41 = vld [vmem:[#allocation2 + $0xcb] sm:$0xff] }
 0x281   : > { %v2860_v29 = vpop.f32.mrf.mxu2 }
 0x282   : > { %v8157_v62 = vpop.f32.mrf.mxu0 }
 0x283   : > { %v2986_v51 = vpop.f32.mrf.mxu3  ;;  %v2747_v37 = vpop.f32.mrf.mxu1 }
 0x284   : > { %v2748_v3 = vadd.f32 %v2747_v37, %v8027_v59  ;;  %6259 = vmatmul.msk.f32.gmra.mxu0 %vm838_vm1, %v3538_v52  ;;  %v6375_v37 = vld [vmem:[%s9044_s3 + $0x1f8] sm:$0xff] }
 0x285   : > { %4487 = vmatpush.msra.mxu3 %v6375_v37 }
 0x286   : > { %6211 = vmatmul.msk.f32.gmra.mxu1 %vm838_vm1, %v3163_v45  ;;  %v2895_v54 = vadd.f32 %v2860_v29, %v2748_v3  ;;  %6229 = vmatmul.msk.f32.gmra.mxu2 %vm838_vm1, %v3290_v42  ;;  %v3420_v29 = vld [vmem:[#allocation2 + $0xcc] sm:$0xff] }
 0x288   : > { %6246 = vmatmul.msk.f32.gmra.mxu3 %vm838_vm1, %v3416_v53  ;;  %v8167_v10 = vadd.f32 %v2986_v51, %v2895_v54  ;;  %v6324_v51 = vld [vmem:[%s9044_s3 + $0xb8] sm:$0xff] }
 0x289   : > { %v2863_v59 = vpop.f32.mrf.mxu2  ;;  %4109 = vmatpush.msrb.mxu0 %v6324_v51  ;;  %v3543_v53 = vld [vmem:[#allocation2 + $0x118] sm:$0xff] }
 0x28a   : > { %v8172_v25 = vpop.f32.mrf.mxu0 }
 0x28b   : > { %v2989_v34 = vpop.f32.mrf.mxu3  ;;  %v2750_v5 = vpop.f32.mrf.mxu1 }
 0x28c   : > { %v2751_v61 = vadd.f32 %v2750_v5, %v8036_v14  ;;  %6260 = vmatmul.msk.f32.gmra.mxu0 %vm838_vm1, %v3539_v4  ;;  %v3421_v5 = vld [vmem:[#allocation2 + $0xd4] sm:$0xff] }
 0x28e   : > { %6212 = vmatmul.msk.f32.gmra.mxu1 %vm838_vm1, %v3164_v28  ;;  %v2896_v40 = vadd.f32 %v2863_v59, %v2751_v61  ;;  %6230 = vmatmul.msk.f32.gmra.mxu2 %vm838_vm1, %v3291_v31  ;;  %v3168_v59 = vld [vmem:[#allocation2 + $0xc1] sm:$0xff] }
 0x290   : > { %6247 = vmatmul.msk.f32.gmra.mxu3 %vm838_vm1, %v3417_v6  ;;  %v8182_v22 = vadd.f32 %v2989_v34, %v2896_v40  ;;  %v3295_v34 = vld [vmem:[#allocation2 + $0xd3] sm:$0xff] }
 0x291   : > { %v2866_v14 = vpop.f32.mrf.mxu2 }
 0x292   : > { %v8186_v21 = vpop.f32.mrf.mxu0 }
 0x293   : > { %v2992_v27 = vpop.f32.mrf.mxu3  ;;  %v2753_v20 = vpop.f32.mrf.mxu1 }
 0x294   : > { %v2754_v49 = vadd.f32 %v2753_v20, %v8048_v58  ;;  %6261 = vmatmul.msk.f32.gmra.mxu0 %vm838_vm1, %v3540_v46  ;;  %v3541_v58 = vld [vmem:[#allocation2 + $0x108] sm:$0xff]  ;;  %v3422_v20 = vld [vmem:[#allocation2 + $0xdc] sm:$0x1] }
 0x296   : > { %6213 = vmatmul.msk.f32.gmra.mxu1 %vm838_vm1, %v3165_v26  ;;  %v2897_v30 = vadd.f32 %v2866_v14, %v2754_v49  ;;  %6231 = vmatmul.msk.f32.gmra.mxu2 %vm838_vm1, %v3292_v44  ;;  %v3296_v14 = vld [vmem:[#allocation2 + $0xdb] sm:$0x1] }
 0x298   : > { %6248 = vmatmul.msk.f32.gmra.mxu3 %vm838_vm1, %v3418_v19  ;;  %v8191_v43 = vadd.f32 %v2992_v27, %v2897_v30  ;;  %v3545_v30 = vld [vmem:[#allocation2 + $0x128] sm:$0xff] }
 0x299   : > { %v2869_v35 = vpop.f32.mrf.mxu2 }
 0x29a   : > { %v8197_v38 = vpop.f32.mrf.mxu0 }
 0x29b   : > { %v2995_v16 = vpop.f32.mrf.mxu3  ;;  %v2756_v48 = vpop.f32.mrf.mxu1 }
 0x29c   : > { %v2757_v55 = vadd.f32 %v2756_v48, %v8066_v8  ;;  %6262 = vmatmul.msk.f32.gmra.mxu0 %vm838_vm1, %v3541_v58  ;;  %v6358_v8 = vld [vmem:[%s9044_s3 + $0x1b8] sm:$0xff]  ;;  %v3788_v48 = vld [vmem:[#allocation2 + $0xeb] sm:$0xff] }
 0x29d   : > { %4361 = vmatpush.msra.mxu2 %v6358_v8  ;;  %v6322_v58 = vld [vmem:[%s9044_s3 + $0xa8] sm:$0xff] }
 0x29e   : > { %6214 = vmatmul.msk.f32.gmra.mxu1 %vm838_vm1, %v3166_v33  ;;  %v2898_v12 = vadd.f32 %v2869_v35, %v2757_v55  ;;  %6232 = vmatmul.msk.f32.gmra.mxu2 %vm838_vm1, %v3293_v39  ;;  %v3170_v35 = vld [vmem:[#allocation2 + $0xd1] sm:$0x1]  ;;  %v6321_v39 = vld [vmem:[%s9044_s3 + $0xa0] sm:$0xff] }
 0x29f   : > { %v3914_v33 = vld [vmem:[#allocation2 + $0xec] sm:$0xff] }
 0x2a0   : > { %6249 = vmatmul.msk.f32.gmra.mxu3 %vm838_vm1, %v3419_v63  ;;  %v8200_v0 = vadd.f32 %v2995_v16, %v2898_v12  ;;  %v6374_v12 = vld [vmem:[%s9044_s3 + $0x1f0] sm:$0xff] }
 0x2a1   : > { %v2872_v15 = vpop.f32.mrf.mxu2  ;;  %v6340_v63 = vld [vmem:[%s9044_s3 + $0xf0] sm:$0xff]  ;;  %4488 = vmatpush.msra.mxu3 %v6374_v12  ;;  %v3146_v12 = vadd.f32 %v8186_v21, %v8155_v60  ;;  %v3147_v21 = vadd.f32 %v8197_v38, %v8167_v10  ;;  %v6355_v10 = vld [vmem:[%s9044_s3 + $0x1a0] sm:$0xff] }
 0x2a2   : > { %v8221_v3 = vpop.f32.mrf.mxu0 }
 0x2a3   : > { %v2998_v23 = vpop.f32.mrf.mxu3  ;;  %v2759_v2 = vpop.f32.mrf.mxu1 }
 0x2a4   : > { %v2760_v7 = vadd.f32 %v2759_v2, %v8075_v36  ;;  %6263 = vmatmul.msk.f32.gmra.mxu0 %vm838_vm1, %v3542_v57  ;;  %v6341_v36 = vld [vmem:[%s9044_s3 + $0xf8] sm:$0xff]  ;;  %v3546_v57 = vld [vmem:[#allocation2 + $0x130] sm:$0xff] }
 0x2a5   : > { %4235 = vmatpush.msra.mxu1 %v6341_v36 }
 0x2a6   : > { %6215 = vmatmul.msk.f32.gmra.mxu1 %vm838_vm1, %v3167_v18  ;;  %v2899_v24 = vadd.f32 %v2872_v15, %v2760_v7  ;;  %6233 = vmatmul.msk.f32.gmra.mxu2 %vm838_vm1, %v3294_v41  ;;  %v3662_v18 = vld [vmem:[#allocation2 + $0xe1] sm:$0xff]  ;;  %v3789_v41 = vld [vmem:[#allocation2 + $0xf3] sm:$0xff] }
 0x2a7   : > { %4236 = vmatpush.msra.mxu1 %v6340_v63 }
 0x2a8   : > { %6250 = vmatmul.msk.f32.gmra.mxu3 %vm838_vm1, %v3420_v29  ;;  %v8219_v52 = vadd.f32 %v2998_v23, %v2899_v24  ;;  %v3915_v29 = vld [vmem:[#allocation2 + $0xf4] sm:$0xff] }
 0x2a9   : > { %v2875_v45 = vpop.f32.mrf.mxu2 }
 0x2aa   : > { %v8230_v31 = vpop.f32.mrf.mxu0 }
 0x2ab   : > { %v3001_v42 = vpop.f32.mrf.mxu3  ;;  %v2762_v54 = vpop.f32.mrf.mxu1 }
 0x2ac   : > { %v2763_v50 = vadd.f32 %v2762_v54, %v8102_v9  ;;  %6264 = vmatmul.msk.f32.gmra.mxu0 %vm838_vm1, %v3543_v53  ;;  %v3544_v9 = vld [vmem:[#allocation2 + $0x120] sm:$0xff]  ;;  %v3663_v53 = vld [vmem:[#allocation2 + $0xe9] sm:$0xff] }
 0x2ae   : > { %6216 = vmatmul.msk.f32.gmra.mxu1 %vm838_vm1, %v3168_v59  ;;  %v2900_v32 = vadd.f32 %v2875_v45, %v2763_v50  ;;  %6234 = vmatmul.msk.f32.gmra.mxu2 %vm838_vm1, %v3295_v34  ;;  %v3790_v50 = vld [vmem:[#allocation2 + $0xfb] sm:$0xff] }
 0x2af   : > { %v3916_v34 = vld [vmem:[#allocation2 + $0xfc] sm:$0xff] }
 0x2b0   : > { %6251 = vmatmul.msk.f32.gmra.mxu3 %vm838_vm1, %v3421_v5  ;;  %v8228_v4 = vadd.f32 %v3001_v42, %v2900_v32 }
 0x2b1   : > { %v2878_v61 = vpop.f32.mrf.mxu2 }
 0x2b2   : > { %v8244_v16 = vpop.f32.mrf.mxu0 }
 0x2b3   : > { %v3004_v28 = vpop.f32.mrf.mxu3  ;;  %v2765_v40 = vpop.f32.mrf.mxu1 }
 0x2b4   : > { %v2766_v6 = vadd.f32 %v2765_v40, %v8111_v1  ;;  %6265 = vmatmul.msk.f32.gmra.mxu0 %vm838_vm1, %v3544_v9  ;;  %v6323_v1 = vld [vmem:[%s9044_s3 + $0xb0] sm:$0xff] }
 0x2b5   : > { %4110 = vmatpush.msrb.mxu0 %v6323_v1  ;;  %v3145_v1 = vadd.f32 %v8172_v25, %v8146_v56  ;;  %v3918_v56 = vld [vmem:[#allocation2 + $0x10c] sm:$0xff] }
 0x2b6   : > { %6217 = vmatmul.msk.f32.gmra.mxu1 %vm838_vm1, %v3169_v13  ;;  %v2901_v27 = vadd.f32 %v2878_v61, %v2766_v6  ;;  %6235 = vmatmul.msk.f32.gmra.mxu2 %vm838_vm1, %v3296_v14  ;;  %v3664_v6 = vld [vmem:[#allocation2 + $0xf1] sm:$0xff]  ;;  %v3791_v13 = vld [vmem:[#allocation2 + $0x103] sm:$0xff] }
 0x2b7   : > { %4111 = vmatpush.msrb.mxu0 %v6322_v58 }
 0x2b8   : > { %6252 = vmatmul.msk.f32.gmra.mxu3 %vm838_vm1, %v3422_v20  ;;  %v8237_v46 = vadd.f32 %v3004_v28, %v2901_v27  ;;  %v3917_v27 = vld [vmem:[#allocation2 + $0x104] sm:$0xff] }
 0x2b9   : > { %v2881_v49 = vpop.f32.mrf.mxu2  ;;  %4112 = vmatpush.msrb.mxu0 %v6321_v39  ;;  %v6356_v20 = vld [vmem:[%s9044_s3 + $0x1a8] sm:$0xff] }
 0x2ba   : > { %v8270_v51 = vpop.f32.mrf.mxu0 }
 0x2bb   : > { %v3007_v26 = vpop.f32.mrf.mxu3  ;;  %v2768_v44 = vpop.f32.mrf.mxu1 }
 0x2bc   : > { %v2769_v19 = vadd.f32 %v2768_v44, %v8120_v17  ;;  %6266 = vmatmul.msk.f32.gmra.mxu0 %vm838_vm1, %v3545_v30  ;;  %v6357_v17 = vld [vmem:[%s9044_s3 + $0x1b0] sm:$0xff]  ;;  %v6339_v30 = vld [vmem:[%s9044_s3 + $0xe8] sm:$0xff] }
 0x2bd   : > { %4362 = vmatpush.msra.mxu2 %v6357_v17  ;;  %4237 = vmatpush.msra.mxu1 %v6339_v30 }
 0x2be   : > { %6218 = vmatmul.msk.f32.gmra.mxu1 %vm838_vm1, %v3170_v35  ;;  %v2902_v55 = vadd.f32 %v2881_v49, %v2769_v19  ;;  %6291 = vmatmul.msk.f32.vlgmr.msrb.gmra.mxu2 %vm838_vm1, %v3788_v48  ;;  %v4040_v48 = vld [vmem:[#allocation2 + $0x150] sm:$0xff] }
 0x2bf   : > { %4363 = vmatpush.msra.mxu2 %v6356_v20 }
 0x2c0   : > { %6308 = vmatmul.msk.f32.vlgmr.msrb.gmra.mxu3 %vm838_vm1, %v3914_v33  ;;  %v8264_v15 = vadd.f32 %v3007_v26, %v2902_v55  ;;  %v3665_v55 = vld [vmem:[#allocation2 + $0xf9] sm:$0xff]  ;;  %v3792_v33 = vld [vmem:[#allocation2 + $0x10b] sm:$0xff] }
 0x2c1   : > { %v2884_v23 = vpop.f32.mrf.mxu2  ;;  %4364 = vmatpush.msra.mxu2 %v6355_v10 }
 0x2c2   : > { %v8282_v5 = vpop.f32.mrf.mxu0 }
 0x2c3   : > { %v3010_v8 = vpop.f32.mrf.mxu3  ;;  %v2771_v2 = vpop.f32.mrf.mxu1 }
 0x2c4   : > { %v2772_v7 = vadd.f32 %v2771_v2, %v8135_v47  ;;  %6267 = vmatmul.msk.f32.gmra.mxu0 %vm838_vm1, %v3546_v57  ;;  %v3547_v47 = vld [vmem:[#allocation2 + $0x138] sm:$0xff]  ;;  %v3666_v57 = vld [vmem:[#allocation2 + $0x101] sm:$0xff] }
 0x2c6   : > { %6274 = vmatmul.msk.f32.vlgmr.msrb.gmra.mxu1 %vm838_vm1, %v3662_v18  ;;  %v2903_v24 = vadd.f32 %v2884_v23, %v2772_v7  ;;  %6292 = vmatmul.msk.f32.gmra.mxu2 %vm838_vm1, %v3789_v41  ;;  %v3793_v18 = vld [vmem:[#allocation2 + $0x113] sm:$0xff] }
 0x2c8   : > { %6309 = vmatmul.msk.f32.gmra.mxu3 %vm838_vm1, %v3915_v29  ;;  %v8273_v37 = vadd.f32 %v3010_v8, %v2903_v24  ;;  %v4041_v8 = vld [vmem:[#allocation2 + $0x158] sm:$0xff] }
 0x2c9   : > { %v2887_v36 = vpop.f32.mrf.mxu2  ;;  %v3919_v24 = vld [vmem:[#allocation2 + $0x114] sm:$0xff] }
 0x2ca   : > { %v8302_v19 = vpop.f32.mrf.mxu0 }
 0x2cb   : > { %v3013_v45 = vpop.f32.mrf.mxu3  ;;  %v2774_v42 = vpop.f32.mrf.mxu1 }
 0x2cc   : > { %v2775_v54 = vadd.f32 %v2774_v42, %v8148_v11  ;;  %6268 = vmatmul.msk.f32.gmra.mxu0 %vm838_vm1, %v3547_v47  ;;  %v3548_v11 = vld [vmem:[#allocation2 + $0x140] sm:$0x1] }
 0x2cd   : > { %v4042_v42 = vld [vmem:[#allocation2 + $0x160] sm:$0xff] }
 0x2ce   : > { %6275 = vmatmul.msk.f32.gmra.mxu1 %vm838_vm1, %v3663_v53  ;;  %v2904_v59 = vadd.f32 %v2887_v36, %v2775_v54  ;;  %6293 = vmatmul.msk.f32.gmra.mxu2 %vm838_vm1, %v3790_v50  ;;  %v3667_v54 = vld [vmem:[#allocation2 + $0x109] sm:$0xff]  ;;  %v3794_v53 = vld [vmem:[#allocation2 + $0x11b] sm:$0xff] }
 0x2d0   : > { %6310 = vmatmul.msk.f32.gmra.mxu3 %vm838_vm1, %v3916_v34  ;;  %v8280_v32 = vadd.f32 %v3013_v45, %v2904_v59  ;;  %v3920_v59 = vld [vmem:[#allocation2 + $0x11c] sm:$0xff] }
 0x2d1   : > { %v2890_v61 = vpop.f32.mrf.mxu2 }
 0x2d2   : > { %v8313_v7 = vpop.f32.mrf.mxu0 }
 0x2d3   : > { %v3016_v28 = vpop.f32.mrf.mxu3  ;;  %v2777_v40 = vpop.f32.mrf.mxu1 }
 0x2d4   : > { %v2778_v9 = vadd.f32 %v2777_v40, %v8157_v62  ;;  %6269 = vmatmul.msk.f32.gmra.mxu0 %vm838_vm1, %v3548_v11  ;;  %v6373_v62 = vld [vmem:[%s9044_s3 + $0x1e8] sm:$0xff]  ;;  %v6372_v11 = vld [vmem:[%s9044_s3 + $0x1e0] sm:$0xff] }
 0x2d5   : > { %4489 = vmatpush.msra.mxu3 %v6373_v62  ;;  %v3921_v62 = vld [vmem:[#allocation2 + $0x124] sm:$0xff] }
 0x2d6   : > { %6276 = vmatmul.msk.f32.gmra.mxu1 %vm838_vm1, %v3664_v6  ;;  %v2905_v14 = vadd.f32 %v2890_v61, %v2778_v9  ;;  %6294 = vmatmul.msk.f32.gmra.mxu2 %vm838_vm1, %v3791_v13  ;;  %v4043_v6 = vld [vmem:[#allocation2 + $0x168] sm:$0xff] }
 0x2d7   : > { %4490 = vmatpush.msra.mxu3 %v6372_v11 }
 0x2d8   : > { %6311 = vmatmul.msk.f32.gmra.mxu3 %vm838_vm1, %v3917_v27  ;;  %v8295_v49 = vadd.f32 %v3016_v28, %v2905_v14  ;;  %v3148_v28 = vadd.f32 %v8221_v3, %v8182_v22  ;;  %v3668_v14 = vld [vmem:[#allocation2 + $0x111] sm:$0xff]  ;;  %v3795_v27 = vld [vmem:[#allocation2 + $0x123] sm:$0xff] }
 0x2d9   : > { %v3358_v26 = vpop.f32.mrf.mxu2  ;;  %v6338_v22 = vld [vmem:[%s9044_s3 + $0xe0] sm:$0xff] }
 0x2da   : > { %v8325_v34 = vpop.f32.mrf.mxu0  ;;  %4238 = vmatpush.msra.mxu1 %v6338_v22 }
 0x2db   : > { %v3484_v44 = vpop.f32.mrf.mxu3  ;;  %v3232_v35 = vpop.f32.mrf.mxu1 }
 0x2dc   : > { %v3271_v58 = vadd.f32 %v3232_v35, %v3145_v1  ;;  %6325 = vmatmul.msk.f32.vlgmr.msrb.gmra.mxu0 %vm838_vm1, %v4040_v48  ;;  %v4044_v48 = vld [vmem:[#allocation2 + $0x170] sm:$0xff] }
 0x2de   : > { %6277 = vmatmul.msk.f32.gmra.mxu1 %vm838_vm1, %v3665_v55  ;;  %v3397_v17 = vadd.f32 %v3358_v26, %v3271_v58  ;;  %6295 = vmatmul.msk.f32.gmra.mxu2 %vm838_vm1, %v3792_v33  ;;  %v3669_v55 = vld [vmem:[#allocation2 + $0x119] sm:$0xff]  ;;  %v3796_v33 = vld [vmem:[#allocation2 + $0x12b] sm:$0xff] }
 0x2e0   : > { %6312 = vmatmul.msk.f32.gmra.mxu3 %vm838_vm1, %v3918_v56  ;;  %v8308_v25 = vadd.f32 %v3484_v44, %v3397_v17  ;;  %v3149_v44 = vadd.f32 %v8230_v31, %v8191_v43  ;;  %v3922_v56 = vld [vmem:[#allocation2 + $0x12c] sm:$0xff]  ;;  %v3150_v43 = vadd.f32 %v8244_v16, %v8200_v0  ;;  %v3151_v16 = vadd.f32 %v8270_v51, %v8219_v52 }
 0x2e1   : > { %v3361_v39 = vpop.f32.mrf.mxu2  ;;  %v3152_v51 = vadd.f32 %v8282_v5, %v8228_v4  ;;  %v3153_v5 = vadd.f32 %v8302_v19, %v8237_v46  ;;  %v3154_v19 = vadd.f32 %v8313_v7, %v8264_v15  ;;  %v3155_v15 = vadd.f32 %v8325_v34, %v8273_v37 }
 0x2e2   : > { %v8347_v26 = vpop.f32.mrf.mxu0 }
 0x2e3   : > { %v3487_v63 = vpop.f32.mrf.mxu3  ;;  %v3235_v23 = vpop.f32.mrf.mxu1  ;;  %v3156_v34 = vadd.f32 %v8347_v26, %v8280_v32 }
 0x2e4   : > { %v3272_v2 = vadd.f32 %v3235_v23, %v3146_v12  ;;  %6326 = vmatmul.msk.f32.gmra.mxu0 %vm838_vm1, %v4041_v8  ;;  %v4045_v8 = vld [vmem:[#allocation2 + $0x178] sm:$0xff] }
 0x2e6   : > { %6278 = vmatmul.msk.f32.gmra.mxu1 %vm838_vm1, %v3666_v57  ;;  %v3398_v41 = vadd.f32 %v3361_v39, %v3272_v2  ;;  %6296 = vmatmul.msk.f32.gmra.mxu2 %vm838_vm1, %v3793_v18  ;;  %v3670_v57 = vld [vmem:[#allocation2 + $0x121] sm:$0xff]  ;;  %v3797_v18 = vld [vmem:[#allocation2 + $0x133] sm:$0xff] }
 0x2e8   : > { %6313 = vmatmul.msk.f32.gmra.mxu3 %vm838_vm1, %v3919_v24  ;;  %v8318_v29 = vadd.f32 %v3487_v63, %v3398_v41  ;;  %v3923_v24 = vld [vmem:[#allocation2 + $0x134] sm:$0xff] }
 0x2e9   : > { %v3364_v60 = vpop.f32.mrf.mxu2 }
 0x2ea   : > { %v8359_v63 = vpop.f32.mrf.mxu0 }
 0x2eb   : > { %v3490_v36 = vpop.f32.mrf.mxu3  ;;  %v3238_v45 = vpop.f32.mrf.mxu1  ;;  %v3157_v26 = vadd.f32 %v8359_v63, %v8295_v49  ;;  %v6396_v49 = vld [vmem:[%s9046_s5 + $0x78] sm:$0xff] }
 0x2ec   : > { %v3273_v47 = vadd.f32 %v3238_v45, %v3147_v21  ;;  %6327 = vmatmul.msk.f32.gmra.mxu0 %vm838_vm1, %v4042_v42  ;;  %v4046_v45 = vld [vmem:[#allocation2 + $0x180] sm:$0xff] }
 0x2ed   : > { %4663 = vmatpush.msra.mxu0 %v6396_v49  ;;  %v4174_v49 = vld [vmem:[#allocation2 + $0x191] sm:$0xff] }
 0x2ee   : > { %6279 = vmatmul.msk.f32.gmra.mxu1 %vm838_vm1, %v3667_v54  ;;  %v3399_v50 = vadd.f32 %v3364_v60, %v3273_v47  ;;  %6297 = vmatmul.msk.f32.gmra.mxu2 %vm838_vm1, %v3794_v53  ;;  %v3671_v47 = vld [vmem:[#allocation2 + $0x129] sm:$0xff]  ;;  %v3798_v53 = vld [vmem:[#allocation2 + $0x13b] sm:$0xff] }
 0x2f0   : > { %6314 = vmatmul.msk.f32.gmra.mxu3 %vm838_vm1, %v3920_v59  ;;  %v8331_v38 = vadd.f32 %v3490_v36, %v3399_v50  ;;  %v3924_v59 = vld [vmem:[#allocation2 + $0x13c] sm:$0xff] }
 0x2f1   : > { %v3367_v61 = vpop.f32.mrf.mxu2 }
 0x2f2   : > { %v8370_v54 = vpop.f32.mrf.mxu0 }
 0x2f3   : > { %v3493_v40 = vpop.f32.mrf.mxu3  ;;  %v3241_v9 = vpop.f32.mrf.mxu1 }
 0x2f4   : > { %v3274_v13 = vadd.f32 %v3241_v9, %v3148_v28  ;;  %6328 = vmatmul.msk.f32.gmra.mxu0 %vm838_vm1, %v4043_v6  ;;  %v3672_v9 = vld [vmem:[#allocation2 + $0x131] sm:$0xff]  ;;  %v3799_v6 = vld [vmem:[#allocation2 + $0x143] sm:$0xff] }
 0x2f6   : > { %6280 = vmatmul.msk.f32.gmra.mxu1 %vm838_vm1, %v3668_v14  ;;  %v3400_v20 = vadd.f32 %v3367_v61, %v3274_v13  ;;  %6298 = vmatmul.msk.f32.gmra.mxu2 %vm838_vm1, %v3795_v27  ;;  %v3925_v14 = vld [vmem:[#allocation2 + $0x144] sm:$0xff] }
 0x2f8   : > { %6315 = vmatmul.msk.f32.gmra.mxu3 %vm838_vm1, %v3921_v62  ;;  %v8345_v3 = vadd.f32 %v3493_v40, %v3400_v20  ;;  %v4047_v40 = vld [vmem:[#allocation2 + $0x188] sm:$0xff] }
 0x2f9   : > { %v3370_v1 = vpop.f32.mrf.mxu2 }
 0x2fa   : > { %v8382_v27 = vpop.f32.mrf.mxu0 }
 0x2fb   : > { %v3496_v30 = vpop.f32.mrf.mxu3  ;;  %v3244_v35 = vpop.f32.mrf.mxu1 }
 0x2fc   : > { %v3275_v58 = vadd.f32 %v3244_v35, %v3149_v44  ;;  %6329 = vmatmul.msk.f32.gmra.mxu0 %vm838_vm1, %v4044_v48  ;;  %v3800_v35 = vld [vmem:[#allocation2 + $0x14b] sm:$0x1] }
 0x2fe   : > { %6281 = vmatmul.msk.f32.gmra.mxu1 %vm838_vm1, %v3669_v55  ;;  %v3401_v17 = vadd.f32 %v3370_v1, %v3275_v58  ;;  %6299 = vmatmul.msk.f32.gmra.mxu2 %vm838_vm1, %v3796_v33  ;;  %v4048_v1 = vld [vmem:[#allocation2 + $0x190] sm:$0xff]  ;;  %v3926_v58 = vld [vmem:[#allocation2 + $0x14c] sm:$0x1] }
 0x300   : > { %6316 = vmatmul.msk.f32.gmra.mxu3 %vm838_vm1, %v3922_v56  ;;  %v8355_v39 = vadd.f32 %v3496_v30, %v3401_v17  ;;  %v3673_v30 = vld [vmem:[#allocation2 + $0x139] sm:$0xff] }
 0x301   : > { %v3373_v12 = vpop.f32.mrf.mxu2 }
 0x302   : > { %v8395_v33 = vpop.f32.mrf.mxu0 }
 0x303   : > { %v3499_v31 = vpop.f32.mrf.mxu3  ;;  %v3247_v23 = vpop.f32.mrf.mxu1 }
 0x304   : > { %v3276_v2 = vadd.f32 %v3247_v23, %v3150_v43  ;;  %6330 = vmatmul.msk.f32.gmra.mxu0 %vm838_vm1, %v4045_v8  ;;  %v4292_v23 = vld [vmem:[#allocation2 + $0x15b] sm:$0xff] }
 0x306   : > { %6282 = vmatmul.msk.f32.gmra.mxu1 %vm838_vm1, %v3670_v57  ;;  %v3402_v41 = vadd.f32 %v3373_v12, %v3276_v2  ;;  %6300 = vmatmul.msk.f32.gmra.mxu2 %vm838_vm1, %v3797_v18  ;;  %v4049_v12 = vld [vmem:[#allocation2 + $0x198] sm:$0xff] }
 0x307   : > { %v4418_v2 = vld [vmem:[#allocation2 + $0x15c] sm:$0xff] }
 0x308   : > { %6317 = vmatmul.msk.f32.gmra.mxu3 %vm838_vm1, %v3923_v24  ;;  %v8365_v60 = vadd.f32 %v3499_v31, %v3402_v41  ;;  %v3674_v31 = vld [vmem:[#allocation2 + $0x141] sm:$0x1] }
 0x309   : > { %v3376_v0 = vpop.f32.mrf.mxu2 }
 0x30a   : > { %v8407_v41 = vpop.f32.mrf.mxu0 }
 0x30b   : > { %v3502_v21 = vpop.f32.mrf.mxu3  ;;  %v3250_v36 = vpop.f32.mrf.mxu1 }
 0x30c   : > { %v3277_v42 = vadd.f32 %v3250_v36, %v3151_v16  ;;  %6331 = vmatmul.msk.f32.gmra.mxu0 %vm838_vm1, %v4046_v45  ;;  %v4293_v36 = vld [vmem:[#allocation2 + $0x163] sm:$0xff] }
 0x30e   : > { %6283 = vmatmul.msk.f32.gmra.mxu1 %vm838_vm1, %v3671_v47  ;;  %v3403_v50 = vadd.f32 %v3376_v0, %v3277_v42  ;;  %6301 = vmatmul.msk.f32.gmra.mxu2 %vm838_vm1, %v3798_v53  ;;  %v4050_v0 = vld [vmem:[#allocation2 + $0x1a0] sm:$0xff] }
 0x30f   : > { %v4419_v42 = vld [vmem:[#allocation2 + $0x164] sm:$0xff] }
 0x310   : > { %6318 = vmatmul.msk.f32.gmra.mxu3 %vm838_vm1, %v3924_v59  ;;  %v8375_v10 = vadd.f32 %v3502_v21, %v3403_v50  ;;  %v4166_v21 = vld [vmem:[#allocation2 + $0x151] sm:$0xff]  ;;  %v4051_v59 = vld [vmem:[#allocation2 + $0x1a8] sm:$0xff] }
 0x311   : > { %v3379_v52 = vpop.f32.mrf.mxu2 }
 0x313   : > { %v3505_v61 = vpop.f32.mrf.mxu3  ;;  %v3253_v28 = vpop.f32.mrf.mxu1 }
 0x314   : > { %v3278_v11 = vadd.f32 %v3253_v28, %v3152_v51  ;;  %6332 = vmatmul.msk.f32.gmra.mxu0 %vm838_vm1, %v4047_v40  ;;  %v4167_v51 = vld [vmem:[#allocation2 + $0x159] sm:$0xff]  ;;  %v4294_v28 = vld [vmem:[#allocation2 + $0x16b] sm:$0xff] }
 0x316   : > { %6284 = vmatmul.msk.f32.gmra.mxu1 %vm838_vm1, %v3672_v9  ;;  %v3404_v13 = vadd.f32 %v3379_v52, %v3278_v11  ;;  %6302 = vmatmul.msk.f32.gmra.mxu2 %vm838_vm1, %v3799_v6  ;;  %v4420_v11 = vld [vmem:[#allocation2 + $0x16c] sm:$0xff] }
 0x318   : > { %6319 = vmatmul.msk.f32.gmra.mxu3 %vm838_vm1, %v3925_v14  ;;  %v8385_v20 = vadd.f32 %v3505_v61, %v3404_v13  ;;  %v8418_v61 = vpop.f32.mrf.mxu0  ;;  %v4052_v14 = vld [vmem:[#allocation2 + $0x1b0] sm:$0x1] }
 0x319   : > { %v3382_v4 = vpop.f32.mrf.mxu2 }
 0x31b   : > { %v3508_v62 = vpop.f32.mrf.mxu3  ;;  %v3256_v22 = vpop.f32.mrf.mxu1 }
 0x31c   : > { %v3279_v44 = vadd.f32 %v3256_v22, %v3153_v5  ;;  %6333 = vmatmul.msk.f32.gmra.mxu0 %vm838_vm1, %v4048_v1  ;;  %v4168_v5 = vld [vmem:[#allocation2 + $0x161] sm:$0xff]  ;;  %v4421_v1 = vld [vmem:[#allocation2 + $0x174] sm:$0xff] }
 0x31e   : > { %6285 = vmatmul.msk.f32.gmra.mxu1 %vm838_vm1, %v3673_v30  ;;  %v3405_v48 = vadd.f32 %v3382_v4, %v3279_v44  ;;  %6303 = vmatmul.msk.f32.gmra.mxu2 %vm838_vm1, %v3800_v35  ;;  %v3649_v35 = vadd.f32 %v8370_v54, %v8308_v25  ;;  %v3650_v25 = vadd.f32 %v8382_v27, %v8318_v29 }
 0x320   : > { %6320 = vmatmul.msk.f32.gmra.mxu3 %vm838_vm1, %v3926_v58  ;;  %v8393_v55 = vadd.f32 %v3508_v62, %v3405_v48  ;;  %v4295_v62 = vld [vmem:[#allocation2 + $0x173] sm:$0xff]  ;;  %v8430_v44 = vpop.f32.mrf.mxu0 }
 0x321   : > { %v3385_v46 = vpop.f32.mrf.mxu2 }
 0x323   : > { %v3511_v17 = vpop.f32.mrf.mxu3  ;;  %v3259_v56 = vpop.f32.mrf.mxu1 }
 0x324   : > { %v3280_v43 = vadd.f32 %v3259_v56, %v3154_v19  ;;  %6334 = vmatmul.msk.f32.gmra.mxu0 %vm838_vm1, %v4049_v12  ;;  %v4169_v19 = vld [vmem:[#allocation2 + $0x169] sm:$0xff]  ;;  %v4422_v12 = vld [vmem:[#allocation2 + $0x17c] sm:$0xff] }
 0x326   : > { %6286 = vmatmul.msk.f32.gmra.mxu1 %vm838_vm1, %v3674_v31  ;;  %v3406_v8 = vadd.f32 %v3385_v46, %v3280_v43  ;;  %6359 = vmatmul.msk.f32.vlgmr.msra.gmra.mxu2 %vm838_vm1, %v4292_v23 }
 0x328   : > { %6376 = vmatmul.msk.f32.vlgmr.msra.gmra.mxu3 %vm838_vm1, %v4418_v2  ;;  %v8403_v57 = vadd.f32 %v3511_v17, %v3406_v8  ;;  %v4296_v17 = vld [vmem:[#allocation2 + $0x17b] sm:$0xff]  ;;  %v8445_v31 = vpop.f32.mrf.mxu0 }
 0x329   : > { %v3388_v18 = vpop.f32.mrf.mxu2 }
 0x32b   : > { %v3514_v7 = vpop.f32.mrf.mxu3  ;;  %v3262_v24 = vpop.f32.mrf.mxu1 }
 0x32c   : > { %v3281_v16 = vadd.f32 %v3262_v24, %v3155_v15  ;;  %6335 = vmatmul.msk.f32.gmra.mxu0 %vm838_vm1, %v4050_v0  ;;  %v4297_v15 = vld [vmem:[#allocation2 + $0x183] sm:$0xff]  ;;  %v6395_v0 = vld [vmem:[%s9046_s5 + $0x70] sm:$0xff] }
 0x32d   : > { %v4423_v24 = vld [vmem:[#allocation2 + $0x184] sm:$0xff]  ;;  %4664 = vmatpush.msra.mxu0 %v6395_v0 }
 0x32e   : > { %6342 = vmatmul.msk.f32.vlgmr.msra.gmra.mxu1 %vm838_vm1, %v4166_v21  ;;  %v3407_v45 = vadd.f32 %v3388_v18, %v3281_v16  ;;  %6360 = vmatmul.msk.f32.gmra.mxu2 %vm838_vm1, %v4293_v36  ;;  %v4170_v18 = vld [vmem:[#allocation2 + $0x171] sm:$0xff] }
 0x330   : > { %6377 = vmatmul.msk.f32.gmra.mxu3 %vm838_vm1, %v4419_v42  ;;  %v8413_v47 = vadd.f32 %v3514_v7, %v3407_v45  ;;  %v8461_v21 = vpop.f32.mrf.mxu0  ;;  %v4171_v45 = vld [vmem:[#allocation2 + $0x179] sm:$0xff]  ;;  %v4298_v42 = vld [vmem:[#allocation2 + $0x18b] sm:$0xff] }
 0x331   : > { %v3391_v37 = vpop.f32.mrf.mxu2 }
 0x333   : > { %v3517_v53 = vpop.f32.mrf.mxu3  ;;  %v3265_v50 = vpop.f32.mrf.mxu1 }
 0x334   : > { %v3282_v52 = vadd.f32 %v3265_v50, %v3156_v34  ;;  %6336 = vmatmul.msk.f32.gmra.mxu0 %vm838_vm1, %v4051_v59  ;;  %v6394_v34 = vld [vmem:[%s9046_s5 + $0x68] sm:$0xff] }
 0x335   : > { %4665 = vmatpush.msra.mxu0 %v6394_v34 }
 0x336   : > { %6343 = vmatmul.msk.f32.gmra.mxu1 %vm838_vm1, %v4167_v51  ;;  %v3408_v40 = vadd.f32 %v3391_v37, %v3282_v52  ;;  %6361 = vmatmul.msk.f32.gmra.mxu2 %vm838_vm1, %v4294_v28  ;;  %v4424_v37 = vld [vmem:[#allocation2 + $0x18c] sm:$0xff]  ;;  %v4172_v52 = vld [vmem:[#allocation2 + $0x181] sm:$0xff] }
 0x337   : > { %v4299_v28 = vld [vmem:[#allocation2 + $0x193] sm:$0xff] }
 0x338   : > { %6378 = vmatmul.msk.f32.gmra.mxu3 %vm838_vm1, %v4420_v11  ;;  %v8423_v9 = vadd.f32 %v3517_v53, %v3408_v40  ;;  %v8477_v51 = vpop.f32.mrf.mxu0  ;;  %v4425_v40 = vld [vmem:[#allocation2 + $0x194] sm:$0xff] }
 0x339   : > { %v3394_v32 = vpop.f32.mrf.mxu2 }
 0x33b   : > { %v3520_v6 = vpop.f32.mrf.mxu3  ;;  %v3268_v13 = vpop.f32.mrf.mxu1 }
 0x33c   : > { %v3283_v4 = vadd.f32 %v3268_v13, %v3157_v26  ;;  %6337 = vmatmul.msk.f32.gmra.mxu0 %vm838_vm1, %v4052_v14  ;;  %v4300_v13 = vld [vmem:[#allocation2 + $0x19b] sm:$0xff] }
 0x33d   : > { %v4426_v14 = vld [vmem:[#allocation2 + $0x19c] sm:$0xff] }
 0x33e   : > { %6344 = vmatmul.msk.f32.gmra.mxu1 %vm838_vm1, %v4168_v5  ;;  %v3409_v22 = vadd.f32 %v3394_v32, %v3283_v4  ;;  %6362 = vmatmul.msk.f32.gmra.mxu2 %vm838_vm1, %v4295_v62  ;;  %v6393_v4 = vld [vmem:[%s9046_s5 + $0x60] sm:$0xff] }
 0x33f   : > { %4666 = vmatpush.msra.mxu0 %v6393_v4 }
 0x340   : > { %6379 = vmatmul.msk.f32.gmra.mxu3 %vm838_vm1, %v4421_v1  ;;  %v8436_v63 = vadd.f32 %v3520_v6, %v3409_v22  ;;  %v4173_v6 = vld [vmem:[#allocation2 + $0x189] sm:$0xff]  ;;  %v8493_v5 = vpop.f32.mrf.mxu0 }
 0x341   : > { %v3862_v30 = vpop.f32.mrf.mxu2 }
 0x342   : > { %9049 = vst [vmem:[#allocation5_spill] sm:$0xff] %v8436_v63 }
 0x343   : > { %v3988_v48 = vpop.f32.mrf.mxu3  ;;  %v3736_v58 = vpop.f32.mrf.mxu1 }
 0x344   : > { %v3775_v46 = vadd.f32 %v3736_v58, %v3649_v35  ;;  %v4427_v35 = vld [vmem:[#allocation2 + $0x1a4] sm:$0xff] }
 0x346   : > { %6345 = vmatmul.msk.f32.gmra.mxu1 %vm838_vm1, %v4169_v19  ;;  %v3901_v56 = vadd.f32 %v3862_v30, %v3775_v46  ;;  %6363 = vmatmul.msk.f32.gmra.mxu2 %vm838_vm1, %v4296_v17  ;;  %v4301_v30 = vld [vmem:[#allocation2 + $0x1a3] sm:$0xff]  ;;  %v6392_v19 = vld [vmem:[%s9046_s5 + $0x58] sm:$0xff] }
 0x347   : > { %4667 = vmatpush.msra.mxu0 %v6392_v19 }
 0x348   : > { %6380 = vmatmul.msk.f32.gmra.mxu3 %vm838_vm1, %v4422_v12  ;;  %v8443_v43 = vadd.f32 %v3988_v48, %v3901_v56  ;;  %v8505_v48 = vpop.f32.mrf.mxu0  ;;  %v4175_v56 = vld [vmem:[#allocation2 + $0x199] sm:$0xff]  ;;  %v4302_v12 = vld [vmem:[#allocation2 + $0x1ab] sm:$0xff] }
 0x349   : > { %v3865_v23 = vpop.f32.mrf.mxu2 }
 0x34b   : > { %v3991_v54 = vpop.f32.mrf.mxu3  ;;  %v3739_v8 = vpop.f32.mrf.mxu1 }
 0x34c   : > { %v3776_v2 = vadd.f32 %v3739_v8, %v3650_v25 }
 0x34e   : > { %6346 = vmatmul.msk.f32.gmra.mxu1 %vm838_vm1, %v4170_v18  ;;  %v3902_v7 = vadd.f32 %v3865_v23, %v3776_v2  ;;  %6364 = vmatmul.msk.f32.gmra.mxu2 %vm838_vm1, %v4297_v15  ;;  %v4428_v23 = vld [vmem:[#allocation2 + $0x1ac] sm:$0xff]  ;;  %v4176_v18 = vld [vmem:[#allocation2 + $0x1a1] sm:$0xff] }
 0x34f   : > { %v4303_v15 = vld [vmem:[#allocation2 + $0x1b3] sm:$0xff] }
 0x350   : > { %6381 = vmatmul.msk.f32.gmra.mxu3 %vm838_vm1, %v4423_v24  ;;  %v8455_v16 = vadd.f32 %v3991_v54, %v3902_v7  ;;  %v8523_v8 = vpop.f32.mrf.mxu0  ;;  %v4429_v7 = vld [vmem:[#allocation2 + $0x1b4] sm:$0xff] }
 0x351   : > { %v8457_v29 = vpop.f32.mrf.mxu2  ;;  %9050 = vst [vmem:[#allocation6_spill] sm:$0xff] %v8523_v8  ;;  %v6391_v24 = vld [vmem:[%s9046_s5 + $0x50] sm:$0xff] }
 0x352   : > { %4668 = vmatpush.msra.mxu0 %v6391_v24  ;;  %v4602_v24 = vld [vmem:[%s9046_s5 + $0x20] sm:$0xff] }
 0x353   : > { %v8459_v27 = vpop.f32.mrf.mxu3  ;;  %v8463_v36 = vpop.f32.mrf.mxu1 }
 0x356   : > { %6347 = vmatmul.msk.f32.gmra.mxu1 %vm838_vm1, %v4171_v45  ;;  %6365 = vmatmul.msk.f32.gmra.mxu2 %vm838_vm1, %v4298_v42 }
 0x358   : > { %6382 = vmatmul.msk.f32.gmra.mxu3 %vm838_vm1, %v4424_v37  ;;  %v4177_v37 = vld [vmem:[#allocation2 + $0x1a9] sm:$0xff]  ;;  %v8539_v34 = vpop.f32.mrf.mxu0 }
 0x359   : > { %v8471_v53 = vpop.f32.mrf.mxu2  ;;  %9051 = vst [vmem:[#allocation7_spill] sm:$0xff] %v8539_v34 }
 0x35b   : > { %v8473_v50 = vpop.f32.mrf.mxu3  ;;  %v8475_v59 = vpop.f32.mrf.mxu1 }
 0x35e   : > { %6348 = vmatmul.msk.f32.gmra.mxu1 %vm838_vm1, %v4172_v52  ;;  %6366 = vmatmul.msk.f32.gmra.mxu2 %vm838_vm1, %v4299_v28  ;;  %v4304_v52 = vld [vmem:[#allocation2 + $0x1bb] sm:$0x1]  ;;  %v4430_v28 = vld [vmem:[#allocation2 + $0x1bc] sm:$0x1] }
 0x360   : > { %6383 = vmatmul.msk.f32.gmra.mxu3 %vm838_vm1, %v4425_v40  ;;  %v6424_v40 = vld [vmem:[%s9046_s5 + $0xb8] sm:$0xff] }
 0x361   : > { %v8482_v11 = vpop.f32.mrf.mxu2  ;;  %4836 = vmatpush.msrb.mxu2 %v6424_v40 }
 0x363   : > { %v8484_v32 = vpop.f32.mrf.mxu3  ;;  %v8486_v26 = vpop.f32.mrf.mxu1 }
 0x366   : > { %6349 = vmatmul.msk.f32.gmra.mxu1 %vm838_vm1, %v4173_v6  ;;  %6367 = vmatmul.msk.f32.gmra.mxu2 %vm838_vm1, %v4300_v13  ;;  %v6442_v6 = vld [vmem:[%s9046_s5 + $0xf8] sm:$0xff] }
 0x367   : > { %v4605_v13 = vld [vmem:[%s9046_s5 + $0x38] sm:$0xff]  ;;  %4942 = vmatpush.msrb.mxu3 %v6442_v6 }
 0x368   : > { %6384 = vmatmul.msk.f32.gmra.mxu3 %vm838_vm1, %v4426_v14  ;;  %4740 = vmatpush.msrb.mxu1 %v4605_v13  ;;  %v4600_v13 = vld [vmem:[%s9046_s5 + $0x10] sm:$0xff] }
 0x369   : > { %v8496_v62 = vpop.f32.mrf.mxu2 }
 0x36b   : > { %v8498_v22 = vpop.f32.mrf.mxu3  ;;  %v8500_v1 = vpop.f32.mrf.mxu1 }
 0x36e   : > { %6350 = vmatmul.msk.f32.gmra.mxu1 %vm838_vm1, %v4174_v49  ;;  %6368 = vmatmul.msk.f32.gmra.mxu2 %vm838_vm1, %v4301_v30  ;;  %v4178_v30 = vld [vmem:[#allocation2 + $0x1b1] sm:$0x1] }
 0x370   : > { %6385 = vmatmul.msk.f32.gmra.mxu3 %vm838_vm1, %v4427_v35  ;;  %v4114_v35 = vpop.f32.mrf.mxu0 }
 0x371   : > { %v8507_v58 = vpop.f32.mrf.mxu2 }
 0x373   : > { %v8509_v46 = vpop.f32.mrf.mxu3  ;;  %v8514_v17 = vpop.f32.mrf.mxu1 }
 0x376   : > { %6351 = vmatmul.msk.f32.gmra.mxu1 %vm838_vm1, %v4175_v56  ;;  %6369 = vmatmul.msk.f32.gmra.mxu2 %vm838_vm1, %v4302_v12 }
 0x378   : > { %6386 = vmatmul.msk.f32.gmra.mxu3 %vm838_vm1, %v4428_v23  ;;  %v4604_v23 = vld [vmem:[%s9046_s5 + $0x30] sm:$0xff] }
 0x379   : > { %v8519_v25 = vpop.f32.mrf.mxu2  ;;  %4741 = vmatpush.msrb.mxu1 %v4604_v23  ;;  %v6422_v23 = vld [vmem:[%s9046_s5 + $0xa8] sm:$0xff] }
 0x37b   : > { %v8521_v54 = vpop.f32.mrf.mxu3  ;;  %v8525_v2 = vpop.f32.mrf.mxu1 }
 0x37e   : > { %6352 = vmatmul.msk.f32.gmra.mxu1 %vm838_vm1, %v4176_v18  ;;  %6370 = vmatmul.msk.f32.gmra.mxu2 %vm838_vm1, %v4303_v15  ;;  %v4603_v18 = vld [vmem:[%s9046_s5 + $0x28] sm:$0xff] }
 0x37f   : > { %v6390_v15 = vld [vmem:[%s9046_s5 + $0x48] sm:$0xff]  ;;  %4742 = vmatpush.msrb.mxu1 %v4603_v18  ;;  %v6441_v18 = vld [vmem:[%s9046_s5 + $0xf0] sm:$0xff] }
 0x380   : > { %6387 = vmatmul.msk.f32.gmra.mxu3 %vm838_vm1, %v4429_v7  ;;  %v6423_v7 = vld [vmem:[%s9046_s5 + $0xb0] sm:$0xff]  ;;  %4669 = vmatpush.msra.mxu0 %v6390_v15  ;;  %v6389_v15 = vld [vmem:[%s9046_s5 + $0x40] sm:$0xff] }
 0x381   : > { %v8533_v0 = vpop.f32.mrf.mxu2  ;;  %4837 = vmatpush.msrb.mxu2 %v6423_v7  ;;  %4743 = vmatpush.msrb.mxu1 %v4602_v24  ;;  %v4598_v7 = vld [vmem:[%s9046_s5] sm:$0xff] }
 0x382   : > { %4943 = vmatpush.msrb.mxu3 %v6441_v18  ;;  %4670 = vmatpush.msra.mxu0 %v6389_v15  ;;  %v6421_v24 = vld [vmem:[%s9046_s5 + $0xa0] sm:$0xff]  ;;  %v6419_v15 = vld [vmem:[%s9046_s5 + $0x90] sm:$0xff] }
 0x383   : > { %v8535_v45 = vpop.f32.mrf.mxu3  ;;  %v8537_v42 = vpop.f32.mrf.mxu1  ;;  %4838 = vmatpush.msrb.mxu2 %v6422_v23 }
 0x385   : > { %4839 = vmatpush.msrb.mxu2 %v6421_v24  ;;  %v6418_v24 = vld [vmem:[%s9046_s5 + $0x88] sm:$0xff] }
 0x386   : > { %6353 = vmatmul.msk.f32.gmra.mxu1 %vm838_vm1, %v4177_v37  ;;  %6371 = vmatmul.msk.f32.gmra.mxu2 %vm838_vm1, %v4304_v52  ;;  %v4117_v37 = vpop.f32.mrf.mxu0 }
 0x388   : > { %6388 = vmatmul.msk.f32.gmra.mxu3 %vm838_vm1, %v4430_v28  ;;  %v4601_v28 = vld [vmem:[%s9046_s5 + $0x18] sm:$0xff] }
 0x389   : > { %v8553_v14 = vpop.f32.mrf.mxu2  ;;  %4744 = vmatpush.msrb.mxu1 %v4601_v28 }
 0x38b   : > { %v8555_v4 = vpop.f32.mrf.mxu3  ;;  %v8557_v49 = vpop.f32.mrf.mxu1  ;;  %4745 = vmatpush.msrb.mxu1 %v4600_v13  ;;  %v6420_v13 = vld [vmem:[%s9046_s5 + $0x98] sm:$0xff] }
 0x38c   : > { %4840 = vmatpush.msrb.mxu2 %v6420_v13  ;;  %v6417_v13 = vld [vmem:[%s9046_s5 + $0x80] sm:$0xff] }
 0x38e   : > { %6354 = vmatmul.msk.f32.gmra.mxu1 %vm838_vm1, %v4178_v30  ;;  %v4599_v30 = vld [vmem:[%s9046_s5 + $0x8] sm:$0xff]  ;;  %v4120_v23 = vpop.f32.mrf.mxu0  ;;  %4841 = vmatpush.msrb.mxu2 %v6419_v15 }
 0x38f   : > { %4746 = vmatpush.msrb.mxu1 %v4599_v30 }
 0x390   : > { %4842 = vmatpush.msrb.mxu2 %v6418_v24  ;;  %v6437_v24 = vld [vmem:[%s9046_s5 + $0xd0] sm:$0xff] }
 0x391   : > { %v8560_v19 = vpop.f32.mrf.mxu2  ;;  %4747 = vmatpush.msrb.mxu1 %v4598_v7  ;;  %v6440_v7 = vld [vmem:[%s9046_s5 + $0xe8] sm:$0xff] }
 0x392   : > { %4944 = vmatpush.msrb.mxu3 %v6440_v7  ;;  %4843 = vmatpush.msrb.mxu2 %v6417_v13  ;;  %v3651_v13 = vadd.f32 %v8395_v33, %v8331_v38  ;;  %v4154_v33 = vadd.f32 %v4117_v37, %v8455_v16 }
 0x393   : > { %v8562_v56 = vpop.f32.mrf.mxu3  ;;  %v8564_v12 = vpop.f32.mrf.mxu1 }
 0x394   : > { %9052 = vst [vmem:[#allocation8_spill] sm:$0xff] %v8562_v56 }
 0x396   : > { %v4123_v63 = vpop.f32.mrf.mxu0 }
 0x399   : > { %v8581_v52 = vpop.f32.mrf.mxu2 }
 0x39a   : > { %9053 = vst [vmem:[#allocation9_spill] sm:$0xff] %v8581_v52 }
 0x39b   : > { %v8586_v40 = vpop.f32.mrf.mxu3  ;;  %v8588_v6 = vpop.f32.mrf.mxu1 }
 0x39c   : > { %9054 = vst [vmem:[#allocation10_spill] sm:$0xff] %v8586_v40  ;;  %v4153_v40 = vadd.f32 %v4114_v35, %v8443_v43  ;;  %v8650_v43 = vld [vmem:[%s9045_s4] ss:$0 sm:$0xff]  ;;  %v6460_v35 = vld [vmem:[%s9046_s5 + $0x138] sm:$0xff] }
 0x39d   : > { %9055 = vst [vmem:[#allocation11_spill] sm:$0xff] %v8588_v6  ;;  %5048 = vmatpush.msrb.mxu0 %v6460_v35  ;;  %v3652_v35 = vadd.f32 %v8407_v41, %v8345_v3 }
 0x39f   : > { %v3778_v16 = vadd.f32 %v8475_v59, %v3652_v35 }
 0x3a1   : > { %v8611_v28 = vpop.f32.mrf.mxu2  ;;  %v3904_v41 = vadd.f32 %v8471_v53, %v3778_v16 }
 0x3a2   : > { %9056 = vst [vmem:[#allocation12_spill] sm:$0xff] %v8611_v28  ;;  %v6438_v28 = vld [vmem:[%s9046_s5 + $0xd8] sm:$0xff] }
 0x3a3   : > { %v8616_v30 = vpop.f32.mrf.mxu3  ;;  %v8618_v18 = vpop.f32.mrf.mxu1  ;;  %v4030_v53 = vadd.f32 %v8473_v50, %v3904_v41 }
 0x3a4   : > { %9057 = vst [vmem:[#allocation13_spill] sm:$0xff] %v8616_v30  ;;  %v6439_v30 = vld [vmem:[%s9046_s5 + $0xe0] sm:$0xff] }
 0x3a5   : > { %9058 = vst [vmem:[#allocation14_spill] sm:$0xff] %v8618_v18  ;;  %4945 = vmatpush.msrb.mxu3 %v6439_v30  ;;  %v6436_v30 = vld [vmem:[%s9046_s5 + $0xc8] sm:$0xff] }
 0x3a7   : > { %4946 = vmatpush.msrb.mxu3 %v6438_v28  ;;  %v3777_v28 = vadd.f32 %v8463_v36, %v3651_v13  ;;  %v6459_v36 = vld [vmem:[%s9046_s5 + $0x130] sm:$0xff] }
 0x3a8   : > { %5049 = vmatpush.msrb.mxu0 %v6459_v36 }
 0x3a9   : > { %v4366_v15 = vpop.f32.mrf.mxu2  ;;  %4947 = vmatpush.msrb.mxu3 %v6437_v24  ;;  %v3903_v56 = vadd.f32 %v8457_v29, %v3777_v28 }
 0x3ab   : > { %v4492_v18 = vpop.f32.mrf.mxu3  ;;  %v4240_v7 = vpop.f32.mrf.mxu1  ;;  %4948 = vmatpush.msrb.mxu3 %v6436_v30  ;;  %v4029_v37 = vadd.f32 %v8459_v27, %v3903_v56  ;;  %v6458_v27 = vld [vmem:[%s9046_s5 + $0x128] sm:$0xff] }
 0x3ac   : > { %v4279_v34 = vadd.f32 %v4240_v7, %v4153_v40  ;;  %v6435_v40 = vld [vmem:[%s9046_s5 + $0xc0] sm:$0xff]  ;;  %5050 = vmatpush.msrb.mxu0 %v6458_v27 }
 0x3ad   : > { %4949 = vmatpush.msrb.mxu3 %v6435_v40  ;;  %v4155_v13 = vadd.f32 %v4120_v23, %v4029_v37 }
 0x3ae   : > { %v4405_v52 = vadd.f32 %v4366_v15, %v4279_v34 }
 0x3b0   : > { %v4531_v7 = vadd.f32 %v4492_v18, %v4405_v52  ;;  %v4126_v52 = vpop.f32.mrf.mxu0 }
 0x3b1   : > { %v4369_v38 = vpop.f32.mrf.mxu2 }
 0x3b2   : > { %v4548_v34 = vadd.f32 %v8650_v43, %v4531_v7 }
 0x3b3   : > { %v4495_v15 = vpop.f32.mrf.mxu3  ;;  %v4243_v24 = vpop.f32.mrf.mxu1 }
 0x3b4   : > { %v4561_v6 = vmax.f32 %v4548_v34, 0.0  ;;  %v4280_v30 = vadd.f32 %v4243_v24, %v4154_v33  ;;  %v3653_v33 = vadd.f32 %v8418_v61, %v8355_v39 }
 0x3b6   : > { %4574 = vst.msk [vmem:[#allocation3] sm:$0xff] %vm325_vm0, %v4561_v6  ;;  %v4406_v8 = vadd.f32 %v4369_v38, %v4280_v30 }
 0x3b8   : > { %v4532_v18 = vadd.f32 %v4495_v15, %v4406_v8  ;;  %v3779_v8 = vadd.f32 %v8486_v26, %v3653_v33  ;;  %v4129_v23 = vpop.f32.mrf.mxu0  ;;  %v4156_v15 = vadd.f32 %v4123_v63, %v4030_v53  ;;  %v3654_v26 = vadd.f32 %v8430_v44, %v8365_v60 }
 0x3b9   : > { %v4372_v29 = vpop.f32.mrf.mxu2 }
 0x3ba   : > { %v4549_v40 = vadd.f32 %v8650_v43, %v4532_v18  ;;  %v3905_v30 = vadd.f32 %v8482_v11, %v3779_v8  ;;  %v3780_v63 = vadd.f32 %v8500_v1, %v3654_v26  ;;  %v3655_v1 = vadd.f32 %v8445_v31, %v8375_v10 }
 0x3bb   : > { %v4498_v28 = vpop.f32.mrf.mxu3  ;;  %v4246_v3 = vpop.f32.mrf.mxu1 }
 0x3bc   : > { %v4562_v6 = vmax.f32 %v4549_v40, 0.0  ;;  %v4281_v7 = vadd.f32 %v4246_v3, %v4155_v13  ;;  %v4031_v11 = vadd.f32 %v8484_v32, %v3905_v30  ;;  %v3906_v41 = vadd.f32 %v8496_v62, %v3780_v63  ;;  %v6457_v62 = vld [vmem:[%s9046_s5 + $0x120] sm:$0xff] }
 0x3bd   : > { %v4588_v38 = vld [vmem:[#allocation3] sm:$0xff]  ;;  %v3781_v27 = vadd.f32 %v8514_v17, %v3655_v1  ;;  %5051 = vmatpush.msrb.mxu0 %v6457_v62 }
 0x3be   : > { %4575 = vst.msk [vmem:[#allocation3 + $0x8] sm:$0xff] %vm325_vm0, %v4562_v6  ;;  %v4407_v59 = vadd.f32 %v4372_v29, %v4281_v7  ;;  %6407 = vmatmul.msk.f32.vlgmr.msrb.gmra.mxu1 %vm325_vm0, %v4588_v38  ;;  %v4157_v40 = vadd.f32 %v4126_v52, %v4031_v11  ;;  %v4032_v10 = vadd.f32 %v8498_v22, %v3906_v41 }
 0x3bf   : > { %v3656_v22 = vadd.f32 %v8461_v21, %v8385_v20 }
 0x3c0   : > { %v4533_v56 = vadd.f32 %v4498_v28, %v4407_v59  ;;  %v4132_v60 = vpop.f32.mrf.mxu0  ;;  %v4158_v53 = vadd.f32 %v4129_v23, %v4032_v10 }
 0x3c1   : > { %v4375_v34 = vpop.f32.mrf.mxu2 }
 0x3c2   : > { %v4550_v39 = vadd.f32 %v8650_v43, %v4533_v56 }
 0x3c3   : > { %v4501_v61 = vpop.f32.mrf.mxu3  ;;  %v4249_v24 = vpop.f32.mrf.mxu1 }
 0x3c4   : > { %v4563_v35 = vmax.f32 %v4550_v39, 0.0  ;;  %v4282_v36 = vadd.f32 %v4249_v24, %v4156_v15  ;;  %v3907_v39 = vadd.f32 %v8507_v58, %v3781_v27  ;;  %v6456_v58 = vld [vmem:[%s9046_s5 + $0x118] sm:$0xff] }
 0x3c5   : > { %v4606_v16 = vld [vmem:[#allocation3 + $0x1] sm:$0xff]  ;;  %5052 = vmatpush.msrb.mxu0 %v6456_v58 }
 0x3c6   : > { %v4589_v37 = vld [vmem:[#allocation3 + $0x8] sm:$0xff]  ;;  %4576 = vst.msk [vmem:[#allocation3 + $0x10] sm:$0xff] %vm325_vm0, %v4563_v35  ;;  %v4408_v50 = vadd.f32 %v4375_v34, %v4282_v36  ;;  %6397 = vmatmul.msk.f32.vlgmr.msra.gmra.mxu0 %vm325_vm0, %v4606_v16  ;;  %v4033_v20 = vadd.f32 %v8509_v46, %v3907_v39 }
 0x3c7   : > { %v4779_v18 = vld [vmem:[#allocation3 + $0x2] sm:$0xff]  ;;  %6408 = vmatmul.msk.f32.gmra.mxu1 %vm325_vm0, %v4589_v37  ;;  %v3782_v37 = vadd.f32 %v8525_v2, %v3656_v22  ;;  %v3657_v2 = vadd.f32 %v8477_v51, %v8393_v55 }
 0x3c8   : > { %6425 = vmatmul.msk.f32.vlgmr.msrb.gmra.mxu2 %vm325_vm0, %v4779_v18  ;;  %v4534_v29 = vadd.f32 %v4501_v61, %v4408_v50  ;;  %v4135_v30 = vpop.f32.mrf.mxu0  ;;  %v4159_v26 = vadd.f32 %v4132_v60, %v4033_v20  ;;  %v6473_v20 = vld [vmem:[%s9046_s5 + $0x150] sm:$0xff] }
 0x3c9   : > { %v4378_v13 = vpop.f32.mrf.mxu2  ;;  %v3783_v55 = vadd.f32 %v8537_v42, %v3657_v2  ;;  %v6514_v2 = vld [vmem:[%s9046_s5 + $0x1f8] sm:$0xff] }
 0x3ca   : > { %v4551_v28 = vadd.f32 %v8650_v43, %v4534_v29  ;;  %v3908_v29 = vadd.f32 %v8519_v25, %v3782_v37  ;;  %v6455_v25 = vld [vmem:[%s9046_s5 + $0x110] sm:$0xff]  ;;  %5366 = vmatpush.msra.mxu3 %v6514_v2 }
 0x3cb   : > { %v4504_v3 = vpop.f32.mrf.mxu3  ;;  %v4252_v44 = vpop.f32.mrf.mxu1  ;;  %5053 = vmatpush.msrb.mxu0 %v6455_v25  ;;  %v3909_v42 = vadd.f32 %v8533_v0, %v3783_v55  ;;  %v6454_v0 = vld [vmem:[%s9046_s5 + $0x108] sm:$0xff]  ;;  %v6513_v55 = vld [vmem:[%s9046_s5 + $0x1f0] sm:$0xff] }
 0x3cc   : > { %v4564_v6 = vmax.f32 %v4551_v28, 0.0  ;;  %v4283_v7 = vadd.f32 %v4252_v44, %v4157_v40  ;;  %v4034_v51 = vadd.f32 %v8521_v54, %v3908_v29  ;;  %5367 = vmatpush.msra.mxu3 %v6513_v55 }
 0x3cd   : > { %v4607_v38 = vld [vmem:[#allocation3 + $0x9] sm:$0xff]  ;;  %5054 = vmatpush.msrb.mxu0 %v6454_v0  ;;  %v6511_v0 = vld [vmem:[%s9046_s5 + $0x1e0] sm:$0xff] }
 0x3ce   : > { %v4590_v33 = vld [vmem:[#allocation3 + $0x10] sm:$0xff]  ;;  %4577 = vst.msk [vmem:[#allocation3 + $0x18] sm:$0xff] %vm325_vm0, %v4564_v6  ;;  %v4409_v32 = vadd.f32 %v4378_v13, %v4283_v7  ;;  %6398 = vmatmul.msk.f32.gmra.mxu0 %vm325_vm0, %v4607_v38  ;;  %v6478_v38 = vld [vmem:[%s9046_s5 + $0x178] sm:$0xff] }
 0x3cf   : > { %v4780_v59 = vld [vmem:[#allocation3 + $0xa] sm:$0xff]  ;;  %6409 = vmatmul.msk.f32.gmra.mxu1 %vm325_vm0, %v4590_v33  ;;  %v4160_v33 = vadd.f32 %v4135_v30, %v4034_v51  ;;  %v6474_v30 = vld [vmem:[%s9046_s5 + $0x158] sm:$0xff] }
 0x3d0   : > { %v4885_v52 = vld [vmem:[#allocation3 + $0xb] sm:$0xff]  ;;  %6426 = vmatmul.msk.f32.gmra.mxu2 %vm325_vm0, %v4780_v59  ;;  %v4535_v31 = vadd.f32 %v4504_v3, %v4409_v32  ;;  %v4138_v41 = vpop.f32.mrf.mxu0  ;;  %5154 = vmatpush.msra.mxu1 %v6478_v38 }
 0x3d1   : > { %6443 = vmatmul.msk.f32.vlgmr.msrb.gmra.mxu3 %vm325_vm0, %v4885_v52  ;;  %v4381_v8 = vpop.f32.mrf.mxu2  ;;  %v6477_v52 = vld [vmem:[%s9046_s5 + $0x170] sm:$0xff] }
 0x3d2   : > { %v4552_v56 = vadd.f32 %v8650_v43, %v4535_v31  ;;  %5155 = vmatpush.msra.mxu1 %v6477_v52  ;;  %v6491_v38 = vld [vmem:[%s9046_s5 + $0x190] sm:$0xff] }
 0x3d3   : > { %v4507_v34 = vpop.f32.mrf.mxu3  ;;  %v4255_v15 = vpop.f32.mrf.mxu1 }
 0x3d4   : > { %v4565_v61 = vmax.f32 %v4552_v56, 0.0  ;;  %v4284_v24 = vadd.f32 %v4255_v15, %v4158_v53  ;;  %v4035_v15 = vadd.f32 %v8535_v45, %v3909_v42 }
 0x3d5   : > { %v4608_v35 = vld [vmem:[#allocation3 + $0x11] sm:$0xff] }
 0x3d6   : > { %v8707_v36 = vld [vmem:[#allocation3 + $0x18] sm:$0xff]  ;;  %4578 = vst.msk [vmem:[#allocation3 + $0x20] sm:$0xff] %vm325_vm0, %v4565_v61  ;;  %v4410_v17 = vadd.f32 %v4381_v8, %v4284_v24  ;;  %6399 = vmatmul.msk.f32.gmra.mxu0 %vm325_vm0, %v4608_v35  ;;  %v3658_v8 = vadd.f32 %v8493_v5, %v8403_v57  ;;  %v6475_v57 = vld [vmem:[%s9046_s5 + $0x160] sm:$0xff] }
 0x3d7   : > { %v4781_v16 = vld [vmem:[#allocation3 + $0x12] sm:$0xff]  ;;  %6410 = vmatmul.msk.f32.gmra.mxu1 %vm325_vm0, %v8707_v36 }
 0x3d8   : > { %v4886_v23 = vld [vmem:[#allocation3 + $0x13] sm:$0xff]  ;;  %6427 = vmatmul.msk.f32.gmra.mxu2 %vm325_vm0, %v4781_v16  ;;  %v4536_v21 = vadd.f32 %v4507_v34, %v4410_v17  ;;  %v6476_v34 = vld [vmem:[%s9046_s5 + $0x168] sm:$0xff]  ;;  %v3784_v5 = vadd.f32 %v8557_v49, %v3658_v8  ;;  %v4141_v61 = vpop.f32.mrf.mxu0  ;;  %v4161_v16 = vadd.f32 %v4138_v41, %v4035_v15 }
 0x3d9   : > { %6444 = vmatmul.msk.f32.gmra.mxu3 %vm325_vm0, %v4886_v23  ;;  %v4384_v18 = vpop.f32.mrf.mxu2  ;;  %5156 = vmatpush.msra.mxu1 %v6476_v34  ;;  %v6496_v35 = vld [vmem:[%s9046_s5 + $0x1b8] sm:$0xff]  ;;  %v6495_v49 = vld [vmem:[%s9046_s5 + $0x1b0] sm:$0xff] }
 0x3da   : > { %v4553_v50 = vadd.f32 %v8650_v43, %v4536_v21  ;;  %5260 = vmatpush.msra.mxu2 %v6496_v35  ;;  %v3910_v23 = vadd.f32 %v8553_v14, %v3784_v5  ;;  %v9061_v8 = vld [vmem:[#allocation8_spill] sm:$0xff]  ;;  %v6532_v34 = vld [vmem:[%s9046_s5 + $0x238] sm:$0xff]  ;;  %v6489_v5 = vld [vmem:[%s9046_s5 + $0x180] sm:$0xff] }
 0x3db   : > { %v4510_v63 = vpop.f32.mrf.mxu3  ;;  %v4258_v11 = vpop.f32.mrf.mxu1  ;;  %5157 = vmatpush.msra.mxu1 %v6475_v57  ;;  %v9062_v35 = vld [vmem:[#allocation9_spill] sm:$0xff] }
 0x3dc   : > { %v4566_v13 = vmax.f32 %v4553_v50, 0.0  ;;  %v4285_v40 = vadd.f32 %v4258_v11, %v4159_v26  ;;  %5261 = vmatpush.msra.mxu2 %v6495_v49  ;;  %v3659_v50 = vadd.f32 %v8505_v48, %v8413_v47  ;;  %v6494_v11 = vld [vmem:[%s9046_s5 + $0x1a8] sm:$0xff]  ;;  %v6493_v48 = vld [vmem:[%s9046_s5 + $0x1a0] sm:$0xff] }
 0x3dd   : > { %v4609_v28 = vld [vmem:[#allocation3 + $0x19] sm:$0xff]  ;;  %5158 = vmatpush.msra.mxu1 %v6474_v30  ;;  %v6472_v47 = vld [vmem:[%s9046_s5 + $0x148] sm:$0xff] }
 0x3de   : > { %v8724_v3 = vld [vmem:[#allocation3 + $0x20] sm:$0xff]  ;;  %4579 = vst.msk [vmem:[#allocation3 + $0x28] sm:$0xff] %vm325_vm0, %v4566_v13  ;;  %v4411_v46 = vadd.f32 %v4384_v18, %v4285_v40  ;;  %6400 = vmatmul.msk.f32.gmra.mxu0 %vm325_vm0, %v4609_v28  ;;  %v3785_v29 = vadd.f32 %v8564_v12, %v3659_v50  ;;  %v4036_v13 = vadd.f32 %v8555_v4, %v3910_v23 }
 0x3df   : > { %v4782_v44 = vld [vmem:[#allocation3 + $0x1a] sm:$0xff]  ;;  %6411 = vmatmul.msk.f32.gmra.mxu1 %vm325_vm0, %v8724_v3  ;;  %5262 = vmatpush.msra.mxu2 %v6494_v11  ;;  %v6531_v11 = vld [vmem:[%s9046_s5 + $0x230] sm:$0xff] }
 0x3e0   : > { %v4887_v60 = vld [vmem:[#allocation3 + $0x1b] sm:$0xff]  ;;  %6428 = vmatmul.msk.f32.gmra.mxu2 %vm325_vm0, %v4782_v44  ;;  %v4537_v6 = vadd.f32 %v4510_v63, %v4411_v46  ;;  %5159 = vmatpush.msra.mxu1 %v6473_v20  ;;  %v4144_v25 = vpop.f32.mrf.mxu0  ;;  %v3911_v51 = vadd.f32 %v8560_v19, %v3785_v29 }
 0x3e1   : > { %6445 = vmatmul.msk.f32.gmra.mxu3 %vm325_vm0, %v4887_v60  ;;  %v4387_v7 = vpop.f32.mrf.mxu2  ;;  %v6471_v44 = vld [vmem:[%s9046_s5 + $0x140] sm:$0xff]  ;;  %v6492_v46 = vld [vmem:[%s9046_s5 + $0x198] sm:$0xff]  ;;  %v4162_v60 = vadd.f32 %v4141_v61, %v4036_v13  ;;  %5263 = vmatpush.msra.mxu2 %v6493_v48 }
 0x3e2   : > { %v4554_v59 = vadd.f32 %v8650_v43, %v4537_v6  ;;  %5160 = vmatpush.msra.mxu1 %v6472_v47  ;;  %v6510_v61 = vld [vmem:[%s9046_s5 + $0x1d8] sm:$0xff]  ;;  %v9065_v47 = vld [vmem:[#allocation14_spill] sm:$0xff] }
 0x3e3   : > { %v4513_v1 = vpop.f32.mrf.mxu3  ;;  %v4261_v32 = vpop.f32.mrf.mxu1  ;;  %5264 = vmatpush.msra.mxu2 %v6492_v46  ;;  %v9063_v20 = vld [vmem:[#allocation5_spill] sm:$0xff]  ;;  %v9066_v29 = vld [vmem:[#allocation10_spill] sm:$0xff] }
 0x3e4   : > { %v4567_v54 = vmax.f32 %v4554_v59, 0.0  ;;  %v4286_v62 = vadd.f32 %v4261_v32, %v4160_v33  ;;  %5161 = vmatpush.msra.mxu1 %v6471_v44  ;;  %v9059_v32 = vld [vmem:[#allocation6_spill] sm:$0xff] }
 0x3e5   : > { %v4610_v27 = vld [vmem:[#allocation3 + $0x21] sm:$0xff]  ;;  %v3660_v52 = vadd.f32 %v9059_v32, %v8423_v9  ;;  %5265 = vmatpush.msra.mxu2 %v6491_v38 }
 0x3e6   : > { %v8747_v10 = vld [vmem:[#allocation3 + $0x28] sm:$0xff]  ;;  %4580 = vst.msk [vmem:[#allocation3 + $0x30] sm:$0xff] %vm325_vm0, %v4567_v54  ;;  %v4412_v53 = vadd.f32 %v4387_v7, %v4286_v62  ;;  %6401 = vmatmul.msk.f32.gmra.mxu0 %vm325_vm0, %v4610_v27  ;;  %v6453_v54 = vld [vmem:[%s9046_s5 + $0x100] sm:$0xff] }
 0x3e7   : > { %v4783_v31 = vld [vmem:[#allocation3 + $0x22] sm:$0xff]  ;;  %6412 = vmatmul.msk.f32.gmra.mxu1 %vm325_vm0, %v8747_v10  ;;  %5055 = vmatpush.msrb.mxu0 %v6453_v54 }
 0x3e8   : > { %v4888_v56 = vld [vmem:[#allocation3 + $0x23] sm:$0xff]  ;;  %6429 = vmatmul.msk.f32.gmra.mxu2 %vm325_vm0, %v4783_v31  ;;  %v4538_v39 = vadd.f32 %v4513_v1, %v4412_v53  ;;  %v4037_v53 = vadd.f32 %v9061_v8, %v3911_v51  ;;  %v4147_v49 = vpop.f32.mrf.mxu0 }
 0x3e9   : > { %6446 = vmatmul.msk.f32.gmra.mxu3 %vm325_vm0, %v4888_v56  ;;  %v4390_v24 = vpop.f32.mrf.mxu2  ;;  %v6490_v9 = vld [vmem:[%s9046_s5 + $0x188] sm:$0xff]  ;;  %5472 = vmatpush.msra.mxu0 %v6532_v34 }
 0x3ea   : > { %v4555_v22 = vadd.f32 %v8650_v43, %v4538_v39  ;;  %v6512_v62 = vld [vmem:[%s9046_s5 + $0x1e8] sm:$0xff]  ;;  %v4163_v15 = vadd.f32 %v4144_v25, %v4037_v53  ;;  %5266 = vmatpush.msra.mxu2 %v6490_v9 }
 0x3eb   : > { %v4516_v17 = vpop.f32.mrf.mxu3  ;;  %v4264_v45 = vpop.f32.mrf.mxu1  ;;  %v9060_v27 = vld [vmem:[#allocation11_spill] sm:$0xff]  ;;  %5368 = vmatpush.msra.mxu3 %v6512_v62  ;;  %5473 = vmatpush.msra.mxu0 %v6531_v11 }
 0x3ec   : > { %v4568_v58 = vmax.f32 %v4555_v22, 0.0  ;;  %v4287_v37 = vadd.f32 %v4264_v45, %v4161_v16  ;;  %v3786_v31 = vadd.f32 %v9060_v27, %v3660_v52  ;;  %5267 = vmatpush.msra.mxu2 %v6489_v5  ;;  %v6509_v45 = vld [vmem:[%s9046_s5 + $0x1d0] sm:$0xff]  ;;  %v6530_v32 = vld [vmem:[%s9046_s5 + $0x228] sm:$0xff]  ;;  %v9068_v52 = vld [vmem:[#allocation13_spill] sm:$0xff] }
 0x3ed   : > { %v4611_v21 = vld [vmem:[#allocation3 + $0x29] sm:$0xff]  ;;  %5369 = vmatpush.msra.mxu3 %v6511_v0  ;;  %5474 = vmatpush.msra.mxu0 %v6530_v32 }
 0x3ee   : > { %v8782_v18 = vld [vmem:[#allocation3 + $0x30] sm:$0xff]  ;;  %4581 = vst.msk [vmem:[#allocation3 + $0x38] sm:$0xff] %vm325_vm0, %v4568_v58  ;;  %v4413_v63 = vadd.f32 %v4390_v24, %v4287_v37  ;;  %6402 = vmatmul.msk.f32.gmra.mxu0 %vm325_vm0, %v4611_v21  ;;  %v3912_v16 = vadd.f32 %v9062_v35, %v3786_v31  ;;  %v9064_v21 = vld [vmem:[#allocation7_spill] sm:$0xff] }
 0x3ef   : > { %v4784_v26 = vld [vmem:[#allocation3 + $0x2a] sm:$0xff]  ;;  %6413 = vmatmul.msk.f32.gmra.mxu1 %vm325_vm0, %v8782_v18  ;;  %5370 = vmatpush.msra.mxu3 %v6510_v61  ;;  %v5098_v35 = vld [vmem:[#allocation3 + $0x15] sm:$0xff] }
 0x3f0   : > { %v4889_v14 = vld [vmem:[#allocation3 + $0x2b] sm:$0xff]  ;;  %6430 = vmatmul.msk.f32.gmra.mxu2 %vm325_vm0, %v4784_v26  ;;  %v4539_v40 = vadd.f32 %v4516_v17, %v4413_v63  ;;  %v3661_v26 = vadd.f32 %v9064_v21, %v9063_v20  ;;  %v4038_v13 = vadd.f32 %v9066_v29, %v3912_v16 }
 0x3f1   : > { %6447 = vmatmul.msk.f32.gmra.mxu3 %vm325_vm0, %v4889_v14  ;;  %v4393_v28 = vpop.f32.mrf.mxu2  ;;  %v6508_v14 = vld [vmem:[%s9046_s5 + $0x1c8] sm:$0xff] }
 0x3f2   : > { %v4556_v12 = vadd.f32 %v8650_v43, %v4539_v40  ;;  %v3787_v48 = vadd.f32 %v9065_v47, %v3661_v26  ;;  %5371 = vmatpush.msra.mxu3 %v6509_v45  ;;  %v4164_v44 = vadd.f32 %v4147_v49, %v4038_v13  ;;  %v5097_v0 = vld [vmem:[#allocation3 + $0xd] sm:$0xff]  ;;  %v5099_v45 = vld [vmem:[#allocation3 + $0x1d] sm:$0xff]  ;;  %v5100_v20 = vld [vmem:[#allocation3 + $0x25] sm:$0xff] }
 0x3f3   : > { %v4519_v4 = vpop.f32.mrf.mxu3  ;;  %v4267_v41 = vpop.f32.mrf.mxu1  ;;  %v5309_v49 = vld [vmem:[#allocation3 + $0x17] sm:$0xff]  ;;  %v5205_v21 = vld [vmem:[#allocation3 + $0x26] sm:$0xff]  ;;  %v5206_v11 = vld [vmem:[#allocation3 + $0x2e] sm:$0xff] }
 0x3f4   : > { %v4569_v6 = vmax.f32 %v4556_v12, 0.0  ;;  %v4288_v7 = vadd.f32 %v4267_v41, %v4162_v60  ;;  %5372 = vmatpush.msra.mxu3 %v6508_v14  ;;  %v9067_v12 = vld [vmem:[#allocation12_spill] sm:$0xff]  ;;  %v5310_v26 = vld [vmem:[#allocation3 + $0x1f] sm:$0xff]  ;;  %v5311_v47 = vld [vmem:[#allocation3 + $0x27] sm:$0xff] }
 0x3f5   : > { %v4612_v33 = vld [vmem:[#allocation3 + $0x31] sm:$0xff] }
 0x3f6   : > { %v8820_v59 = vld [vmem:[#allocation3 + $0x38] sm:$0xff]  ;;  %4582 = vst.msk [vmem:[#allocation3 + $0x40] sm:$0xff] %vm325_vm0, %v4569_v6  ;;  %v4414_v42 = vadd.f32 %v4393_v28, %v4288_v7  ;;  %6403 = vmatmul.msk.f32.gmra.mxu0 %vm325_vm0, %v4612_v33  ;;  %v6507_v28 = vld [vmem:[%s9046_s5 + $0x1c0] sm:$0xff]  ;;  %v5101_v14 = vld [vmem:[#allocation3 + $0x2d] sm:$0xff] }
 0x3f7   : > { %v4785_v1 = vld [vmem:[#allocation3 + $0x32] sm:$0xff]  ;;  %6414 = vmatmul.msk.f32.gmra.mxu1 %vm325_vm0, %v8820_v59  ;;  %5373 = vmatpush.msra.mxu3 %v6507_v28 }
 0x3f8   : > { %v4890_v19 = vld [vmem:[#allocation3 + $0x33] sm:$0xff]  ;;  %6431 = vmatmul.msk.f32.gmra.mxu2 %vm325_vm0, %v4785_v1  ;;  %v4540_v56 = vadd.f32 %v4519_v4, %v4414_v42  ;;  %v3913_v4 = vadd.f32 %v9067_v12, %v3787_v48  ;;  %v4150_v1 = vpop.f32.mrf.mxu0  ;;  %v6526_v48 = vld [vmem:[%s9046_s5 + $0x208] sm:$0xff] }
 0x3f9   : > { %6448 = vmatmul.msk.f32.gmra.mxu3 %vm325_vm0, %v4890_v19  ;;  %v4396_v57 = vpop.f32.mrf.mxu2  ;;  %v4995_v29 = vld [vmem:[#allocation3 + $0x2c] sm:$0xff]  ;;  %v5102_v13 = vld [vmem:[#allocation3 + $0x35] sm:$0xff] }
 0x3fa   : > { %v4557_v39 = vadd.f32 %v8650_v43, %v4540_v56  ;;  %v4039_v42 = vadd.f32 %v9068_v52, %v3913_v4  ;;  %v5312_v28 = vld [vmem:[#allocation3 + $0x2f] sm:$0xff]  ;;  %v5313_v4 = vld [vmem:[#allocation3 + $0x37] sm:$0xff] }
 0x3fb   : > { %v4522_v24 = vpop.f32.mrf.mxu3  ;;  %v4270_v30 = vpop.f32.mrf.mxu1 }
 0x3fc   : > { %v4570_v22 = vmax.f32 %v4557_v39, 0.0  ;;  %v4289_v17 = vadd.f32 %v4270_v30, %v4163_v15  ;;  %v4165_v54 = vadd.f32 %v4150_v1, %v4039_v42  ;;  %v6529_v15 = vld [vmem:[%s9046_s5 + $0x220] sm:$0xff]  ;;  %v4991_v30 = vld [vmem:[#allocation3 + $0xc] sm:$0xff] }
 0x3fd   : > { %v4613_v23 = vld [vmem:[#allocation3 + $0x39] sm:$0xff]  ;;  %5475 = vmatpush.msra.mxu0 %v6529_v15 }
 0x3fe   : > { %v8858_v58 = vld [vmem:[#allocation3 + $0x40] sm:$0xff]  ;;  %4583 = vst.msk [vmem:[#allocation3 + $0x48] sm:$0xff] %vm325_vm0, %v4570_v22  ;;  %v4415_v50 = vadd.f32 %v4396_v57, %v4289_v17  ;;  %6404 = vmatmul.msk.f32.gmra.mxu0 %vm325_vm0, %v4613_v23  ;;  %v5203_v22 = vld [vmem:[#allocation3 + $0x16] sm:$0xff] }
 0x3ff   : > { %v4786_v37 = vld [vmem:[#allocation3 + $0x3a] sm:$0xff]  ;;  %6415 = vmatmul.msk.f32.gmra.mxu1 %vm325_vm0, %v8858_v58 }
 0x400   : > { %v4891_v63 = vld [vmem:[#allocation3 + $0x3b] sm:$0xff]  ;;  %6432 = vmatmul.msk.f32.gmra.mxu2 %vm325_vm0, %v4786_v37  ;;  %v4541_v40 = vadd.f32 %v4522_v24, %v4415_v50  ;;  %v6527_v50 = vld [vmem:[%s9046_s5 + $0x210] sm:$0xff] }
 0x401   : > { %6449 = vmatmul.msk.f32.gmra.mxu3 %vm325_vm0, %v4891_v63  ;;  %v4399_v46 = vpop.f32.mrf.mxu2  ;;  %v4992_v17 = vld [vmem:[#allocation3 + $0x14] sm:$0xff]  ;;  %v4993_v37 = vld [vmem:[#allocation3 + $0x1c] sm:$0xff]  ;;  %v4994_v63 = vld [vmem:[#allocation3 + $0x24] sm:$0xff] }
 0x402   : > { %v4558_v2 = vadd.f32 %v8650_v43, %v4541_v40  ;;  %v6528_v23 = vld [vmem:[%s9046_s5 + $0x218] sm:$0xff] }
 0x403   : > { %v4273_v60 = vpop.f32.mrf.mxu1  ;;  %v4525_v55 = vpop.f32.mrf.mxu3  ;;  %5476 = vmatpush.msra.mxu0 %v6528_v23  ;;  %v5207_v40 = vld [vmem:[#allocation3 + $0x36] sm:$0xff]  ;;  %v5208_v12 = vld [vmem:[#allocation3 + $0x3e] sm:$0xff] }
 0x404   : > { %v4571_v25 = vmax.f32 %v4558_v2, 0.0  ;;  %v4290_v41 = vadd.f32 %v4273_v60, %v4164_v44  ;;  %v6525_v2 = vld [vmem:[%s9046_s5 + $0x200] sm:$0xff] }
 0x405   : > { %v4614_v51 = vld [vmem:[#allocation3 + $0x41] sm:$0xff]  ;;  %v4615_v53 = vld [vmem:[#allocation3 + $0x49] sm:$0x1]  ;;  %v4788_v57 = vld [vmem:[#allocation3 + $0x4a] sm:$0x1]  ;;  %5477 = vmatpush.msra.mxu0 %v6527_v50 }
 0x406   : > { %v4597_v6 = vld [vmem:[#allocation3 + $0x48] sm:$0x1]  ;;  %4584 = vst.msk [vmem:[#allocation3 + $0x50] sm:$0xff] %vm325_vm0, %v4571_v25  ;;  %v4416_v38 = vadd.f32 %v4399_v46, %v4290_v41  ;;  %6405 = vmatmul.msk.f32.gmra.mxu0 %vm325_vm0, %v4614_v51  ;;  %v4996_v46 = vld [vmem:[#allocation3 + $0x34] sm:$0xff]  ;;  %v5103_v60 = vld [vmem:[#allocation3 + $0x3d] sm:$0xff] }
 0x407   : > { %v4787_v7 = vld [vmem:[#allocation3 + $0x42] sm:$0xff]  ;;  %6416 = vmatmul.msk.f32.gmra.mxu1 %vm325_vm0, %v4597_v6  ;;  %5478 = vmatpush.msra.mxu0 %v6526_v48 }
 0x408   : > { %v4892_v33 = vld [vmem:[#allocation3 + $0x43] sm:$0xff]  ;;  %6433 = vmatmul.msk.f32.gmra.mxu2 %vm325_vm0, %v4787_v7  ;;  %v4542_v19 = vadd.f32 %v4525_v55, %v4416_v38 }
 0x409   : > { %6450 = vmatmul.msk.f32.gmra.mxu3 %vm325_vm0, %v4892_v33  ;;  %v4402_v8 = vpop.f32.mrf.mxu2  ;;  %5479 = vmatpush.msra.mxu0 %v6525_v2  ;;  %v4997_v55 = vld [vmem:[#allocation3 + $0x3c] sm:$0xff]  ;;  %v5104_v51 = vld [vmem:[#allocation3 + $0x45] sm:$0xff] }
 0x40a   : > { %v4559_v9 = vadd.f32 %v8650_v43, %v4542_v19  ;;  %v5209_v6 = vld [vmem:[#allocation3 + $0x46] sm:$0xff] }
 0x40b   : > { %v4276_v62 = vpop.f32.mrf.mxu1  ;;  %v4528_v5 = vpop.f32.mrf.mxu3  ;;  %v5314_v7 = vld [vmem:[#allocation3 + $0x3f] sm:$0xff] }
 0x40c   : > { %v4572_v27 = vmax.f32 %v4559_v9, 0.0  ;;  %v4291_v31 = vadd.f32 %v4276_v62, %v4165_v54  ;;  %v4998_v42 = vld [vmem:[#allocation3 + $0x44] sm:$0xff] }
 0x40d   : > { %v4893_v56 = vld [vmem:[#allocation3 + $0x4b] sm:$0xff]  ;;  %v4894_v16 = vld [vmem:[#allocation3 + $0x53] sm:$0x1] }
 0x40e   : > { %4585 = vst.msk [vmem:[#allocation3 + $0x58] sm:$0xff] %vm325_vm0, %v4572_v27  ;;  %v4417_v34 = vadd.f32 %v4402_v8, %v4291_v31  ;;  %6406 = vmatmul.msk.f32.gmra.mxu0 %vm325_vm0, %v4615_v53  ;;  %v5105_v19 = vld [vmem:[#allocation3 + $0x4d] sm:$0xff] }
 0x40f   : > { %6479 = vmatmul.msk.f32.vlgmr.msra.gmra.mxu1 %vm325_vm0, %v5097_v0  ;;  %v5210_v54 = vld [vmem:[#allocation3 + $0x4e] sm:$0xff] }
 0x410   : > { %6434 = vmatmul.msk.f32.gmra.mxu2 %vm325_vm0, %v4788_v57  ;;  %v4543_v39 = vadd.f32 %v4528_v5, %v4417_v34  ;;  %v5315_v9 = vld [vmem:[#allocation3 + $0x47] sm:$0xff]  ;;  %v5106_v57 = vld [vmem:[#allocation3 + $0x55] sm:$0x1] }
 0x411   : > { %6451 = vmatmul.msk.f32.gmra.mxu3 %vm325_vm0, %v4893_v56  ;;  %v4999_v34 = vld [vmem:[#allocation3 + $0x4c] sm:$0xff] }
 0x412   : > { %v4560_v61 = vadd.f32 %v8650_v43, %v4543_v39  ;;  %v5204_v43 = vld [vmem:[#allocation3 + $0x1e] sm:$0xff]  ;;  %v5316_v15 = vld [vmem:[#allocation3 + $0x4f] sm:$0xff] }
 0x414   : > { %v4573_v24 = vmax.f32 %v4560_v61, 0.0 }
 0x415   : > { %v5211_v5 = vld [vmem:[#allocation3 + $0x56] sm:$0xff] }
 0x416   : > { %4587 = vst.msk [vmem:[#allocation3 + $0x60] sm:$0x1] %vm4586_vm3, %v4573_v24  ;;  %6461 = vmatmul.msk.f32.vlgmr.msrb.gmra.mxu0 %vm325_vm0, %v4991_v30 }
 0x417   : > { %6480 = vmatmul.msk.f32.gmra.mxu1 %vm325_vm0, %v5098_v35 }
 0x418   : > { %6497 = vmatmul.msk.f32.vlgmr.msra.gmra.mxu2 %vm325_vm0, %v5203_v22 }
 0x419   : > { %6452 = vmatmul.msk.f32.gmra.mxu3 %vm325_vm0, %v4894_v16 }
 0x41e   : > { %6462 = vmatmul.msk.f32.gmra.mxu0 %vm325_vm0, %v4992_v17  ;;  %v5000_v17 = vld [vmem:[#allocation3 + $0x54] sm:$0x1] }
 0x41f   : > { %6481 = vmatmul.msk.f32.gmra.mxu1 %vm325_vm0, %v5099_v45  ;;  %v5212_v45 = vld [vmem:[#allocation3 + $0x5e] sm:$0x1] }
 0x420   : > { %6498 = vmatmul.msk.f32.gmra.mxu2 %vm325_vm0, %v5204_v43  ;;  %v5317_v43 = vld [vmem:[#allocation3 + $0x57] sm:$0xff] }
 0x421   : > { %6515 = vmatmul.msk.f32.vlgmr.msra.gmra.mxu3 %vm325_vm0, %v5309_v49 }
 0x426   : > { %6463 = vmatmul.msk.f32.gmra.mxu0 %vm325_vm0, %v4993_v37 }
 0x427   : > { %6482 = vmatmul.msk.f32.gmra.mxu1 %vm325_vm0, %v5100_v20 }
 0x428   : > { %6499 = vmatmul.msk.f32.gmra.mxu2 %vm325_vm0, %v5205_v21 }
 0x429   : > { %6516 = vmatmul.msk.f32.gmra.mxu3 %vm325_vm0, %v5310_v26 }
 0x42e   : > { %6464 = vmatmul.msk.f32.gmra.mxu0 %vm325_vm0, %v4994_v63  ;;  %v5318_v63 = vld [vmem:[#allocation3 + $0x5f] sm:$0x1] }
 0x42f   : > { %6483 = vmatmul.msk.f32.gmra.mxu1 %vm325_vm0, %v5101_v14 }
 0x430   : > { %6500 = vmatmul.msk.f32.gmra.mxu2 %vm325_vm0, %v5206_v11 }
 0x431   : > { %6517 = vmatmul.msk.f32.gmra.mxu3 %vm325_vm0, %v5311_v47 }
 0x436   : > { %6465 = vmatmul.msk.f32.gmra.mxu0 %vm325_vm0, %v4995_v29 }
 0x437   : > { %6484 = vmatmul.msk.f32.gmra.mxu1 %vm325_vm0, %v5102_v13 }
 0x438   : > { %6501 = vmatmul.msk.f32.gmra.mxu2 %vm325_vm0, %v5207_v40 }
 0x439   : > { %6518 = vmatmul.msk.f32.gmra.mxu3 %vm325_vm0, %v5312_v28 }
 0x43b   : > { %v4749_v44 = vpop.f32.mrf.mxu1 }
 0x43e   : > { %6466 = vmatmul.msk.f32.gmra.mxu0 %vm325_vm0, %v4996_v46 }
 0x43f   : > { %6485 = vmatmul.msk.f32.gmra.mxu1 %vm325_vm0, %v5103_v60 }
 0x440   : > { %6502 = vmatmul.msk.f32.gmra.mxu2 %vm325_vm0, %v5208_v12 }
 0x441   : > { %6519 = vmatmul.msk.f32.gmra.mxu3 %vm325_vm0, %v5313_v4 }
 0x443   : > { %v4672_v25 = vpop.f32.mrf.mxu0 }
 0x444   : > { %v4752_v41 = vpop.f32.mrf.mxu1  ;;  %v4750_v38 = vadd.f32 %v4749_v44, %v4672_v25 }
 0x446   : > { %6467 = vmatmul.msk.f32.gmra.mxu0 %vm325_vm0, %v4997_v55 }
 0x447   : > { %6486 = vmatmul.msk.f32.gmra.mxu1 %vm325_vm0, %v5104_v51 }
 0x448   : > { %6503 = vmatmul.msk.f32.gmra.mxu2 %vm325_vm0, %v5209_v6 }
 0x449   : > { %6520 = vmatmul.msk.f32.gmra.mxu3 %vm325_vm0, %v5314_v7 }
 0x44b   : > { %v4845_v33 = vpop.f32.mrf.mxu2  ;;  %v4675_v32 = vpop.f32.mrf.mxu0 }
 0x44c   : > { %v4875_v1 = vadd.f32 %v4845_v33, %v4750_v38  ;;  %v4755_v52 = vpop.f32.mrf.mxu1  ;;  %v4753_v62 = vadd.f32 %v4752_v41, %v4675_v32 }
 0x44e   : > { %6468 = vmatmul.msk.f32.gmra.mxu0 %vm325_vm0, %v4998_v42 }
 0x44f   : > { %6487 = vmatmul.msk.f32.gmra.mxu1 %vm325_vm0, %v5105_v19 }
 0x450   : > { %6504 = vmatmul.msk.f32.gmra.mxu2 %vm325_vm0, %v5210_v54 }
 0x451   : > { %6521 = vmatmul.msk.f32.gmra.mxu3 %vm325_vm0, %v5315_v9 }
 0x453   : > { %v4848_v27 = vpop.f32.mrf.mxu2  ;;  %v4678_v56 = vpop.f32.mrf.mxu0 }
 0x454   : > { %v4951_v31 = vpop.f32.mrf.mxu3  ;;  %v4876_v8 = vadd.f32 %v4848_v27, %v4753_v62  ;;  %v4758_v0 = vpop.f32.mrf.mxu1  ;;  %v4756_v39 = vadd.f32 %v4755_v52, %v4678_v56 }
 0x455   : > { %v8945_v53 = vadd.f32 %v4951_v31, %v4875_v1 }
 0x456   : > { %6469 = vmatmul.msk.f32.gmra.mxu0 %vm325_vm0, %v4999_v34 }
 0x457   : > { %6488 = vmatmul.msk.f32.gmra.mxu1 %vm325_vm0, %v5106_v57 }
 0x458   : > { %6505 = vmatmul.msk.f32.gmra.mxu2 %vm325_vm0, %v5211_v5  ;;  %v5421_v5 = vld [vmem:[#allocation3 + $0x48] sm:$0xff] }
 0x459   : > { %6522 = vmatmul.msk.f32.gmra.mxu3 %vm325_vm0, %v5316_v15 }
 0x45b   : > { %v4851_v61 = vpop.f32.mrf.mxu2  ;;  %v4681_v16 = vpop.f32.mrf.mxu0 }
 0x45c   : > { %v4954_v24 = vpop.f32.mrf.mxu3  ;;  %v4877_v30 = vadd.f32 %v4851_v61, %v4756_v39  ;;  %v4761_v22 = vpop.f32.mrf.mxu1  ;;  %v4759_v49 = vadd.f32 %v4758_v0, %v4681_v16  ;;  %v5423_v16 = vld [vmem:[#allocation3 + $0x58] sm:$0xff] }
 0x45d   : > { %v8951_v35 = vadd.f32 %v4954_v24, %v4876_v8  ;;  %v5422_v24 = vld [vmem:[#allocation3 + $0x50] sm:$0xff] }
 0x45e   : > { %6470 = vmatmul.msk.f32.gmra.mxu0 %vm325_vm0, %v5000_v17 }
 0x460   : > { %6506 = vmatmul.msk.f32.gmra.mxu2 %vm325_vm0, %v5212_v45  ;;  %v5424_v45 = vld [vmem:[#allocation3 + $0x60] sm:$0x1] }
 0x461   : > { %6523 = vmatmul.msk.f32.gmra.mxu3 %vm325_vm0, %v5317_v43 }
 0x463   : > { %v4854_v23 = vpop.f32.mrf.mxu2  ;;  %v4684_v26 = vpop.f32.mrf.mxu0 }
 0x464   : > { %v4957_v37 = vpop.f32.mrf.mxu3  ;;  %v4878_v20 = vadd.f32 %v4854_v23, %v4759_v49  ;;  %v4764_v50 = vpop.f32.mrf.mxu1  ;;  %v4762_v14 = vadd.f32 %v4761_v22, %v4684_v26 }
 0x465   : > { %v4983_v21 = vadd.f32 %v4957_v37, %v4877_v30 }
 0x466   : > { %6533 = vmatmul.msk.f32.vlgmr.msra.gmra.mxu0 %vm325_vm0, %v8707_v36 }
 0x469   : > { %6524 = vmatmul.msk.f32.gmra.mxu3 %vm325_vm0, %v5318_v63 }
 0x46b   : > { %v4857_v11 = vpop.f32.mrf.mxu2  ;;  %v4687_v13 = vpop.f32.mrf.mxu0 }
 0x46c   : > { %v4960_v47 = vpop.f32.mrf.mxu3  ;;  %v4879_v48 = vadd.f32 %v4857_v11, %v4762_v14  ;;  %v4767_v40 = vpop.f32.mrf.mxu1  ;;  %v4765_v28 = vadd.f32 %v4764_v50, %v4687_v13 }
 0x46d   : > { %v4984_v29 = vadd.f32 %v4960_v47, %v4878_v20 }
 0x46e   : > { %6534 = vmatmul.msk.f32.gmra.mxu0 %vm325_vm0, %v8724_v3 }
 0x473   : > { %v4860_v44 = vpop.f32.mrf.mxu2  ;;  %v4690_v12 = vpop.f32.mrf.mxu0 }
 0x474   : > { %v4963_v2 = vpop.f32.mrf.mxu3  ;;  %v4880_v46 = vadd.f32 %v4860_v44, %v4765_v28  ;;  %v4768_v4 = vadd.f32 %v4767_v40, %v4690_v12  ;;  %v4770_v36 = vpop.f32.mrf.mxu1 }
 0x475   : > { %v4985_v60 = vadd.f32 %v4963_v2, %v4879_v48 }
 0x476   : > { %6535 = vmatmul.msk.f32.gmra.mxu0 %vm325_vm0, %v8747_v10 }
 0x47b   : > { %v4863_v25 = vpop.f32.mrf.mxu2  ;;  %v4693_v6 = vpop.f32.mrf.mxu0 }
 0x47c   : > { %v4966_v41 = vpop.f32.mrf.mxu3  ;;  %v4881_v55 = vadd.f32 %v4863_v25, %v4768_v4  ;;  %v4771_v7 = vadd.f32 %v4770_v36, %v4693_v6  ;;  %v4773_v3 = vpop.f32.mrf.mxu1  ;;  %v8990_v4 = vld [vmem:[%s9047_s6] ss:$0 sm:$0xff] }
 0x47d   : > { %v4986_v51 = vadd.f32 %v4966_v41, %v4880_v46 }
 0x47e   : > { %6536 = vmatmul.msk.f32.gmra.mxu0 %vm325_vm0, %v8782_v18 }
 0x483   : > { %v4866_v38 = vpop.f32.mrf.mxu2  ;;  %v4696_v52 = vpop.f32.mrf.mxu0 }
 0x484   : > { %v4969_v33 = vpop.f32.mrf.mxu3  ;;  %v4882_v1 = vadd.f32 %v4866_v38, %v4771_v7  ;;  %v4774_v42 = vadd.f32 %v4773_v3, %v4696_v52  ;;  %v4776_v54 = vpop.f32.mrf.mxu1 }
 0x485   : > { %v4987_v32 = vadd.f32 %v4969_v33, %v4881_v55 }
 0x486   : > { %6537 = vmatmul.msk.f32.gmra.mxu0 %vm325_vm0, %v8820_v59 }
 0x48b   : > { %v4869_v10 = vpop.f32.mrf.mxu2  ;;  %v4699_v27 = vpop.f32.mrf.mxu0 }
 0x48c   : > { %v4972_v19 = vpop.f32.mrf.mxu3  ;;  %v4883_v9 = vadd.f32 %v4869_v10, %v4774_v42  ;;  %v4777_v31 = vadd.f32 %v4776_v54, %v4699_v27  ;;  %v5163_v20 = vpop.f32.mrf.mxu1 }
 0x48d   : > { %v4988_v62 = vadd.f32 %v4972_v19, %v4882_v1 }
 0x48e   : > { %6538 = vmatmul.msk.f32.gmra.mxu0 %vm325_vm0, %v8858_v58 }
 0x493   : > { %v4872_v18 = vpop.f32.mrf.mxu2  ;;  %v5057_v34 = vpop.f32.mrf.mxu0 }
 0x494   : > { %v4975_v8 = vpop.f32.mrf.mxu3  ;;  %v4884_v56 = vadd.f32 %v4872_v18, %v4777_v31  ;;  %v5087_v57 = vadd.f32 %v5057_v34, %v8945_v53  ;;  %v5166_v11 = vpop.f32.mrf.mxu1 }
 0x495   : > { %v4989_v0 = vadd.f32 %v4975_v8, %v4883_v9 }
 0x496   : > { %6539 = vmatmul.msk.f32.gmra.mxu0 %vm325_vm0, %v5421_v5  ;;  %v5193_v28 = vadd.f32 %v5163_v20, %v5087_v57 }
 0x49b   : > { %v5060_v39 = vpop.f32.mrf.mxu0  ;;  %v5269_v26 = vpop.f32.mrf.mxu2 }
 0x49c   : > { %v4978_v59 = vpop.f32.mrf.mxu3  ;;  %v5088_v61 = vadd.f32 %v5060_v39, %v8951_v35  ;;  %v5169_v44 = vpop.f32.mrf.mxu1  ;;  %v5299_v46 = vadd.f32 %v5269_v26, %v5193_v28 }
 0x49d   : > { %v4990_v15 = vadd.f32 %v4978_v59, %v4884_v56 }
 0x49e   : > { %6540 = vmatmul.msk.f32.gmra.mxu0 %vm325_vm0, %v5422_v24  ;;  %v5194_v41 = vadd.f32 %v5166_v11, %v5088_v61 }
 0x4a3   : > { %v5063_v30 = vpop.f32.mrf.mxu0  ;;  %v5272_v48 = vpop.f32.mrf.mxu2 }
 0x4a4   : > { %v5089_v58 = vadd.f32 %v5063_v30, %v4983_v21  ;;  %v5375_v63 = vpop.f32.mrf.mxu3  ;;  %v5172_v6 = vpop.f32.mrf.mxu1 }
 0x4a5   : > { %v5405_v12 = vadd.f32 %v5375_v63, %v5299_v46 }
 0x4a6   : > { %6541 = vmatmul.msk.f32.gmra.mxu0 %vm325_vm0, %v5423_v16  ;;  %v5195_v52 = vadd.f32 %v5169_v44, %v5089_v58 }
 0x4ab   : > { %v5066_v22 = vpop.f32.mrf.mxu0  ;;  %v5275_v2 = vpop.f32.mrf.mxu2 }
 0x4ac   : > { %v5090_v17 = vadd.f32 %v5066_v22, %v4984_v29  ;;  %v5378_v29 = vpop.f32.mrf.mxu3  ;;  %v5301_v10 = vadd.f32 %v5275_v2, %v5195_v52  ;;  %v5175_v9 = vpop.f32.mrf.mxu1 }
 0x4ae   : > { %6542 = vmatmul.msk.f32.gmra.mxu0 %vm325_vm0, %v5424_v45  ;;  %v5196_v56 = vadd.f32 %v5172_v6, %v5090_v17 }
 0x4b3   : > { %v5069_v53 = vpop.f32.mrf.mxu0  ;;  %v5278_v3 = vpop.f32.mrf.mxu2 }
 0x4b4   : > { %v8975_v43 = vadd.f32 %v5069_v53, %v4985_v60  ;;  %v5381_v60 = vpop.f32.mrf.mxu3  ;;  %v5302_v34 = vadd.f32 %v5278_v3, %v5196_v56 }
 0x4b6   : > { %v5197_v24 = vadd.f32 %v5175_v9, %v8975_v43 }
 0x4bb   : > { %v5072_v49 = vpop.f32.mrf.mxu0  ;;  %v5281_v27 = vpop.f32.mrf.mxu2 }
 0x4bc   : > { %v8977_v23 = vadd.f32 %v5072_v49, %v4986_v51  ;;  %v5300_v51 = vadd.f32 %v5272_v48, %v5194_v41  ;;  %v5384_v33 = vpop.f32.mrf.mxu3  ;;  %v5303_v16 = vadd.f32 %v5281_v27, %v5197_v24 }
 0x4bd   : > { %v5408_v5 = vadd.f32 %v5384_v33, %v5302_v34 }
 0x4be   : > { %v5406_v38 = vadd.f32 %v5378_v29, %v5300_v51 }
 0x4c3   : > { %v5075_v35 = vpop.f32.mrf.mxu0  ;;  %v5284_v61 = vpop.f32.mrf.mxu2 }
 0x4c4   : > { %v8979_v37 = vadd.f32 %v5075_v35, %v4987_v32  ;;  %v5387_v8 = vpop.f32.mrf.mxu3 }
 0x4c5   : > { %v5409_v45 = vadd.f32 %v5387_v8, %v5303_v16 }
 0x4cb   : > { %v5078_v21 = vpop.f32.mrf.mxu0  ;;  %v5287_v43 = vpop.f32.mrf.mxu2 }
 0x4cc   : > { %v8981_v50 = vadd.f32 %v5078_v21, %v4988_v62  ;;  %v5407_v62 = vadd.f32 %v5381_v60, %v5301_v10  ;;  %v5390_v58 = vpop.f32.mrf.mxu3 }
 0x4d3   : > { %v5081_v14 = vpop.f32.mrf.mxu0  ;;  %v5290_v60 = vpop.f32.mrf.mxu2 }
 0x4d4   : > { %v8983_v47 = vadd.f32 %v5081_v14, %v4989_v0  ;;  %v5393_v14 = vpop.f32.mrf.mxu3 }
 0x4db   : > { %v5084_v13 = vpop.f32.mrf.mxu0  ;;  %v5293_v33 = vpop.f32.mrf.mxu2 }
 0x4dc   : > { %v8985_v40 = vadd.f32 %v5084_v13, %v4990_v15  ;;  %v5178_v15 = vpop.f32.mrf.mxu1 }
 0x4dd   : > { %v5198_v20 = vadd.f32 %v5178_v15, %v8977_v23 }
 0x4df   : > { %v5304_v21 = vadd.f32 %v5284_v61, %v5198_v20 }
 0x4e1   : > { %v5410_v11 = vadd.f32 %v5390_v58, %v5304_v21 }
 0x4e3   : > { %v5481_v36 = vpop.f32.mrf.mxu0 }
 0x4e4   : > { %v5511_v25 = vadd.f32 %v5481_v36, %v5405_v12  ;;  %v5181_v35 = vpop.f32.mrf.mxu1 }
 0x4e5   : > { %v5199_v28 = vadd.f32 %v5181_v35, %v8979_v37 }
 0x4e6   : > { %v5525_v55 = vadd.f32 %v8990_v4, %v5511_v25  ;;  %v5396_v25 = vpop.f32.mrf.mxu3 }
 0x4e7   : > { %v5305_v2 = vadd.f32 %v5287_v43, %v5199_v28 }
 0x4e8   : > { %v5535_v7 = vmax.f32 %v5525_v55, 0.0 }
 0x4e9   : > { %v5411_v36 = vadd.f32 %v5393_v14, %v5305_v2 }
 0x4ea   : > { %5545 = vst.msk [vmem:[#allocation4] sm:$0xff] %vm325_vm0, %v5535_v7 }
 0x4eb   : > { %v5484_v1 = vpop.f32.mrf.mxu0 }
 0x4ec   : > { %v5512_v32 = vadd.f32 %v5484_v1, %v5406_v38  ;;  %v5184_v23 = vpop.f32.mrf.mxu1 }
 0x4ed   : > { %v5200_v51 = vadd.f32 %v5184_v23, %v8981_v50 }
 0x4ee   : > { %v5526_v42 = vadd.f32 %v8990_v4, %v5512_v32  ;;  %v5399_v52 = vpop.f32.mrf.mxu3 }
 0x4ef   : > { %v5306_v37 = vadd.f32 %v5290_v60, %v5200_v51 }
 0x4f0   : > { %v5536_v19 = vmax.f32 %v5526_v42, 0.0 }
 0x4f1   : > { %v5555_v54 = vld [vmem:[#allocation4] sm:$0x7f]  ;;  %v5412_v38 = vadd.f32 %v5396_v25, %v5306_v37 }
 0x4f2   : > { %5557 = vst.msk [vmem:[%s8999_s9] sm:$0x7f] %vm5556_vm4, %v5555_v54 }
 0x4f3   : > { %5546 = vst.msk [vmem:[#allocation4 + $0x8] sm:$0xff] %vm325_vm0, %v5536_v19  ;;  %v5487_v31 = vpop.f32.mrf.mxu0 }
 0x4f4   : > { %v5513_v18 = vadd.f32 %v5487_v31, %v5407_v62  ;;  %v5187_v3 = vpop.f32.mrf.mxu1 }
 0x4f5   : > { %v5201_v42 = vadd.f32 %v5187_v3, %v8983_v47 }
 0x4f6   : > { %v5527_v0 = vadd.f32 %v8990_v4, %v5513_v18  ;;  %v5296_v18 = vpop.f32.mrf.mxu2  ;;  %v5402_v56 = vpop.f32.mrf.mxu3 }
 0x4f7   : > { %v5307_v19 = vadd.f32 %v5293_v33, %v5201_v42 }
 0x4f8   : > { %v5537_v57 = vmax.f32 %v5527_v0, 0.0 }
 0x4f9   : > { %v5413_v9 = vadd.f32 %v5399_v52, %v5307_v19 }
 0x4fa   : > { %5547 = vst.msk [vmem:[#allocation4 + $0x10] sm:$0xff] %vm325_vm0, %v5537_v57 }
 0x4fb   : > { %v5490_v59 = vpop.f32.mrf.mxu0 }
 0x4fc   : > { %v5514_v39 = vadd.f32 %v5490_v59, %v5408_v5  ;;  %v5190_v31 = vpop.f32.mrf.mxu1 }
 0x4fd   : > { %v5202_v8 = vadd.f32 %v5190_v31, %v8985_v40 }
 0x4fe   : > { %v5528_v30 = vadd.f32 %v8990_v4, %v5514_v39 }
 0x4ff   : > { %v5308_v0 = vadd.f32 %v5296_v18, %v5202_v8 }
 0x500   : > { %v5538_v22 = vmax.f32 %v5528_v30, 0.0 }
 0x501   : > { %v5558_v17 = vld [vmem:[#allocation4 + $0xb] sm:$0x7f]  ;;  %v5414_v57 = vadd.f32 %v5402_v56, %v5308_v0 }
 0x502   : > { %5559 = vst.msk [vmem:[%s8999_s9 + $0x7] sm:$0x7f] %vm5556_vm4, %v5558_v17 }
 0x503   : > { %5548 = vst.msk [vmem:[#allocation4 + $0x18] sm:$0xff] %vm325_vm0, %v5538_v22  ;;  %v5493_v53 = vpop.f32.mrf.mxu0 }
 0x504   : > { %v5515_v49 = vadd.f32 %v5493_v53, %v5409_v45 }
 0x506   : > { %v5529_v26 = vadd.f32 %v8990_v4, %v5515_v49 }
 0x508   : > { %v5539_v63 = vmax.f32 %v5529_v26, 0.0 }
 0x50a   : > { %v5560_v48 = vld [vmem:[#allocation4 + $0x16] sm:$0x7f]  ;;  %5549 = vst.msk [vmem:[#allocation4 + $0x20] sm:$0xff] %vm325_vm0, %v5539_v63 }
 0x50b   : > { %5561 = vst.msk [vmem:[%s8999_s9 + $0xe] sm:$0x7f] %vm5556_vm4, %v5560_v48  ;;  %v5496_v29 = vpop.f32.mrf.mxu0 }
 0x50c   : > { %v5516_v13 = vadd.f32 %v5496_v29, %v5410_v11 }
 0x50e   : > { %v5530_v44 = vadd.f32 %v8990_v4, %v5516_v13 }
 0x510   : > { %v5540_v46 = vmax.f32 %v5530_v44, 0.0 }
 0x511   : > { %v5562_v12 = vld [vmem:[#allocation4 + $0x21] sm:$0x7f] }
 0x512   : > { %5563 = vst.msk [vmem:[%s8999_s9 + $0x15] sm:$0x7f] %vm5556_vm4, %v5562_v12 }
 0x513   : > { %5550 = vst.msk [vmem:[#allocation4 + $0x28] sm:$0xff] %vm325_vm0, %v5540_v46  ;;  %v5499_v41 = vpop.f32.mrf.mxu0 }
 0x514   : > { %v5517_v55 = vadd.f32 %v5499_v41, %v5411_v36 }
 0x516   : > { %v5531_v6 = vadd.f32 %v8990_v4, %v5517_v55 }
 0x518   : > { %v5541_v7 = vmax.f32 %v5531_v6, 0.0 }
 0x51a   : > { %5551 = vst.msk [vmem:[#allocation4 + $0x30] sm:$0xff] %vm325_vm0, %v5541_v7 }
 0x51b   : > { %v5502_v1 = vpop.f32.mrf.mxu0 }
 0x51c   : > { %v5518_v32 = vadd.f32 %v5502_v1, %v5412_v38 }
 0x51e   : > { %v5532_v10 = vadd.f32 %v8990_v4, %v5518_v32 }
 0x520   : > { %v5542_v54 = vmax.f32 %v5532_v10, 0.0 }
 0x521   : > { %v5564_v50 = vld [vmem:[#allocation4 + $0x2c] sm:$0x7f] }
 0x522   : > { %5565 = vst.msk [vmem:[%s8999_s9 + $0x1c] sm:$0x7f] %vm5556_vm4, %v5564_v50 }
 0x523   : > { %5552 = vst.msk [vmem:[#allocation4 + $0x38] sm:$0xff] %vm325_vm0, %v5542_v54  ;;  %v5505_v62 = vpop.f32.mrf.mxu0 }
 0x524   : > { %v5519_v27 = vadd.f32 %v5505_v62, %v5413_v9 }
 0x526   : > { %v5533_v47 = vadd.f32 %v8990_v4, %v5519_v27 }
 0x528   : > { %v5543_v34 = vmax.f32 %v5533_v47, 0.0 }
 0x52a   : > { %v5566_v5 = vld [vmem:[#allocation4 + $0x37] sm:$0x7f]  ;;  %5553 = vst.msk [vmem:[#allocation4 + $0x40] sm:$0xff] %vm325_vm0, %v5543_v34 }
 0x52b   : > { %5567 = vst.msk [vmem:[%s8999_s9 + $0x23] sm:$0x7f] %vm5556_vm4, %v5566_v5  ;;  %v5508_v59 = vpop.f32.mrf.mxu0 }
 0x52c   : > { %v5520_v15 = vadd.f32 %v5508_v59, %v5414_v57 }
 0x52e   : > { %v5534_v39 = vadd.f32 %v8990_v4, %v5520_v15 }
 0x530   : > { %v5544_v61 = vmax.f32 %v5534_v39, 0.0 }
 0x532   : > { %5554 = vst.msk [vmem:[#allocation4 + $0x48] sm:$0x1] %vm4586_vm3, %v5544_v61 }
 0x539   : > { %v5568_v24 = vld [vmem:[#allocation4 + $0x42] sm:$0x7f] }
 0x53a   : > { %5569 = vst.msk [vmem:[%s8999_s9 + $0x2a] sm:$0x7f] %vm5556_vm4, %v5568_v24 }
 0x53b PF: > { %s17_s24 = sadd.s32 1, %s6591_s24  }
 0x53c   : > { %p14_p4 = scmp.ge.s32.totalorder %s17_s24, 4  }
 0x53e   :  { %16 = sbr.rel (!%p14_p4) target bundleno = 1 (0x1), region = 110 }

// kernel: dqn_forward.3
= control target key start
LH: loop header
LB: loop body
LE: loop exit
PB: predicated region body
PF: predicated region fallthrough
CT: control target
= control target key end

     0   :  { %s15474_s0 = inlined_call_operand.vmem [shape: f32[2,3136], index: 0, kind: input, shape index: {}]   ;;  %s15475_s1 = inlined_call_operand.vmem [shape: bf16[3136,512], index: 1, kind: input, shape index: {}]   ;;  %s15476_s2 = inlined_call_operand.vmem [shape: f32[1,512], index: 2, kind: input, shape index: {}]   ;;  %s15477_s3 = inlined_call_operand.vmem [shape: f32[512,4], index: 3, kind: input, shape index: {}]   ;;  %s15478_s4 = inlined_call_operand.vmem [shape: f32[1,4], index: 4, kind: input, shape index: {}]   ;;  %s15479_s5 = inlined_call_operand.hbm [shape: f32[2,4], index: 5, kind: output, shape index: {}]  }
   0x1   :  { %v6421_v0 = vld [vmem:[%s15475_s1 + $0xe0] sm:$0xf]  ;;  %v9477_v1 = vld [vmem:[%s15475_s1 + $0xec] sm:$0xf0] }
   0x2   :  { %v6549_v2 = vld [vmem:[%s15475_s1 + $0x1e0] sm:$0xf]  ;;  %v6422_v3 = vor.u32 %v9477_v1, %v6421_v0  ;;  %v9509_v4 = vld [vmem:[%s15475_s1 + $0x1ec] sm:$0xf0] }
   0x3   :  { %v6677_v5 = vld [vmem:[%s15475_s1 + $0x2e0] sm:$0xf]  ;;  %v9541_v6 = vld [vmem:[%s15475_s1 + $0x2ec] sm:$0xf0]  ;;  %v6550_v7 = vor.u32 %v9509_v4, %v6549_v2 }
   0x4   :  { %v6678_v8 = vor.u32 %v9541_v6, %v6677_v5  ;;  %v6805_v9 = vld [vmem:[%s15475_s1 + $0x3e0] sm:$0xf]  ;;  %v9573_v10 = vld [vmem:[%s15475_s1 + $0x3ec] sm:$0xf0]  ;;  %4837 = vmatpush.bf16.msra.mxu0 %v6422_v3 }
   0x5   :  { %v6405_v11 = vld [vmem:[%s15475_s1 + $0xc0] sm:$0xf]  ;;  %v6806_v12 = vor.u32 %v9573_v10, %v6805_v9  ;;  %v9473_v13 = vld [vmem:[%s15475_s1 + $0xcc] sm:$0xf0]  ;;  %4850 = vmatpush.bf16.msra.mxu1 %v6550_v7 }
   0x6   :  { %v6533_v14 = vld [vmem:[%s15475_s1 + $0x1c0] sm:$0xf]  ;;  %v9505_v15 = vld [vmem:[%s15475_s1 + $0x1cc] sm:$0xf0]  ;;  %4863 = vmatpush.bf16.msra.mxu2 %v6678_v8  ;;  %v6406_v16 = vor.u32 %v9473_v13, %v6405_v11 }
   0x7   :  { %v6534_v17 = vor.u32 %v9505_v15, %v6533_v14  ;;  %v6661_v18 = vld [vmem:[%s15475_s1 + $0x2c0] sm:$0xf]  ;;  %v9537_v19 = vld [vmem:[%s15475_s1 + $0x2cc] sm:$0xf0]  ;;  %4876 = vmatpush.bf16.msra.mxu3 %v6806_v12 }
   0x8   :  { %v6789_v20 = vld [vmem:[%s15475_s1 + $0x3c0] sm:$0xf]  ;;  %v6662_v21 = vor.u32 %v9537_v19, %v6661_v18  ;;  %v9569_v22 = vld [vmem:[%s15475_s1 + $0x3cc] sm:$0xf0]  ;;  %4838 = vmatpush.bf16.msra.mxu0 %v6406_v16 }
   0x9   :  { %v6389_v23 = vld [vmem:[%s15475_s1 + $0xa0] sm:$0xf]  ;;  %v9469_v24 = vld [vmem:[%s15475_s1 + $0xac] sm:$0xf0]  ;;  %v6790_v25 = vor.u32 %v9569_v22, %v6789_v20  ;;  %4851 = vmatpush.bf16.msra.mxu1 %v6534_v17 }
   0xa   :  { %v6517_v26 = vld [vmem:[%s15475_s1 + $0x1a0] sm:$0xf]  ;;  %v9501_v27 = vld [vmem:[%s15475_s1 + $0x1ac] sm:$0xf0]  ;;  %v6390_v29 = vor.u32 %v9469_v24, %v6389_v23  ;;  %4864 = vmatpush.bf16.msra.mxu2 %v6662_v21 }
   0xb   :  { %v6645_v28 = vld [vmem:[%s15475_s1 + $0x2a0] sm:$0xf]  ;;  %v9533_v30 = vld [vmem:[%s15475_s1 + $0x2ac] sm:$0xf0]  ;;  %v6518_v33 = vor.u32 %v9501_v27, %v6517_v26  ;;  %4877 = vmatpush.bf16.msra.mxu3 %v6790_v25 }
   0xc   :  { %v6773_v31 = vld [vmem:[%s15475_s1 + $0x3a0] sm:$0xf]  ;;  %v9565_v32 = vld [vmem:[%s15475_s1 + $0x3ac] sm:$0xf0]  ;;  %v6646_v34 = vor.u32 %v9533_v30, %v6645_v28  ;;  %4839 = vmatpush.bf16.msra.mxu0 %v6390_v29 }
   0xd   :  { %v6373_v35 = vld [vmem:[%s15475_s1 + $0x80] sm:$0xf]  ;;  %v9465_v36 = vld [vmem:[%s15475_s1 + $0x8c] sm:$0xf0]  ;;  %v6774_v38 = vor.u32 %v9565_v32, %v6773_v31  ;;  %4852 = vmatpush.bf16.msra.mxu1 %v6518_v33 }
   0xe   :  { %v6501_v37 = vld [vmem:[%s15475_s1 + $0x180] sm:$0xf]  ;;  %v9497_v39 = vld [vmem:[%s15475_s1 + $0x18c] sm:$0xf0]  ;;  %v6374_v44 = vor.u32 %v9465_v36, %v6373_v35  ;;  %4865 = vmatpush.bf16.msra.mxu2 %v6646_v34 }
   0xf   :  { %v6629_v40 = vld [vmem:[%s15475_s1 + $0x280] sm:$0xf]  ;;  %v9529_v41 = vld [vmem:[%s15475_s1 + $0x28c] sm:$0xf0]  ;;  %v6502_v45 = vor.u32 %v9497_v39, %v6501_v37  ;;  %4878 = vmatpush.bf16.msra.mxu3 %v6774_v38 }
  0x10   :  { %v6757_v42 = vld [vmem:[%s15475_s1 + $0x380] sm:$0xf]  ;;  %v9561_v43 = vld [vmem:[%s15475_s1 + $0x38c] sm:$0xf0]  ;;  %v6630_v46 = vor.u32 %v9529_v41, %v6629_v40  ;;  %4840 = vmatpush.bf16.msra.mxu0 %v6374_v44 }
  0x11   :  { %v6357_v47 = vld [vmem:[%s15475_s1 + $0x60] sm:$0xf]  ;;  %v9461_v48 = vld [vmem:[%s15475_s1 + $0x6c] sm:$0xf0]  ;;  %v6758_v50 = vor.u32 %v9561_v43, %v6757_v42  ;;  %4853 = vmatpush.bf16.msra.mxu1 %v6502_v45 }
  0x12   :  { %v6485_v49 = vld [vmem:[%s15475_s1 + $0x160] sm:$0xf]  ;;  %v9493_v51 = vld [vmem:[%s15475_s1 + $0x16c] sm:$0xf0]  ;;  %v6358_v56 = vor.u32 %v9461_v48, %v6357_v47  ;;  %4866 = vmatpush.bf16.msra.mxu2 %v6630_v46 }
  0x13   :  { %v6613_v52 = vld [vmem:[%s15475_s1 + $0x260] sm:$0xf]  ;;  %v9525_v53 = vld [vmem:[%s15475_s1 + $0x26c] sm:$0xf0]  ;;  %v6486_v57 = vor.u32 %v9493_v51, %v6485_v49  ;;  %4879 = vmatpush.bf16.msra.mxu3 %v6758_v50 }
  0x14   :  { %v6741_v54 = vld [vmem:[%s15475_s1 + $0x360] sm:$0xf]  ;;  %v9557_v55 = vld [vmem:[%s15475_s1 + $0x36c] sm:$0xf0]  ;;  %v6614_v58 = vor.u32 %v9525_v53, %v6613_v52  ;;  %4841 = vmatpush.bf16.msra.mxu0 %v6358_v56 }
  0x15   :  { %v6341_v59 = vld [vmem:[%s15475_s1 + $0x40] sm:$0xf]  ;;  %v9457_v60 = vld [vmem:[%s15475_s1 + $0x4c] sm:$0xf0]  ;;  %v6742_v62 = vor.u32 %v9557_v55, %v6741_v54  ;;  %4854 = vmatpush.bf16.msra.mxu1 %v6486_v57 }
  0x16   :  { %v6469_v61 = vld [vmem:[%s15475_s1 + $0x140] sm:$0xf]  ;;  %v9489_v63 = vld [vmem:[%s15475_s1 + $0x14c] sm:$0xf0]  ;;  %v6342_v4 = vor.u32 %v9457_v60, %v6341_v59  ;;  %4867 = vmatpush.bf16.msra.mxu2 %v6614_v58 }
  0x17   :  { %v6597_v0 = vld [vmem:[%s15475_s1 + $0x240] sm:$0xf]  ;;  %v9521_v1 = vld [vmem:[%s15475_s1 + $0x24c] sm:$0xf0]  ;;  %v6470_v5 = vor.u32 %v9489_v63, %v6469_v61  ;;  %4880 = vmatpush.bf16.msra.mxu3 %v6742_v62 }
  0x18   :  { %v6725_v2 = vld [vmem:[%s15475_s1 + $0x340] sm:$0xf]  ;;  %v9553_v3 = vld [vmem:[%s15475_s1 + $0x34c] sm:$0xf0]  ;;  %v6598_v6 = vor.u32 %v9521_v1, %v6597_v0  ;;  %4842 = vmatpush.bf16.msra.mxu0 %v6342_v4 }
  0x19   :  { %v6325_v7 = vld [vmem:[%s15475_s1 + $0x20] sm:$0xf]  ;;  %v9453_v8 = vld [vmem:[%s15475_s1 + $0x2c] sm:$0xf0]  ;;  %v6726_v10 = vor.u32 %v9553_v3, %v6725_v2  ;;  %4855 = vmatpush.bf16.msra.mxu1 %v6470_v5 }
  0x1a   :  { %v6453_v9 = vld [vmem:[%s15475_s1 + $0x120] sm:$0xf]  ;;  %v9485_v11 = vld [vmem:[%s15475_s1 + $0x12c] sm:$0xf0]  ;;  %v6326_v16 = vor.u32 %v9453_v8, %v6325_v7  ;;  %4868 = vmatpush.bf16.msra.mxu2 %v6598_v6 }
  0x1b   :  { %v6581_v12 = vld [vmem:[%s15475_s1 + $0x220] sm:$0xf]  ;;  %v9517_v13 = vld [vmem:[%s15475_s1 + $0x22c] sm:$0xf0]  ;;  %v6454_v19 = vor.u32 %v9485_v11, %v6453_v9  ;;  %4881 = vmatpush.bf16.msra.mxu3 %v6726_v10 }
  0x1c   :  { %v6709_v14 = vld [vmem:[%s15475_s1 + $0x320] sm:$0xf]  ;;  %v9549_v15 = vld [vmem:[%s15475_s1 + $0x32c] sm:$0xf0]  ;;  %v6582_v20 = vor.u32 %v9517_v13, %v6581_v12  ;;  %4843 = vmatpush.bf16.msra.mxu0 %v6326_v16 }
  0x1d   :  { %v6309_v17 = vld [vmem:[%s15475_s1] sm:$0xf]  ;;  %v9449_v18 = vld [vmem:[%s15475_s1 + $0xc] sm:$0xf0]  ;;  %v6710_v24 = vor.u32 %v9549_v15, %v6709_v14  ;;  %4856 = vmatpush.bf16.msra.mxu1 %v6454_v19 }
  0x1e   :  { %v6437_v21 = vld [vmem:[%s15475_s1 + $0x100] sm:$0xf]  ;;  %v9481_v22 = vld [vmem:[%s15475_s1 + $0x10c] sm:$0xf0]  ;;  %v6310_v31 = vor.u32 %v9449_v18, %v6309_v17  ;;  %4869 = vmatpush.bf16.msra.mxu2 %v6582_v20 }
  0x1f   :  { %v6565_v23 = vld [vmem:[%s15475_s1 + $0x200] sm:$0xf]  ;;  %v9513_v25 = vld [vmem:[%s15475_s1 + $0x20c] sm:$0xf0]  ;;  %v6438_v35 = vor.u32 %v9481_v22, %v6437_v21  ;;  %4882 = vmatpush.bf16.msra.mxu3 %v6710_v24 }
  0x20   :  { %v6693_v26 = vld [vmem:[%s15475_s1 + $0x300] sm:$0xf]  ;;  %v9545_v27 = vld [vmem:[%s15475_s1 + $0x30c] sm:$0xf0]  ;;  %v6566_v36 = vor.u32 %v9513_v25, %v6565_v23  ;;  %4844 = vmatpush.bf16.msra.mxu0 %v6310_v31 }
  0x21   :  { %v6933_v28 = vld [vmem:[%s15475_s1 + $0x4e0] sm:$0xf]  ;;  %v9605_v29 = vld [vmem:[%s15475_s1 + $0x4ec] sm:$0xf0]  ;;  %v6694_v39 = vor.u32 %v9545_v27, %v6693_v26  ;;  %4857 = vmatpush.bf16.msra.mxu1 %v6438_v35 }
  0x22   :  { %v7061_v30 = vld [vmem:[%s15475_s1 + $0x5e0] sm:$0xf]  ;;  %v9637_v32 = vld [vmem:[%s15475_s1 + $0x5ec] sm:$0xf0]  ;;  %v6934_v40 = vor.u32 %v9605_v29, %v6933_v28  ;;  %4870 = vmatpush.bf16.msra.mxu2 %v6566_v36 }
  0x23   :  { %v7189_v33 = vld [vmem:[%s15475_s1 + $0x6e0] sm:$0xf]  ;;  %v9669_v34 = vld [vmem:[%s15475_s1 + $0x6ec] sm:$0xf0]  ;;  %v7062_v41 = vor.u32 %v9637_v32, %v7061_v30  ;;  %4883 = vmatpush.bf16.msra.mxu3 %v6694_v39 }
  0x24   :  { %v7317_v37 = vld [vmem:[%s15475_s1 + $0x7e0] sm:$0xf]  ;;  %v9701_v38 = vld [vmem:[%s15475_s1 + $0x7ec] sm:$0xf0]  ;;  %v7190_v42 = vor.u32 %v9669_v34, %v7189_v33  ;;  %4889 = vmatpush.bf16.msrb.mxu0 %v6934_v40 }
  0x25   :  { %v6917_v43 = vld [vmem:[%s15475_s1 + $0x4c0] sm:$0xf]  ;;  %v9601_v44 = vld [vmem:[%s15475_s1 + $0x4cc] sm:$0xf0]  ;;  %v7318_v46 = vor.u32 %v9701_v38, %v7317_v37  ;;  %4902 = vmatpush.bf16.msrb.mxu1 %v7062_v41 }
  0x26   :  { %v7045_v45 = vld [vmem:[%s15475_s1 + $0x5c0] sm:$0xf]  ;;  %v9633_v47 = vld [vmem:[%s15475_s1 + $0x5cc] sm:$0xf0]  ;;  %v6918_v52 = vor.u32 %v9601_v44, %v6917_v43  ;;  %4915 = vmatpush.bf16.msrb.mxu2 %v7190_v42 }
  0x27   :  { %v7173_v48 = vld [vmem:[%s15475_s1 + $0x6c0] sm:$0xf]  ;;  %v9665_v49 = vld [vmem:[%s15475_s1 + $0x6cc] sm:$0xf0]  ;;  %v7046_v55 = vor.u32 %v9633_v47, %v7045_v45  ;;  %4928 = vmatpush.bf16.msrb.mxu3 %v7318_v46 }
  0x28   :  { %v7301_v50 = vld [vmem:[%s15475_s1 + $0x7c0] sm:$0xf]  ;;  %v9697_v51 = vld [vmem:[%s15475_s1 + $0x7cc] sm:$0xf0]  ;;  %v7174_v56 = vor.u32 %v9665_v49, %v7173_v48  ;;  %4890 = vmatpush.bf16.msrb.mxu0 %v6918_v52 }
  0x29   :  { %v6901_v53 = vld [vmem:[%s15475_s1 + $0x4a0] sm:$0xf]  ;;  %v9597_v54 = vld [vmem:[%s15475_s1 + $0x4ac] sm:$0xf0]  ;;  %v7302_v60 = vor.u32 %v9697_v51, %v7301_v50  ;;  %4903 = vmatpush.bf16.msrb.mxu1 %v7046_v55 }
  0x2a   :  { %v7029_v57 = vld [vmem:[%s15475_s1 + $0x5a0] sm:$0xf]  ;;  %v9629_v58 = vld [vmem:[%s15475_s1 + $0x5ac] sm:$0xf0]  ;;  %v6902_v1 = vor.u32 %v9597_v54, %v6901_v53  ;;  %4916 = vmatpush.bf16.msrb.mxu2 %v7174_v56 }
  0x2b   :  { %v22_v59 = vld [vmem:[%s15474_s0] sm:$0xff]  ;;  %v9661_v62 = vld [vmem:[%s15475_s1 + $0x6ac] sm:$0xf0]  ;;  %v7030_v3 = vor.u32 %v9629_v58, %v7029_v57  ;;  %4929 = vmatpush.bf16.msrb.mxu3 %v7302_v60  ;;  %v23_v57 = vld [vmem:[%s15474_s0 + $0x8] sm:$0xff] }
  0x2c   :  { %v7157_v61 = vld [vmem:[%s15475_s1 + $0x6a0] sm:$0xf]  ;;  %36 = vst [vmem:[#allocation1] ss:$4 sm:$0xff] %v22_v59  ;;  %v9693_v0 = vld [vmem:[%s15475_s1 + $0x7ac] sm:$0xf0]  ;;  %4891 = vmatpush.bf16.msrb.mxu0 %v6902_v1 }
  0x2d   :  { %v7285_v63 = vld [vmem:[%s15475_s1 + $0x7a0] sm:$0xf]  ;;  %v7158_v4 = vor.u32 %v9661_v62, %v7157_v61  ;;  %v9593_v5 = vld [vmem:[%s15475_s1 + $0x48c] sm:$0xf0]  ;;  %4904 = vmatpush.bf16.msrb.mxu1 %v7030_v3  ;;  %38 = vst [vmem:[#allocation1 + $0x20] ss:$4 sm:$0xff] %v23_v57 }
  0x2e   :  { %v6885_v2 = vld [vmem:[%s15475_s1 + $0x480] sm:$0xf]  ;;  %v9625_v7 = vld [vmem:[%s15475_s1 + $0x58c] sm:$0xf0]  ;;  %v7286_v8 = vor.u32 %v9693_v0, %v7285_v63 }
  0x2f   :  { %v7013_v6 = vld [vmem:[%s15475_s1 + $0x580] sm:$0xf]  ;;  %v9657_v10 = vld [vmem:[%s15475_s1 + $0x68c] sm:$0xf0]  ;;  %v6886_v15 = vor.u32 %v9593_v5, %v6885_v2  ;;  %4917 = vmatpush.bf16.msrb.mxu2 %v7158_v4 }
  0x30   :  { %v7141_v9 = vld [vmem:[%s15475_s1 + $0x680] sm:$0xf]  ;;  %v9689_v12 = vld [vmem:[%s15475_s1 + $0x78c] sm:$0xf0]  ;;  %v7014_v21 = vor.u32 %v9625_v7, %v7013_v6  ;;  %4930 = vmatpush.bf16.msrb.mxu3 %v7286_v8 }
  0x31   :  { %v7269_v11 = vld [vmem:[%s15475_s1 + $0x780] sm:$0xf]  ;;  %v9589_v14 = vld [vmem:[%s15475_s1 + $0x46c] sm:$0xf0]  ;;  %v7142_v22 = vor.u32 %v9657_v10, %v7141_v9  ;;  %4892 = vmatpush.bf16.msrb.mxu0 %v6886_v15 }
  0x32   :  { %v6869_v13 = vld [vmem:[%s15475_s1 + $0x460] sm:$0xf]  ;;  %v9621_v17 = vld [vmem:[%s15475_s1 + $0x56c] sm:$0xf0]  ;;  %v7270_v25 = vor.u32 %v9689_v12, %v7269_v11  ;;  %4905 = vmatpush.bf16.msrb.mxu1 %v7014_v21 }
  0x33   :  { %v6997_v16 = vld [vmem:[%s15475_s1 + $0x560] sm:$0xf]  ;;  %v9653_v19 = vld [vmem:[%s15475_s1 + $0x66c] sm:$0xf0]  ;;  %v6870_v34 = vor.u32 %v9589_v14, %v6869_v13  ;;  %4918 = vmatpush.bf16.msrb.mxu2 %v7142_v22 }
  0x34   :  { %v7125_v18 = vld [vmem:[%s15475_s1 + $0x660] sm:$0xf]  ;;  %v24_v20 = vld [vmem:[%s15474_s0 + $0x10] sm:$0xff]  ;;  %v42_v28 = vld.sshfl [vmem:[#allocation1 + $0x18] sm:$0xff pattern:$0x73625140]  ;;  %v6998_v35 = vor.u32 %v9621_v17, %v6997_v16  ;;  %4931 = vmatpush.bf16.msrb.mxu3 %v7270_v25 }
  0x35   :  { %v41_v23 = vld.sshfl [vmem:[#allocation1 + $0x10] sm:$0xff pattern:$0x73625140]  ;;  %v39_v24 = vld.sshfl [vmem:[#allocation1] sm:$0xff pattern:$0x73625140]  ;;  %v10615_v32 = vpack.c.bf16 %v42_v28, %v42_v28  ;;  %v7126_v36 = vor.u32 %v9653_v19, %v7125_v18  ;;  %4893 = vmatpush.bf16.msrb.mxu0 %v6870_v34 }
  0x36   :  { %v10605_v26 = vpack.c.bf16 %v41_v23, %v41_v23  ;;  %v10607_v27 = vpack.c.bf16 %v39_v24, %v39_v24  ;;  %v40_v29 = vld.sshfl [vmem:[#allocation1 + $0x8] sm:$0xff pattern:$0x73625140]  ;;  %v7253_v30 = vld [vmem:[%s15475_s1 + $0x760] sm:$0xf]  ;;  %4906 = vmatpush.bf16.msrb.mxu1 %v6998_v35 }
  0x37   :  { %v9685_v31 = vld [vmem:[%s15475_s1 + $0x76c] sm:$0xf0]  ;;  %47 = vst [vmem:[#allocation1] ss:$4 sm:$0xff] %v24_v20  ;;  %v10617_v33 = vpack.c.bf16 %v40_v29, %v40_v29  ;;  %v6853_v37 = vld [vmem:[%s15475_s1 + $0x440] sm:$0xf]  ;;  %4884 = vmatmul.bf16.vlgmr.msra.gmra.mxu3 %v10615_v32  ;;  %4919 = vmatpush.bf16.msrb.mxu2 %v7126_v36 }
  0x38   :  { %4871 = vmatmul.bf16.vlgmr.msra.gmra.mxu2 %v10605_v26  ;;  %v9585_v38 = vld [vmem:[%s15475_s1 + $0x44c] sm:$0xf0]  ;;  %v6981_v39 = vld [vmem:[%s15475_s1 + $0x540] sm:$0xf]  ;;  %v7254_v40 = vor.u32 %v9685_v31, %v7253_v30  ;;  %4845 = vmatmul.bf16.vlgmr.msra.gmra.mxu0 %v10607_v27  ;;  %v25_v20 = vld [vmem:[%s15474_s0 + $0x18] sm:$0xff] }
  0x39   :  { %v9617_v41 = vld [vmem:[%s15475_s1 + $0x54c] sm:$0xf0]  ;;  %v7109_v42 = vld [vmem:[%s15475_s1 + $0x640] sm:$0xf]  ;;  %4858 = vmatmul.bf16.vlgmr.msra.gmra.mxu1 %v10617_v33  ;;  %v6854_v46 = vor.u32 %v9585_v38, %v6853_v37 }
  0x3a   :  { %v9649_v43 = vld [vmem:[%s15475_s1 + $0x64c] sm:$0xf0]  ;;  %v7237_v44 = vld [vmem:[%s15475_s1 + $0x740] sm:$0xf]  ;;  %v6982_v49 = vor.u32 %v9617_v41, %v6981_v39  ;;  %4932 = vmatpush.bf16.msrb.mxu3 %v7254_v40 }
  0x3b   :  { %v9681_v45 = vld [vmem:[%s15475_s1 + $0x74c] sm:$0xf0]  ;;  %v6837_v47 = vld [vmem:[%s15475_s1 + $0x420] sm:$0xf]  ;;  %v7110_v50 = vor.u32 %v9649_v43, %v7109_v42  ;;  %4894 = vmatpush.bf16.msrb.mxu0 %v6854_v46 }
  0x3c   :  { %v9581_v48 = vld [vmem:[%s15475_s1 + $0x42c] sm:$0xf0]  ;;  %v6965_v51 = vld [vmem:[%s15475_s1 + $0x520] sm:$0xf]  ;;  %v7238_v54 = vor.u32 %v9681_v45, %v7237_v44  ;;  %4907 = vmatpush.bf16.msrb.mxu1 %v6982_v49 }
  0x3d   :  { %v9613_v52 = vld [vmem:[%s15475_s1 + $0x52c] sm:$0xf0]  ;;  %v7093_v53 = vld [vmem:[%s15475_s1 + $0x620] sm:$0xf]  ;;  %v6838_v60 = vor.u32 %v9581_v48, %v6837_v47  ;;  %4920 = vmatpush.bf16.msrb.mxu2 %v7110_v50 }
  0x3e   :  { %v9645_v55 = vld [vmem:[%s15475_s1 + $0x62c] sm:$0xf0]  ;;  %v7221_v56 = vld [vmem:[%s15475_s1 + $0x720] sm:$0xf]  ;;  %v6966_v0 = vor.u32 %v9613_v52, %v6965_v51  ;;  %4933 = vmatpush.bf16.msrb.mxu3 %v7238_v54 }
  0x3f   :  { %v9677_v58 = vld [vmem:[%s15475_s1 + $0x72c] sm:$0xf0]  ;;  %v6821_v59 = vld [vmem:[%s15475_s1 + $0x400] sm:$0xf]  ;;  %v7094_v1 = vor.u32 %v9645_v55, %v7093_v53  ;;  %4895 = vmatpush.bf16.msrb.mxu0 %v6838_v60 }
  0x40   :  { %v9577_v61 = vld [vmem:[%s15475_s1 + $0x40c] sm:$0xf0]  ;;  %v6949_v62 = vld [vmem:[%s15475_s1 + $0x500] sm:$0xf]  ;;  %v7222_v5 = vor.u32 %v9677_v58, %v7221_v56  ;;  %4908 = vmatpush.bf16.msrb.mxu1 %v6966_v0 }
  0x41   :  { %v9609_v63 = vld [vmem:[%s15475_s1 + $0x50c] sm:$0xf0]  ;;  %v7077_v2 = vld [vmem:[%s15475_s1 + $0x600] sm:$0xf]  ;;  %v6822_v12 = vor.u32 %v9577_v61, %v6821_v59  ;;  %4921 = vmatpush.bf16.msrb.mxu2 %v7094_v1 }
  0x42   :  { %v9641_v3 = vld [vmem:[%s15475_s1 + $0x60c] sm:$0xf0]  ;;  %v7205_v4 = vld [vmem:[%s15475_s1 + $0x700] sm:$0xf]  ;;  %v6950_v16 = vor.u32 %v9609_v63, %v6949_v62  ;;  %4934 = vmatpush.bf16.msrb.mxu3 %v7222_v5 }
  0x43   :  { %v9673_v6 = vld [vmem:[%s15475_s1 + $0x70c] sm:$0xf0]  ;;  %v7445_v7 = vld [vmem:[%s15475_s1 + $0x8e0] sm:$0xf]  ;;  %v7078_v17 = vor.u32 %v9641_v3, %v7077_v2  ;;  %4896 = vmatpush.bf16.msrb.mxu0 %v6822_v12 }
  0x44   :  { %v9733_v8 = vld [vmem:[%s15475_s1 + $0x8ec] sm:$0xf0]  ;;  %v7573_v9 = vld [vmem:[%s15475_s1 + $0x9e0] sm:$0xf]  ;;  %v7206_v21 = vor.u32 %v9673_v6, %v7205_v4  ;;  %4909 = vmatpush.bf16.msrb.mxu1 %v6950_v16 }
  0x45   :  { %v9765_v10 = vld [vmem:[%s15475_s1 + $0x9ec] sm:$0xf0]  ;;  %v7701_v11 = vld [vmem:[%s15475_s1 + $0xae0] sm:$0xf]  ;;  %v7446_v22 = vor.u32 %v9733_v8, %v7445_v7  ;;  %4922 = vmatpush.bf16.msrb.mxu2 %v7078_v17 }
  0x46   :  { %v9797_v13 = vld [vmem:[%s15475_s1 + $0xaec] sm:$0xf0]  ;;  %v7829_v14 = vld [vmem:[%s15475_s1 + $0xbe0] sm:$0xf]  ;;  %v7574_v29 = vor.u32 %v9765_v10, %v7573_v9  ;;  %4935 = vmatpush.bf16.msrb.mxu3 %v7206_v21 }
  0x47   :  { %v9829_v15 = vld [vmem:[%s15475_s1 + $0xbec] sm:$0xf0]  ;;  %v7429_v18 = vld [vmem:[%s15475_s1 + $0x8c0] sm:$0xf]  ;;  %v7702_v30 = vor.u32 %v9797_v13, %v7701_v11  ;;  %4941 = vmatpush.bf16.msra.mxu0 %v7446_v22 }
  0x48   :  { %v9729_v19 = vld [vmem:[%s15475_s1 + $0x8cc] sm:$0xf0]  ;;  %v7557_v23 = vld [vmem:[%s15475_s1 + $0x9c0] sm:$0xf]  ;;  %v7830_v35 = vor.u32 %v9829_v15, %v7829_v14  ;;  %4954 = vmatpush.bf16.msra.mxu1 %v7574_v29 }
  0x49   :  { %v9761_v24 = vld [vmem:[%s15475_s1 + $0x9cc] sm:$0xf0]  ;;  %v43_v28 = vld.sshfl [vmem:[#allocation1 + $0x20] sm:$0xff pattern:$0x73625140]  ;;  %v7430_v43 = vor.u32 %v9729_v19, %v7429_v18  ;;  %4967 = vmatpush.bf16.msra.mxu2 %v7702_v30 }
  0x4a   :  { %v45_v25 = vld.sshfl [vmem:[#allocation1 + $0x30] sm:$0xff pattern:$0x73625140]  ;;  %v46_v31 = vld.sshfl [vmem:[#allocation1 + $0x38] sm:$0xff pattern:$0x73625140]  ;;  %v10751_v41 = vpack.c.bf16 %v43_v28, %v43_v28  ;;  %v7558_v45 = vor.u32 %v9761_v24, %v7557_v23  ;;  %4980 = vmatpush.bf16.msra.mxu3 %v7830_v35 }
  0x4b   :  { %v44_v34 = vld.sshfl [vmem:[#allocation1 + $0x28] sm:$0xff pattern:$0x73625140]  ;;  %v7685_v36 = vld [vmem:[%s15475_s1 + $0xac0] sm:$0xf]  ;;  %v10743_v38 = vpack.c.bf16 %v45_v25, %v45_v25  ;;  %v10753_v42 = vpack.c.bf16 %v46_v31, %v46_v31  ;;  %4942 = vmatpush.bf16.msra.mxu0 %v7430_v43 }
  0x4c   :  { %v9793_v37 = vld [vmem:[%s15475_s1 + $0xacc] sm:$0xf0]  ;;  %48 = vst [vmem:[#allocation1 + $0x20] ss:$4 sm:$0xff] %v25_v20  ;;  %v7813_v39 = vld [vmem:[%s15475_s1 + $0xbc0] sm:$0xf]  ;;  %v10755_v44 = vpack.c.bf16 %v44_v34, %v44_v34  ;;  %4897 = vmatmul.bf16.vlgmr.msrb.gmra.mxu0 %v10751_v41  ;;  %4955 = vmatpush.bf16.msra.mxu1 %v7558_v45 }
  0x4d   :  { %v9825_v40 = vld [vmem:[%s15475_s1 + $0xbcc] sm:$0xf0]  ;;  %v7686_v46 = vor.u32 %v9793_v37, %v7685_v36  ;;  %v7413_v47 = vld [vmem:[%s15475_s1 + $0x8a0] sm:$0xf]  ;;  %4923 = vmatmul.bf16.vlgmr.msrb.gmra.mxu2 %v10743_v38  ;;  %4936 = vmatmul.bf16.vlgmr.msrb.gmra.mxu3 %v10753_v42 }
  0x4e   :  { %v9725_v48 = vld [vmem:[%s15475_s1 + $0x8ac] sm:$0xf0]  ;;  %v7541_v49 = vld [vmem:[%s15475_s1 + $0x9a0] sm:$0xf]  ;;  %v7814_v50 = vor.u32 %v9825_v40, %v7813_v39  ;;  %4910 = vmatmul.bf16.vlgmr.msrb.gmra.mxu1 %v10755_v44 }
  0x4f   :  { %v9757_v51 = vld [vmem:[%s15475_s1 + $0x9ac] sm:$0xf0]  ;;  %v7669_v52 = vld [vmem:[%s15475_s1 + $0xaa0] sm:$0xf]  ;;  %v7414_v56 = vor.u32 %v9725_v48, %v7413_v47  ;;  %4968 = vmatpush.bf16.msra.mxu2 %v7686_v46 }
  0x50   :  { %v9789_v53 = vld [vmem:[%s15475_s1 + $0xaac] sm:$0xf0]  ;;  %v7797_v54 = vld [vmem:[%s15475_s1 + $0xba0] sm:$0xf]  ;;  %v7542_v57 = vor.u32 %v9757_v51, %v7541_v49  ;;  %4981 = vmatpush.bf16.msra.mxu3 %v7814_v50 }
  0x51   :  { %v9821_v55 = vld [vmem:[%s15475_s1 + $0xbac] sm:$0xf0]  ;;  %v7670_v58 = vor.u32 %v9789_v53, %v7669_v52  ;;  %v7397_v59 = vld [vmem:[%s15475_s1 + $0x880] sm:$0xf]  ;;  %4943 = vmatpush.bf16.msra.mxu0 %v7414_v56 }
  0x52   :  { %v9721_v60 = vld [vmem:[%s15475_s1 + $0x88c] sm:$0xf0]  ;;  %v7525_v61 = vld [vmem:[%s15475_s1 + $0x980] sm:$0xf]  ;;  %v7798_v62 = vor.u32 %v9821_v55, %v7797_v54  ;;  %4956 = vmatpush.bf16.msra.mxu1 %v7542_v57 }
  0x53   :  { %v9753_v63 = vld [vmem:[%s15475_s1 + $0x98c] sm:$0xf0]  ;;  %v7653_v0 = vld [vmem:[%s15475_s1 + $0xa80] sm:$0xf]  ;;  %v7398_v4 = vor.u32 %v9721_v60, %v7397_v59  ;;  %4969 = vmatpush.bf16.msra.mxu2 %v7670_v58 }
  0x54   :  { %v9785_v1 = vld [vmem:[%s15475_s1 + $0xa8c] sm:$0xf0]  ;;  %v7781_v2 = vld [vmem:[%s15475_s1 + $0xb80] sm:$0xf]  ;;  %v7526_v8 = vor.u32 %v9753_v63, %v7525_v61  ;;  %4982 = vmatpush.bf16.msra.mxu3 %v7798_v62 }
  0x55   :  { %v9817_v3 = vld [vmem:[%s15475_s1 + $0xb8c] sm:$0xf0]  ;;  %v7381_v5 = vld [vmem:[%s15475_s1 + $0x860] sm:$0xf]  ;;  %v7654_v9 = vor.u32 %v9785_v1, %v7653_v0  ;;  %4944 = vmatpush.bf16.msra.mxu0 %v7398_v4 }
  0x56   :  { %v9717_v6 = vld [vmem:[%s15475_s1 + $0x86c] sm:$0xf0]  ;;  %v7509_v7 = vld [vmem:[%s15475_s1 + $0x960] sm:$0xf]  ;;  %v7782_v13 = vor.u32 %v9817_v3, %v7781_v2  ;;  %4957 = vmatpush.bf16.msra.mxu1 %v7526_v8 }
  0x57   :  { %v9749_v10 = vld [vmem:[%s15475_s1 + $0x96c] sm:$0xf0]  ;;  %v7637_v11 = vld [vmem:[%s15475_s1 + $0xa60] sm:$0xf]  ;;  %v7382_v20 = vor.u32 %v9717_v6, %v7381_v5  ;;  %4970 = vmatpush.bf16.msra.mxu2 %v7654_v9 }
  0x58   :  { %v9781_v12 = vld [vmem:[%s15475_s1 + $0xa6c] sm:$0xf0]  ;;  %v7765_v14 = vld [vmem:[%s15475_s1 + $0xb60] sm:$0xf]  ;;  %v7510_v23 = vor.u32 %v9749_v10, %v7509_v7  ;;  %4983 = vmatpush.bf16.msra.mxu3 %v7782_v13 }
  0x59   :  { %v9813_v15 = vld [vmem:[%s15475_s1 + $0xb6c] sm:$0xf0]  ;;  %v26_v16 = vld [vmem:[%s15474_s0 + $0x20] sm:$0xff]  ;;  %v10843_v21 = vld.sshfl [vmem:[#allocation1 + $0x8] sm:$0xff pattern:$0x73625140]  ;;  %v7638_v24 = vor.u32 %v9781_v12, %v7637_v11  ;;  %4945 = vmatpush.bf16.msra.mxu0 %v7382_v20 }
  0x5a   :  { %v7365_v17 = vld [vmem:[%s15475_s1 + $0x840] sm:$0xf]  ;;  %v10841_v19 = vld.sshfl [vmem:[#allocation1 + $0x10] sm:$0xff pattern:$0x73625140]  ;;  %v7766_v29 = vor.u32 %v9813_v15, %v7765_v14  ;;  %4958 = vmatpush.bf16.msra.mxu1 %v7510_v23 }
  0x5b   :  { %v10839_v18 = vld.sshfl [vmem:[#allocation1] sm:$0xff pattern:$0x73625140]  ;;  %v10845_v22 = vld.sshfl [vmem:[#allocation1 + $0x18] sm:$0xff pattern:$0x73625140]  ;;  %4971 = vmatpush.bf16.msra.mxu2 %v7638_v24 }
  0x5c   :  { %v9713_v25 = vld [vmem:[%s15475_s1 + $0x84c] sm:$0xf0]  ;;  %v7493_v28 = vld [vmem:[%s15475_s1 + $0x940] sm:$0xf]  ;;  %57 = vst [vmem:[#allocation1] ss:$4 sm:$0xff] %v26_v16  ;;  %4984 = vmatpush.bf16.msra.mxu3 %v7766_v29  ;;  %v10951_v24 = vpack.c.bf16 %v10839_v18, %v10839_v18  ;;  %v10968_v18 = vpack.c.bf16 %v10843_v21, %v10843_v21 }
  0x5d   :  { %v9745_v30 = vld [vmem:[%s15475_s1 + $0x94c] sm:$0xf0]  ;;  %v7621_v31 = vld [vmem:[%s15475_s1 + $0xa40] sm:$0xf]  ;;  %v7366_v37 = vor.u32 %v9713_v25, %v7365_v17 }
  0x5e   :  { %v9777_v34 = vld [vmem:[%s15475_s1 + $0xa4c] sm:$0xf0]  ;;  %v7749_v35 = vld [vmem:[%s15475_s1 + $0xb40] sm:$0xf]  ;;  %v7494_v39 = vor.u32 %v9745_v30, %v7493_v28  ;;  %v10964_v30 = vpack.c.bf16 %v10841_v19, %v10841_v19 }
  0x5f   :  { %v9809_v36 = vld [vmem:[%s15475_s1 + $0xb4c] sm:$0xf0]  ;;  %v7622_v40 = vor.u32 %v9777_v34, %v7621_v31  ;;  %v7349_v43 = vld [vmem:[%s15475_s1 + $0x820] sm:$0xf]  ;;  %4946 = vmatpush.bf16.msra.mxu0 %v7366_v37 }
  0x60   :  { %v9709_v45 = vld [vmem:[%s15475_s1 + $0x82c] sm:$0xf0]  ;;  %v7477_v46 = vld [vmem:[%s15475_s1 + $0x920] sm:$0xf]  ;;  %v7750_v47 = vor.u32 %v9809_v36, %v7749_v35  ;;  %4959 = vmatpush.bf16.msra.mxu1 %v7494_v39  ;;  %v10978_v35 = vpack.c.bf16 %v10845_v22, %v10845_v22 }
  0x61   :  { %v9741_v48 = vld [vmem:[%s15475_s1 + $0x92c] sm:$0xf0]  ;;  %v7605_v49 = vld [vmem:[%s15475_s1 + $0xa20] sm:$0xf]  ;;  %v7350_v53 = vor.u32 %v9709_v45, %v7349_v43  ;;  %4972 = vmatpush.bf16.msra.mxu2 %v7622_v40 }
  0x62   :  { %v9773_v50 = vld [vmem:[%s15475_s1 + $0xa2c] sm:$0xf0]  ;;  %v7733_v51 = vld [vmem:[%s15475_s1 + $0xb20] sm:$0xf]  ;;  %v7478_v56 = vor.u32 %v9741_v48, %v7477_v46  ;;  %4985 = vmatpush.bf16.msra.mxu3 %v7750_v47 }
  0x63   :  { %v9805_v52 = vld [vmem:[%s15475_s1 + $0xb2c] sm:$0xf0]  ;;  %v7333_v54 = vld [vmem:[%s15475_s1 + $0x800] sm:$0xf]  ;;  %v7606_v57 = vor.u32 %v9773_v50, %v7605_v49  ;;  %4947 = vmatpush.bf16.msra.mxu0 %v7350_v53 }
  0x64   :  { %v9705_v55 = vld [vmem:[%s15475_s1 + $0x80c] sm:$0xf0]  ;;  %v7461_v58 = vld [vmem:[%s15475_s1 + $0x900] sm:$0xf]  ;;  %v7734_v61 = vor.u32 %v9805_v52, %v7733_v51  ;;  %4960 = vmatpush.bf16.msra.mxu1 %v7478_v56  ;;  %v27_v56 = vld [vmem:[%s15474_s0 + $0x28] sm:$0xff] }
  0x65   :  { %v9737_v59 = vld [vmem:[%s15475_s1 + $0x90c] sm:$0xf0]  ;;  %v7589_v60 = vld [vmem:[%s15475_s1 + $0xa00] sm:$0xf]  ;;  %v7334_v4 = vor.u32 %v9705_v55, %v7333_v54  ;;  %4973 = vmatpush.bf16.msra.mxu2 %v7606_v57 }
  0x66   :  { %v9769_v62 = vld [vmem:[%s15475_s1 + $0xa0c] sm:$0xf0]  ;;  %v7717_v63 = vld [vmem:[%s15475_s1 + $0xb00] sm:$0xf]  ;;  %v7462_v8 = vor.u32 %v9737_v59, %v7461_v58  ;;  %4986 = vmatpush.bf16.msra.mxu3 %v7734_v61 }
  0x67   :  { %v9801_v0 = vld [vmem:[%s15475_s1 + $0xb0c] sm:$0xf0]  ;;  %v7957_v1 = vld [vmem:[%s15475_s1 + $0xce0] sm:$0xf]  ;;  %v7590_v9 = vor.u32 %v9769_v62, %v7589_v60  ;;  %4948 = vmatpush.bf16.msra.mxu0 %v7334_v4 }
  0x68   :  { %v9861_v2 = vld [vmem:[%s15475_s1 + $0xcec] sm:$0xf0]  ;;  %v8085_v3 = vld [vmem:[%s15475_s1 + $0xde0] sm:$0xf]  ;;  %v7718_v12 = vor.u32 %v9801_v0, %v7717_v63  ;;  %4961 = vmatpush.bf16.msra.mxu1 %v7462_v8 }
  0x69   :  { %v9893_v5 = vld [vmem:[%s15475_s1 + $0xdec] sm:$0xf0]  ;;  %v8213_v6 = vld [vmem:[%s15475_s1 + $0xee0] sm:$0xf]  ;;  %v7958_v13 = vor.u32 %v9861_v2, %v7957_v1  ;;  %4974 = vmatpush.bf16.msra.mxu2 %v7590_v9 }
  0x6a   :  { %v9925_v7 = vld [vmem:[%s15475_s1 + $0xeec] sm:$0xf0]  ;;  %v8341_v10 = vld [vmem:[%s15475_s1 + $0xfe0] sm:$0xf]  ;;  %v8086_v14 = vor.u32 %v9893_v5, %v8085_v3  ;;  %4987 = vmatpush.bf16.msra.mxu3 %v7718_v12  ;;  %4949 = vmatmul.bf16.vlgmr.msra.gmra.mxu0 %v10951_v24 }
  0x6b   :  { %v9957_v11 = vld [vmem:[%s15475_s1 + $0xfec] sm:$0xf0]  ;;  %v8214_v15 = vor.u32 %v9925_v7, %v8213_v6  ;;  %v7941_v16 = vld [vmem:[%s15475_s1 + $0xcc0] sm:$0xf]  ;;  %4993 = vmatpush.bf16.msrb.mxu0 %v7958_v13  ;;  %4962 = vmatmul.bf16.vlgmr.msra.gmra.mxu1 %v10968_v18 }
  0x6c   :  { %v9857_v17 = vld [vmem:[%s15475_s1 + $0xccc] sm:$0xf0]  ;;  %v8069_v20 = vld [vmem:[%s15475_s1 + $0xdc0] sm:$0xf]  ;;  %v8342_v23 = vor.u32 %v9957_v11, %v8341_v10  ;;  %5006 = vmatpush.bf16.msrb.mxu1 %v8086_v14  ;;  %4975 = vmatmul.bf16.vlgmr.msra.gmra.mxu2 %v10964_v30 }
  0x6d   :  { %v9889_v25 = vld [vmem:[%s15475_s1 + $0xdcc] sm:$0xf0]  ;;  %v8197_v28 = vld [vmem:[%s15475_s1 + $0xec0] sm:$0xf]  ;;  %v7942_v19 = vor.u32 %v9857_v17, %v7941_v16  ;;  %5019 = vmatpush.bf16.msrb.mxu2 %v8214_v15  ;;  %4988 = vmatmul.bf16.vlgmr.msra.gmra.mxu3 %v10978_v35 }
  0x6e   :  { %v9921_v29 = vld [vmem:[%s15475_s1 + $0xecc] sm:$0xf0]  ;;  %v8325_v31 = vld [vmem:[%s15475_s1 + $0xfc0] sm:$0xf]  ;;  %v8070_v36 = vor.u32 %v9889_v25, %v8069_v20  ;;  %5032 = vmatpush.bf16.msrb.mxu3 %v8342_v23 }
  0x6f   :  { %v9953_v34 = vld [vmem:[%s15475_s1 + $0xfcc] sm:$0xf0]  ;;  %v7925_v21 = vld [vmem:[%s15475_s1 + $0xca0] sm:$0xf]  ;;  %v8198_v37 = vor.u32 %v9921_v29, %v8197_v28  ;;  %4994 = vmatpush.bf16.msrb.mxu0 %v7942_v19 }
  0x70   :  { %v9853_v39 = vld [vmem:[%s15475_s1 + $0xcac] sm:$0xf0]  ;;  %v8053_v40 = vld [vmem:[%s15475_s1 + $0xda0] sm:$0xf]  ;;  %v8326_v43 = vor.u32 %v9953_v34, %v8325_v31  ;;  %5007 = vmatpush.bf16.msrb.mxu1 %v8070_v36 }
  0x71   :  { %v9885_v22 = vld [vmem:[%s15475_s1 + $0xdac] sm:$0xf0]  ;;  %v8181_v45 = vld [vmem:[%s15475_s1 + $0xea0] sm:$0xf]  ;;  %v7926_v51 = vor.u32 %v9853_v39, %v7925_v21  ;;  %5020 = vmatpush.bf16.msrb.mxu2 %v8198_v37 }
  0x72   :  { %v9917_v46 = vld [vmem:[%s15475_s1 + $0xeac] sm:$0xf0]  ;;  %v8309_v47 = vld [vmem:[%s15475_s1 + $0xfa0] sm:$0xf]  ;;  %v8054_v57 = vor.u32 %v9885_v22, %v8053_v40  ;;  %5033 = vmatpush.bf16.msrb.mxu3 %v8326_v43 }
  0x73   :  { %v9949_v48 = vld [vmem:[%s15475_s1 + $0xfac] sm:$0xf0]  ;;  %v7909_v49 = vld [vmem:[%s15475_s1 + $0xc80] sm:$0xf]  ;;  %v8182_v58 = vor.u32 %v9917_v46, %v8181_v45  ;;  %4995 = vmatpush.bf16.msrb.mxu0 %v7926_v51 }
  0x74   :  { %v9849_v50 = vld [vmem:[%s15475_s1 + $0xc8c] sm:$0xf0]  ;;  %v8037_v52 = vld [vmem:[%s15475_s1 + $0xd80] sm:$0xf]  ;;  %v8310_v61 = vor.u32 %v9949_v48, %v8309_v47  ;;  %5008 = vmatpush.bf16.msrb.mxu1 %v8054_v57 }
  0x75   :  { %v9881_v53 = vld [vmem:[%s15475_s1 + $0xd8c] sm:$0xf0]  ;;  %v8165_v54 = vld [vmem:[%s15475_s1 + $0xe80] sm:$0xf]  ;;  %v7910_v2 = vor.u32 %v9849_v50, %v7909_v49  ;;  %5021 = vmatpush.bf16.msrb.mxu2 %v8182_v58 }
  0x76   :  { %v9913_v55 = vld [vmem:[%s15475_s1 + $0xe8c] sm:$0xf0]  ;;  %v11029_v59 = vld.sshfl [vmem:[#allocation1 + $0x20] sm:$0xff pattern:$0x73625140]  ;;  %v8038_v3 = vor.u32 %v9881_v53, %v8037_v52  ;;  %5034 = vmatpush.bf16.msrb.mxu3 %v8310_v61 }
  0x77   :  { %v11031_v60 = vld.sshfl [vmem:[#allocation1 + $0x30] sm:$0xff pattern:$0x73625140]  ;;  %v11033_v62 = vld.sshfl [vmem:[#allocation1 + $0x28] sm:$0xff pattern:$0x73625140]  ;;  %v8166_v4 = vor.u32 %v9913_v55, %v8165_v54  ;;  %4996 = vmatpush.bf16.msrb.mxu0 %v7910_v2 }
  0x78   :  { %v11035_v63 = vld.sshfl [vmem:[#allocation1 + $0x38] sm:$0xff pattern:$0x73625140]  ;;  %v8293_v0 = vld [vmem:[%s15475_s1 + $0xf80] sm:$0xf]  ;;  %5009 = vmatpush.bf16.msrb.mxu1 %v8038_v3 }
  0x79   :  { %v9945_v1 = vld [vmem:[%s15475_s1 + $0xf8c] sm:$0xf0]  ;;  %58 = vst [vmem:[#allocation1 + $0x20] ss:$4 sm:$0xff] %v27_v56  ;;  %v7893_v5 = vld [vmem:[%s15475_s1 + $0xc60] sm:$0xf]  ;;  %5022 = vmatpush.bf16.msrb.mxu2 %v8166_v4 }
  0x7a   :  { %v9845_v6 = vld [vmem:[%s15475_s1 + $0xc6c] sm:$0xf0]  ;;  %v8021_v7 = vld [vmem:[%s15475_s1 + $0xd60] sm:$0xf]  ;;  %v8294_v8 = vor.u32 %v9945_v1, %v8293_v0 }
  0x7b   :  { %v9877_v9 = vld [vmem:[%s15475_s1 + $0xd6c] sm:$0xf0]  ;;  %v8149_v10 = vld [vmem:[%s15475_s1 + $0xe60] sm:$0xf]  ;;  %v7894_v14 = vor.u32 %v9845_v6, %v7893_v5 }
  0x7c   :  { %v9909_v11 = vld [vmem:[%s15475_s1 + $0xe6c] sm:$0xf0]  ;;  %v8277_v12 = vld [vmem:[%s15475_s1 + $0xf60] sm:$0xf]  ;;  %v8022_v15 = vor.u32 %v9877_v9, %v8021_v7  ;;  %5035 = vmatpush.bf16.msrb.mxu3 %v8294_v8 }
  0x7d   :  { %v9941_v13 = vld [vmem:[%s15475_s1 + $0xf6c] sm:$0xf0]  ;;  %v8150_v16 = vor.u32 %v9909_v11, %v8149_v10  ;;  %v7877_v17 = vld [vmem:[%s15475_s1 + $0xc40] sm:$0xf]  ;;  %4997 = vmatpush.bf16.msrb.mxu0 %v7894_v14 }
  0x7e   :  { %v9841_v20 = vld [vmem:[%s15475_s1 + $0xc4c] sm:$0xf0]  ;;  %v8005_v23 = vld [vmem:[%s15475_s1 + $0xd40] sm:$0xf]  ;;  %v8278_v25 = vor.u32 %v9941_v13, %v8277_v12  ;;  %5010 = vmatpush.bf16.msrb.mxu1 %v8022_v15 }
  0x7f   :  { %v9873_v28 = vld [vmem:[%s15475_s1 + $0xd4c] sm:$0xf0]  ;;  %v8133_v29 = vld [vmem:[%s15475_s1 + $0xe40] sm:$0xf]  ;;  %v7878_v21 = vor.u32 %v9841_v20, %v7877_v17  ;;  %5023 = vmatpush.bf16.msrb.mxu2 %v8150_v16 }
  0x80   :  { %v9905_v31 = vld [vmem:[%s15475_s1 + $0xe4c] sm:$0xf0]  ;;  %v8261_v34 = vld [vmem:[%s15475_s1 + $0xf40] sm:$0xf]  ;;  %v8006_v36 = vor.u32 %v9873_v28, %v8005_v23  ;;  %5036 = vmatpush.bf16.msrb.mxu3 %v8278_v25 }
  0x81   :  { %v9937_v19 = vld [vmem:[%s15475_s1 + $0xf4c] sm:$0xf0]  ;;  %v8134_v37 = vor.u32 %v9905_v31, %v8133_v29  ;;  %v7861_v39 = vld [vmem:[%s15475_s1 + $0xc20] sm:$0xf]  ;;  %4998 = vmatpush.bf16.msrb.mxu0 %v7878_v21 }
  0x82   :  { %v9837_v40 = vld [vmem:[%s15475_s1 + $0xc2c] sm:$0xf0]  ;;  %v7989_v22 = vld [vmem:[%s15475_s1 + $0xd20] sm:$0xf]  ;;  %v8262_v43 = vor.u32 %v9937_v19, %v8261_v34  ;;  %5011 = vmatpush.bf16.msrb.mxu1 %v8006_v36 }
  0x83   :  { %v9869_v45 = vld [vmem:[%s15475_s1 + $0xd2c] sm:$0xf0]  ;;  %v8117_v46 = vld [vmem:[%s15475_s1 + $0xe20] sm:$0xf]  ;;  %v7862_v51 = vor.u32 %v9837_v40, %v7861_v39  ;;  %5024 = vmatpush.bf16.msrb.mxu2 %v8134_v37 }
  0x84   :  { %v9901_v47 = vld [vmem:[%s15475_s1 + $0xe2c] sm:$0xf0]  ;;  %v8245_v48 = vld [vmem:[%s15475_s1 + $0xf20] sm:$0xf]  ;;  %v7990_v55 = vor.u32 %v9869_v45, %v7989_v22  ;;  %5037 = vmatpush.bf16.msrb.mxu3 %v8262_v43 }
  0x85   :  { %v9933_v49 = vld [vmem:[%s15475_s1 + $0xf2c] sm:$0xf0]  ;;  %v7845_v50 = vld [vmem:[%s15475_s1 + $0xc00] sm:$0xf]  ;;  %v8118_v56 = vor.u32 %v9901_v47, %v8117_v46 }
  0x86   :  { %v9833_v52 = vld [vmem:[%s15475_s1 + $0xc0c] sm:$0xf0]  ;;  %v7973_v53 = vld [vmem:[%s15475_s1 + $0xd00] sm:$0xf]  ;;  %v8246_v0 = vor.u32 %v9933_v49, %v8245_v48 }
  0x87   :  { %v9865_v54 = vld [vmem:[%s15475_s1 + $0xd0c] sm:$0xf0]  ;;  %v8101_v57 = vld [vmem:[%s15475_s1 + $0xe00] sm:$0xf] }
  0x88   :  { %v9897_v58 = vld [vmem:[%s15475_s1 + $0xe0c] sm:$0xf0]  ;;  %v8229_v61 = vld [vmem:[%s15475_s1 + $0xf00] sm:$0xf] }
  0x89   :  { %v9929_v1 = vld [vmem:[%s15475_s1 + $0xf0c] sm:$0xf0]  ;;  %v8469_v2 = vld [vmem:[%s15475_s1 + $0x10e0] sm:$0xf] }
  0x8a   :  { %v9989_v3 = vld [vmem:[%s15475_s1 + $0x10ec] sm:$0xf0]  ;;  %v8597_v4 = vld [vmem:[%s15475_s1 + $0x11e0] sm:$0xf] }
  0x8b   :  { %10 = vsyncpa [#allocation3], 0  ;;  %4999 = vmatpush.bf16.msrb.mxu0 %v7862_v51  ;;  %v7846_v5 = vor.u32 %v9833_v52, %v7845_v50  ;;  %v10021_v6 = vld [vmem:[%s15475_s1 + $0x11ec] sm:$0xf0]  ;;  %v8725_v7 = vld [vmem:[%s15475_s1 + $0x12e0] sm:$0xf]  ;;  %5012 = vmatpush.bf16.msrb.mxu1 %v7990_v55  ;;  %v7974_v9 = vor.u32 %v9865_v54, %v7973_v53  ;;  %v8102_v10 = vor.u32 %v9897_v58, %v8101_v57 }
  0x8c   :  { %v10053_v8 = vld [vmem:[%s15475_s1 + $0x12ec] sm:$0xf0]  ;;  %5025 = vmatpush.bf16.msrb.mxu2 %v8118_v56  ;;  %v8853_v11 = vld [vmem:[%s15475_s1 + $0x13e0] sm:$0xf]  ;;  %5038 = vmatpush.bf16.msrb.mxu3 %v8246_v0  ;;  %v8230_v13 = vor.u32 %v9929_v1, %v8229_v61  ;;  %v8470_v14 = vor.u32 %v9989_v3, %v8469_v2  ;;  %v8598_v15 = vor.u32 %v10021_v6, %v8597_v4  ;;  %vm4833_vm0 = vcmask 523264   ;;  %s10262_s18 = smov [#allocation2]  }
  0x8d   :  { %v10085_v12 = vld [vmem:[%s15475_s1 + $0x13ec] sm:$0xf0]  ;;  %v8726_v16 = vor.u32 %v10053_v8, %v8725_v7  ;;  %v8453_v17 = vld [vmem:[%s15475_s1 + $0x10c0] sm:$0xf]  ;;  %v11174_v28 = vpack.c.bf16 %v11029_v59, %v11029_v59  ;;  %v11187_v19 = vpack.c.bf16 %v11031_v60, %v11031_v60  ;;  %v11191_v59 = vpack.c.bf16 %v11033_v62, %v11033_v62  ;;  %s6296_s19 = sshll.u32 %s10262_s18, 4  ;;  %s6298_s21 = sshll.u32 %s15479_s5, 4  ;;  %s6297_s19 = int_to_ptr.vmem [resolvable:$true] %s6296_s19  ;;  %s6299_s21 = int_to_ptr.hbm [resolvable:$true] %s6298_s21 }
  0x8e   :  { %v9985_v20 = vld [vmem:[%s15475_s1 + $0x10cc] sm:$0xf0]  ;;  %v8581_v23 = vld [vmem:[%s15475_s1 + $0x11c0] sm:$0xf]  ;;  %v8854_v25 = vor.u32 %v10085_v12, %v8853_v11  ;;  %v11201_v37 = vpack.c.bf16 %v11035_v63, %v11035_v63  ;;  %vm6289_vm1 = vcmask 25600  }
  0x8f   :  { %5000 = vmatpush.bf16.msrb.mxu0 %v7846_v5  ;;  %v10017_v29 = vld [vmem:[%s15475_s1 + $0x11cc] sm:$0xf0]  ;;  %v8709_v31 = vld [vmem:[%s15475_s1 + $0x12c0] sm:$0xf]  ;;  %5013 = vmatpush.bf16.msrb.mxu1 %v7974_v9  ;;  %v8454_v60 = vor.u32 %v9985_v20, %v8453_v17 }
  0x90   :  { %v10049_v34 = vld [vmem:[%s15475_s1 + $0x12cc] sm:$0xf0]  ;;  %5026 = vmatpush.bf16.msrb.mxu2 %v8102_v10  ;;  %v8837_v21 = vld [vmem:[%s15475_s1 + $0x13c0] sm:$0xf]  ;;  %5039 = vmatpush.bf16.msrb.mxu3 %v8230_v13  ;;  %v8582_v39 = vor.u32 %v10017_v29, %v8581_v23 }
  0x91   :  { %v10081_v36 = vld [vmem:[%s15475_s1 + $0x13cc] sm:$0xf0]  ;;  %v8710_v62 = vor.u32 %v10049_v34, %v8709_v31  ;;  %v8437_v40 = vld [vmem:[%s15475_s1 + $0x10a0] sm:$0xf] }
  0x92   :  { %v9981_v22 = vld [vmem:[%s15475_s1 + $0x10ac] sm:$0xf0]  ;;  %v8565_v43 = vld [vmem:[%s15475_s1 + $0x11a0] sm:$0xf]  ;;  %5001 = vmatmul.bf16.vlgmr.msrb.gmra.mxu0 %v11174_v28  ;;  %v8838_v63 = vor.u32 %v10081_v36, %v8837_v21  ;;  %5014 = vmatmul.bf16.vlgmr.msrb.gmra.mxu1 %v11191_v59 }
  0x93   :  { %5045 = vmatpush.bf16.msra.mxu0 %v8470_v14  ;;  %5058 = vmatpush.bf16.msra.mxu1 %v8598_v15  ;;  %v10013_v45 = vld [vmem:[%s15475_s1 + $0x11ac] sm:$0xf0]  ;;  %v8693_v46 = vld [vmem:[%s15475_s1 + $0x12a0] sm:$0xf]  ;;  %v8438_v50 = vor.u32 %v9981_v22, %v8437_v40 }
  0x94   :  { %5071 = vmatpush.bf16.msra.mxu2 %v8726_v16  ;;  %5084 = vmatpush.bf16.msra.mxu3 %v8854_v25  ;;  %v10045_v47 = vld [vmem:[%s15475_s1 + $0x12ac] sm:$0xf0]  ;;  %v8821_v48 = vld [vmem:[%s15475_s1 + $0x13a0] sm:$0xf]  ;;  %v8566_v51 = vor.u32 %v10013_v45, %v8565_v43 }
  0x95   :  { %5027 = vmatmul.bf16.vlgmr.msrb.gmra.mxu2 %v11187_v19  ;;  %v10077_v49 = vld [vmem:[%s15475_s1 + $0x13ac] sm:$0xf0]  ;;  %5040 = vmatmul.bf16.vlgmr.msrb.gmra.mxu3 %v11201_v37  ;;  %v8694_v52 = vor.u32 %v10045_v47, %v8693_v46  ;;  %v8421_v53 = vld [vmem:[%s15475_s1 + $0x1080] sm:$0xf] }
  0x96   :  { %v9977_v54 = vld [vmem:[%s15475_s1 + $0x108c] sm:$0xf0]  ;;  %v8549_v55 = vld [vmem:[%s15475_s1 + $0x1180] sm:$0xf]  ;;  %v8822_v56 = vor.u32 %v10077_v49, %v8821_v48 }
  0x97   :  { %5046 = vmatpush.bf16.msra.mxu0 %v8454_v60  ;;  %5059 = vmatpush.bf16.msra.mxu1 %v8582_v39  ;;  %v10009_v57 = vld [vmem:[%s15475_s1 + $0x118c] sm:$0xf0]  ;;  %v8677_v58 = vld [vmem:[%s15475_s1 + $0x1280] sm:$0xf]  ;;  %v8422_v2 = vor.u32 %v9977_v54, %v8421_v53 }
  0x98   :  { %5072 = vmatpush.bf16.msra.mxu2 %v8710_v62  ;;  %5085 = vmatpush.bf16.msra.mxu3 %v8838_v63  ;;  %v10041_v61 = vld [vmem:[%s15475_s1 + $0x128c] sm:$0xf0]  ;;  %v8805_v0 = vld [vmem:[%s15475_s1 + $0x1380] sm:$0xf]  ;;  %v8550_v3 = vor.u32 %v10009_v57, %v8549_v55 }
  0x99   :  { %v10073_v1 = vld [vmem:[%s15475_s1 + $0x138c] sm:$0xf0]  ;;  %v8678_v4 = vor.u32 %v10041_v61, %v8677_v58  ;;  %v8405_v5 = vld [vmem:[%s15475_s1 + $0x1060] sm:$0xf] }
  0x9a   :  { %v9973_v6 = vld [vmem:[%s15475_s1 + $0x106c] sm:$0xf0]  ;;  %v8533_v7 = vld [vmem:[%s15475_s1 + $0x1160] sm:$0xf]  ;;  %v8806_v8 = vor.u32 %v10073_v1, %v8805_v0 }
  0x9b   :  { %5047 = vmatpush.bf16.msra.mxu0 %v8438_v50  ;;  %5060 = vmatpush.bf16.msra.mxu1 %v8566_v51  ;;  %v10005_v9 = vld [vmem:[%s15475_s1 + $0x116c] sm:$0xf0]  ;;  %v8661_v10 = vld [vmem:[%s15475_s1 + $0x1260] sm:$0xf]  ;;  %v8406_v14 = vor.u32 %v9973_v6, %v8405_v5 }
  0x9c   :  { %5073 = vmatpush.bf16.msra.mxu2 %v8694_v52  ;;  %5086 = vmatpush.bf16.msra.mxu3 %v8822_v56  ;;  %v10037_v11 = vld [vmem:[%s15475_s1 + $0x126c] sm:$0xf0]  ;;  %v8789_v12 = vld [vmem:[%s15475_s1 + $0x1360] sm:$0xf]  ;;  %v8534_v15 = vor.u32 %v10005_v9, %v8533_v7 }
  0x9d   :  { %v10069_v13 = vld [vmem:[%s15475_s1 + $0x136c] sm:$0xf0]  ;;  %v8662_v16 = vor.u32 %v10037_v11, %v8661_v10  ;;  %v8389_v17 = vld [vmem:[%s15475_s1 + $0x1040] sm:$0xf] }
  0x9e   :  { %v9969_v20 = vld [vmem:[%s15475_s1 + $0x104c] sm:$0xf0]  ;;  %v8517_v23 = vld [vmem:[%s15475_s1 + $0x1140] sm:$0xf]  ;;  %v8790_v25 = vor.u32 %v10069_v13, %v8789_v12 }
  0x9f   :  { %5048 = vmatpush.bf16.msra.mxu0 %v8422_v2  ;;  %5061 = vmatpush.bf16.msra.mxu1 %v8550_v3  ;;  %v10001_v29 = vld [vmem:[%s15475_s1 + $0x114c] sm:$0xf0]  ;;  %v8645_v31 = vld [vmem:[%s15475_s1 + $0x1240] sm:$0xf]  ;;  %v8390_v60 = vor.u32 %v9969_v20, %v8389_v17 }
  0xa0   :  { %5074 = vmatpush.bf16.msra.mxu2 %v8678_v4  ;;  %5087 = vmatpush.bf16.msra.mxu3 %v8806_v8  ;;  %v10033_v34 = vld [vmem:[%s15475_s1 + $0x124c] sm:$0xf0]  ;;  %v8773_v21 = vld [vmem:[%s15475_s1 + $0x1340] sm:$0xf]  ;;  %v8518_v39 = vor.u32 %v10001_v29, %v8517_v23 }
  0xa1   :  { %v10065_v36 = vld [vmem:[%s15475_s1 + $0x134c] sm:$0xf0]  ;;  %v8646_v62 = vor.u32 %v10033_v34, %v8645_v31  ;;  %v8373_v40 = vld [vmem:[%s15475_s1 + $0x1020] sm:$0xf] }
  0xa2   :  { %v9965_v22 = vld [vmem:[%s15475_s1 + $0x102c] sm:$0xf0]  ;;  %v8501_v43 = vld [vmem:[%s15475_s1 + $0x1120] sm:$0xf]  ;;  %v8774_v63 = vor.u32 %v10065_v36, %v8773_v21 }
  0xa3   :  { %5049 = vmatpush.bf16.msra.mxu0 %v8406_v14  ;;  %5062 = vmatpush.bf16.msra.mxu1 %v8534_v15  ;;  %v9997_v45 = vld [vmem:[%s15475_s1 + $0x112c] sm:$0xf0]  ;;  %v8629_v46 = vld [vmem:[%s15475_s1 + $0x1220] sm:$0xf]  ;;  %v8374_v51 = vor.u32 %v9965_v22, %v8373_v40 }
  0xa4   :  { %5075 = vmatpush.bf16.msra.mxu2 %v8662_v16  ;;  %5088 = vmatpush.bf16.msra.mxu3 %v8790_v25  ;;  %v10029_v47 = vld [vmem:[%s15475_s1 + $0x122c] sm:$0xf0]  ;;  %v8757_v48 = vld [vmem:[%s15475_s1 + $0x1320] sm:$0xf]  ;;  %v8502_v55 = vor.u32 %v9997_v45, %v8501_v43 }
  0xa5   :  { %v10061_v49 = vld [vmem:[%s15475_s1 + $0x132c] sm:$0xf0]  ;;  %v8357_v50 = vld [vmem:[%s15475_s1 + $0x1000] sm:$0xf]  ;;  %v8630_v56 = vor.u32 %v10029_v47, %v8629_v46 }
  0xa6   :  { %v9961_v52 = vld [vmem:[%s15475_s1 + $0x100c] sm:$0xf0]  ;;  %v8485_v53 = vld [vmem:[%s15475_s1 + $0x1100] sm:$0xf]  ;;  %v8758_v0 = vor.u32 %v10061_v49, %v8757_v48 }
  0xa7   :  { %5050 = vmatpush.bf16.msra.mxu0 %v8390_v60  ;;  %v9993_v54 = vld [vmem:[%s15475_s1 + $0x110c] sm:$0xf0]  ;;  %5063 = vmatpush.bf16.msra.mxu1 %v8518_v39  ;;  %v8613_v57 = vld [vmem:[%s15475_s1 + $0x1200] sm:$0xf]  ;;  %v8358_v7 = vor.u32 %v9961_v52, %v8357_v50 }
  0xa8   :  { %5076 = vmatpush.bf16.msra.mxu2 %v8646_v62  ;;  %v10025_v58 = vld [vmem:[%s15475_s1 + $0x120c] sm:$0xf0]  ;;  %v8741_v61 = vld [vmem:[%s15475_s1 + $0x1300] sm:$0xf]  ;;  %5089 = vmatpush.bf16.msra.mxu3 %v8774_v63  ;;  %v8486_v11 = vor.u32 %v9993_v54, %v8485_v53 }
  0xa9   :  { %v10057_v1 = vld [vmem:[%s15475_s1 + $0x130c] sm:$0xf0]  ;;  %v8981_v2 = vld [vmem:[%s15475_s1 + $0x14e0] sm:$0xf]  ;;  %v8614_v12 = vor.u32 %v10025_v58, %v8613_v57 }
  0xaa   :  { %v10117_v3 = vld [vmem:[%s15475_s1 + $0x14ec] sm:$0xf0]  ;;  %v9109_v4 = vld [vmem:[%s15475_s1 + $0x15e0] sm:$0xf]  ;;  %v8742_v15 = vor.u32 %v10057_v1, %v8741_v61 }
  0xab   :  { %v10149_v5 = vld [vmem:[%s15475_s1 + $0x15ec] sm:$0xf0]  ;;  %v9237_v6 = vld [vmem:[%s15475_s1 + $0x16e0] sm:$0xf]  ;;  %5051 = vmatpush.bf16.msra.mxu0 %v8374_v51  ;;  %5064 = vmatpush.bf16.msra.mxu1 %v8502_v55  ;;  %v8982_v16 = vor.u32 %v10117_v3, %v8981_v2 }
  0xac   :  { %v10181_v8 = vld [vmem:[%s15475_s1 + $0x16ec] sm:$0xf0]  ;;  %v9365_v9 = vld [vmem:[%s15475_s1 + $0x17e0] sm:$0xf]  ;;  %5077 = vmatpush.bf16.msra.mxu2 %v8630_v56  ;;  %5090 = vmatpush.bf16.msra.mxu3 %v8758_v0  ;;  %v9110_v23 = vor.u32 %v10149_v5, %v9109_v4 }
  0xad   :  { %v10213_v10 = vld [vmem:[%s15475_s1 + $0x17ec] sm:$0xf0]  ;;  %v59_v13 = vld.sshfl [vmem:[#allocation1] sm:$0xff pattern:$0x73625140]  ;;  %v9238_v25 = vor.u32 %v10181_v8, %v9237_v6 }
  0xae   :  { %v61_v14 = vld.sshfl [vmem:[#allocation1 + $0x10] sm:$0xff pattern:$0x73625140]  ;;  %v60_v17 = vld.sshfl [vmem:[#allocation1 + $0x8] sm:$0xff pattern:$0x73625140]  ;;  %v9366_v21 = vor.u32 %v10213_v10, %v9365_v9  ;;  %v11384_v36 = vpack.c.bf16 %v59_v13, %v59_v13 }
  0xaf   :  { %v62_v20 = vld.sshfl [vmem:[#allocation1 + $0x18] sm:$0xff pattern:$0x73625140]  ;;  %v8965_v29 = vld [vmem:[%s15475_s1 + $0x14c0] sm:$0xf]  ;;  %5052 = vmatpush.bf16.msra.mxu0 %v8358_v7  ;;  %5065 = vmatpush.bf16.msra.mxu1 %v8486_v11  ;;  %v11395_v40 = vpack.c.bf16 %v61_v14, %v61_v14  ;;  %v11397_v22 = vpack.c.bf16 %v60_v17, %v60_v17 }
  0xb0   :  { %v10113_v31 = vld [vmem:[%s15475_s1 + $0x14cc] sm:$0xf0]  ;;  %v9093_v34 = vld [vmem:[%s15475_s1 + $0x15c0] sm:$0xf]  ;;  %5078 = vmatpush.bf16.msra.mxu2 %v8614_v12  ;;  %5091 = vmatpush.bf16.msra.mxu3 %v8742_v15  ;;  %v11405_v45 = vpack.c.bf16 %v62_v20, %v62_v20 }
  0xb1   :  { %v10145_v60 = vld [vmem:[%s15475_s1 + $0x15cc] sm:$0xf0]  ;;  %v9221_v39 = vld [vmem:[%s15475_s1 + $0x16c0] sm:$0xf]  ;;  %v8966_v46 = vor.u32 %v10113_v31, %v8965_v29 }
  0xb2   :  { %v10177_v62 = vld [vmem:[%s15475_s1 + $0x16cc] sm:$0xf0]  ;;  %v9349_v43 = vld [vmem:[%s15475_s1 + $0x17c0] sm:$0xf]  ;;  %v9094_v47 = vor.u32 %v10145_v60, %v9093_v34  ;;  %5053 = vmatmul.bf16.vlgmr.msra.gmra.mxu0 %v11384_v36  ;;  %5066 = vmatmul.bf16.vlgmr.msra.gmra.mxu1 %v11397_v22 }
  0xb3   :  { %v10209_v63 = vld [vmem:[%s15475_s1 + $0x17cc] sm:$0xf0]  ;;  %5097 = vmatpush.bf16.msrb.mxu0 %v8982_v16  ;;  %5110 = vmatpush.bf16.msrb.mxu1 %v9110_v23  ;;  %v9222_v48 = vor.u32 %v10177_v62, %v9221_v39  ;;  %v8949_v49 = vld [vmem:[%s15475_s1 + $0x14a0] sm:$0xf] }
  0xb4   :  { %5123 = vmatpush.bf16.msrb.mxu2 %v9238_v25  ;;  %v10109_v50 = vld [vmem:[%s15475_s1 + $0x14ac] sm:$0xf0]  ;;  %v9077_v51 = vld [vmem:[%s15475_s1 + $0x15a0] sm:$0xf]  ;;  %5136 = vmatpush.bf16.msrb.mxu3 %v9366_v21  ;;  %v9350_v52 = vor.u32 %v10209_v63, %v9349_v43 }
  0xb5   :  { %v10141_v53 = vld [vmem:[%s15475_s1 + $0x15ac] sm:$0xf0]  ;;  %v9205_v54 = vld [vmem:[%s15475_s1 + $0x16a0] sm:$0xf]  ;;  %5079 = vmatmul.bf16.vlgmr.msra.gmra.mxu2 %v11395_v40  ;;  %5092 = vmatmul.bf16.vlgmr.msra.gmra.mxu3 %v11405_v45  ;;  %v8950_v58 = vor.u32 %v10109_v50, %v8949_v49 }
  0xb6   :  { %v10173_v55 = vld [vmem:[%s15475_s1 + $0x16ac] sm:$0xf0]  ;;  %v9333_v56 = vld [vmem:[%s15475_s1 + $0x17a0] sm:$0xf]  ;;  %v9078_v61 = vor.u32 %v10141_v53, %v9077_v51 }
  0xb7   :  { %v10205_v57 = vld [vmem:[%s15475_s1 + $0x17ac] sm:$0xf0]  ;;  %5098 = vmatpush.bf16.msrb.mxu0 %v8966_v46  ;;  %5111 = vmatpush.bf16.msrb.mxu1 %v9094_v47  ;;  %v9206_v0 = vor.u32 %v10173_v55, %v9205_v54  ;;  %v8933_v1 = vld [vmem:[%s15475_s1 + $0x1480] sm:$0xf] }
  0xb8   :  { %5124 = vmatpush.bf16.msrb.mxu2 %v9222_v48  ;;  %v10105_v2 = vld [vmem:[%s15475_s1 + $0x148c] sm:$0xf0]  ;;  %v9061_v3 = vld [vmem:[%s15475_s1 + $0x1580] sm:$0xf]  ;;  %5137 = vmatpush.bf16.msrb.mxu3 %v9350_v52  ;;  %v9334_v4 = vor.u32 %v10205_v57, %v9333_v56 }
  0xb9   :  { %v10137_v5 = vld [vmem:[%s15475_s1 + $0x158c] sm:$0xf0]  ;;  %v9189_v6 = vld [vmem:[%s15475_s1 + $0x1680] sm:$0xf]  ;;  %v8934_v10 = vor.u32 %v10105_v2, %v8933_v1 }
  0xba   :  { %v10169_v7 = vld [vmem:[%s15475_s1 + $0x168c] sm:$0xf0]  ;;  %v9317_v8 = vld [vmem:[%s15475_s1 + $0x1780] sm:$0xf]  ;;  %v9062_v12 = vor.u32 %v10137_v5, %v9061_v3 }
  0xbb   :  { %v10201_v9 = vld [vmem:[%s15475_s1 + $0x178c] sm:$0xf0]  ;;  %5099 = vmatpush.bf16.msrb.mxu0 %v8950_v58  ;;  %5112 = vmatpush.bf16.msrb.mxu1 %v9078_v61  ;;  %v9190_v13 = vor.u32 %v10169_v7, %v9189_v6  ;;  %v8917_v14 = vld [vmem:[%s15475_s1 + $0x1460] sm:$0xf]  ;;  %v4846_v6 = vpop.f32.mrf.mxu0 }
  0xbc   :  { %v28_v11 = vld [vmem:[%s15474_s0 + $0x30] sm:$0x3]  ;;  %5125 = vmatpush.bf16.msrb.mxu2 %v9206_v0  ;;  %v9045_v16 = vld [vmem:[%s15475_s1 + $0x1560] sm:$0xf]  ;;  %5138 = vmatpush.bf16.msrb.mxu3 %v9334_v4  ;;  %v9318_v17 = vor.u32 %v10201_v9, %v9317_v8 }
  0xbd   :  { %v10101_v15 = vld [vmem:[%s15475_s1 + $0x146c] sm:$0xf0]  ;;  %v9173_v23 = vld [vmem:[%s15475_s1 + $0x1660] sm:$0xf]  ;;  %67 = vst [vmem:[#allocation1] ss:$4 sm:$0xff] %v28_v11 }
  0xbe   :  { %v10133_v20 = vld [vmem:[%s15475_s1 + $0x156c] sm:$0xf0]  ;;  %v9301_v29 = vld [vmem:[%s15475_s1 + $0x1760] sm:$0xf]  ;;  %v8918_v34 = vor.u32 %v10101_v15, %v8917_v14 }
  0xbf   :  { %v10165_v25 = vld [vmem:[%s15475_s1 + $0x166c] sm:$0xf0]  ;;  %5100 = vmatpush.bf16.msrb.mxu0 %v8934_v10  ;;  %v8901_v21 = vld [vmem:[%s15475_s1 + $0x1440] sm:$0xf]  ;;  %5113 = vmatpush.bf16.msrb.mxu1 %v9062_v12  ;;  %v9046_v60 = vor.u32 %v10133_v20, %v9045_v16  ;;  %v4859_v12 = vpop.f32.mrf.mxu1 }
  0xc0   :  { %v10197_v31 = vld [vmem:[%s15475_s1 + $0x176c] sm:$0xf0]  ;;  %5126 = vmatpush.bf16.msrb.mxu2 %v9190_v13  ;;  %v9174_v39 = vor.u32 %v10165_v25, %v9173_v23  ;;  %v9029_v43 = vld [vmem:[%s15475_s1 + $0x1540] sm:$0xf]  ;;  %5139 = vmatpush.bf16.msrb.mxu3 %v9318_v17 }
  0xc1   :  { %v10097_v62 = vld [vmem:[%s15475_s1 + $0x144c] sm:$0xf0]  ;;  %v903_v63 = vld [vmem:[%s15476_s2] sm:$0xf]  ;;  %v9302_v46 = vor.u32 %v10197_v31, %v9301_v29 }
  0xc2   :  { %v10129_v47 = vld [vmem:[%s15475_s1 + $0x154c] sm:$0xf0]  ;;  %v9157_v48 = vld [vmem:[%s15475_s1 + $0x1640] sm:$0xf]  ;;  %v8902_v52 = vor.u32 %v10097_v62, %v8901_v21  ;;  %v905_v53 = vperm.slane %v903_v63, 0 }
  0xc3   :  { %v10161_v49 = vld [vmem:[%s15475_s1 + $0x164c] sm:$0xf0]  ;;  %v9285_v50 = vld [vmem:[%s15475_s1 + $0x1740] sm:$0xf]  ;;  %5101 = vmatpush.bf16.msrb.mxu0 %v8918_v34  ;;  %5114 = vmatpush.bf16.msrb.mxu1 %v9046_v60  ;;  %v9030_v54 = vor.u32 %v10129_v47, %v9029_v43  ;;  %v9475_v34 = vld [vmem:[%s15475_s1 + $0xe4] sm:$0xf] }
  0xc4   :  { %v10193_v51 = vld [vmem:[%s15475_s1 + $0x174c] sm:$0xf0]  ;;  %5127 = vmatpush.bf16.msrb.mxu2 %v9174_v39  ;;  %v9158_v55 = vor.u32 %v10161_v49, %v9157_v48  ;;  %v8885_v56 = vld [vmem:[%s15475_s1 + $0x1420] sm:$0xf]  ;;  %5140 = vmatpush.bf16.msrb.mxu3 %v9302_v46  ;;  %v4847_v11 = vadd.f32 %v4846_v6, %v905_v53  ;;  %v6423_v21 = vld [vmem:[%s15475_s1 + $0xf0] sm:$0xf0]  ;;  %v4872_v39 = vpop.f32.mrf.mxu2 }
  0xc5   :  { %v10093_v57 = vld [vmem:[%s15475_s1 + $0x142c] sm:$0xf0]  ;;  %v9013_v58 = vld [vmem:[%s15475_s1 + $0x1520] sm:$0xf]  ;;  %v9286_v61 = vor.u32 %v10193_v51, %v9285_v50  ;;  %v9507_v60 = vld [vmem:[%s15475_s1 + $0x1e4] sm:$0xf] }
  0xc6   :  { %v10125_v0 = vld [vmem:[%s15475_s1 + $0x152c] sm:$0xf0]  ;;  %v9141_v1 = vld [vmem:[%s15475_s1 + $0x1620] sm:$0xf]  ;;  %v8886_v7 = vor.u32 %v10093_v57, %v8885_v56  ;;  %v4860_v31 = vadd.f32 %v4859_v12, %v4847_v11  ;;  %v6551_v43 = vld [vmem:[%s15475_s1 + $0x1f0] sm:$0xf0]  ;;  %v4885_v56 = vpop.f32.mrf.mxu3  ;;  %v6426_v57 = vor.u32 %v9475_v34, %v6423_v21 }
  0xc7   :  { %v10157_v2 = vld [vmem:[%s15475_s1 + $0x162c] sm:$0xf0]  ;;  %v9269_v3 = vld [vmem:[%s15475_s1 + $0x1720] sm:$0xf]  ;;  %5102 = vmatpush.bf16.msrb.mxu0 %v8902_v52  ;;  %5115 = vmatpush.bf16.msrb.mxu1 %v9030_v54  ;;  %v9014_v13 = vor.u32 %v10125_v0, %v9013_v58  ;;  %v9539_v63 = vld [vmem:[%s15475_s1 + $0x2e4] sm:$0xf]  ;;  %v6554_v58 = vor.u32 %v9507_v60, %v6551_v43 }
  0xc8   :  { %v10189_v4 = vld [vmem:[%s15475_s1 + $0x172c] sm:$0xf0]  ;;  %v8869_v5 = vld [vmem:[%s15475_s1 + $0x1400] sm:$0xf]  ;;  %5128 = vmatpush.bf16.msrb.mxu2 %v9158_v55  ;;  %v9142_v14 = vor.u32 %v10157_v2, %v9141_v1  ;;  %5141 = vmatpush.bf16.msrb.mxu3 %v9286_v61  ;;  %v6679_v46 = vld [vmem:[%s15475_s1 + $0x2f0] sm:$0xf0]  ;;  %v4873_v47 = vadd.f32 %v4872_v39, %v4860_v31 }
  0xc9   :  { %v10089_v8 = vld [vmem:[%s15475_s1 + $0x140c] sm:$0xf0]  ;;  %v8997_v9 = vld [vmem:[%s15475_s1 + $0x1500] sm:$0xf]  ;;  %v9270_v20 = vor.u32 %v10189_v4, %v9269_v3  ;;  %v9471_v1 = vld [vmem:[%s15475_s1 + $0xc4] sm:$0xf]  ;;  %v4848_v3 = vpop.f32.mrf.mxu0  ;;  %v6682_v4 = vor.u32 %v9539_v63, %v6679_v46 }
  0xca   :  { %v10121_v10 = vld [vmem:[%s15475_s1 + $0x150c] sm:$0xf0]  ;;  %v9125_v15 = vld [vmem:[%s15475_s1 + $0x1600] sm:$0xf]  ;;  %v8870_v62 = vor.u32 %v10089_v8, %v8869_v5  ;;  %v11594_v2 = vadd.f32 %v4885_v56, %v4873_v47  ;;  %v6407_v6 = vld [vmem:[%s15475_s1 + $0xd0] sm:$0xf0] }
  0xcb   :  { %v10153_v16 = vld [vmem:[%s15475_s1 + $0x160c] sm:$0xf0]  ;;  %v9253_v17 = vld [vmem:[%s15475_s1 + $0x1700] sm:$0xf]  ;;  %5103 = vmatpush.bf16.msrb.mxu0 %v8886_v7  ;;  %5116 = vmatpush.bf16.msrb.mxu1 %v9014_v13  ;;  %v8998_v48 = vor.u32 %v10121_v10, %v8997_v9  ;;  %v9503_v7 = vld [vmem:[%s15475_s1 + $0x1c4] sm:$0xf]  ;;  %v4861_v9 = vpop.f32.mrf.mxu1 }
  0xcc   :  { %v10185_v23 = vld [vmem:[%s15475_s1 + $0x170c] sm:$0xf0]  ;;  %v9429_v25 = vld [vmem:[%s15475_s1 + $0x1860] sm:$0xf]  ;;  %5129 = vmatpush.bf16.msrb.mxu2 %v9142_v14  ;;  %v9126_v49 = vor.u32 %v10153_v16, %v9125_v15  ;;  %5142 = vmatpush.bf16.msrb.mxu3 %v9270_v20  ;;  %v6535_v8 = vld [vmem:[%s15475_s1 + $0x1d0] sm:$0xf0]  ;;  %v6410_v16 = vor.u32 %v9471_v1, %v6407_v6 }
  0xcd   :  { %v10229_v29 = vld [vmem:[%s15475_s1 + $0x186c] sm:$0xf0]  ;;  %v63_v50 = vld.sshfl [vmem:[#allocation1 + $0x20] sm:$0xff pattern:$0x73625140]  ;;  %v9254_v52 = vor.u32 %v10185_v23, %v9253_v17  ;;  %v6538_v17 = vor.u32 %v9503_v7, %v6535_v8 }
  0xce   :  { %v65_v51 = vld.sshfl [vmem:[#allocation1 + $0x30] sm:$0xff pattern:$0x73625140]  ;;  %v9430_v53 = vor.u32 %v10229_v29, %v9429_v25  ;;  %v64_v54 = vld.sshfl [vmem:[#allocation1 + $0x28] sm:$0xff pattern:$0x73625140]  ;;  %v11596_v5 = vpack.c.bf16 %v63_v50, %v63_v50  ;;  %v4874_v29 = vpop.f32.mrf.mxu2  ;;  %v4887_v46 = vpop.f32.mrf.mxu3 }
  0xcf   :  { %v66_v55 = vld.sshfl [vmem:[#allocation1 + $0x38] sm:$0xff pattern:$0x73625140]  ;;  %v9413_v61 = vld [vmem:[%s15475_s1 + $0x1840] sm:$0xf]  ;;  %5104 = vmatpush.bf16.msrb.mxu0 %v8870_v62  ;;  %5117 = vmatpush.bf16.msrb.mxu1 %v8998_v48  ;;  %v11607_v10 = vpack.c.bf16 %v65_v51, %v65_v51  ;;  %v11609_v11 = vpack.c.bf16 %v64_v54, %v64_v54 }
  0xd0   :  { %v10225_v0 = vld [vmem:[%s15475_s1 + $0x184c] sm:$0xf0]  ;;  %5130 = vmatpush.bf16.msrb.mxu2 %v9126_v49  ;;  %v9535_v12 = vld [vmem:[%s15475_s1 + $0x2c4] sm:$0xf]  ;;  %v6663_v13 = vld [vmem:[%s15475_s1 + $0x2d0] sm:$0xf0]  ;;  %5143 = vmatpush.bf16.msrb.mxu3 %v9254_v52  ;;  %v11617_v14 = vpack.c.bf16 %v66_v55, %v66_v55 }
  0xd1   :  { %v9414_v15 = vor.u32 %v10225_v0, %v9413_v61  ;;  %v9397_v20 = vld [vmem:[%s15475_s1 + $0x1820] sm:$0xf]  ;;  %v10221_v23 = vld [vmem:[%s15475_s1 + $0x182c] sm:$0xf0]  ;;  %v9467_v25 = vld [vmem:[%s15475_s1 + $0xa4] sm:$0xf]  ;;  %v6666_v31 = vor.u32 %v9535_v12, %v6663_v13  ;;  %v4898_v0 = vpop.f32.mrf.mxu0 }
  0xd2   :  { %5105 = vmatmul.bf16.vlgmr.msrb.gmra.mxu0 %v11596_v5  ;;  %v6391_v34 = vld [vmem:[%s15475_s1 + $0xb0] sm:$0xf0]  ;;  %v9499_v21 = vld [vmem:[%s15475_s1 + $0x1a4] sm:$0xf]  ;;  %5118 = vmatmul.bf16.vlgmr.msrb.gmra.mxu1 %v11609_v11  ;;  %v9398_v43 = vor.u32 %v10221_v23, %v9397_v20  ;;  %v9381_v63 = vld [vmem:[%s15475_s1 + $0x1800] sm:$0xf]  ;;  %v4899_v7 = vadd.f32 %v4898_v0, %v11594_v2 }
  0xd3   :  { %5153 = vmatpush.bf16.msra.mxu0 %v9430_v53  ;;  %5162 = vmatpush.bf16.msra.mxu1 %v6426_v57  ;;  %v6519_v60 = vld [vmem:[%s15475_s1 + $0x1b0] sm:$0xf0]  ;;  %v9531_v39 = vld [vmem:[%s15475_s1 + $0x2a4] sm:$0xf]  ;;  %v6394_v47 = vor.u32 %v9467_v25, %v6391_v34  ;;  %v10217_v49 = vld [vmem:[%s15475_s1 + $0x180c] sm:$0xf0]  ;;  %v4911_v8 = vpop.f32.mrf.mxu1 }
  0xd4   :  { %5175 = vmatpush.bf16.msra.mxu2 %v6554_v58  ;;  %5188 = vmatpush.bf16.msra.mxu3 %v6682_v4  ;;  %v6647_v62 = vld [vmem:[%s15475_s1 + $0x2b0] sm:$0xf0]  ;;  %v6522_v48 = vor.u32 %v9499_v21, %v6519_v60  ;;  %v9463_v50 = vld [vmem:[%s15475_s1 + $0x84] sm:$0xf]  ;;  %v9382_v61 = vor.u32 %v10217_v49, %v9381_v63  ;;  %v4912_v23 = vadd.f32 %v4911_v8, %v4899_v7 }
  0xd5   :  { %5131 = vmatmul.bf16.vlgmr.msrb.gmra.mxu2 %v11607_v10  ;;  %5144 = vmatmul.bf16.vlgmr.msrb.gmra.mxu3 %v11617_v14  ;;  %v6375_v51 = vld [vmem:[%s15475_s1 + $0x90] sm:$0xf0]  ;;  %v6650_v52 = vor.u32 %v9531_v39, %v6647_v62  ;;  %v9495_v53 = vld [vmem:[%s15475_s1 + $0x184] sm:$0xf] }
  0xd6   :  { %v6503_v54 = vld [vmem:[%s15475_s1 + $0x190] sm:$0xf0]  ;;  %v9527_v55 = vld [vmem:[%s15475_s1 + $0x284] sm:$0xf]  ;;  %v6378_v1 = vor.u32 %v9463_v50, %v6375_v51  ;;  %v4924_v60 = vpop.f32.mrf.mxu2 }
  0xd7   :  { %5154 = vmatpush.bf16.msra.mxu0 %v9414_v15  ;;  %5163 = vmatpush.bf16.msra.mxu1 %v6410_v16  ;;  %v6631_v56 = vld [vmem:[%s15475_s1 + $0x290] sm:$0xf0]  ;;  %v9571_v57 = vld [vmem:[%s15475_s1 + $0x3e4] sm:$0xf]  ;;  %v6506_v3 = vor.u32 %v9495_v53, %v6503_v54 }
  0xd8   :  { %5176 = vmatpush.bf16.msra.mxu2 %v6538_v17  ;;  %5189 = vmatpush.bf16.msra.mxu3 %v6666_v31  ;;  %v6807_v58 = vld [vmem:[%s15475_s1 + $0x3f0] sm:$0xf0]  ;;  %v9459_v4 = vld [vmem:[%s15475_s1 + $0x64] sm:$0xf]  ;;  %v6634_v9 = vor.u32 %v9527_v55, %v6631_v56 }
  0xd9   :  { %v6359_v6 = vld [vmem:[%s15475_s1 + $0x70] sm:$0xf0]  ;;  %v6810_v12 = vor.u32 %v9571_v57, %v6807_v58  ;;  %v9491_v13 = vld [vmem:[%s15475_s1 + $0x164] sm:$0xf]  ;;  %v4900_v54 = vpop.f32.mrf.mxu0 }
  0xda   :  { %v6487_v15 = vld [vmem:[%s15475_s1 + $0x170] sm:$0xf0]  ;;  %v9523_v16 = vld [vmem:[%s15475_s1 + $0x264] sm:$0xf]  ;;  %v6362_v29 = vor.u32 %v9459_v4, %v6359_v6 }
  0xdb   :  { %5155 = vmatpush.bf16.msra.mxu0 %v9398_v43  ;;  %5164 = vmatpush.bf16.msra.mxu1 %v6394_v47  ;;  %v6615_v2 = vld [vmem:[%s15475_s1 + $0x270] sm:$0xf0]  ;;  %v9567_v17 = vld [vmem:[%s15475_s1 + $0x3c4] sm:$0xf]  ;;  %v6490_v31 = vor.u32 %v9491_v13, %v6487_v15  ;;  %v4925_v47 = vadd.f32 %v4924_v60, %v4912_v23 }
  0xdc   :  { %5177 = vmatpush.bf16.msra.mxu2 %v6522_v48  ;;  %5190 = vmatpush.bf16.msra.mxu3 %v6650_v52  ;;  %v6791_v20 = vld [vmem:[%s15475_s1 + $0x3d0] sm:$0xf0]  ;;  %v68_v25 = vld.sshfl [vmem:[#allocation1] sm:$0xff pattern:$0x73625140]  ;;  %v6618_v39 = vor.u32 %v9523_v16, %v6615_v2  ;;  %v4937_v48 = vpop.f32.mrf.mxu3 }
  0xdd   :  { %v9455_v34 = vld [vmem:[%s15475_s1 + $0x44] sm:$0xf]  ;;  %v6343_v21 = vld [vmem:[%s15475_s1 + $0x50] sm:$0xf0]  ;;  %v6794_v62 = vor.u32 %v9567_v17, %v6791_v20  ;;  %v11717_v49 = vpack.c.bf16 %v68_v25, %v68_v25  ;;  %v11728_v53 = vadd.f32 %v4937_v48, %v4925_v47 }
  0xde   :  { %v9487_v43 = vld [vmem:[%s15475_s1 + $0x144] sm:$0xf]  ;;  %v6471_v63 = vld [vmem:[%s15475_s1 + $0x150] sm:$0xf0]  ;;  %v6346_v55 = vor.u32 %v9455_v34, %v6343_v21  ;;  %v4926_v17 = vpop.f32.mrf.mxu2 }
  0xdf   :  { %5156 = vmatpush.bf16.msra.mxu0 %v9382_v61  ;;  %5165 = vmatpush.bf16.msra.mxu1 %v6378_v1  ;;  %v9519_v46 = vld [vmem:[%s15475_s1 + $0x244] sm:$0xf]  ;;  %v6599_v50 = vld [vmem:[%s15475_s1 + $0x250] sm:$0xf0]  ;;  %v6474_v56 = vor.u32 %v9487_v43, %v6471_v63  ;;  %v4913_v61 = vpop.f32.mrf.mxu1 }
  0xe0   :  { %5178 = vmatpush.bf16.msra.mxu2 %v6506_v3  ;;  %5191 = vmatpush.bf16.msra.mxu3 %v6634_v9  ;;  %v9563_v51 = vld [vmem:[%s15475_s1 + $0x3a4] sm:$0xf]  ;;  %v6775_v52 = vld [vmem:[%s15475_s1 + $0x3b0] sm:$0xf0]  ;;  %v6602_v0 = vor.u32 %v9519_v46, %v6599_v50 }
  0xe1   :  { %v9451_v57 = vld [vmem:[%s15475_s1 + $0x24] sm:$0xf]  ;;  %v6327_v58 = vld [vmem:[%s15475_s1 + $0x30] sm:$0xf0]  ;;  %v6778_v1 = vor.u32 %v9563_v51, %v6775_v52 }
  0xe2   :  { %v9483_v3 = vld [vmem:[%s15475_s1 + $0x124] sm:$0xf]  ;;  %v6455_v4 = vld [vmem:[%s15475_s1 + $0x130] sm:$0xf0]  ;;  %9443 = vmatmul.msk.bf16.vlgmr.msra.gmra.mxu0 %vm4833_vm0, %v11717_v49 }
  0xe3   :  { %5201 = vmatpush.bf16.msrb.mxu0 %v6810_v12  ;;  %5166 = vmatpush.bf16.msra.mxu1 %v6362_v29  ;;  %v9515_v6 = vld [vmem:[%s15475_s1 + $0x224] sm:$0xf]  ;;  %v6583_v7 = vld [vmem:[%s15475_s1 + $0x230] sm:$0xf0]  ;;  %v6330_v12 = vor.u32 %v9451_v57, %v6327_v58  ;;  %v6458_v13 = vor.u32 %v9483_v3, %v6455_v4 }
  0xe4   :  { %5179 = vmatpush.bf16.msra.mxu2 %v6490_v31  ;;  %5192 = vmatpush.bf16.msra.mxu3 %v6618_v39  ;;  %v9559_v8 = vld [vmem:[%s15475_s1 + $0x384] sm:$0xf]  ;;  %v6759_v9 = vld [vmem:[%s15475_s1 + $0x390] sm:$0xf0]  ;;  %v6586_v20 = vor.u32 %v9515_v6, %v6583_v7  ;;  %v4939_v34 = vpop.f32.mrf.mxu3 }
  0xe5   :  { %v9447_v15 = vld [vmem:[%s15475_s1 + $0x4] sm:$0xf]  ;;  %v6311_v16 = vld [vmem:[%s15475_s1 + $0x10] sm:$0xf0]  ;;  %v6762_v23 = vor.u32 %v9559_v8, %v6759_v9 }
  0xe6   :  { %v9479_v2 = vld [vmem:[%s15475_s1 + $0x104] sm:$0xf]  ;;  %v6439_v25 = vld [vmem:[%s15475_s1 + $0x110] sm:$0xf0]  ;;  %v6314_v46 = vor.u32 %v9447_v15, %v6311_v16 }
  0xe7   :  { %5202 = vmatpush.bf16.msrb.mxu0 %v6794_v62  ;;  %5167 = vmatpush.bf16.msra.mxu1 %v6346_v55  ;;  %v9511_v29 = vld [vmem:[%s15475_s1 + $0x204] sm:$0xf]  ;;  %v6567_v31 = vld [vmem:[%s15475_s1 + $0x210] sm:$0xf0]  ;;  %v6442_v47 = vor.u32 %v9479_v2, %v6439_v25 }
  0xe8   :  { %5180 = vmatpush.bf16.msra.mxu2 %v6474_v56  ;;  %5193 = vmatpush.bf16.msra.mxu3 %v6602_v0  ;;  %v9555_v21 = vld [vmem:[%s15475_s1 + $0x364] sm:$0xf]  ;;  %v6743_v60 = vld [vmem:[%s15475_s1 + $0x370] sm:$0xf0]  ;;  %v6570_v51 = vor.u32 %v9511_v29, %v6567_v31 }
  0xe9   :  { %v9603_v39 = vld [vmem:[%s15475_s1 + $0x4e4] sm:$0xf]  ;;  %v6935_v62 = vld [vmem:[%s15475_s1 + $0x4f0] sm:$0xf0]  ;;  %v6746_v52 = vor.u32 %v9555_v21, %v6743_v60 }
  0xea   :  { %v9635_v43 = vld [vmem:[%s15475_s1 + $0x5e4] sm:$0xf]  ;;  %v7063_v63 = vld [vmem:[%s15475_s1 + $0x5f0] sm:$0xf0]  ;;  %v6938_v54 = vor.u32 %v9603_v39, %v6935_v62 }
  0xeb   :  { %5203 = vmatpush.bf16.msrb.mxu0 %v6778_v1  ;;  %5168 = vmatpush.bf16.msra.mxu1 %v6330_v12  ;;  %v9667_v48 = vld [vmem:[%s15475_s1 + $0x6e4] sm:$0xf]  ;;  %v7191_v50 = vld [vmem:[%s15475_s1 + $0x6f0] sm:$0xf0]  ;;  %v7066_v55 = vor.u32 %v9635_v43, %v7063_v63 }
  0xec   :  { %5181 = vmatpush.bf16.msra.mxu2 %v6458_v13  ;;  %5194 = vmatpush.bf16.msra.mxu3 %v6586_v20  ;;  %v9551_v56 = vld [vmem:[%s15475_s1 + $0x344] sm:$0xf]  ;;  %v6727_v57 = vld [vmem:[%s15475_s1 + $0x350] sm:$0xf0]  ;;  %v7194_v61 = vor.u32 %v9667_v48, %v7191_v50  ;;  %v4950_v48 = vpop.f32.mrf.mxu0 }
  0xed   :  { %v9599_v58 = vld [vmem:[%s15475_s1 + $0x4c4] sm:$0xf]  ;;  %v6919_v0 = vld [vmem:[%s15475_s1 + $0x4d0] sm:$0xf0]  ;;  %v6730_v7 = vor.u32 %v9551_v56, %v6727_v57  ;;  %v4963_v56 = vpop.f32.mrf.mxu1 }
  0xee   :  { %v9631_v1 = vld [vmem:[%s15475_s1 + $0x5c4] sm:$0xf]  ;;  %v7047_v3 = vld [vmem:[%s15475_s1 + $0x5d0] sm:$0xf0]  ;;  %v6922_v8 = vor.u32 %v9599_v58, %v6919_v0 }
  0xef   :  { %5204 = vmatpush.bf16.msrb.mxu0 %v6762_v23  ;;  %5169 = vmatpush.bf16.msra.mxu1 %v6314_v46  ;;  %v9663_v4 = vld [vmem:[%s15475_s1 + $0x6c4] sm:$0xf]  ;;  %v7175_v6 = vld [vmem:[%s15475_s1 + $0x6d0] sm:$0xf0]  ;;  %v7050_v9 = vor.u32 %v9631_v1, %v7047_v3 }
  0xf0   :  { %5182 = vmatpush.bf16.msra.mxu2 %v6442_v47  ;;  %5195 = vmatpush.bf16.msra.mxu3 %v6570_v51  ;;  %v9547_v12 = vld [vmem:[%s15475_s1 + $0x324] sm:$0xf]  ;;  %v6711_v13 = vld [vmem:[%s15475_s1 + $0x330] sm:$0xf0]  ;;  %v7178_v16 = vor.u32 %v9663_v4, %v7175_v6 }
  0xf1   :  { %v9595_v15 = vld [vmem:[%s15475_s1 + $0x4a4] sm:$0xf]  ;;  %v6903_v2 = vld [vmem:[%s15475_s1 + $0x4b0] sm:$0xf0]  ;;  %v6714_v29 = vor.u32 %v9547_v12, %v6711_v13 }
  0xf2   :  { %v9627_v17 = vld [vmem:[%s15475_s1 + $0x5a4] sm:$0xf]  ;;  %v7031_v20 = vld [vmem:[%s15475_s1 + $0x5b0] sm:$0xf0]  ;;  %5170 = vmatmul.bf16.vlgmr.msra.gmra.mxu1 %v10607_v27  ;;  %v6906_v34 = vor.u32 %v9595_v15, %v6903_v2 }
  0xf3   :  { %5205 = vmatpush.bf16.msrb.mxu0 %v6746_v52  ;;  %5214 = vmatpush.bf16.msrb.mxu1 %v6938_v54  ;;  %v9659_v23 = vld [vmem:[%s15475_s1 + $0x6a4] sm:$0xf]  ;;  %v7159_v25 = vld [vmem:[%s15475_s1 + $0x6b0] sm:$0xf0]  ;;  %v7034_v21 = vor.u32 %v9627_v17, %v7031_v20  ;;  %v4951_v54 = vadd.f32 %v4950_v48, %v11728_v53  ;;  %v4976_v20 = vpop.f32.mrf.mxu2 }
  0xf4   :  { %5227 = vmatpush.bf16.msrb.mxu2 %v7066_v55  ;;  %5240 = vmatpush.bf16.msrb.mxu3 %v7194_v61  ;;  %v9543_v31 = vld [vmem:[%s15475_s1 + $0x304] sm:$0xf]  ;;  %v6695_v60 = vld [vmem:[%s15475_s1 + $0x310] sm:$0xf0]  ;;  %v7162_v43 = vor.u32 %v9659_v23, %v7159_v25 }
  0xf5   :  { %5183 = vmatmul.bf16.vlgmr.msra.gmra.mxu2 %v10617_v33  ;;  %5196 = vmatmul.bf16.vlgmr.msra.gmra.mxu3 %v10605_v26  ;;  %v9591_v39 = vld [vmem:[%s15475_s1 + $0x484] sm:$0xf]  ;;  %v6887_v62 = vld [vmem:[%s15475_s1 + $0x490] sm:$0xf0]  ;;  %v6698_v55 = vor.u32 %v9543_v31, %v6695_v60  ;;  %v4964_v3 = vadd.f32 %v4963_v56, %v4951_v54 }
  0xf6   :  { %v9623_v63 = vld [vmem:[%s15475_s1 + $0x584] sm:$0xf]  ;;  %v7015_v46 = vld [vmem:[%s15475_s1 + $0x590] sm:$0xf0]  ;;  %v6890_v57 = vor.u32 %v9591_v39, %v6887_v62 }
  0xf7   :  { %5206 = vmatpush.bf16.msrb.mxu0 %v6730_v7  ;;  %5215 = vmatpush.bf16.msrb.mxu1 %v6922_v8  ;;  %v9655_v47 = vld [vmem:[%s15475_s1 + $0x684] sm:$0xf]  ;;  %v7143_v50 = vld [vmem:[%s15475_s1 + $0x690] sm:$0xf0]  ;;  %v7018_v58 = vor.u32 %v9623_v63, %v7015_v46  ;;  %v4965_v63 = vpop.f32.mrf.mxu1 }
  0xf8   :  { %5228 = vmatpush.bf16.msrb.mxu2 %v7050_v9  ;;  %5241 = vmatpush.bf16.msrb.mxu3 %v7178_v16  ;;  %v9699_v51 = vld [vmem:[%s15475_s1 + $0x7e4] sm:$0xf]  ;;  %v7319_v52 = vld [vmem:[%s15475_s1 + $0x7f0] sm:$0xf0]  ;;  %v7146_v1 = vor.u32 %v9655_v47, %v7143_v50 }
  0xf9   :  { %v9587_v61 = vld [vmem:[%s15475_s1 + $0x464] sm:$0xf]  ;;  %v6871_v0 = vld [vmem:[%s15475_s1 + $0x470] sm:$0xf0]  ;;  %v7322_v4 = vor.u32 %v9699_v51, %v7319_v52 }
  0xfa   :  { %v9619_v53 = vld [vmem:[%s15475_s1 + $0x564] sm:$0xf]  ;;  %v6999_v6 = vld [vmem:[%s15475_s1 + $0x570] sm:$0xf0]  ;;  %v6874_v13 = vor.u32 %v9587_v61, %v6871_v0 }
  0xfb   :  { %5207 = vmatpush.bf16.msrb.mxu0 %v6714_v29  ;;  %5216 = vmatpush.bf16.msrb.mxu1 %v6906_v34  ;;  %v9651_v7 = vld [vmem:[%s15475_s1 + $0x664] sm:$0xf]  ;;  %v7127_v8 = vld [vmem:[%s15475_s1 + $0x670] sm:$0xf0]  ;;  %v7002_v15 = vor.u32 %v9619_v53, %v6999_v6  ;;  %v4977_v34 = vadd.f32 %v4976_v20, %v4964_v3 }
  0xfc   :  { %5229 = vmatpush.bf16.msrb.mxu2 %v7034_v21  ;;  %5242 = vmatpush.bf16.msrb.mxu3 %v7162_v43  ;;  %v9695_v9 = vld [vmem:[%s15475_s1 + $0x7c4] sm:$0xf]  ;;  %v7303_v12 = vld [vmem:[%s15475_s1 + $0x7d0] sm:$0xf0]  ;;  %v7130_v17 = vor.u32 %v9651_v7, %v7127_v8  ;;  %v4989_v21 = vpop.f32.mrf.mxu3  ;;  %v4952_v43 = vpop.f32.mrf.mxu0 }
  0xfd   :  { %v9583_v16 = vld [vmem:[%s15475_s1 + $0x444] sm:$0xf]  ;;  %v6855_v2 = vld [vmem:[%s15475_s1 + $0x450] sm:$0xf0]  ;;  %v7306_v23 = vor.u32 %v9695_v9, %v7303_v12  ;;  %v11929_v46 = vadd.f32 %v4989_v21, %v4977_v34 }
  0xfe   :  { %v9615_v25 = vld [vmem:[%s15475_s1 + $0x544] sm:$0xf]  ;;  %v6983_v29 = vld [vmem:[%s15475_s1 + $0x550] sm:$0xf0]  ;;  %v6858_v47 = vor.u32 %v9583_v16, %v6855_v2 }
  0xff   :  { %5208 = vmatpush.bf16.msrb.mxu0 %v6698_v55  ;;  %5217 = vmatpush.bf16.msrb.mxu1 %v6890_v57  ;;  %v9647_v31 = vld [vmem:[%s15475_s1 + $0x644] sm:$0xf]  ;;  %v7111_v60 = vld [vmem:[%s15475_s1 + $0x650] sm:$0xf0]  ;;  %v6986_v48 = vor.u32 %v9615_v25, %v6983_v29 }
 0x100   :  { %5230 = vmatpush.bf16.msrb.mxu2 %v7018_v58  ;;  %5243 = vmatpush.bf16.msrb.mxu3 %v7146_v1  ;;  %v9691_v39 = vld [vmem:[%s15475_s1 + $0x7a4] sm:$0xf]  ;;  %v7287_v62 = vld [vmem:[%s15475_s1 + $0x7b0] sm:$0xf0]  ;;  %v7114_v52 = vor.u32 %v9647_v31, %v7111_v60 }
 0x101   :  { %v9579_v50 = vld [vmem:[%s15475_s1 + $0x424] sm:$0xf]  ;;  %v6839_v51 = vld [vmem:[%s15475_s1 + $0x430] sm:$0xf0]  ;;  %v7290_v54 = vor.u32 %v9691_v39, %v7287_v62 }
 0x102   :  { %5209 = vmatmul.bf16.vlgmr.msrb.gmra.mxu0 %v10615_v32  ;;  %v9611_v55 = vld [vmem:[%s15475_s1 + $0x524] sm:$0xf]  ;;  %v6967_v56 = vld [vmem:[%s15475_s1 + $0x530] sm:$0xf0]  ;;  %v6842_v1 = vor.u32 %v9579_v50, %v6839_v51 }
 0x103   :  { %5253 = vmatpush.bf16.msra.mxu0 %v7322_v4  ;;  %5218 = vmatpush.bf16.msrb.mxu1 %v6874_v13  ;;  %v9643_v57 = vld [vmem:[%s15475_s1 + $0x624] sm:$0xf]  ;;  %v7095_v58 = vld [vmem:[%s15475_s1 + $0x630] sm:$0xf0]  ;;  %v6970_v3 = vor.u32 %v9611_v55, %v6967_v56 }
 0x104   :  { %5231 = vmatpush.bf16.msrb.mxu2 %v7002_v15  ;;  %5244 = vmatpush.bf16.msrb.mxu3 %v7130_v17  ;;  %v9687_v61 = vld [vmem:[%s15475_s1 + $0x784] sm:$0xf]  ;;  %v7271_v0 = vld [vmem:[%s15475_s1 + $0x790] sm:$0xf0]  ;;  %v7098_v7 = vor.u32 %v9643_v57, %v7095_v58  ;;  %v4978_v15 = vpop.f32.mrf.mxu2  ;;  %v4991_v20 = vpop.f32.mrf.mxu3 }
 0x105   :  { %v9575_v4 = vld [vmem:[%s15475_s1 + $0x404] sm:$0xf]  ;;  %v6823_v53 = vld [vmem:[%s15475_s1 + $0x410] sm:$0xf0]  ;;  %v7274_v8 = vor.u32 %v9687_v61, %v7271_v0 }
 0x106   :  { %v9607_v6 = vld [vmem:[%s15475_s1 + $0x504] sm:$0xf]  ;;  %v6951_v9 = vld [vmem:[%s15475_s1 + $0x510] sm:$0xf0]  ;;  %v6826_v31 = vor.u32 %v9575_v4, %v6823_v53 }
 0x107   :  { %5254 = vmatpush.bf16.msra.mxu0 %v7306_v23  ;;  %5219 = vmatpush.bf16.msrb.mxu1 %v6858_v47  ;;  %v9639_v12 = vld [vmem:[%s15475_s1 + $0x604] sm:$0xf]  ;;  %v7079_v13 = vld [vmem:[%s15475_s1 + $0x610] sm:$0xf0]  ;;  %v6954_v34 = vor.u32 %v9607_v6, %v6951_v9 }
 0x108   :  { %5232 = vmatpush.bf16.msrb.mxu2 %v6986_v48  ;;  %5245 = vmatpush.bf16.msrb.mxu3 %v7114_v52  ;;  %v9683_v16 = vld [vmem:[%s15475_s1 + $0x764] sm:$0xf]  ;;  %v7255_v2 = vld [vmem:[%s15475_s1 + $0x770] sm:$0xf0]  ;;  %v7082_v39 = vor.u32 %v9639_v12, %v7079_v13 }
 0x109   :  { %v9731_v17 = vld [vmem:[%s15475_s1 + $0x8e4] sm:$0xf]  ;;  %v7447_v23 = vld [vmem:[%s15475_s1 + $0x8f0] sm:$0xf0]  ;;  %v7258_v62 = vor.u32 %v9683_v16, %v7255_v2 }
 0x10a   :  { %v9763_v25 = vld [vmem:[%s15475_s1 + $0x9e4] sm:$0xf]  ;;  %v7575_v29 = vld [vmem:[%s15475_s1 + $0x9f0] sm:$0xf0]  ;;  %v7450_v43 = vor.u32 %v9731_v17, %v7447_v23 }
 0x10b   :  { %5255 = vmatpush.bf16.msra.mxu0 %v7290_v54  ;;  %5220 = vmatpush.bf16.msrb.mxu1 %v6842_v1  ;;  %v9795_v21 = vld [vmem:[%s15475_s1 + $0xae4] sm:$0xf]  ;;  %v7703_v60 = vld [vmem:[%s15475_s1 + $0xaf0] sm:$0xf0]  ;;  %v7578_v63 = vor.u32 %v9763_v25, %v7575_v29 }
 0x10c   :  { %5233 = vmatpush.bf16.msrb.mxu2 %v6970_v3  ;;  %5246 = vmatpush.bf16.msrb.mxu3 %v7098_v7  ;;  %v9679_v47 = vld [vmem:[%s15475_s1 + $0x744] sm:$0xf]  ;;  %v7239_v48 = vld [vmem:[%s15475_s1 + $0x750] sm:$0xf0]  ;;  %v7706_v51 = vor.u32 %v9795_v21, %v7703_v60 }
 0x10d   :  { %v9727_v50 = vld [vmem:[%s15475_s1 + $0x8c4] sm:$0xf]  ;;  %v7431_v52 = vld [vmem:[%s15475_s1 + $0x8d0] sm:$0xf0]  ;;  %v7242_v58 = vor.u32 %v9679_v47, %v7239_v48 }
 0x10e   :  { %v9759_v54 = vld [vmem:[%s15475_s1 + $0x9c4] sm:$0xf]  ;;  %v7559_v55 = vld [vmem:[%s15475_s1 + $0x9d0] sm:$0xf0]  ;;  %v7434_v61 = vor.u32 %v9727_v50, %v7431_v52 }
 0x10f   :  { %5256 = vmatpush.bf16.msra.mxu0 %v7274_v8  ;;  %5221 = vmatpush.bf16.msrb.mxu1 %v6826_v31  ;;  %v9791_v56 = vld [vmem:[%s15475_s1 + $0xac4] sm:$0xf]  ;;  %v7687_v57 = vld [vmem:[%s15475_s1 + $0xad0] sm:$0xf0]  ;;  %v7562_v0 = vor.u32 %v9759_v54, %v7559_v55  ;;  %v5002_v21 = vpop.f32.mrf.mxu0  ;;  %v5015_v47 = vpop.f32.mrf.mxu1 }
 0x110   :  { %5234 = vmatpush.bf16.msrb.mxu2 %v6954_v34  ;;  %5247 = vmatpush.bf16.msrb.mxu3 %v7082_v39  ;;  %v9675_v1 = vld [vmem:[%s15475_s1 + $0x724] sm:$0xf]  ;;  %v7223_v3 = vld [vmem:[%s15475_s1 + $0x730] sm:$0xf0]  ;;  %v7690_v53 = vor.u32 %v9791_v56, %v7687_v57 }
 0x111   :  { %v9723_v4 = vld [vmem:[%s15475_s1 + $0x8a4] sm:$0xf]  ;;  %v7415_v6 = vld [vmem:[%s15475_s1 + $0x8b0] sm:$0xf0]  ;;  %v7226_v13 = vor.u32 %v9675_v1, %v7223_v3 }
 0x112   :  { %v9755_v7 = vld [vmem:[%s15475_s1 + $0x9a4] sm:$0xf]  ;;  %v7543_v8 = vld [vmem:[%s15475_s1 + $0x9b0] sm:$0xf0]  ;;  %5222 = vmatmul.bf16.vlgmr.msrb.gmra.mxu1 %v10751_v41  ;;  %v7418_v16 = vor.u32 %v9723_v4, %v7415_v6 }
 0x113   :  { %5257 = vmatpush.bf16.msra.mxu0 %v7258_v62  ;;  %5266 = vmatpush.bf16.msra.mxu1 %v7450_v43  ;;  %v9787_v9 = vld [vmem:[%s15475_s1 + $0xaa4] sm:$0xf]  ;;  %v7671_v12 = vld [vmem:[%s15475_s1 + $0xab0] sm:$0xf0]  ;;  %v7546_v2 = vor.u32 %v9755_v7, %v7543_v8  ;;  %v5003_v43 = vadd.f32 %v5002_v21, %v11929_v46 }
 0x114   :  { %5279 = vmatpush.bf16.msra.mxu2 %v7578_v63  ;;  %5292 = vmatpush.bf16.msra.mxu3 %v7706_v51  ;;  %v9671_v15 = vld [vmem:[%s15475_s1 + $0x704] sm:$0xf]  ;;  %v7207_v17 = vld [vmem:[%s15475_s1 + $0x710] sm:$0xf0]  ;;  %v7674_v25 = vor.u32 %v9787_v9, %v7671_v12 }
 0x115   :  { %5235 = vmatmul.bf16.vlgmr.msrb.gmra.mxu2 %v10755_v44  ;;  %5248 = vmatmul.bf16.vlgmr.msrb.gmra.mxu3 %v10743_v38  ;;  %v9719_v20 = vld [vmem:[%s15475_s1 + $0x884] sm:$0xf]  ;;  %v7399_v23 = vld [vmem:[%s15475_s1 + $0x890] sm:$0xf0]  ;;  %v7210_v63 = vor.u32 %v9671_v15, %v7207_v17  ;;  %v5016_v55 = vadd.f32 %v5015_v47, %v5003_v43 }
 0x116   :  { %v9751_v29 = vld [vmem:[%s15475_s1 + $0x984] sm:$0xf]  ;;  %v7527_v31 = vld [vmem:[%s15475_s1 + $0x990] sm:$0xf0]  ;;  %v7402_v48 = vor.u32 %v9719_v20, %v7399_v23 }
 0x117   :  { %5258 = vmatpush.bf16.msra.mxu0 %v7242_v58  ;;  %5267 = vmatpush.bf16.msra.mxu1 %v7434_v61  ;;  %v9783_v34 = vld [vmem:[%s15475_s1 + $0xa84] sm:$0xf]  ;;  %v7655_v60 = vld [vmem:[%s15475_s1 + $0xa90] sm:$0xf0]  ;;  %v7530_v50 = vor.u32 %v9751_v29, %v7527_v31  ;;  %v5017_v29 = vpop.f32.mrf.mxu1 }
 0x118   :  { %5280 = vmatpush.bf16.msra.mxu2 %v7562_v0  ;;  %5293 = vmatpush.bf16.msra.mxu3 %v7690_v53  ;;  %v9827_v39 = vld [vmem:[%s15475_s1 + $0xbe4] sm:$0xf]  ;;  %v7831_v62 = vld [vmem:[%s15475_s1 + $0xbf0] sm:$0xf0]  ;;  %v7658_v54 = vor.u32 %v9783_v34, %v7655_v60  ;;  %v5028_v8 = vpop.f32.mrf.mxu2 }
 0x119   :  { %v9715_v51 = vld [vmem:[%s15475_s1 + $0x864] sm:$0xf]  ;;  %v7383_v52 = vld [vmem:[%s15475_s1 + $0x870] sm:$0xf0]  ;;  %v7834_v56 = vor.u32 %v9827_v39, %v7831_v62 }
 0x11a   :  { %v9747_v46 = vld [vmem:[%s15475_s1 + $0x964] sm:$0xf]  ;;  %v7511_v57 = vld [vmem:[%s15475_s1 + $0x970] sm:$0xf0]  ;;  %v7386_v3 = vor.u32 %v9715_v51, %v7383_v52 }
 0x11b   :  { %5259 = vmatpush.bf16.msra.mxu0 %v7226_v13  ;;  %5268 = vmatpush.bf16.msra.mxu1 %v7418_v16  ;;  %v9779_v58 = vld [vmem:[%s15475_s1 + $0xa64] sm:$0xf]  ;;  %v7639_v61 = vld [vmem:[%s15475_s1 + $0xa70] sm:$0xf0]  ;;  %v7514_v4 = vor.u32 %v9747_v46, %v7511_v57  ;;  %v5029_v16 = vadd.f32 %v5028_v8, %v5016_v55 }
 0x11c   :  { %5281 = vmatpush.bf16.msra.mxu2 %v7546_v2  ;;  %5294 = vmatpush.bf16.msra.mxu3 %v7674_v25  ;;  %v9823_v0 = vld [vmem:[%s15475_s1 + $0xbc4] sm:$0xf]  ;;  %v7815_v1 = vld [vmem:[%s15475_s1 + $0xbd0] sm:$0xf0]  ;;  %v7642_v7 = vor.u32 %v9779_v58, %v7639_v61  ;;  %v5041_v2 = vpop.f32.mrf.mxu3  ;;  %v5004_v25 = vpop.f32.mrf.mxu0 }
 0x11d   :  { %v9711_v53 = vld [vmem:[%s15475_s1 + $0x844] sm:$0xf]  ;;  %v7367_v6 = vld [vmem:[%s15475_s1 + $0x850] sm:$0xf0]  ;;  %v7818_v9 = vor.u32 %v9823_v0, %v7815_v1  ;;  %v12128_v31 = vadd.f32 %v5041_v2, %v5029_v16 }
 0x11e   :  { %v9743_v12 = vld [vmem:[%s15475_s1 + $0x944] sm:$0xf]  ;;  %v7495_v13 = vld [vmem:[%s15475_s1 + $0x950] sm:$0xf0]  ;;  %v7370_v34 = vor.u32 %v9711_v53, %v7367_v6 }
 0x11f   :  { %5260 = vmatpush.bf16.msra.mxu0 %v7210_v63  ;;  %5269 = vmatpush.bf16.msra.mxu1 %v7402_v48  ;;  %v9775_v15 = vld [vmem:[%s15475_s1 + $0xa44] sm:$0xf]  ;;  %v7623_v17 = vld [vmem:[%s15475_s1 + $0xa50] sm:$0xf0]  ;;  %v7498_v21 = vor.u32 %v9743_v12, %v7495_v13 }
 0x120   :  { %5282 = vmatpush.bf16.msra.mxu2 %v7530_v50  ;;  %5295 = vmatpush.bf16.msra.mxu3 %v7658_v54  ;;  %v9819_v20 = vld [vmem:[%s15475_s1 + $0xba4] sm:$0xf]  ;;  %v7799_v23 = vld [vmem:[%s15475_s1 + $0xbb0] sm:$0xf0]  ;;  %v7626_v62 = vor.u32 %v9775_v15, %v7623_v17 }
 0x121   :  { %v9707_v60 = vld [vmem:[%s15475_s1 + $0x824] sm:$0xf]  ;;  %v7351_v39 = vld [vmem:[%s15475_s1 + $0x830] sm:$0xf0]  ;;  %v7802_v43 = vor.u32 %v9819_v20, %v7799_v23 }
 0x122   :  { %5261 = vmatmul.bf16.vlgmr.msra.gmra.mxu0 %v10753_v42  ;;  %v9739_v63 = vld [vmem:[%s15475_s1 + $0x924] sm:$0xf]  ;;  %v7479_v47 = vld [vmem:[%s15475_s1 + $0x930] sm:$0xf0]  ;;  %v7354_v54 = vor.u32 %v9707_v60, %v7351_v39 }
 0x123   :  { %5305 = vmatpush.bf16.msrb.mxu0 %v7834_v56  ;;  %5270 = vmatpush.bf16.msra.mxu1 %v7386_v3  ;;  %v9771_v48 = vld [vmem:[%s15475_s1 + $0xa24] sm:$0xf]  ;;  %v7607_v50 = vld [vmem:[%s15475_s1 + $0xa30] sm:$0xf0]  ;;  %v7482_v55 = vor.u32 %v9739_v63, %v7479_v47 }
 0x124   :  { %5283 = vmatpush.bf16.msra.mxu2 %v7514_v4  ;;  %5296 = vmatpush.bf16.msra.mxu3 %v7642_v7  ;;  %v9815_v51 = vld [vmem:[%s15475_s1 + $0xb84] sm:$0xf]  ;;  %v7783_v52 = vld [vmem:[%s15475_s1 + $0xb90] sm:$0xf0]  ;;  %v7610_v58 = vor.u32 %v9771_v48, %v7607_v50  ;;  %v5030_v4 = vpop.f32.mrf.mxu2  ;;  %v5043_v8 = vpop.f32.mrf.mxu3 }
 0x125   :  { %v9703_v56 = vld [vmem:[%s15475_s1 + $0x804] sm:$0xf]  ;;  %v7335_v46 = vld [vmem:[%s15475_s1 + $0x810] sm:$0xf0]  ;;  %v7786_v61 = vor.u32 %v9815_v51, %v7783_v52 }
 0x126   :  { %v9735_v57 = vld [vmem:[%s15475_s1 + $0x904] sm:$0xf]  ;;  %v7463_v0 = vld [vmem:[%s15475_s1 + $0x910] sm:$0xf0]  ;;  %v7338_v15 = vor.u32 %v9703_v56, %v7335_v46 }
 0x127   :  { %5306 = vmatpush.bf16.msrb.mxu0 %v7818_v9  ;;  %5271 = vmatpush.bf16.msra.mxu1 %v7370_v34  ;;  %v9767_v1 = vld [vmem:[%s15475_s1 + $0xa04] sm:$0xf]  ;;  %v7591_v3 = vld [vmem:[%s15475_s1 + $0xa10] sm:$0xf0]  ;;  %v7466_v16 = vor.u32 %v9735_v57, %v7463_v0 }
 0x128   :  { %5284 = vmatpush.bf16.msra.mxu2 %v7498_v21  ;;  %5297 = vmatpush.bf16.msra.mxu3 %v7626_v62  ;;  %v9811_v53 = vld [vmem:[%s15475_s1 + $0xb64] sm:$0xf]  ;;  %v7767_v6 = vld [vmem:[%s15475_s1 + $0xb70] sm:$0xf0]  ;;  %v7594_v20 = vor.u32 %v9767_v1, %v7591_v3 }
 0x129   :  { %v9859_v7 = vld [vmem:[%s15475_s1 + $0xce4] sm:$0xf]  ;;  %v7959_v9 = vld [vmem:[%s15475_s1 + $0xcf0] sm:$0xf0]  ;;  %v7770_v23 = vor.u32 %v9811_v53, %v7767_v6 }
 0x12a   :  { %v9891_v12 = vld [vmem:[%s15475_s1 + $0xde4] sm:$0xf]  ;;  %v8087_v13 = vld [vmem:[%s15475_s1 + $0xdf0] sm:$0xf0]  ;;  %v7962_v25 = vor.u32 %v9859_v7, %v7959_v9 }
 0x12b   :  { %5307 = vmatpush.bf16.msrb.mxu0 %v7802_v43  ;;  %5272 = vmatpush.bf16.msra.mxu1 %v7354_v54  ;;  %v9923_v2 = vld [vmem:[%s15475_s1 + $0xee4] sm:$0xf]  ;;  %v8215_v17 = vld [vmem:[%s15475_s1 + $0xef0] sm:$0xf0]  ;;  %v8090_v29 = vor.u32 %v9891_v12, %v8087_v13 }
 0x12c   :  { %5285 = vmatpush.bf16.msra.mxu2 %v7482_v55  ;;  %5298 = vmatpush.bf16.msra.mxu3 %v7610_v58  ;;  %v9807_v34 = vld [vmem:[%s15475_s1 + $0xb44] sm:$0xf]  ;;  %v7751_v21 = vld [vmem:[%s15475_s1 + $0xb50] sm:$0xf0]  ;;  %v8218_v39 = vor.u32 %v9923_v2, %v8215_v17 }
 0x12d   :  { %v9855_v60 = vld [vmem:[%s15475_s1 + $0xcc4] sm:$0xf]  ;;  %v7943_v62 = vld [vmem:[%s15475_s1 + $0xcd0] sm:$0xf0]  ;;  %v7754_v50 = vor.u32 %v9807_v34, %v7751_v21 }
 0x12e   :  { %v9887_v43 = vld [vmem:[%s15475_s1 + $0xdc4] sm:$0xf]  ;;  %v8071_v63 = vld [vmem:[%s15475_s1 + $0xdd0] sm:$0xf0]  ;;  %v7946_v51 = vor.u32 %v9855_v60, %v7943_v62 }
 0x12f   :  { %5308 = vmatpush.bf16.msrb.mxu0 %v7786_v61  ;;  %5273 = vmatpush.bf16.msra.mxu1 %v7338_v15  ;;  %v9919_v47 = vld [vmem:[%s15475_s1 + $0xec4] sm:$0xf]  ;;  %v8199_v48 = vld [vmem:[%s15475_s1 + $0xed0] sm:$0xf0]  ;;  %v8074_v52 = vor.u32 %v9887_v43, %v8071_v63  ;;  %v5054_v2 = vpop.f32.mrf.mxu0  ;;  %v5067_v34 = vpop.f32.mrf.mxu1 }
 0x130   :  { %5286 = vmatpush.bf16.msra.mxu2 %v7466_v16  ;;  %5299 = vmatpush.bf16.msra.mxu3 %v7594_v20  ;;  %v9803_v54 = vld [vmem:[%s15475_s1 + $0xb24] sm:$0xf]  ;;  %v7735_v55 = vld [vmem:[%s15475_s1 + $0xb30] sm:$0xf0]  ;;  %v8202_v46 = vor.u32 %v9919_v47, %v8199_v48 }
 0x131   :  { %v9851_v56 = vld [vmem:[%s15475_s1 + $0xca4] sm:$0xf]  ;;  %v7927_v57 = vld [vmem:[%s15475_s1 + $0xcb0] sm:$0xf0]  ;;  %v7738_v3 = vor.u32 %v9803_v54, %v7735_v55 }
 0x132   :  { %5274 = vmatmul.bf16.vlgmr.msra.gmra.mxu1 %v10951_v24  ;;  %v9883_v58 = vld [vmem:[%s15475_s1 + $0xda4] sm:$0xf]  ;;  %v8055_v61 = vld [vmem:[%s15475_s1 + $0xdb0] sm:$0xf0]  ;;  %v7930_v53 = vor.u32 %v9851_v56, %v7927_v57 }
 0x133   :  { %5309 = vmatpush.bf16.msrb.mxu0 %v7770_v23  ;;  %5318 = vmatpush.bf16.msrb.mxu1 %v7962_v25  ;;  %v9915_v0 = vld [vmem:[%s15475_s1 + $0xea4] sm:$0xf]  ;;  %v8183_v1 = vld [vmem:[%s15475_s1 + $0xeb0] sm:$0xf0]  ;;  %v8058_v6 = vor.u32 %v9883_v58, %v8055_v61  ;;  %v5055_v25 = vadd.f32 %v5054_v2, %v12128_v31 }
 0x134   :  { %5331 = vmatpush.bf16.msrb.mxu2 %v8090_v29  ;;  %5344 = vmatpush.bf16.msrb.mxu3 %v8218_v39  ;;  %v9799_v4 = vld [vmem:[%s15475_s1 + $0xb04] sm:$0xf]  ;;  %v7719_v7 = vld [vmem:[%s15475_s1 + $0xb10] sm:$0xf0]  ;;  %v8186_v12 = vor.u32 %v9915_v0, %v8183_v1 }
 0x135   :  { %5287 = vmatmul.bf16.vlgmr.msra.gmra.mxu2 %v10968_v18  ;;  %5300 = vmatmul.bf16.vlgmr.msra.gmra.mxu3 %v10964_v30  ;;  %v9847_v8 = vld [vmem:[%s15475_s1 + $0xc84] sm:$0xf]  ;;  %v7911_v9 = vld [vmem:[%s15475_s1 + $0xc90] sm:$0xf0]  ;;  %v7722_v29 = vor.u32 %v9799_v4, %v7719_v7  ;;  %v5068_v63 = vadd.f32 %v5067_v34, %v5055_v25 }
 0x136   :  { %v9879_v13 = vld [vmem:[%s15475_s1 + $0xd84] sm:$0xf]  ;;  %v8039_v15 = vld [vmem:[%s15475_s1 + $0xd90] sm:$0xf0]  ;;  %v7914_v21 = vor.u32 %v9847_v8, %v7911_v9 }
 0x137   :  { %5310 = vmatpush.bf16.msrb.mxu0 %v7754_v50  ;;  %5319 = vmatpush.bf16.msrb.mxu1 %v7946_v51  ;;  %v9911_v16 = vld [vmem:[%s15475_s1 + $0xe84] sm:$0xf]  ;;  %v8167_v17 = vld [vmem:[%s15475_s1 + $0xe90] sm:$0xf0]  ;;  %v8042_v60 = vor.u32 %v9879_v13, %v8039_v15  ;;  %v5069_v13 = vpop.f32.mrf.mxu1 }
 0x138   :  { %5332 = vmatpush.bf16.msrb.mxu2 %v8074_v52  ;;  %5345 = vmatpush.bf16.msrb.mxu3 %v8202_v46  ;;  %v9955_v20 = vld [vmem:[%s15475_s1 + $0xfe4] sm:$0xf]  ;;  %v8343_v23 = vld [vmem:[%s15475_s1 + $0xff0] sm:$0xf0]  ;;  %v8170_v43 = vor.u32 %v9911_v16, %v8167_v17  ;;  %v5080_v61 = vpop.f32.mrf.mxu2 }
 0x139   :  { %v9843_v39 = vld [vmem:[%s15475_s1 + $0xc64] sm:$0xf]  ;;  %v7895_v62 = vld [vmem:[%s15475_s1 + $0xc70] sm:$0xf0]  ;;  %v8346_v47 = vor.u32 %v9955_v20, %v8343_v23 }
 0x13a   :  { %v9875_v31 = vld [vmem:[%s15475_s1 + $0xd64] sm:$0xf]  ;;  %v8023_v48 = vld [vmem:[%s15475_s1 + $0xd70] sm:$0xf0]  ;;  %v7898_v55 = vor.u32 %v9843_v39, %v7895_v62 }
 0x13b   :  { %5311 = vmatpush.bf16.msrb.mxu0 %v7738_v3  ;;  %5320 = vmatpush.bf16.msrb.mxu1 %v7930_v53  ;;  %v9907_v50 = vld [vmem:[%s15475_s1 + $0xe64] sm:$0xf]  ;;  %v8151_v51 = vld [vmem:[%s15475_s1 + $0xe70] sm:$0xf0]  ;;  %v8026_v56 = vor.u32 %v9875_v31, %v8023_v48  ;;  %v5081_v53 = vadd.f32 %v5080_v61, %v5068_v63 }
 0x13c   :  { %5333 = vmatpush.bf16.msrb.mxu2 %v8058_v6  ;;  %5346 = vmatpush.bf16.msrb.mxu3 %v8186_v12  ;;  %v9951_v52 = vld [vmem:[%s15475_s1 + $0xfc4] sm:$0xf]  ;;  %v8327_v54 = vld [vmem:[%s15475_s1 + $0xfd0] sm:$0xf0]  ;;  %v8154_v58 = vor.u32 %v9907_v50, %v8151_v51  ;;  %v5093_v6 = vpop.f32.mrf.mxu3  ;;  %v5056_v12 = vpop.f32.mrf.mxu0 }
 0x13d   :  { %v9839_v46 = vld [vmem:[%s15475_s1 + $0xc44] sm:$0xf]  ;;  %v7879_v57 = vld [vmem:[%s15475_s1 + $0xc50] sm:$0xf0]  ;;  %v8330_v0 = vor.u32 %v9951_v52, %v8327_v54  ;;  %v12327_v15 = vadd.f32 %v5093_v6, %v5081_v53 }
 0x13e   :  { %v9871_v1 = vld [vmem:[%s15475_s1 + $0xd44] sm:$0xf]  ;;  %v8007_v3 = vld [vmem:[%s15475_s1 + $0xd50] sm:$0xf0]  ;;  %v7882_v16 = vor.u32 %v9839_v46, %v7879_v57 }
 0x13f   :  { %5312 = vmatpush.bf16.msrb.mxu0 %v7722_v29  ;;  %5321 = vmatpush.bf16.msrb.mxu1 %v7914_v21  ;;  %v9903_v4 = vld [vmem:[%s15475_s1 + $0xe44] sm:$0xf]  ;;  %v8135_v7 = vld [vmem:[%s15475_s1 + $0xe50] sm:$0xf0]  ;;  %v8010_v2 = vor.u32 %v9871_v1, %v8007_v3 }
 0x140   :  { %5334 = vmatpush.bf16.msrb.mxu2 %v8042_v60  ;;  %5347 = vmatpush.bf16.msrb.mxu3 %v8170_v43  ;;  %v9947_v8 = vld [vmem:[%s15475_s1 + $0xfa4] sm:$0xf]  ;;  %v8311_v9 = vld [vmem:[%s15475_s1 + $0xfb0] sm:$0xf0]  ;;  %v8138_v23 = vor.u32 %v9903_v4, %v8135_v7 }
 0x141   :  { %v9835_v17 = vld [vmem:[%s15475_s1 + $0xc24] sm:$0xf]  ;;  %v7863_v20 = vld [vmem:[%s15475_s1 + $0xc30] sm:$0xf0]  ;;  %v8314_v25 = vor.u32 %v9947_v8, %v8311_v9 }
 0x142   :  { %5313 = vmatmul.bf16.vlgmr.msrb.gmra.mxu0 %v10978_v35  ;;  %v9867_v29 = vld [vmem:[%s15475_s1 + $0xd24] sm:$0xf]  ;;  %v7991_v34 = vld [vmem:[%s15475_s1 + $0xd30] sm:$0xf0]  ;;  %v7866_v43 = vor.u32 %v9835_v17, %v7863_v20 }
 0x143   :  { %5357 = vmatpush.bf16.msra.mxu0 %v8346_v47  ;;  %5322 = vmatpush.bf16.msrb.mxu1 %v7898_v55  ;;  %v9899_v21 = vld [vmem:[%s15475_s1 + $0xe24] sm:$0xf]  ;;  %v8119_v60 = vld [vmem:[%s15475_s1 + $0xe30] sm:$0xf0]  ;;  %v7994_v63 = vor.u32 %v9867_v29, %v7991_v34 }
 0x144   :  { %5335 = vmatpush.bf16.msrb.mxu2 %v8026_v56  ;;  %5348 = vmatpush.bf16.msrb.mxu3 %v8154_v58  ;;  %v9943_v39 = vld [vmem:[%s15475_s1 + $0xf84] sm:$0xf]  ;;  %v8295_v62 = vld [vmem:[%s15475_s1 + $0xf90] sm:$0xf0]  ;;  %v8122_v50 = vor.u32 %v9899_v21, %v8119_v60  ;;  %v5082_v56 = vpop.f32.mrf.mxu2  ;;  %v5095_v61 = vpop.f32.mrf.mxu3 }
 0x145   :  { %v9831_v47 = vld [vmem:[%s15475_s1 + $0xc04] sm:$0xf]  ;;  %v7847_v31 = vld [vmem:[%s15475_s1 + $0xc10] sm:$0xf0]  ;;  %v8298_v51 = vor.u32 %v9943_v39, %v8295_v62 }
 0x146   :  { %v9863_v48 = vld [vmem:[%s15475_s1 + $0xd04] sm:$0xf]  ;;  %v7975_v52 = vld [vmem:[%s15475_s1 + $0xd10] sm:$0xf0]  ;;  %v7850_v4 = vor.u32 %v9831_v47, %v7847_v31 }
 0x147   :  { %5358 = vmatpush.bf16.msra.mxu0 %v8330_v0  ;;  %5323 = vmatpush.bf16.msrb.mxu1 %v7882_v16  ;;  %v9895_v54 = vld [vmem:[%s15475_s1 + $0xe04] sm:$0xf]  ;;  %v8103_v55 = vld [vmem:[%s15475_s1 + $0xe10] sm:$0xf0]  ;;  %v7978_v53 = vor.u32 %v9863_v48, %v7975_v52 }
 0x148   :  { %5336 = vmatpush.bf16.msrb.mxu2 %v8010_v2  ;;  %5349 = vmatpush.bf16.msrb.mxu3 %v8138_v23  ;;  %v9939_v46 = vld [vmem:[%s15475_s1 + $0xf64] sm:$0xf]  ;;  %v8279_v57 = vld [vmem:[%s15475_s1 + $0xf70] sm:$0xf0]  ;;  %v8106_v8 = vor.u32 %v9895_v54, %v8103_v55 }
 0x149   :  { %v9987_v58 = vld [vmem:[%s15475_s1 + $0x10e4] sm:$0xf]  ;;  %v8471_v0 = vld [vmem:[%s15475_s1 + $0x10f0] sm:$0xf0]  ;;  %v8282_v9 = vor.u32 %v9939_v46, %v8279_v57 }
 0x14a   :  { %v10019_v1 = vld [vmem:[%s15475_s1 + $0x11e4] sm:$0xf]  ;;  %v8599_v3 = vld [vmem:[%s15475_s1 + $0x11f0] sm:$0xf0]  ;;  %v8474_v12 = vor.u32 %v9987_v58, %v8471_v0 }
 0x14b   :  { %5359 = vmatpush.bf16.msra.mxu0 %v8314_v25  ;;  %5324 = vmatpush.bf16.msrb.mxu1 %v7866_v43  ;;  %v10051_v6 = vld [vmem:[%s15475_s1 + $0x12e4] sm:$0xf]  ;;  %v8727_v7 = vld [vmem:[%s15475_s1 + $0x12f0] sm:$0xf0]  ;;  %v8602_v13 = vor.u32 %v10019_v1, %v8599_v3 }
 0x14c   :  { %5337 = vmatpush.bf16.msrb.mxu2 %v7994_v63  ;;  %5350 = vmatpush.bf16.msrb.mxu3 %v8122_v50  ;;  %v9935_v16 = vld [vmem:[%s15475_s1 + $0xf44] sm:$0xf]  ;;  %v8263_v2 = vld [vmem:[%s15475_s1 + $0xf50] sm:$0xf0]  ;;  %v8730_v20 = vor.u32 %v10051_v6, %v8727_v7 }
 0x14d   :  { %v9983_v17 = vld [vmem:[%s15475_s1 + $0x10c4] sm:$0xf]  ;;  %v8455_v23 = vld [vmem:[%s15475_s1 + $0x10d0] sm:$0xf0]  ;;  %v8266_v60 = vor.u32 %v9935_v16, %v8263_v2 }
 0x14e   :  { %v10015_v25 = vld [vmem:[%s15475_s1 + $0x11c4] sm:$0xf]  ;;  %v8583_v29 = vld [vmem:[%s15475_s1 + $0x11d0] sm:$0xf0]  ;;  %v8458_v39 = vor.u32 %v9983_v17, %v8455_v23 }
 0x14f   :  { %5360 = vmatpush.bf16.msra.mxu0 %v8298_v51  ;;  %5325 = vmatpush.bf16.msrb.mxu1 %v7850_v4  ;;  %v10047_v34 = vld [vmem:[%s15475_s1 + $0x12c4] sm:$0xf]  ;;  %v8711_v21 = vld [vmem:[%s15475_s1 + $0x12d0] sm:$0xf0]  ;;  %v8586_v62 = vor.u32 %v10015_v25, %v8583_v29  ;;  %v5106_v6 = vpop.f32.mrf.mxu0  ;;  %v5119_v16 = vpop.f32.mrf.mxu1 }
 0x150   :  { %5338 = vmatpush.bf16.msrb.mxu2 %v7978_v53  ;;  %5351 = vmatpush.bf16.msrb.mxu3 %v8106_v8  ;;  %v9931_v43 = vld [vmem:[%s15475_s1 + $0xf24] sm:$0xf]  ;;  %v8247_v63 = vld [vmem:[%s15475_s1 + $0xf30] sm:$0xf0]  ;;  %v8714_v31 = vor.u32 %v10047_v34, %v8711_v21 }
 0x151   :  { %v9979_v47 = vld [vmem:[%s15475_s1 + $0x10a4] sm:$0xf]  ;;  %v8439_v48 = vld [vmem:[%s15475_s1 + $0x10b0] sm:$0xf0]  ;;  %v8250_v55 = vor.u32 %v9931_v43, %v8247_v63 }
 0x152   :  { %5326 = vmatmul.bf16.vlgmr.msrb.gmra.mxu1 %v11174_v28  ;;  %v10011_v50 = vld [vmem:[%s15475_s1 + $0x11a4] sm:$0xf]  ;;  %v8567_v51 = vld [vmem:[%s15475_s1 + $0x11b0] sm:$0xf0]  ;;  %v8442_v46 = vor.u32 %v9979_v47, %v8439_v48 }
 0x153   :  { %5361 = vmatpush.bf16.msra.mxu0 %v8282_v9  ;;  %5370 = vmatpush.bf16.msra.mxu1 %v8474_v12  ;;  %v10043_v52 = vld [vmem:[%s15475_s1 + $0x12a4] sm:$0xf]  ;;  %v8695_v54 = vld [vmem:[%s15475_s1 + $0x12b0] sm:$0xf0]  ;;  %v8570_v57 = vor.u32 %v10011_v50, %v8567_v51  ;;  %v5107_v12 = vadd.f32 %v5106_v6, %v12327_v15 }
 0x154   :  { %5383 = vmatpush.bf16.msra.mxu2 %v8602_v13  ;;  %5396 = vmatpush.bf16.msra.mxu3 %v8730_v20  ;;  %v9927_v56 = vld [vmem:[%s15475_s1 + $0xf04] sm:$0xf]  ;;  %v8231_v58 = vld [vmem:[%s15475_s1 + $0xf10] sm:$0xf0]  ;;  %v8698_v1 = vor.u32 %v10043_v52, %v8695_v54 }
 0x155   :  { %5339 = vmatmul.bf16.vlgmr.msrb.gmra.mxu2 %v11191_v59  ;;  %5352 = vmatmul.bf16.vlgmr.msrb.gmra.mxu3 %v11187_v19  ;;  %v9975_v61 = vld [vmem:[%s15475_s1 + $0x1084] sm:$0xf]  ;;  %v8423_v0 = vld [vmem:[%s15475_s1 + $0x1090] sm:$0xf0]  ;;  %v8234_v13 = vor.u32 %v9927_v56, %v8231_v58  ;;  %v5120_v29 = vadd.f32 %v5119_v16, %v5107_v12 }
 0x156   :  { %v10007_v3 = vld [vmem:[%s15475_s1 + $0x1184] sm:$0xf]  ;;  %v8551_v4 = vld [vmem:[%s15475_s1 + $0x1190] sm:$0xf0]  ;;  %v8426_v2 = vor.u32 %v9975_v61, %v8423_v0 }
 0x157   :  { %5362 = vmatpush.bf16.msra.mxu0 %v8266_v60  ;;  %5371 = vmatpush.bf16.msra.mxu1 %v8458_v39  ;;  %v10039_v53 = vld [vmem:[%s15475_s1 + $0x1284] sm:$0xf]  ;;  %v8679_v7 = vld [vmem:[%s15475_s1 + $0x1290] sm:$0xf0]  ;;  %v8554_v17 = vor.u32 %v10007_v3, %v8551_v4  ;;  %v5121_v3 = vpop.f32.mrf.mxu1 }
 0x158   :  { %5384 = vmatpush.bf16.msra.mxu2 %v8586_v62  ;;  %5397 = vmatpush.bf16.msra.mxu3 %v8714_v31  ;;  %v10083_v8 = vld [vmem:[%s15475_s1 + $0x13e4] sm:$0xf]  ;;  %v8855_v9 = vld [vmem:[%s15475_s1 + $0x13f0] sm:$0xf0]  ;;  %v8682_v25 = vor.u32 %v10039_v53, %v8679_v7  ;;  %v5132_v51 = vpop.f32.mrf.mxu2  ;;  %v5145_v58 = vpop.f32.mrf.mxu3 }
 0x159   :  { %v9971_v20 = vld [vmem:[%s15475_s1 + $0x1064] sm:$0xf]  ;;  %v8407_v23 = vld [vmem:[%s15475_s1 + $0x1070] sm:$0xf0]  ;;  %v8858_v34 = vor.u32 %v10083_v8, %v8855_v9 }
 0x15a   :  { %v10003_v15 = vld [vmem:[%s15475_s1 + $0x1164] sm:$0xf]  ;;  %v8535_v21 = vld [vmem:[%s15475_s1 + $0x1170] sm:$0xf0]  ;;  %v8410_v63 = vor.u32 %v9971_v20, %v8407_v23 }
 0x15b   :  { %5363 = vmatpush.bf16.msra.mxu0 %v8250_v55  ;;  %5372 = vmatpush.bf16.msra.mxu1 %v8442_v46  ;;  %v10035_v60 = vld [vmem:[%s15475_s1 + $0x1264] sm:$0xf]  ;;  %v8663_v39 = vld [vmem:[%s15475_s1 + $0x1270] sm:$0xf0]  ;;  %v8538_v47 = vor.u32 %v10003_v15, %v8535_v21  ;;  %v5133_v46 = vadd.f32 %v5132_v51, %v5120_v29 }
 0x15c   :  { %5385 = vmatpush.bf16.msra.mxu2 %v8570_v57  ;;  %5398 = vmatpush.bf16.msra.mxu3 %v8698_v1  ;;  %v10079_v62 = vld [vmem:[%s15475_s1 + $0x13c4] sm:$0xf]  ;;  %v8839_v43 = vld [vmem:[%s15475_s1 + $0x13d0] sm:$0xf0]  ;;  %v8666_v50 = vor.u32 %v10035_v60, %v8663_v39  ;;  %v5108_v57 = vpop.f32.mrf.mxu0 }
 0x15d   :  { %v9967_v31 = vld [vmem:[%s15475_s1 + $0x1044] sm:$0xf]  ;;  %v8391_v48 = vld [vmem:[%s15475_s1 + $0x1050] sm:$0xf0]  ;;  %v8842_v52 = vor.u32 %v10079_v62, %v8839_v43  ;;  %v5146_v4 = vadd.f32 %v5145_v58, %v5133_v46 }
 0x15e   :  { %v9999_v54 = vld [vmem:[%s15475_s1 + $0x1144] sm:$0xf]  ;;  %v8519_v55 = vld [vmem:[%s15475_s1 + $0x1150] sm:$0xf0]  ;;  %v8394_v53 = vor.u32 %v9967_v31, %v8391_v48 }
 0x15f   :  { %5364 = vmatpush.bf16.msra.mxu0 %v8234_v13  ;;  %5373 = vmatpush.bf16.msra.mxu1 %v8426_v2  ;;  %v10031_v56 = vld [vmem:[%s15475_s1 + $0x1244] sm:$0xf]  ;;  %v8647_v61 = vld [vmem:[%s15475_s1 + $0x1250] sm:$0xf0]  ;;  %v8522_v6 = vor.u32 %v9999_v54, %v8519_v55 }
 0x160   :  { %5386 = vmatpush.bf16.msra.mxu2 %v8554_v17  ;;  %5399 = vmatpush.bf16.msra.mxu3 %v8682_v25  ;;  %v10075_v0 = vld [vmem:[%s15475_s1 + $0x13a4] sm:$0xf]  ;;  %v8823_v1 = vld [vmem:[%s15475_s1 + $0x13b0] sm:$0xf0]  ;;  %v8650_v9 = vor.u32 %v10031_v56, %v8647_v61  ;;  %v5147_v51 = vpop.f32.mrf.mxu3 }
 0x161   :  { %v9963_v7 = vld [vmem:[%s15475_s1 + $0x1024] sm:$0xf]  ;;  %v8375_v8 = vld [vmem:[%s15475_s1 + $0x1030] sm:$0xf0]  ;;  %v8826_v12 = vor.u32 %v10075_v0, %v8823_v1 }
 0x162   :  { %5365 = vmatmul.bf16.vlgmr.msra.gmra.mxu0 %v11201_v37  ;;  %v9995_v13 = vld [vmem:[%s15475_s1 + $0x1124] sm:$0xf]  ;;  %v8503_v16 = vld [vmem:[%s15475_s1 + $0x1130] sm:$0xf0]  ;;  %v8378_v25 = vor.u32 %v9963_v7, %v8375_v8 }
 0x163   :  { %5409 = vmatpush.bf16.msrb.mxu0 %v8858_v34  ;;  %5374 = vmatpush.bf16.msra.mxu1 %v8410_v63  ;;  %v10027_v2 = vld [vmem:[%s15475_s1 + $0x1224] sm:$0xf]  ;;  %v8631_v17 = vld [vmem:[%s15475_s1 + $0x1230] sm:$0xf0]  ;;  %v8506_v29 = vor.u32 %v9995_v13, %v8503_v16 }
 0x164   :  { %5387 = vmatpush.bf16.msra.mxu2 %v8538_v47  ;;  %5400 = vmatpush.bf16.msra.mxu3 %v8666_v50  ;;  %v10071_v20 = vld [vmem:[%s15475_s1 + $0x1384] sm:$0xf]  ;;  %v8807_v23 = vld [vmem:[%s15475_s1 + $0x1390] sm:$0xf0]  ;;  %v8634_v60 = vor.u32 %v10027_v2, %v8631_v17  ;;  %v5134_v47 = vpop.f32.mrf.mxu2 }
 0x165   :  { %v9959_v34 = vld [vmem:[%s15475_s1 + $0x1004] sm:$0xf]  ;;  %v8359_v15 = vld [vmem:[%s15475_s1 + $0x1010] sm:$0xf0]  ;;  %v8810_v39 = vor.u32 %v10071_v20, %v8807_v23 }
 0x166   :  { %v9991_v21 = vld [vmem:[%s15475_s1 + $0x1104] sm:$0xf]  ;;  %v8487_v62 = vld [vmem:[%s15475_s1 + $0x1110] sm:$0xf0]  ;;  %v8362_v57 = vor.u32 %v9959_v34, %v8359_v15 }
 0x167   :  { %5410 = vmatpush.bf16.msrb.mxu0 %v8842_v52  ;;  %5375 = vmatpush.bf16.msra.mxu1 %v8394_v53  ;;  %v10023_v43 = vld [vmem:[%s15475_s1 + $0x1204] sm:$0xf]  ;;  %v8615_v63 = vld [vmem:[%s15475_s1 + $0x1210] sm:$0xf0]  ;;  %v5158_v52 = vpop.f32.mrf.mxu0  ;;  %v8490_v58 = vor.u32 %v9991_v21, %v8487_v62 }
 0x168   :  { %5388 = vmatpush.bf16.msra.mxu2 %v8522_v6  ;;  %5401 = vmatpush.bf16.msra.mxu3 %v8650_v9  ;;  %v10067_v31 = vld [vmem:[%s15475_s1 + $0x1364] sm:$0xf]  ;;  %v8791_v48 = vld [vmem:[%s15475_s1 + $0x1370] sm:$0xf0]  ;;  %v12586_v46 = vadd.f32 %v5158_v52, %v5146_v4  ;;  %v8618_v1 = vor.u32 %v10023_v43, %v8615_v63 }
 0x169   :  { %v10115_v50 = vld [vmem:[%s15475_s1 + $0x14e4] sm:$0xf]  ;;  %v8983_v54 = vld [vmem:[%s15475_s1 + $0x14f0] sm:$0xf0]  ;;  %v8794_v3 = vor.u32 %v10067_v31, %v8791_v48 }
 0x16a   :  { %v10147_v55 = vld [vmem:[%s15475_s1 + $0x15e4] sm:$0xf]  ;;  %v9111_v56 = vld [vmem:[%s15475_s1 + $0x15f0] sm:$0xf0]  ;;  %v8986_v53 = vor.u32 %v10115_v50, %v8983_v54 }
 0x16b   :  { %5411 = vmatpush.bf16.msrb.mxu0 %v8826_v12  ;;  %5376 = vmatpush.bf16.msra.mxu1 %v8378_v25  ;;  %v10179_v61 = vld [vmem:[%s15475_s1 + $0x16e4] sm:$0xf]  ;;  %v9239_v0 = vld [vmem:[%s15475_s1 + $0x16f0] sm:$0xf0]  ;;  %v9114_v6 = vor.u32 %v10147_v55, %v9111_v56 }
 0x16c   :  { %5389 = vmatpush.bf16.msra.mxu2 %v8506_v29  ;;  %5402 = vmatpush.bf16.msra.mxu3 %v8634_v60  ;;  %v10063_v4 = vld [vmem:[%s15475_s1 + $0x1344] sm:$0xf]  ;;  %v8775_v7 = vld [vmem:[%s15475_s1 + $0x1350] sm:$0xf0]  ;;  %v9242_v9 = vor.u32 %v10179_v61, %v9239_v0  ;;  %v10233_v0 = vld [vmem:[%s15476_s2] sm:$0xf] }
 0x16d   :  { %v10111_v8 = vld [vmem:[%s15475_s1 + $0x14c4] sm:$0xf]  ;;  %v8967_v12 = vld [vmem:[%s15475_s1 + $0x14d0] sm:$0xf0]  ;;  %v8778_v20 = vor.u32 %v10063_v4, %v8775_v7 }
 0x16e   :  { %v10143_v13 = vld [vmem:[%s15475_s1 + $0x15c4] sm:$0xf]  ;;  %v9095_v16 = vld [vmem:[%s15475_s1 + $0x15d0] sm:$0xf0]  ;;  %v8970_v23 = vor.u32 %v10111_v8, %v8967_v12 }
 0x16f   :  { %5412 = vmatpush.bf16.msrb.mxu0 %v8810_v39  ;;  %5377 = vmatpush.bf16.msra.mxu1 %v8362_v57  ;;  %v10175_v2 = vld [vmem:[%s15475_s1 + $0x16c4] sm:$0xf]  ;;  %v9223_v17 = vld [vmem:[%s15475_s1 + $0x16d0] sm:$0xf0]  ;;  %v9098_v25 = vor.u32 %v10143_v13, %v9095_v16  ;;  %v5160_v43 = vpop.f32.mrf.mxu0  ;;  %v5171_v7 = vpop.f32.mrf.mxu1 }
 0x170   :  { %5390 = vmatpush.bf16.msra.mxu2 %v8490_v58  ;;  %5403 = vmatpush.bf16.msra.mxu3 %v8618_v1  ;;  %v10059_v29 = vld [vmem:[%s15475_s1 + $0x1324] sm:$0xf]  ;;  %v8759_v34 = vld [vmem:[%s15475_s1 + $0x1330] sm:$0xf0]  ;;  %v9226_v21 = vor.u32 %v10175_v2, %v9223_v17  ;;  %v906_v1 = vperm.slane %v10233_v0, 1 }
 0x171   :  { %v10107_v15 = vld [vmem:[%s15475_s1 + $0x14a4] sm:$0xf]  ;;  %v8951_v60 = vld [vmem:[%s15475_s1 + $0x14b0] sm:$0xf0]  ;;  %v8762_v31 = vor.u32 %v10059_v29, %v8759_v34 }
 0x172   :  { %5378 = vmatmul.bf16.vlgmr.msra.gmra.mxu1 %v11384_v36  ;;  %v10139_v39 = vld [vmem:[%s15475_s1 + $0x15a4] sm:$0xf]  ;;  %v9079_v62 = vld [vmem:[%s15475_s1 + $0x15b0] sm:$0xf0]  ;;  %v8954_v51 = vor.u32 %v10107_v15, %v8951_v60 }
 0x173   :  { %5413 = vmatpush.bf16.msrb.mxu0 %v8794_v3  ;;  %5422 = vmatpush.bf16.msrb.mxu1 %v8986_v53  ;;  %v10171_v63 = vld [vmem:[%s15475_s1 + $0x16a4] sm:$0xf]  ;;  %v9207_v47 = vld [vmem:[%s15475_s1 + $0x16b0] sm:$0xf0]  ;;  %v9082_v52 = vor.u32 %v10139_v39, %v9079_v62 }
 0x174   :  { %5435 = vmatpush.bf16.msrb.mxu2 %v9114_v6  ;;  %5448 = vmatpush.bf16.msrb.mxu3 %v9242_v9  ;;  %v10055_v48 = vld [vmem:[%s15475_s1 + $0x1304] sm:$0xf]  ;;  %v8743_v50 = vld [vmem:[%s15475_s1 + $0x1310] sm:$0xf0]  ;;  %v9210_v57 = vor.u32 %v10171_v63, %v9207_v47 }
 0x175   :  { %5391 = vmatmul.bf16.vlgmr.msra.gmra.mxu2 %v11397_v22  ;;  %5404 = vmatmul.bf16.vlgmr.msra.gmra.mxu3 %v11395_v40  ;;  %v10103_v54 = vld [vmem:[%s15475_s1 + $0x1484] sm:$0xf]  ;;  %v8935_v55 = vld [vmem:[%s15475_s1 + $0x1490] sm:$0xf0]  ;;  %v8746_v4 = vor.u32 %v10055_v48, %v8743_v50 }
 0x176   :  { %v10135_v56 = vld [vmem:[%s15475_s1 + $0x1584] sm:$0xf]  ;;  %v9063_v58 = vld [vmem:[%s15475_s1 + $0x1590] sm:$0xf0]  ;;  %v8938_v8 = vor.u32 %v10103_v54, %v8935_v55 }
 0x177   :  { %5414 = vmatpush.bf16.msrb.mxu0 %v8778_v20  ;;  %5423 = vmatpush.bf16.msrb.mxu1 %v8970_v23  ;;  %v10167_v61 = vld [vmem:[%s15475_s1 + $0x1684] sm:$0xf]  ;;  %v9191_v3 = vld [vmem:[%s15475_s1 + $0x1690] sm:$0xf0]  ;;  %v9066_v9 = vor.u32 %v10135_v56, %v9063_v58  ;;  %v5173_v58 = vpop.f32.mrf.mxu1 }
 0x178   :  { %5436 = vmatpush.bf16.msrb.mxu2 %v9098_v25  ;;  %5449 = vmatpush.bf16.msrb.mxu3 %v9226_v21  ;;  %v10211_v53 = vld [vmem:[%s15475_s1 + $0x17e4] sm:$0xf]  ;;  %v9367_v6 = vld [vmem:[%s15475_s1 + $0x17f0] sm:$0xf0]  ;;  %v9194_v16 = vor.u32 %v10167_v61, %v9191_v3  ;;  %v5172_v25 = vadd.f32 %v5171_v7, %v906_v1  ;;  %v5184_v43 = vpop.f32.mrf.mxu2 }
 0x179   :  { %v10099_v12 = vld [vmem:[%s15475_s1 + $0x1464] sm:$0xf]  ;;  %v8919_v13 = vld [vmem:[%s15475_s1 + $0x1470] sm:$0xf0]  ;;  %v9370_v2 = vor.u32 %v10211_v53, %v9367_v6 }
 0x17a   :  { %v10131_v17 = vld [vmem:[%s15475_s1 + $0x1564] sm:$0xf]  ;;  %v9047_v20 = vld [vmem:[%s15475_s1 + $0x1570] sm:$0xf0]  ;;  %v8922_v21 = vor.u32 %v10099_v12, %v8919_v13 }
 0x17b   :  { %5415 = vmatpush.bf16.msrb.mxu0 %v8762_v31  ;;  %5424 = vmatpush.bf16.msrb.mxu1 %v8954_v51  ;;  %v10163_v23 = vld [vmem:[%s15475_s1 + $0x1664] sm:$0xf]  ;;  %v9175_v29 = vld [vmem:[%s15475_s1 + $0x1670] sm:$0xf0]  ;;  %v9050_v60 = vor.u32 %v10131_v17, %v9047_v20  ;;  %v5185_v51 = vadd.f32 %v5184_v43, %v5172_v25 }
 0x17c   :  { %5437 = vmatpush.bf16.msrb.mxu2 %v9082_v52  ;;  %5450 = vmatpush.bf16.msrb.mxu3 %v9210_v57  ;;  %v10207_v34 = vld [vmem:[%s15475_s1 + $0x17c4] sm:$0xf]  ;;  %v9351_v15 = vld [vmem:[%s15475_s1 + $0x17d0] sm:$0xf0]  ;;  %v9178_v63 = vor.u32 %v10163_v23, %v9175_v29  ;;  %v5197_v52 = vpop.f32.mrf.mxu3 }
 0x17d   :  { %v10095_v39 = vld [vmem:[%s15475_s1 + $0x1444] sm:$0xf]  ;;  %v8903_v62 = vld [vmem:[%s15475_s1 + $0x1450] sm:$0xf0]  ;;  %v9354_v47 = vor.u32 %v10207_v34, %v9351_v15  ;;  %v5198_v57 = vadd.f32 %v5197_v52, %v5185_v51  ;;  %v9478_v51 = vld [vmem:[%s15475_s1 + $0xf4] sm:$0xf0] }
 0x17e   :  { %v10127_v31 = vld [vmem:[%s15475_s1 + $0x1544] sm:$0xf]  ;;  %v9031_v48 = vld [vmem:[%s15475_s1 + $0x1550] sm:$0xf0]  ;;  %v8906_v61 = vor.u32 %v10095_v39, %v8903_v62 }
 0x17f   :  { %5416 = vmatpush.bf16.msrb.mxu0 %v8746_v4  ;;  %5425 = vmatpush.bf16.msrb.mxu1 %v8938_v8  ;;  %v10159_v50 = vld [vmem:[%s15475_s1 + $0x1644] sm:$0xf]  ;;  %v9159_v54 = vld [vmem:[%s15475_s1 + $0x1650] sm:$0xf0]  ;;  %v9034_v0 = vor.u32 %v10127_v31, %v9031_v48 }
 0x180   :  { %5438 = vmatpush.bf16.msrb.mxu2 %v9066_v9  ;;  %5451 = vmatpush.bf16.msrb.mxu3 %v9194_v16  ;;  %v10203_v55 = vld [vmem:[%s15475_s1 + $0x17a4] sm:$0xf]  ;;  %v9335_v56 = vld [vmem:[%s15475_s1 + $0x17b0] sm:$0xf0]  ;;  %v9162_v53 = vor.u32 %v10159_v50, %v9159_v54  ;;  %v5210_v16 = vpop.f32.mrf.mxu0  ;;  %v5186_v34 = vpop.f32.mrf.mxu2  ;;  %v6429_v50 = vld [vmem:[%s15475_s1 + $0xe8] sm:$0xf] }
 0x181   :  { %v10091_v1 = vld [vmem:[%s15475_s1 + $0x1424] sm:$0xf]  ;;  %v8887_v3 = vld [vmem:[%s15475_s1 + $0x1430] sm:$0xf0]  ;;  %v9338_v6 = vor.u32 %v10203_v55, %v9335_v56  ;;  %v12760_v29 = vadd.f32 %v5210_v16, %v5198_v57  ;;  %v6557_v55 = vld [vmem:[%s15475_s1 + $0x1e8] sm:$0xf] }
 0x182   :  { %5417 = vmatmul.bf16.vlgmr.msrb.gmra.mxu0 %v11405_v45  ;;  %v10123_v4 = vld [vmem:[%s15475_s1 + $0x1524] sm:$0xf]  ;;  %v9015_v7 = vld [vmem:[%s15475_s1 + $0x1530] sm:$0xf0]  ;;  %v9510_v56 = vld [vmem:[%s15475_s1 + $0x1f4] sm:$0xf0] }
 0x183   :  { %5461 = vmatpush.bf16.msra.mxu0 %v9370_v2  ;;  %5426 = vmatpush.bf16.msrb.mxu1 %v8922_v21  ;;  %v10155_v8 = vld [vmem:[%s15475_s1 + $0x1624] sm:$0xf]  ;;  %v9143_v9 = vld [vmem:[%s15475_s1 + $0x1630] sm:$0xf0]  ;;  %v8890_v2 = vor.u32 %v10091_v1, %v8887_v3  ;;  %v9018_v17 = vor.u32 %v10123_v4, %v9015_v7  ;;  %v6413_v7 = vld [vmem:[%s15475_s1 + $0xc8] sm:$0xf] }
 0x184   :  { %5439 = vmatpush.bf16.msrb.mxu2 %v9050_v60  ;;  %5452 = vmatpush.bf16.msrb.mxu3 %v9178_v63  ;;  %v10199_v12 = vld [vmem:[%s15475_s1 + $0x1784] sm:$0xf]  ;;  %v9319_v13 = vld [vmem:[%s15475_s1 + $0x1790] sm:$0xf0]  ;;  %v9146_v15 = vor.u32 %v10155_v8, %v9143_v9  ;;  %v5199_v43 = vpop.f32.mrf.mxu3  ;;  %v9474_v8 = vld [vmem:[%s15475_s1 + $0xd4] sm:$0xf0] }
 0x185   :  { %v10087_v20 = vld [vmem:[%s15475_s1 + $0x1404] sm:$0xf]  ;;  %v8871_v23 = vld [vmem:[%s15475_s1 + $0x1410] sm:$0xf0]  ;;  %v9322_v21 = vor.u32 %v10199_v12, %v9319_v13  ;;  %v6541_v12 = vld [vmem:[%s15475_s1 + $0x1c8] sm:$0xf] }
 0x186   :  { %v10119_v25 = vld [vmem:[%s15475_s1 + $0x1504] sm:$0xf]  ;;  %v8999_v60 = vld [vmem:[%s15475_s1 + $0x1510] sm:$0xf0]  ;;  %v8874_v52 = vor.u32 %v10087_v20, %v8871_v23  ;;  %v9506_v13 = vld [vmem:[%s15475_s1 + $0x1d4] sm:$0xf0] }
 0x187   :  { %5462 = vmatpush.bf16.msra.mxu0 %v9354_v47  ;;  %5427 = vmatpush.bf16.msrb.mxu1 %v8906_v61  ;;  %v10151_v39 = vld [vmem:[%s15475_s1 + $0x1604] sm:$0xf]  ;;  %v9127_v62 = vld [vmem:[%s15475_s1 + $0x1610] sm:$0xf0]  ;;  %v9002_v54 = vor.u32 %v10119_v25, %v8999_v60  ;;  %v6542_v34 = vor.u32 %v9506_v13, %v6541_v12  ;;  %v9470_v60 = vld [vmem:[%s15475_s1 + $0xb4] sm:$0xf0] }
 0x188   :  { %5440 = vmatpush.bf16.msrb.mxu2 %v9034_v0  ;;  %5453 = vmatpush.bf16.msrb.mxu3 %v9162_v53  ;;  %v10195_v63 = vld [vmem:[%s15475_s1 + $0x1764] sm:$0xf]  ;;  %v9303_v47 = vld [vmem:[%s15475_s1 + $0x1770] sm:$0xf0]  ;;  %v9130_v57 = vor.u32 %v10151_v39, %v9127_v62  ;;  %v6430_v0 = vor.u32 %v9478_v51, %v6429_v50  ;;  %v5212_v9 = vpop.f32.mrf.mxu0  ;;  %v6525_v39 = vld [vmem:[%s15475_s1 + $0x1a8] sm:$0xf] }
 0x189   :  { %v10227_v31 = vld [vmem:[%s15475_s1 + $0x1864] sm:$0xf]  ;;  %v9431_v48 = vld [vmem:[%s15475_s1 + $0x1870] sm:$0xf0]  ;;  %v9306_v58 = vor.u32 %v10195_v63, %v9303_v47  ;;  %v9502_v62 = vld [vmem:[%s15475_s1 + $0x1b4] sm:$0xf0] }
 0x18a   :  { %v9434_v61 = vor.u32 %v10227_v31, %v9431_v48  ;;  %v10191_v1 = vld [vmem:[%s15475_s1 + $0x1744] sm:$0xf]  ;;  %v9287_v3 = vld [vmem:[%s15475_s1 + $0x1750] sm:$0xf0]  ;;  %v6365_v12 = vld [vmem:[%s15475_s1 + $0x68] sm:$0xf] }
 0x18b   :  { %5463 = vmatpush.bf16.msra.mxu0 %v9338_v6  ;;  %5428 = vmatpush.bf16.msrb.mxu1 %v8890_v2  ;;  %v10223_v53 = vld [vmem:[%s15475_s1 + $0x1844] sm:$0xf]  ;;  %v6558_v6 = vor.u32 %v9510_v56, %v6557_v55  ;;  %v9415_v4 = vld [vmem:[%s15475_s1 + $0x1850] sm:$0xf0]  ;;  %v9290_v16 = vor.u32 %v10191_v1, %v9287_v3  ;;  %v9466_v55 = vld [vmem:[%s15475_s1 + $0x94] sm:$0xf0] }
 0x18c   :  { %5441 = vmatpush.bf16.msrb.mxu2 %v9018_v17  ;;  %5454 = vmatpush.bf16.msrb.mxu3 %v9146_v15  ;;  %v9418_v2 = vor.u32 %v10223_v53, %v9415_v4  ;;  %v6414_v17 = vor.u32 %v9474_v8, %v6413_v7  ;;  %v10187_v20 = vld [vmem:[%s15475_s1 + $0x1724] sm:$0xf]  ;;  %v9271_v23 = vld [vmem:[%s15475_s1 + $0x1730] sm:$0xf0]  ;;  %v6509_v56 = vld [vmem:[%s15475_s1 + $0x188] sm:$0xf] }
 0x18d   :  { %v10219_v25 = vld [vmem:[%s15475_s1 + $0x1824] sm:$0xf]  ;;  %v9399_v15 = vld [vmem:[%s15475_s1 + $0x1830] sm:$0xf0]  ;;  %v9274_v43 = vor.u32 %v10187_v20, %v9271_v23  ;;  %v6813_v1 = vld [vmem:[%s15475_s1 + $0x3e8] sm:$0xf] }
 0x18e   :  { %v10183_v63 = vld [vmem:[%s15475_s1 + $0x1704] sm:$0xf]  ;;  %v9402_v47 = vor.u32 %v10219_v25, %v9399_v15  ;;  %v9255_v48 = vld [vmem:[%s15475_s1 + $0x1710] sm:$0xf0]  ;;  %v9574_v3 = vld [vmem:[%s15475_s1 + $0x3f4] sm:$0xf0] }
 0x18f   :  { %5464 = vmatpush.bf16.msra.mxu0 %v9322_v21  ;;  %5429 = vmatpush.bf16.msrb.mxu1 %v8874_v52  ;;  %v6397_v21 = vld [vmem:[%s15475_s1 + $0xa8] sm:$0xf]  ;;  %v10215_v50 = vld [vmem:[%s15475_s1 + $0x1804] sm:$0xf]  ;;  %v9383_v51 = vld [vmem:[%s15475_s1 + $0x1810] sm:$0xf0]  ;;  %v6526_v52 = vor.u32 %v9502_v62, %v6525_v39  ;;  %v5223_v53 = vpop.f32.mrf.mxu1 }
 0x190   :  { %5442 = vmatpush.bf16.msrb.mxu2 %v9002_v54  ;;  %5455 = vmatpush.bf16.msrb.mxu3 %v9130_v57  ;;  %v6398_v31 = vor.u32 %v9470_v60, %v6397_v21  ;;  %v6381_v54 = vld [vmem:[%s15475_s1 + $0x88] sm:$0xf]  ;;  %v9498_v57 = vld [vmem:[%s15475_s1 + $0x194] sm:$0xf0]  ;;  %v5224_v7 = vadd.f32 %v5223_v53, %v12760_v29 }
 0x191   :  { %v6382_v4 = vor.u32 %v9466_v55, %v6381_v54  ;;  %v6510_v8 = vor.u32 %v9498_v57, %v6509_v56  ;;  %v9462_v13 = vld [vmem:[%s15475_s1 + $0x74] sm:$0xf0]  ;;  %v6797_v23 = vld [vmem:[%s15475_s1 + $0x3c8] sm:$0xf] }
 0x192   :  { %5430 = vmatmul.bf16.vlgmr.msrb.gmra.mxu1 %v11596_v5  ;;  %v9494_v29 = vld [vmem:[%s15475_s1 + $0x174] sm:$0xf0]  ;;  %v6349_v39 = vld [vmem:[%s15475_s1 + $0x48] sm:$0xf] }
 0x193   :  { %5465 = vmatpush.bf16.msra.mxu0 %v9306_v58  ;;  %5478 = vmatpush.bf16.msra.mxu1 %v9434_v61  ;;  %v6685_v58 = vld [vmem:[%s15475_s1 + $0x2e8] sm:$0xf]  ;;  %v9542_v61 = vld [vmem:[%s15475_s1 + $0x2f4] sm:$0xf0] }
 0x194   :  { %5487 = vmatpush.bf16.msra.mxu2 %v6430_v0  ;;  %5500 = vmatpush.bf16.msra.mxu3 %v6558_v6  ;;  %v9258_v0 = vor.u32 %v10183_v63, %v9255_v48  ;;  %v9386_v6 = vor.u32 %v10215_v50, %v9383_v51  ;;  %v6686_v9 = vor.u32 %v9542_v61, %v6685_v58  ;;  %v9538_v20 = vld [vmem:[%s15475_s1 + $0x2d4] sm:$0xf0]  ;;  %v6653_v50 = vld [vmem:[%s15475_s1 + $0x2a8] sm:$0xf] }
 0x195   :  { %5443 = vmatmul.bf16.vlgmr.msrb.gmra.mxu2 %v11609_v11  ;;  %5456 = vmatmul.bf16.vlgmr.msrb.gmra.mxu3 %v11607_v10  ;;  %v9570_v25 = vld [vmem:[%s15475_s1 + $0x3d4] sm:$0xf0] }
 0x196   :  { %v9458_v62 = vld [vmem:[%s15475_s1 + $0x54] sm:$0xf0] }
 0x197   :  { %5466 = vmatpush.bf16.msra.mxu0 %v9290_v16  ;;  %5479 = vmatpush.bf16.msra.mxu1 %v9418_v2  ;;  %v6493_v16 = vld [vmem:[%s15475_s1 + $0x168] sm:$0xf]  ;;  %v6814_v2 = vor.u32 %v9574_v3, %v6813_v1  ;;  %v9490_v48 = vld [vmem:[%s15475_s1 + $0x154] sm:$0xf0]  ;;  %v5225_v56 = vpop.f32.mrf.mxu1  ;;  %v6350_v57 = vor.u32 %v9458_v62, %v6349_v39 }
 0x198   :  { %5488 = vmatpush.bf16.msra.mxu2 %v6414_v17  ;;  %5501 = vmatpush.bf16.msra.mxu3 %v6542_v34  ;;  %v6669_v17 = vld [vmem:[%s15475_s1 + $0x2c8] sm:$0xf]  ;;  %v6366_v34 = vor.u32 %v9462_v13, %v6365_v12  ;;  %v5236_v15 = vpop.f32.mrf.mxu2  ;;  %v6494_v21 = vor.u32 %v9494_v29, %v6493_v16  ;;  %v9534_v51 = vld [vmem:[%s15475_s1 + $0x2b4] sm:$0xf0] }
 0x199   :  { %v6670_v60 = vor.u32 %v9538_v20, %v6669_v17  ;;  %v5237_v63 = vadd.f32 %v5236_v15, %v5224_v7  ;;  %v9566_v54 = vld [vmem:[%s15475_s1 + $0x3b4] sm:$0xf0]  ;;  %v6654_v61 = vor.u32 %v9534_v51, %v6653_v50  ;;  %v6461_v3 = vld [vmem:[%s15475_s1 + $0x128] sm:$0xf] }
 0x19a   :  { %v9454_v1 = vld [vmem:[%s15475_s1 + $0x34] sm:$0xf0]  ;;  %v6749_v62 = vld [vmem:[%s15475_s1 + $0x368] sm:$0xf] }
 0x19b   :  { %5467 = vmatpush.bf16.msra.mxu0 %v9274_v43  ;;  %5480 = vmatpush.bf16.msra.mxu1 %v9402_v47  ;;  %v6477_v43 = vld [vmem:[%s15475_s1 + $0x148] sm:$0xf]  ;;  %v5249_v47 = vpop.f32.mrf.mxu3  ;;  %v9530_v7 = vld [vmem:[%s15475_s1 + $0x294] sm:$0xf0] }
 0x19c   :  { %5489 = vmatpush.bf16.msra.mxu2 %v6398_v31  ;;  %5502 = vmatpush.bf16.msra.mxu3 %v6526_v52  ;;  %v6798_v31 = vor.u32 %v9570_v25, %v6797_v23  ;;  %v6781_v52 = vld [vmem:[%s15475_s1 + $0x3a8] sm:$0xf]  ;;  %v5250_v55 = vadd.f32 %v5249_v47, %v5237_v63  ;;  %v6478_v58 = vor.u32 %v9490_v48, %v6477_v43  ;;  %v9562_v12 = vld [vmem:[%s15475_s1 + $0x394] sm:$0xf0] }
 0x19d   :  { %v6782_v53 = vor.u32 %v9566_v54, %v6781_v52  ;;  %v9450_v23 = vld [vmem:[%s15475_s1 + $0x14] sm:$0xf0]  ;;  %v6445_v25 = vld [vmem:[%s15475_s1 + $0x108] sm:$0xf] }
 0x19e   :  { %v9526_v39 = vld [vmem:[%s15475_s1 + $0x274] sm:$0xf0]  ;;  %v6941_v63 = vld [vmem:[%s15475_s1 + $0x4e8] sm:$0xf] }
 0x19f   :  { %5468 = vmatpush.bf16.msra.mxu0 %v9258_v0  ;;  %5481 = vmatpush.bf16.msra.mxu1 %v9386_v6  ;;  %v6333_v0 = vld [vmem:[%s15475_s1 + $0x28] sm:$0xf]  ;;  %v9486_v6 = vld [vmem:[%s15475_s1 + $0x134] sm:$0xf0] }
 0x1a0   :  { %5490 = vmatpush.bf16.msra.mxu2 %v6382_v4  ;;  %5503 = vmatpush.bf16.msra.mxu3 %v6510_v8  ;;  %v6637_v4 = vld [vmem:[%s15475_s1 + $0x288] sm:$0xf]  ;;  %v5262_v8 = vpop.f32.mrf.mxu0  ;;  %v6334_v13 = vor.u32 %v9454_v1, %v6333_v0  ;;  %v5238_v29 = vpop.f32.mrf.mxu2  ;;  %v6462_v17 = vor.u32 %v9486_v6, %v6461_v3  ;;  %v9558_v43 = vld [vmem:[%s15475_s1 + $0x374] sm:$0xf0] }
 0x1a1   :  { %v12958_v16 = vadd.f32 %v5262_v8, %v5250_v55  ;;  %v6638_v20 = vor.u32 %v9530_v7, %v6637_v4  ;;  %v9606_v47 = vld [vmem:[%s15475_s1 + $0x4f4] sm:$0xf0]  ;;  %v7069_v48 = vld [vmem:[%s15475_s1 + $0x5e8] sm:$0xf]  ;;  %v6750_v54 = vor.u32 %v9558_v43, %v6749_v62 }
 0x1a2   :  { %5469 = vmatmul.bf16.vlgmr.msra.gmra.mxu0 %v11617_v14  ;;  %9444 = vmatmul.msk.bf16.vlgmr.msra.gmra.mxu1 %vm4833_vm0, %v11717_v49  ;;  %v9638_v50 = vld [vmem:[%s15475_s1 + $0x5f4] sm:$0xf0]  ;;  %v6942_v55 = vor.u32 %v9606_v47, %v6941_v63  ;;  %v6605_v56 = vld [vmem:[%s15475_s1 + $0x248] sm:$0xf] }
 0x1a3   :  { %5513 = vmatpush.bf16.msrb.mxu0 %v6686_v9  ;;  %5526 = vmatpush.bf16.msrb.mxu1 %v6814_v2  ;;  %v6765_v9 = vld [vmem:[%s15475_s1 + $0x388] sm:$0xf]  ;;  %v5251_v15 = vpop.f32.mrf.mxu3  ;;  %v9554_v0 = vld [vmem:[%s15475_s1 + $0x354] sm:$0xf0] }
 0x1a4   :  { %5491 = vmatpush.bf16.msra.mxu2 %v6366_v34  ;;  %5504 = vmatpush.bf16.msra.mxu3 %v6494_v21  ;;  %v6317_v2 = vld [vmem:[%s15475_s1 + $0x8] sm:$0xf]  ;;  %v9482_v34 = vld [vmem:[%s15475_s1 + $0x114] sm:$0xf0]  ;;  %v6766_v21 = vor.u32 %v9562_v12, %v6765_v9 }
 0x1a5   :  { %v6446_v51 = vor.u32 %v9482_v34, %v6445_v25  ;;  %v6925_v1 = vld [vmem:[%s15475_s1 + $0x4c8] sm:$0xf]  ;;  %v9602_v3 = vld [vmem:[%s15475_s1 + $0x4d4] sm:$0xf0] }
 0x1a6   :  { %v7053_v6 = vld [vmem:[%s15475_s1 + $0x5c8] sm:$0xf]  ;;  %v9634_v4 = vld [vmem:[%s15475_s1 + $0x5d4] sm:$0xf0]  ;;  %v6926_v9 = vor.u32 %v9602_v3, %v6925_v1 }
 0x1a7   :  { %5514 = vmatpush.bf16.msrb.mxu0 %v6670_v60  ;;  %5527 = vmatpush.bf16.msrb.mxu1 %v6798_v31  ;;  %v6621_v60 = vld [vmem:[%s15475_s1 + $0x268] sm:$0xf]  ;;  %v6318_v31 = vor.u32 %v9450_v23, %v6317_v2  ;;  %v7054_v29 = vor.u32 %v9634_v4, %v7053_v6  ;;  %v9598_v23 = vld [vmem:[%s15475_s1 + $0x4b4] sm:$0xf0] }
 0x1a8   :  { %5492 = vmatpush.bf16.msra.mxu2 %v6350_v57  ;;  %5505 = vmatpush.bf16.msra.mxu3 %v6478_v58  ;;  %v6622_v52 = vor.u32 %v9526_v39, %v6621_v60  ;;  %v9522_v57 = vld [vmem:[%s15475_s1 + $0x254] sm:$0xf0]  ;;  %v6733_v58 = vld [vmem:[%s15475_s1 + $0x348] sm:$0xf] }
 0x1a9   :  { %v6606_v7 = vor.u32 %v9522_v57, %v6605_v56  ;;  %v6734_v8 = vor.u32 %v9554_v0, %v6733_v58  ;;  %v6589_v12 = vld [vmem:[%s15475_s1 + $0x228] sm:$0xf]  ;;  %v9630_v34 = vld [vmem:[%s15475_s1 + $0x5b4] sm:$0xf0] }
 0x1aa   :  { %v6717_v2 = vld [vmem:[%s15475_s1 + $0x328] sm:$0xf]  ;;  %v9514_v62 = vld [vmem:[%s15475_s1 + $0x214] sm:$0xf0] }
 0x1ab   :  { %5515 = vmatpush.bf16.msrb.mxu0 %v6654_v61  ;;  %5528 = vmatpush.bf16.msrb.mxu1 %v6782_v53  ;;  %v7070_v61 = vor.u32 %v9638_v50, %v7069_v48  ;;  %v5264_v53 = vpop.f32.mrf.mxu0  ;;  %v7037_v25 = vld [vmem:[%s15475_s1 + $0x5a8] sm:$0xf]  ;;  %v9546_v63 = vld [vmem:[%s15475_s1 + $0x314] sm:$0xf0] }
 0x1ac   :  { %5493 = vmatpush.bf16.msra.mxu2 %v6334_v13  ;;  %5506 = vmatpush.bf16.msra.mxu3 %v6462_v17  ;;  %v9518_v13 = vld [vmem:[%s15475_s1 + $0x234] sm:$0xf0]  ;;  %v6701_v43 = vld [vmem:[%s15475_s1 + $0x308] sm:$0xf]  ;;  %v7038_v47 = vor.u32 %v9630_v34, %v7037_v25 }
 0x1ad   :  { %v9550_v17 = vld [vmem:[%s15475_s1 + $0x334] sm:$0xf0]  ;;  %v6590_v15 = vor.u32 %v9518_v13, %v6589_v12  ;;  %v7021_v50 = vld [vmem:[%s15475_s1 + $0x588] sm:$0xf]  ;;  %v6702_v0 = vor.u32 %v9546_v63, %v6701_v43 }
 0x1ae   :  { %v6718_v60 = vor.u32 %v9550_v17, %v6717_v2  ;;  %v9594_v48 = vld [vmem:[%s15475_s1 + $0x494] sm:$0xf0]  ;;  %v7325_v58 = vld [vmem:[%s15475_s1 + $0x7e8] sm:$0xf] }
 0x1af   :  { %5516 = vmatpush.bf16.msrb.mxu0 %v6638_v20  ;;  %5529 = vmatpush.bf16.msrb.mxu1 %v6766_v21  ;;  %v6909_v20 = vld [vmem:[%s15475_s1 + $0x4a8] sm:$0xf]  ;;  %v9590_v6 = vld [vmem:[%s15475_s1 + $0x474] sm:$0xf0] }
 0x1b0   :  { %5494 = vmatpush.bf16.msra.mxu2 %v6318_v31  ;;  %5507 = vmatpush.bf16.msra.mxu3 %v6446_v51  ;;  %v6573_v21 = vld [vmem:[%s15475_s1 + $0x208] sm:$0xf]  ;;  %v6910_v39 = vor.u32 %v9598_v23, %v6909_v20  ;;  %v5275_v51 = vpop.f32.mrf.mxu1  ;;  %v9666_v12 = vld [vmem:[%s15475_s1 + $0x6d4] sm:$0xf0] }
 0x1b1   :  { %v6893_v31 = vld [vmem:[%s15475_s1 + $0x488] sm:$0xf]  ;;  %v5276_v56 = vadd.f32 %v5275_v51, %v12958_v16  ;;  %v6574_v57 = vor.u32 %v9514_v62, %v6573_v21  ;;  %v9698_v2 = vld [vmem:[%s15475_s1 + $0x7d4] sm:$0xf0] }
 0x1b2   :  { %v6894_v1 = vor.u32 %v9594_v48, %v6893_v31  ;;  %v6877_v16 = vld [vmem:[%s15475_s1 + $0x468] sm:$0xf]  ;;  %v9618_v62 = vld [vmem:[%s15475_s1 + $0x554] sm:$0xf0] }
 0x1b3   :  { %5517 = vmatpush.bf16.msrb.mxu0 %v6622_v52  ;;  %5530 = vmatpush.bf16.msrb.mxu1 %v6750_v54  ;;  %v9626_v52 = vld [vmem:[%s15475_s1 + $0x594] sm:$0xf0]  ;;  %v7197_v54 = vld [vmem:[%s15475_s1 + $0x6e8] sm:$0xf] }
 0x1b4   :  { %5539 = vmatpush.bf16.msrb.mxu2 %v6942_v55  ;;  %5552 = vmatpush.bf16.msrb.mxu3 %v7070_v61  ;;  %v9670_v55 = vld [vmem:[%s15475_s1 + $0x6f4] sm:$0xf0]  ;;  %v7022_v3 = vor.u32 %v9626_v52, %v7021_v50  ;;  %v7005_v4 = vld [vmem:[%s15475_s1 + $0x568] sm:$0xf] }
 0x1b5   :  { %5495 = vmatmul.bf16.vlgmr.msra.gmra.mxu2 %v10607_v27  ;;  %5508 = vmatmul.bf16.vlgmr.msra.gmra.mxu3 %v10617_v33  ;;  %v9702_v61 = vld [vmem:[%s15475_s1 + $0x7f4] sm:$0xf0]  ;;  %v7198_v53 = vor.u32 %v9670_v55, %v7197_v54  ;;  %v7309_v13 = vld [vmem:[%s15475_s1 + $0x7c8] sm:$0xf] }
 0x1b6   :  { %v6861_v34 = vld [vmem:[%s15475_s1 + $0x448] sm:$0xf]  ;;  %v9662_v63 = vld [vmem:[%s15475_s1 + $0x6b4] sm:$0xf0] }
 0x1b7   :  { %5518 = vmatpush.bf16.msrb.mxu0 %v6606_v7  ;;  %5531 = vmatpush.bf16.msrb.mxu1 %v6734_v8  ;;  %v7326_v7 = vor.u32 %v9702_v61, %v7325_v58  ;;  %v9622_v8 = vld [vmem:[%s15475_s1 + $0x574] sm:$0xf0]  ;;  %v6989_v21 = vld [vmem:[%s15475_s1 + $0x548] sm:$0xf] }
 0x1b8   :  { %5540 = vmatpush.bf16.msrb.mxu2 %v6926_v9  ;;  %5553 = vmatpush.bf16.msrb.mxu3 %v7054_v29  ;;  %v7181_v9 = vld [vmem:[%s15475_s1 + $0x6c8] sm:$0xf]  ;;  %v6878_v29 = vor.u32 %v9590_v6, %v6877_v16  ;;  %v7006_v17 = vor.u32 %v9622_v8, %v7005_v4  ;;  %v5288_v20 = vpop.f32.mrf.mxu2  ;;  %v5301_v25 = vpop.f32.mrf.mxu3  ;;  %v9694_v48 = vld [vmem:[%s15475_s1 + $0x7b4] sm:$0xf0]  ;;  %v6990_v52 = vor.u32 %v9618_v62, %v6989_v21 }
 0x1b9   :  { %v7182_v23 = vor.u32 %v9666_v12, %v7181_v9  ;;  %v7165_v43 = vld [vmem:[%s15475_s1 + $0x6a8] sm:$0xf]  ;;  %v9614_v61 = vld [vmem:[%s15475_s1 + $0x534] sm:$0xf0] }
 0x1ba   :  { %v7293_v31 = vld [vmem:[%s15475_s1 + $0x7a8] sm:$0xf]  ;;  %v7166_v54 = vor.u32 %v9662_v63, %v7165_v43  ;;  %v9690_v16 = vld [vmem:[%s15475_s1 + $0x794] sm:$0xf0] }
 0x1bb   :  { %5519 = vmatpush.bf16.msrb.mxu0 %v6590_v15  ;;  %5532 = vmatpush.bf16.msrb.mxu1 %v6718_v60  ;;  %v9586_v15 = vld [vmem:[%s15475_s1 + $0x454] sm:$0xf0]  ;;  %v5289_v60 = vadd.f32 %v5288_v20, %v5276_v56  ;;  %v6845_v55 = vld [vmem:[%s15475_s1 + $0x428] sm:$0xf]  ;;  %v7294_v58 = vor.u32 %v9694_v48, %v7293_v31 }
 0x1bc   :  { %5541 = vmatpush.bf16.msrb.mxu2 %v6910_v39  ;;  %5554 = vmatpush.bf16.msrb.mxu3 %v7038_v47  ;;  %v7310_v39 = vor.u32 %v9698_v2, %v7309_v13  ;;  %v5277_v47 = vpop.f32.mrf.mxu1  ;;  %v6862_v51 = vor.u32 %v9586_v15, %v6861_v34  ;;  %v9582_v56 = vld [vmem:[%s15475_s1 + $0x434] sm:$0xf0]  ;;  %v6957_v13 = vld [vmem:[%s15475_s1 + $0x508] sm:$0xf] }
 0x1bd   :  { %v5302_v50 = vadd.f32 %v5301_v25, %v5289_v60  ;;  %v6846_v4 = vor.u32 %v9582_v56, %v6845_v55  ;;  %v9578_v12 = vld [vmem:[%s15475_s1 + $0x414] sm:$0xf0]  ;;  %v7261_v34 = vld [vmem:[%s15475_s1 + $0x768] sm:$0xf] }
 0x1be   :  { %v9610_v2 = vld [vmem:[%s15475_s1 + $0x514] sm:$0xf0]  ;;  %v7453_v21 = vld [vmem:[%s15475_s1 + $0x8e8] sm:$0xf] }
 0x1bf   :  { %5520 = vmatpush.bf16.msrb.mxu0 %v6574_v57  ;;  %5533 = vmatpush.bf16.msrb.mxu1 %v6702_v0  ;;  %v6973_v57 = vld [vmem:[%s15475_s1 + $0x528] sm:$0xf]  ;;  %v9654_v25 = vld [vmem:[%s15475_s1 + $0x674] sm:$0xf0]  ;;  %v6958_v63 = vor.u32 %v9610_v2, %v6957_v13 }
 0x1c0   :  { %5542 = vmatpush.bf16.msrb.mxu2 %v6894_v1  ;;  %5555 = vmatpush.bf16.msrb.mxu3 %v7022_v3  ;;  %v7149_v0 = vld [vmem:[%s15475_s1 + $0x688] sm:$0xf]  ;;  %v9658_v1 = vld [vmem:[%s15475_s1 + $0x694] sm:$0xf0]  ;;  %v5314_v3 = vpop.f32.mrf.mxu0  ;;  %v6974_v8 = vor.u32 %v9614_v61, %v6973_v57 }
 0x1c1   :  { %v13157_v6 = vadd.f32 %v5314_v3, %v5302_v50  ;;  %v7150_v9 = vor.u32 %v9658_v1, %v7149_v0  ;;  %v9686_v15 = vld [vmem:[%s15475_s1 + $0x774] sm:$0xf0]  ;;  %v7581_v62 = vld [vmem:[%s15475_s1 + $0x9e8] sm:$0xf] }
 0x1c2   :  { %5521 = vmatmul.bf16.vlgmr.msrb.gmra.mxu0 %v10605_v26  ;;  %5534 = vmatmul.bf16.vlgmr.msrb.gmra.mxu1 %v10615_v32  ;;  %v9734_v60 = vld [vmem:[%s15475_s1 + $0x8f4] sm:$0xf0]  ;;  %v7262_v31 = vor.u32 %v9686_v15, %v7261_v34  ;;  %v7117_v50 = vld [vmem:[%s15475_s1 + $0x648] sm:$0xf] }
 0x1c3   :  { %5565 = vmatpush.bf16.msra.mxu0 %v7198_v53  ;;  %5578 = vmatpush.bf16.msra.mxu1 %v7326_v7  ;;  %v7277_v53 = vld [vmem:[%s15475_s1 + $0x788] sm:$0xf]  ;;  %v9766_v43 = vld [vmem:[%s15475_s1 + $0x9f4] sm:$0xf0]  ;;  %v7454_v48 = vor.u32 %v9734_v60, %v7453_v21 }
 0x1c4   :  { %5543 = vmatpush.bf16.msrb.mxu2 %v6878_v29  ;;  %5556 = vmatpush.bf16.msrb.mxu3 %v7006_v17  ;;  %v6829_v7 = vld [vmem:[%s15475_s1 + $0x408] sm:$0xf]  ;;  %v5290_v29 = vpop.f32.mrf.mxu2  ;;  %v5303_v17 = vpop.f32.mrf.mxu3  ;;  %v7278_v20 = vor.u32 %v9690_v16, %v7277_v53  ;;  %v9682_v55 = vld [vmem:[%s15475_s1 + $0x754] sm:$0xf0] }
 0x1c5   :  { %v7437_v56 = vld [vmem:[%s15475_s1 + $0x8c8] sm:$0xf]  ;;  %v9730_v57 = vld [vmem:[%s15475_s1 + $0x8d4] sm:$0xf0] }
 0x1c6   :  { %v7565_v61 = vld [vmem:[%s15475_s1 + $0x9c8] sm:$0xf]  ;;  %v9762_v0 = vld [vmem:[%s15475_s1 + $0x9d4] sm:$0xf0]  ;;  %v7438_v53 = vor.u32 %v9730_v57, %v7437_v56 }
 0x1c7   :  { %5566 = vmatpush.bf16.msra.mxu0 %v7182_v23  ;;  %5579 = vmatpush.bf16.msra.mxu1 %v7310_v39  ;;  %v7133_v23 = vld [vmem:[%s15475_s1 + $0x668] sm:$0xf]  ;;  %v6830_v39 = vor.u32 %v9578_v12, %v6829_v7  ;;  %v9726_v13 = vld [vmem:[%s15475_s1 + $0x8b4] sm:$0xf0] }
 0x1c8   :  { %5544 = vmatpush.bf16.msrb.mxu2 %v6862_v51  ;;  %5557 = vmatpush.bf16.msrb.mxu3 %v6990_v52  ;;  %v7134_v47 = vor.u32 %v9654_v25, %v7133_v23  ;;  %v9650_v51 = vld [vmem:[%s15475_s1 + $0x654] sm:$0xf0]  ;;  %v7245_v52 = vld [vmem:[%s15475_s1 + $0x748] sm:$0xf] }
 0x1c9   :  { %v7118_v1 = vor.u32 %v9650_v51, %v7117_v50  ;;  %v7246_v3 = vor.u32 %v9682_v55, %v7245_v52  ;;  %v7101_v16 = vld [vmem:[%s15475_s1 + $0x628] sm:$0xf]  ;;  %v9758_v29 = vld [vmem:[%s15475_s1 + $0x9b4] sm:$0xf0] }
 0x1ca   :  { %v7229_v7 = vld [vmem:[%s15475_s1 + $0x728] sm:$0xf]  ;;  %v9642_v34 = vld [vmem:[%s15475_s1 + $0x614] sm:$0xf0] }
 0x1cb   :  { %5567 = vmatpush.bf16.msra.mxu0 %v7166_v54  ;;  %5580 = vmatpush.bf16.msra.mxu1 %v7294_v58  ;;  %v7582_v54 = vor.u32 %v9766_v43, %v7581_v62  ;;  %v5316_v58 = vpop.f32.mrf.mxu0  ;;  %v7421_v12 = vld [vmem:[%s15475_s1 + $0x8a8] sm:$0xf]  ;;  %v9674_v21 = vld [vmem:[%s15475_s1 + $0x714] sm:$0xf0] }
 0x1cc   :  { %5545 = vmatpush.bf16.msrb.mxu2 %v6846_v4  ;;  %5558 = vmatpush.bf16.msrb.mxu3 %v6974_v8  ;;  %v9646_v4 = vld [vmem:[%s15475_s1 + $0x634] sm:$0xf0]  ;;  %v7566_v8 = vor.u32 %v9762_v0, %v7565_v61  ;;  %v7549_v2 = vld [vmem:[%s15475_s1 + $0x9a8] sm:$0xf]  ;;  %v7422_v25 = vor.u32 %v9726_v13, %v7421_v12 }
 0x1cd   :  { %v7102_v17 = vor.u32 %v9646_v4, %v7101_v16  ;;  %v7213_v15 = vld [vmem:[%s15475_s1 + $0x708] sm:$0xf]  ;;  %v7550_v60 = vor.u32 %v9758_v29, %v7549_v2  ;;  %v9722_v62 = vld [vmem:[%s15475_s1 + $0x894] sm:$0xf0] }
 0x1ce   :  { %v7533_v43 = vld [vmem:[%s15475_s1 + $0x988] sm:$0xf]  ;;  %v7214_v55 = vor.u32 %v9674_v21, %v7213_v15  ;;  %v9718_v61 = vld [vmem:[%s15475_s1 + $0x874] sm:$0xf0] }
 0x1cf   :  { %5568 = vmatpush.bf16.msra.mxu0 %v7150_v9  ;;  %5581 = vmatpush.bf16.msra.mxu1 %v7278_v20  ;;  %v9678_v9 = vld [vmem:[%s15475_s1 + $0x734] sm:$0xf0]  ;;  %v7085_v20 = vld [vmem:[%s15475_s1 + $0x608] sm:$0xf] }
 0x1d0   :  { %5546 = vmatpush.bf16.msrb.mxu2 %v6830_v39  ;;  %5559 = vmatpush.bf16.msrb.mxu3 %v6958_v63  ;;  %v7230_v23 = vor.u32 %v9678_v9, %v7229_v7  ;;  %v7405_v39 = vld [vmem:[%s15475_s1 + $0x888] sm:$0xf]  ;;  %v5327_v63 = vpop.f32.mrf.mxu1  ;;  %v7086_v51 = vor.u32 %v9642_v34, %v7085_v20  ;;  %v9794_v16 = vld [vmem:[%s15475_s1 + $0xad4] sm:$0xf0] }
 0x1d1   :  { %v5328_v50 = vadd.f32 %v5327_v63, %v13157_v6  ;;  %v7837_v52 = vld [vmem:[%s15475_s1 + $0xbe8] sm:$0xf]  ;;  %v7406_v56 = vor.u32 %v9722_v62, %v7405_v39  ;;  %v9826_v7 = vld [vmem:[%s15475_s1 + $0xbd4] sm:$0xf0] }
 0x1d2   :  { %v7389_v6 = vld [vmem:[%s15475_s1 + $0x868] sm:$0xf]  ;;  %v9746_v34 = vld [vmem:[%s15475_s1 + $0x954] sm:$0xf0] }
 0x1d3   :  { %5569 = vmatpush.bf16.msra.mxu0 %v7134_v47  ;;  %5582 = vmatpush.bf16.msra.mxu1 %v7262_v31  ;;  %v9754_v47 = vld [vmem:[%s15475_s1 + $0x994] sm:$0xf0]  ;;  %v7709_v31 = vld [vmem:[%s15475_s1 + $0xae8] sm:$0xf] }
 0x1d4   :  { %5591 = vmatpush.bf16.msra.mxu2 %v7454_v48  ;;  %5604 = vmatpush.bf16.msra.mxu3 %v7582_v54  ;;  %v9798_v48 = vld [vmem:[%s15475_s1 + $0xaf4] sm:$0xf0]  ;;  %v7534_v57 = vor.u32 %v9754_v47, %v7533_v43  ;;  %v7517_v0 = vld [vmem:[%s15475_s1 + $0x968] sm:$0xf] }
 0x1d5   :  { %5547 = vmatmul.bf16.vlgmr.msrb.gmra.mxu2 %v10751_v41  ;;  %5560 = vmatmul.bf16.vlgmr.msrb.gmra.mxu3 %v10755_v44  ;;  %v9830_v54 = vld [vmem:[%s15475_s1 + $0xbf4] sm:$0xf0]  ;;  %v7710_v58 = vor.u32 %v9798_v48, %v7709_v31  ;;  %v7821_v4 = vld [vmem:[%s15475_s1 + $0xbc8] sm:$0xf] }
 0x1d6   :  { %v7373_v29 = vld [vmem:[%s15475_s1 + $0x848] sm:$0xf]  ;;  %v9790_v21 = vld [vmem:[%s15475_s1 + $0xab4] sm:$0xf0] }
 0x1d7   :  { %5570 = vmatpush.bf16.msra.mxu0 %v7118_v1  ;;  %5583 = vmatpush.bf16.msra.mxu1 %v7246_v3  ;;  %v7838_v1 = vor.u32 %v9830_v54, %v7837_v52  ;;  %v9750_v3 = vld [vmem:[%s15475_s1 + $0x974] sm:$0xf0]  ;;  %v7501_v20 = vld [vmem:[%s15475_s1 + $0x948] sm:$0xf] }
 0x1d8   :  { %5592 = vmatpush.bf16.msra.mxu2 %v7438_v53  ;;  %5605 = vmatpush.bf16.msra.mxu3 %v7566_v8  ;;  %v7693_v53 = vld [vmem:[%s15475_s1 + $0xac8] sm:$0xf]  ;;  %v7390_v8 = vor.u32 %v9718_v61, %v7389_v6  ;;  %v7518_v9 = vor.u32 %v9750_v3, %v7517_v0  ;;  %v5340_v12 = vpop.f32.mrf.mxu2  ;;  %v5353_v2 = vpop.f32.mrf.mxu3  ;;  %v9822_v62 = vld [vmem:[%s15475_s1 + $0xbb4] sm:$0xf0]  ;;  %v7502_v47 = vor.u32 %v9746_v34, %v7501_v20 }
 0x1d9   :  { %v7694_v13 = vor.u32 %v9794_v16, %v7693_v53  ;;  %v7677_v15 = vld [vmem:[%s15475_s1 + $0xaa8] sm:$0xf]  ;;  %v9742_v54 = vld [vmem:[%s15475_s1 + $0x934] sm:$0xf0] }
 0x1da   :  { %v7805_v39 = vld [vmem:[%s15475_s1 + $0xba8] sm:$0xf]  ;;  %v7678_v31 = vor.u32 %v9790_v21, %v7677_v15  ;;  %v9818_v6 = vld [vmem:[%s15475_s1 + $0xb94] sm:$0xf0] }
 0x1db   :  { %5571 = vmatpush.bf16.msra.mxu0 %v7102_v17  ;;  %5584 = vmatpush.bf16.msra.mxu1 %v7230_v23  ;;  %v9714_v17 = vld [vmem:[%s15475_s1 + $0x854] sm:$0xf0]  ;;  %v5341_v23 = vadd.f32 %v5340_v12, %v5328_v50  ;;  %v7357_v48 = vld [vmem:[%s15475_s1 + $0x828] sm:$0xf]  ;;  %v7806_v52 = vor.u32 %v9822_v62, %v7805_v39 }
 0x1dc   :  { %5593 = vmatpush.bf16.msra.mxu2 %v7422_v25  ;;  %5606 = vmatpush.bf16.msra.mxu3 %v7550_v60  ;;  %v7822_v25 = vor.u32 %v9826_v7, %v7821_v4  ;;  %v5329_v60 = vpop.f32.mrf.mxu1  ;;  %v7374_v63 = vor.u32 %v9714_v17, %v7373_v29  ;;  %v9710_v50 = vld [vmem:[%s15475_s1 + $0x834] sm:$0xf0]  ;;  %v7469_v4 = vld [vmem:[%s15475_s1 + $0x908] sm:$0xf] }
 0x1dd   :  { %v5354_v43 = vadd.f32 %v5353_v2, %v5341_v23  ;;  %v7358_v0 = vor.u32 %v9710_v50, %v7357_v48  ;;  %v9706_v16 = vld [vmem:[%s15475_s1 + $0x814] sm:$0xf0]  ;;  %v7773_v29 = vld [vmem:[%s15475_s1 + $0xb68] sm:$0xf] }
 0x1de   :  { %v9738_v7 = vld [vmem:[%s15475_s1 + $0x914] sm:$0xf0]  ;;  %v7965_v20 = vld [vmem:[%s15475_s1 + $0xce8] sm:$0xf] }
 0x1df   :  { %5572 = vmatpush.bf16.msra.mxu0 %v7086_v51  ;;  %5585 = vmatpush.bf16.msra.mxu1 %v7214_v55  ;;  %v7485_v51 = vld [vmem:[%s15475_s1 + $0x928] sm:$0xf]  ;;  %v9782_v2 = vld [vmem:[%s15475_s1 + $0xa74] sm:$0xf0]  ;;  %v7470_v21 = vor.u32 %v9738_v7, %v7469_v4 }
 0x1e0   :  { %5594 = vmatpush.bf16.msra.mxu2 %v7406_v56  ;;  %5607 = vmatpush.bf16.msra.mxu3 %v7534_v57  ;;  %v7661_v55 = vld [vmem:[%s15475_s1 + $0xa88] sm:$0xf]  ;;  %v9786_v56 = vld [vmem:[%s15475_s1 + $0xa94] sm:$0xf0]  ;;  %v5366_v57 = vpop.f32.mrf.mxu0  ;;  %v7486_v3 = vor.u32 %v9742_v54, %v7485_v51 }
 0x1e1   :  { %v13356_v61 = vadd.f32 %v5366_v57, %v5354_v43  ;;  %v7662_v53 = vor.u32 %v9786_v56, %v7661_v55  ;;  %v9814_v17 = vld [vmem:[%s15475_s1 + $0xb74] sm:$0xf0]  ;;  %v8093_v34 = vld [vmem:[%s15475_s1 + $0xde8] sm:$0xf] }
 0x1e2   :  { %5573 = vmatmul.bf16.vlgmr.msra.gmra.mxu0 %v10743_v38  ;;  %5586 = vmatmul.bf16.vlgmr.msra.gmra.mxu1 %v10753_v42  ;;  %v9862_v23 = vld [vmem:[%s15475_s1 + $0xcf4] sm:$0xf0]  ;;  %v7774_v39 = vor.u32 %v9814_v17, %v7773_v29  ;;  %v7629_v43 = vld [vmem:[%s15475_s1 + $0xa48] sm:$0xf] }
 0x1e3   :  { %5617 = vmatpush.bf16.msrb.mxu0 %v7710_v58  ;;  %5630 = vmatpush.bf16.msrb.mxu1 %v7838_v1  ;;  %v7789_v58 = vld [vmem:[%s15475_s1 + $0xb88] sm:$0xf]  ;;  %v9894_v15 = vld [vmem:[%s15475_s1 + $0xdf4] sm:$0xf0]  ;;  %v7966_v62 = vor.u32 %v9862_v23, %v7965_v20 }
 0x1e4   :  { %5595 = vmatpush.bf16.msra.mxu2 %v7390_v8  ;;  %5608 = vmatpush.bf16.msra.mxu3 %v7518_v9  ;;  %v7341_v1 = vld [vmem:[%s15475_s1 + $0x808] sm:$0xf]  ;;  %v5342_v8 = vpop.f32.mrf.mxu2  ;;  %v5355_v9 = vpop.f32.mrf.mxu3  ;;  %v7790_v12 = vor.u32 %v9818_v6, %v7789_v58  ;;  %v9810_v48 = vld [vmem:[%s15475_s1 + $0xb54] sm:$0xf0] }
 0x1e5   :  { %v7949_v50 = vld [vmem:[%s15475_s1 + $0xcc8] sm:$0xf]  ;;  %v9858_v51 = vld [vmem:[%s15475_s1 + $0xcd4] sm:$0xf0] }
 0x1e6   :  { %v8077_v54 = vld [vmem:[%s15475_s1 + $0xdc8] sm:$0xf]  ;;  %v9890_v55 = vld [vmem:[%s15475_s1 + $0xdd4] sm:$0xf0]  ;;  %v7950_v58 = vor.u32 %v9858_v51, %v7949_v50 }
 0x1e7   :  { %5618 = vmatpush.bf16.msrb.mxu0 %v7694_v13  ;;  %5631 = vmatpush.bf16.msrb.mxu1 %v7822_v25  ;;  %v7645_v13 = vld [vmem:[%s15475_s1 + $0xa68] sm:$0xf]  ;;  %v7342_v25 = vor.u32 %v9706_v16, %v7341_v1  ;;  %v9854_v4 = vld [vmem:[%s15475_s1 + $0xcb4] sm:$0xf0] }
 0x1e8   :  { %5596 = vmatpush.bf16.msra.mxu2 %v7374_v63  ;;  %5609 = vmatpush.bf16.msra.mxu3 %v7502_v47  ;;  %v7646_v60 = vor.u32 %v9782_v2, %v7645_v13  ;;  %v9778_v63 = vld [vmem:[%s15475_s1 + $0xa54] sm:$0xf0]  ;;  %v7757_v47 = vld [vmem:[%s15475_s1 + $0xb48] sm:$0xf] }
 0x1e9   :  { %v7630_v56 = vor.u32 %v9778_v63, %v7629_v43  ;;  %v7758_v57 = vor.u32 %v9810_v48, %v7757_v47  ;;  %v7613_v6 = vld [vmem:[%s15475_s1 + $0xa28] sm:$0xf]  ;;  %v9886_v8 = vld [vmem:[%s15475_s1 + $0xdb4] sm:$0xf0] }
 0x1ea   :  { %v7741_v1 = vld [vmem:[%s15475_s1 + $0xb28] sm:$0xf]  ;;  %v9770_v29 = vld [vmem:[%s15475_s1 + $0xa14] sm:$0xf0] }
 0x1eb   :  { %5619 = vmatpush.bf16.msrb.mxu0 %v7678_v31  ;;  %5632 = vmatpush.bf16.msrb.mxu1 %v7806_v52  ;;  %v8094_v31 = vor.u32 %v9894_v15, %v8093_v34  ;;  %v5368_v52 = vpop.f32.mrf.mxu0  ;;  %v7933_v16 = vld [vmem:[%s15475_s1 + $0xca8] sm:$0xf]  ;;  %v9802_v20 = vld [vmem:[%s15475_s1 + $0xb14] sm:$0xf0] }
 0x1ec   :  { %5597 = vmatpush.bf16.msra.mxu2 %v7358_v0  ;;  %5610 = vmatpush.bf16.msra.mxu3 %v7486_v3  ;;  %v9774_v0 = vld [vmem:[%s15475_s1 + $0xa34] sm:$0xf0]  ;;  %v8078_v3 = vor.u32 %v9890_v55, %v8077_v54  ;;  %v8061_v7 = vld [vmem:[%s15475_s1 + $0xda8] sm:$0xf]  ;;  %v7934_v2 = vor.u32 %v9854_v4, %v7933_v16 }
 0x1ed   :  { %v7614_v9 = vor.u32 %v9774_v0, %v7613_v6  ;;  %v7725_v17 = vld [vmem:[%s15475_s1 + $0xb08] sm:$0xf]  ;;  %v8062_v23 = vor.u32 %v9886_v8, %v8061_v7  ;;  %v9850_v34 = vld [vmem:[%s15475_s1 + $0xc94] sm:$0xf0] }
 0x1ee   :  { %v8045_v15 = vld [vmem:[%s15475_s1 + $0xd88] sm:$0xf]  ;;  %v7726_v48 = vor.u32 %v9802_v20, %v7725_v17  ;;  %v9846_v54 = vld [vmem:[%s15475_s1 + $0xc74] sm:$0xf0] }
 0x1ef   :  { %5620 = vmatpush.bf16.msrb.mxu0 %v7662_v53  ;;  %5633 = vmatpush.bf16.msrb.mxu1 %v7790_v12  ;;  %v9806_v53 = vld [vmem:[%s15475_s1 + $0xb34] sm:$0xf0]  ;;  %v7597_v12 = vld [vmem:[%s15475_s1 + $0xa08] sm:$0xf] }
 0x1f0   :  { %5598 = vmatpush.bf16.msra.mxu2 %v7342_v25  ;;  %5611 = vmatpush.bf16.msra.mxu3 %v7470_v21  ;;  %v7742_v13 = vor.u32 %v9806_v53, %v7741_v1  ;;  %v7917_v25 = vld [vmem:[%s15475_s1 + $0xc88] sm:$0xf]  ;;  %v5379_v21 = vpop.f32.mrf.mxu1  ;;  %v7598_v63 = vor.u32 %v9770_v29, %v7597_v12  ;;  %v9922_v6 = vld [vmem:[%s15475_s1 + $0xed4] sm:$0xf0] }
 0x1f1   :  { %v5380_v43 = vadd.f32 %v5379_v21, %v13356_v61  ;;  %v8349_v47 = vld [vmem:[%s15475_s1 + $0xfe8] sm:$0xf]  ;;  %v7918_v50 = vor.u32 %v9850_v34, %v7917_v25  ;;  %v9954_v1 = vld [vmem:[%s15475_s1 + $0xfd4] sm:$0xf0] }
 0x1f2   :  { %v7901_v61 = vld [vmem:[%s15475_s1 + $0xc68] sm:$0xf]  ;;  %v9874_v29 = vld [vmem:[%s15475_s1 + $0xd54] sm:$0xf0] }
 0x1f3   :  { %5621 = vmatpush.bf16.msrb.mxu0 %v7646_v60  ;;  %5634 = vmatpush.bf16.msrb.mxu1 %v7774_v39  ;;  %v9882_v60 = vld [vmem:[%s15475_s1 + $0xd94] sm:$0xf0]  ;;  %v8221_v39 = vld [vmem:[%s15475_s1 + $0xee8] sm:$0xf] }
 0x1f4   :  { %5643 = vmatpush.bf16.msrb.mxu2 %v7966_v62  ;;  %5656 = vmatpush.bf16.msrb.mxu3 %v8094_v31  ;;  %v9926_v62 = vld [vmem:[%s15475_s1 + $0xef4] sm:$0xf0]  ;;  %v8046_v51 = vor.u32 %v9882_v60, %v8045_v15  ;;  %v8029_v55 = vld [vmem:[%s15475_s1 + $0xd68] sm:$0xf] }
 0x1f5   :  { %5599 = vmatmul.bf16.vlgmr.msra.gmra.mxu2 %v10951_v24  ;;  %5612 = vmatmul.bf16.vlgmr.msra.gmra.mxu3 %v10968_v18  ;;  %v9958_v31 = vld [vmem:[%s15475_s1 + $0xff4] sm:$0xf0]  ;;  %v8222_v52 = vor.u32 %v9926_v62, %v8221_v39  ;;  %v8333_v0 = vld [vmem:[%s15475_s1 + $0xfc8] sm:$0xf] }
 0x1f6   :  { %v7885_v8 = vld [vmem:[%s15475_s1 + $0xc48] sm:$0xf]  ;;  %v9918_v20 = vld [vmem:[%s15475_s1 + $0xeb4] sm:$0xf0] }
 0x1f7   :  { %5622 = vmatpush.bf16.msrb.mxu0 %v7630_v56  ;;  %5635 = vmatpush.bf16.msrb.mxu1 %v7758_v57  ;;  %v8350_v56 = vor.u32 %v9958_v31, %v8349_v47  ;;  %v9878_v57 = vld [vmem:[%s15475_s1 + $0xd74] sm:$0xf0]  ;;  %v8013_v12 = vld [vmem:[%s15475_s1 + $0xd48] sm:$0xf] }
 0x1f8   :  { %5644 = vmatpush.bf16.msrb.mxu2 %v7950_v58  ;;  %5657 = vmatpush.bf16.msrb.mxu3 %v8078_v3  ;;  %v8205_v58 = vld [vmem:[%s15475_s1 + $0xec8] sm:$0xf]  ;;  %v7902_v3 = vor.u32 %v9846_v54, %v7901_v61  ;;  %v8030_v53 = vor.u32 %v9878_v57, %v8029_v55  ;;  %v5392_v16 = vpop.f32.mrf.mxu2  ;;  %v5405_v7 = vpop.f32.mrf.mxu3  ;;  %v9950_v34 = vld [vmem:[%s15475_s1 + $0xfb4] sm:$0xf0]  ;;  %v8014_v60 = vor.u32 %v9874_v29, %v8013_v12 }
 0x1f9   :  { %v8206_v4 = vor.u32 %v9922_v6, %v8205_v58  ;;  %v8189_v17 = vld [vmem:[%s15475_s1 + $0xea8] sm:$0xf]  ;;  %v9870_v31 = vld [vmem:[%s15475_s1 + $0xd34] sm:$0xf0] }
 0x1fa   :  { %v8317_v25 = vld [vmem:[%s15475_s1 + $0xfa8] sm:$0xf]  ;;  %v8190_v39 = vor.u32 %v9918_v20, %v8189_v17  ;;  %v9946_v61 = vld [vmem:[%s15475_s1 + $0xf94] sm:$0xf0] }
 0x1fb   :  { %5623 = vmatpush.bf16.msrb.mxu0 %v7614_v9  ;;  %5636 = vmatpush.bf16.msrb.mxu1 %v7742_v13  ;;  %v9842_v9 = vld [vmem:[%s15475_s1 + $0xc54] sm:$0xf0]  ;;  %v5393_v13 = vadd.f32 %v5392_v16, %v5380_v43  ;;  %v7869_v62 = vld [vmem:[%s15475_s1 + $0xc28] sm:$0xf]  ;;  %v8318_v47 = vor.u32 %v9950_v34, %v8317_v25 }
 0x1fc   :  { %5645 = vmatpush.bf16.msrb.mxu2 %v7934_v2  ;;  %5658 = vmatpush.bf16.msrb.mxu3 %v8062_v23  ;;  %v8334_v2 = vor.u32 %v9954_v1, %v8333_v0  ;;  %v5381_v23 = vpop.f32.mrf.mxu1  ;;  %v7886_v21 = vor.u32 %v9842_v9, %v7885_v8  ;;  %v9838_v43 = vld [vmem:[%s15475_s1 + $0xc34] sm:$0xf0]  ;;  %v7981_v0 = vld [vmem:[%s15475_s1 + $0xd08] sm:$0xf] }
 0x1fd   :  { %v5406_v15 = vadd.f32 %v5405_v7, %v5393_v13  ;;  %v7870_v55 = vor.u32 %v9838_v43, %v7869_v62  ;;  %v9834_v6 = vld [vmem:[%s15475_s1 + $0xc14] sm:$0xf0]  ;;  %v8285_v8 = vld [vmem:[%s15475_s1 + $0xf68] sm:$0xf] }
 0x1fe   :  { %v9866_v1 = vld [vmem:[%s15475_s1 + $0xd14] sm:$0xf0]  ;;  %v8477_v12 = vld [vmem:[%s15475_s1 + $0x10e8] sm:$0xf] }
 0x1ff   :  { %5624 = vmatpush.bf16.msrb.mxu0 %v7598_v63  ;;  %5637 = vmatpush.bf16.msrb.mxu1 %v7726_v48  ;;  %v7997_v63 = vld [vmem:[%s15475_s1 + $0xd28] sm:$0xf]  ;;  %v9910_v7 = vld [vmem:[%s15475_s1 + $0xe74] sm:$0xf0]  ;;  %v7982_v20 = vor.u32 %v9866_v1, %v7981_v0 }
 0x200   :  { %5646 = vmatpush.bf16.msrb.mxu2 %v7918_v50  ;;  %5659 = vmatpush.bf16.msrb.mxu3 %v8046_v51  ;;  %v8173_v48 = vld [vmem:[%s15475_s1 + $0xe88] sm:$0xf]  ;;  %v9914_v50 = vld [vmem:[%s15475_s1 + $0xe94] sm:$0xf0]  ;;  %v5418_v51 = vpop.f32.mrf.mxu0  ;;  %v7998_v57 = vor.u32 %v9870_v31, %v7997_v63 }
 0x201   :  { %v13555_v54 = vadd.f32 %v5418_v51, %v5406_v15  ;;  %v8174_v58 = vor.u32 %v9914_v50, %v8173_v48  ;;  %v9942_v9 = vld [vmem:[%s15475_s1 + $0xf74] sm:$0xf0]  ;;  %v8605_v29 = vld [vmem:[%s15475_s1 + $0x11e8] sm:$0xf] }
 0x202   :  { %5625 = vmatmul.bf16.vlgmr.msrb.gmra.mxu0 %v10964_v30  ;;  %5638 = vmatmul.bf16.vlgmr.msrb.gmra.mxu1 %v10978_v35  ;;  %v9990_v13 = vld [vmem:[%s15475_s1 + $0x10f4] sm:$0xf0]  ;;  %v8286_v25 = vor.u32 %v9942_v9, %v8285_v8  ;;  %v8141_v15 = vld [vmem:[%s15475_s1 + $0xe48] sm:$0xf] }
 0x203   :  { %5669 = vmatpush.bf16.msra.mxu0 %v8222_v52  ;;  %5682 = vmatpush.bf16.msra.mxu1 %v8350_v56  ;;  %v8301_v52 = vld [vmem:[%s15475_s1 + $0xf88] sm:$0xf]  ;;  %v10022_v17 = vld [vmem:[%s15475_s1 + $0x11f4] sm:$0xf0]  ;;  %v8478_v34 = vor.u32 %v9990_v13, %v8477_v12 }
 0x204   :  { %5647 = vmatpush.bf16.msrb.mxu2 %v7902_v3  ;;  %5660 = vmatpush.bf16.msrb.mxu3 %v8030_v53  ;;  %v7853_v56 = vld [vmem:[%s15475_s1 + $0xc08] sm:$0xf]  ;;  %v5394_v3 = vpop.f32.mrf.mxu2  ;;  %v5407_v53 = vpop.f32.mrf.mxu3  ;;  %v8302_v16 = vor.u32 %v9946_v61, %v8301_v52  ;;  %v9938_v62 = vld [vmem:[%s15475_s1 + $0xf54] sm:$0xf0] }
 0x205   :  { %v8461_v43 = vld [vmem:[%s15475_s1 + $0x10c8] sm:$0xf]  ;;  %v9986_v63 = vld [vmem:[%s15475_s1 + $0x10d4] sm:$0xf0] }
 0x206   :  { %v8589_v31 = vld [vmem:[%s15475_s1 + $0x11c8] sm:$0xf]  ;;  %v10018_v48 = vld [vmem:[%s15475_s1 + $0x11d4] sm:$0xf0]  ;;  %v8462_v52 = vor.u32 %v9986_v63, %v8461_v43 }
 0x207   :  { %5670 = vmatpush.bf16.msra.mxu0 %v8206_v4  ;;  %5683 = vmatpush.bf16.msra.mxu1 %v8334_v2  ;;  %v8157_v4 = vld [vmem:[%s15475_s1 + $0xe68] sm:$0xf]  ;;  %v7854_v2 = vor.u32 %v9834_v6, %v7853_v56  ;;  %v9982_v0 = vld [vmem:[%s15475_s1 + $0x10b4] sm:$0xf0] }
 0x208   :  { %5648 = vmatpush.bf16.msrb.mxu2 %v7886_v21  ;;  %5661 = vmatpush.bf16.msrb.mxu3 %v8014_v60  ;;  %v8158_v23 = vor.u32 %v9910_v7, %v8157_v4  ;;  %v9906_v21 = vld [vmem:[%s15475_s1 + $0xe54] sm:$0xf0]  ;;  %v8269_v60 = vld [vmem:[%s15475_s1 + $0xf48] sm:$0xf] }
 0x209   :  { %v8142_v50 = vor.u32 %v9906_v21, %v8141_v15  ;;  %v8270_v51 = vor.u32 %v9938_v62, %v8269_v60  ;;  %v8125_v61 = vld [vmem:[%s15475_s1 + $0xe28] sm:$0xf]  ;;  %v10014_v3 = vld [vmem:[%s15475_s1 + $0x11b4] sm:$0xf0] }
 0x20a   :  { %v8253_v56 = vld [vmem:[%s15475_s1 + $0xf28] sm:$0xf]  ;;  %v9898_v8 = vld [vmem:[%s15475_s1 + $0xe14] sm:$0xf0] }
 0x20b   :  { %5671 = vmatpush.bf16.msra.mxu0 %v8190_v39  ;;  %5684 = vmatpush.bf16.msra.mxu1 %v8318_v47  ;;  %v8606_v39 = vor.u32 %v10022_v17, %v8605_v29  ;;  %v5420_v47 = vpop.f32.mrf.mxu0  ;;  %v8445_v6 = vld [vmem:[%s15475_s1 + $0x10a8] sm:$0xf]  ;;  %v9930_v12 = vld [vmem:[%s15475_s1 + $0xf14] sm:$0xf0] }
 0x20c   :  { %5649 = vmatpush.bf16.msrb.mxu2 %v7870_v55  ;;  %5662 = vmatpush.bf16.msrb.mxu3 %v7998_v57  ;;  %v9902_v55 = vld [vmem:[%s15475_s1 + $0xe34] sm:$0xf0]  ;;  %v8590_v57 = vor.u32 %v10018_v48, %v8589_v31  ;;  %v8573_v1 = vld [vmem:[%s15475_s1 + $0x11a8] sm:$0xf]  ;;  %v8446_v7 = vor.u32 %v9982_v0, %v8445_v6 }
 0x20d   :  { %v8126_v53 = vor.u32 %v9902_v55, %v8125_v61  ;;  %v8237_v9 = vld [vmem:[%s15475_s1 + $0xf08] sm:$0xf]  ;;  %v8574_v13 = vor.u32 %v10014_v3, %v8573_v1  ;;  %v9978_v29 = vld [vmem:[%s15475_s1 + $0x1094] sm:$0xf0] }
 0x20e   :  { %v8557_v17 = vld [vmem:[%s15475_s1 + $0x1188] sm:$0xf]  ;;  %v8238_v62 = vor.u32 %v9930_v12, %v8237_v9  ;;  %v9974_v31 = vld [vmem:[%s15475_s1 + $0x1074] sm:$0xf0] }
 0x20f   :  { %5672 = vmatpush.bf16.msra.mxu0 %v8174_v58  ;;  %5685 = vmatpush.bf16.msra.mxu1 %v8302_v16  ;;  %v9934_v58 = vld [vmem:[%s15475_s1 + $0xf34] sm:$0xf0]  ;;  %v8109_v16 = vld [vmem:[%s15475_s1 + $0xe08] sm:$0xf] }
 0x210   :  { %5650 = vmatpush.bf16.msrb.mxu2 %v7854_v2  ;;  %5663 = vmatpush.bf16.msrb.mxu3 %v7982_v20  ;;  %v8254_v4 = vor.u32 %v9934_v58, %v8253_v56  ;;  %v8429_v2 = vld [vmem:[%s15475_s1 + $0x1088] sm:$0xf]  ;;  %v5431_v20 = vpop.f32.mrf.mxu1  ;;  %v8110_v21 = vor.u32 %v9898_v8, %v8109_v16  ;;  %v10050_v61 = vld [vmem:[%s15475_s1 + $0x12d4] sm:$0xf0] }
 0x211   :  { %v5432_v15 = vadd.f32 %v5431_v20, %v13555_v54  ;;  %v8861_v60 = vld [vmem:[%s15475_s1 + $0x13e8] sm:$0xf]  ;;  %v8430_v43 = vor.u32 %v9978_v29, %v8429_v2  ;;  %v10082_v56 = vld [vmem:[%s15475_s1 + $0x13d4] sm:$0xf0] }
 0x212   :  { %v8413_v54 = vld [vmem:[%s15475_s1 + $0x1068] sm:$0xf]  ;;  %v10002_v9 = vld [vmem:[%s15475_s1 + $0x1154] sm:$0xf0] }
 0x213   :  { %5673 = vmatpush.bf16.msra.mxu0 %v8158_v23  ;;  %5686 = vmatpush.bf16.msra.mxu1 %v8286_v25  ;;  %v10010_v23 = vld [vmem:[%s15475_s1 + $0x1194] sm:$0xf0]  ;;  %v8733_v25 = vld [vmem:[%s15475_s1 + $0x12e8] sm:$0xf] }
 0x214   :  { %5695 = vmatpush.bf16.msra.mxu2 %v8478_v34  ;;  %5708 = vmatpush.bf16.msra.mxu3 %v8606_v39  ;;  %v10054_v34 = vld [vmem:[%s15475_s1 + $0x12f4] sm:$0xf0]  ;;  %v8558_v63 = vor.u32 %v10010_v23, %v8557_v17  ;;  %v8541_v48 = vld [vmem:[%s15475_s1 + $0x1168] sm:$0xf] }
 0x215   :  { %5651 = vmatmul.bf16.vlgmr.msrb.gmra.mxu2 %v11174_v28  ;;  %5664 = vmatmul.bf16.vlgmr.msrb.gmra.mxu3 %v11191_v59  ;;  %v10086_v39 = vld [vmem:[%s15475_s1 + $0x13f4] sm:$0xf0]  ;;  %v8734_v47 = vor.u32 %v10054_v34, %v8733_v25  ;;  %v8845_v55 = vld [vmem:[%s15475_s1 + $0x13c8] sm:$0xf] }
 0x216   :  { %v8397_v3 = vld [vmem:[%s15475_s1 + $0x1048] sm:$0xf]  ;;  %v10078_v29 = vld [vmem:[%s15475_s1 + $0x13b4] sm:$0xf0] }
 0x217   :  { %5674 = vmatpush.bf16.msra.mxu0 %v8142_v50  ;;  %5687 = vmatpush.bf16.msra.mxu1 %v8270_v51  ;;  %v8862_v50 = vor.u32 %v10086_v39, %v8861_v60  ;;  %v10006_v51 = vld [vmem:[%s15475_s1 + $0x1174] sm:$0xf0]  ;;  %v8525_v16 = vld [vmem:[%s15475_s1 + $0x1148] sm:$0xf] }
 0x218   :  { %5696 = vmatpush.bf16.msra.mxu2 %v8462_v52  ;;  %5709 = vmatpush.bf16.msra.mxu3 %v8590_v57  ;;  %v8717_v52 = vld [vmem:[%s15475_s1 + $0x12c8] sm:$0xf]  ;;  %v8414_v57 = vor.u32 %v9974_v31, %v8413_v54  ;;  %v8542_v58 = vor.u32 %v10006_v51, %v8541_v48  ;;  %v5444_v6 = vpop.f32.mrf.mxu2  ;;  %v5457_v1 = vpop.f32.mrf.mxu3  ;;  %v8526_v23 = vor.u32 %v10002_v9, %v8525_v16  ;;  %v9998_v39 = vld [vmem:[%s15475_s1 + $0x1134] sm:$0xf0] }
 0x219   :  { %v8718_v0 = vor.u32 %v10050_v61, %v8717_v52  ;;  %v5433_v8 = vpop.f32.mrf.mxu1  ;;  %v8701_v12 = vld [vmem:[%s15475_s1 + $0x12a8] sm:$0xf]  ;;  %v10074_v54 = vld [vmem:[%s15475_s1 + $0x1394] sm:$0xf0] }
 0x21a   :  { %v8829_v2 = vld [vmem:[%s15475_s1 + $0x13a8] sm:$0xf]  ;;  %v9962_v61 = vld [vmem:[%s15475_s1 + $0x1014] sm:$0xf0] }
 0x21b   :  { %5675 = vmatpush.bf16.msra.mxu0 %v8126_v53  ;;  %5688 = vmatpush.bf16.msra.mxu1 %v8254_v4  ;;  %v9970_v53 = vld [vmem:[%s15475_s1 + $0x1054] sm:$0xf0]  ;;  %v5445_v4 = vadd.f32 %v5444_v6, %v5432_v15  ;;  %v8381_v34 = vld [vmem:[%s15475_s1 + $0x1028] sm:$0xf]  ;;  %v8830_v60 = vor.u32 %v10078_v29, %v8829_v2 }
 0x21c   :  { %5697 = vmatpush.bf16.msra.mxu2 %v8446_v7  ;;  %5710 = vmatpush.bf16.msra.mxu3 %v8574_v13  ;;  %v8846_v7 = vor.u32 %v10082_v56, %v8845_v55  ;;  %v10046_v13 = vld [vmem:[%s15475_s1 + $0x12b4] sm:$0xf0]  ;;  %v8398_v20 = vor.u32 %v9970_v53, %v8397_v3  ;;  %v8493_v55 = vld [vmem:[%s15475_s1 + $0x1108] sm:$0xf] }
 0x21d   :  { %v5458_v17 = vadd.f32 %v5457_v1, %v5445_v4  ;;  %v8702_v25 = vor.u32 %v10046_v13, %v8701_v12  ;;  %v9966_v15 = vld [vmem:[%s15475_s1 + $0x1034] sm:$0xf0]  ;;  %v8797_v3 = vld [vmem:[%s15475_s1 + $0x1368] sm:$0xf] }
 0x21e   :  { %v8382_v48 = vor.u32 %v9966_v15, %v8381_v34  ;;  %v9994_v56 = vld [vmem:[%s15475_s1 + $0x1114] sm:$0xf0]  ;;  %v8989_v16 = vld [vmem:[%s15475_s1 + $0x14e8] sm:$0xf] }
 0x21f   :  { %5676 = vmatpush.bf16.msra.mxu0 %v8110_v21  ;;  %5689 = vmatpush.bf16.msra.mxu1 %v8238_v62  ;;  %v8509_v21 = vld [vmem:[%s15475_s1 + $0x1128] sm:$0xf]  ;;  %v10038_v1 = vld [vmem:[%s15475_s1 + $0x1274] sm:$0xf0]  ;;  %v8494_v2 = vor.u32 %v9994_v56, %v8493_v55 }
 0x220   :  { %5698 = vmatpush.bf16.msra.mxu2 %v8430_v43  ;;  %5711 = vmatpush.bf16.msra.mxu3 %v8558_v63  ;;  %v8685_v62 = vld [vmem:[%s15475_s1 + $0x1288] sm:$0xf]  ;;  %v10042_v43 = vld [vmem:[%s15475_s1 + $0x1294] sm:$0xf0]  ;;  %v5470_v63 = vpop.f32.mrf.mxu0  ;;  %v8510_v51 = vor.u32 %v9998_v39, %v8509_v21 }
 0x221   :  { %v5471_v31 = vadd.f32 %v5470_v63, %v5458_v17  ;;  %v8686_v52 = vor.u32 %v10042_v43, %v8685_v62  ;;  %v10070_v53 = vld [vmem:[%s15475_s1 + $0x1374] sm:$0xf0]  ;;  %v9117_v9 = vld [vmem:[%s15475_s1 + $0x15e8] sm:$0xf] }
 0x222   :  { %5677 = vmatmul.bf16.vlgmr.msra.gmra.mxu0 %v11187_v19  ;;  %5690 = vmatmul.bf16.vlgmr.msra.gmra.mxu1 %v11201_v37  ;;  %v10118_v4 = vld [vmem:[%s15475_s1 + $0x14f4] sm:$0xf0]  ;;  %v8798_v17 = vor.u32 %v10070_v53, %v8797_v3  ;;  %v8781_v34 = vld [vmem:[%s15475_s1 + $0x1348] sm:$0xf] }
 0x223   :  { %5721 = vmatpush.bf16.msrb.mxu0 %v8734_v47  ;;  %5734 = vmatpush.bf16.msrb.mxu1 %v8862_v50  ;;  %v8813_v47 = vld [vmem:[%s15475_s1 + $0x1388] sm:$0xf]  ;;  %v10150_v12 = vld [vmem:[%s15475_s1 + $0x15f4] sm:$0xf0] }
 0x224   :  { %5699 = vmatpush.bf16.msra.mxu2 %v8414_v57  ;;  %5712 = vmatpush.bf16.msra.mxu3 %v8542_v58  ;;  %v8365_v50 = vld [vmem:[%s15475_s1 + $0x1008] sm:$0xf]  ;;  %v5459_v57 = vpop.f32.mrf.mxu3  ;;  %v5446_v58 = vpop.f32.mrf.mxu2  ;;  %v8814_v6 = vor.u32 %v10074_v54, %v8813_v47  ;;  %v9118_v15 = vor.u32 %v10150_v12, %v9117_v9  ;;  %v10066_v21 = vld [vmem:[%s15475_s1 + $0x1354] sm:$0xf0] }
 0x225   :  { %v8366_v8 = vor.u32 %v9962_v61, %v8365_v50  ;;  %v10114_v39 = vld [vmem:[%s15475_s1 + $0x14d4] sm:$0xf0]  ;;  %v9101_v43 = vld [vmem:[%s15475_s1 + $0x15c8] sm:$0xf]  ;;  %v8782_v54 = vor.u32 %v10066_v21, %v8781_v34 }
 0x226   :  { %v10146_v63 = vld [vmem:[%s15475_s1 + $0x15d4] sm:$0xf0]  ;;  %v8957_v55 = vld [vmem:[%s15475_s1 + $0x14a8] sm:$0xf] }
 0x227   :  { %5722 = vmatpush.bf16.msrb.mxu0 %v8718_v0  ;;  %5735 = vmatpush.bf16.msrb.mxu1 %v8846_v7  ;;  %v8669_v0 = vld [vmem:[%s15475_s1 + $0x1268] sm:$0xf]  ;;  %v5483_v7 = vpop.f32.mrf.mxu1  ;;  %v10030_v50 = vld [vmem:[%s15475_s1 + $0x1234] sm:$0xf0] }
 0x228   :  { %5700 = vmatpush.bf16.msra.mxu2 %v8398_v20  ;;  %5713 = vmatpush.bf16.msra.mxu3 %v8526_v23  ;;  %v13790_v13 = vadd.f32 %v5483_v7, %v5471_v31  ;;  %v8670_v29 = vor.u32 %v10038_v1, %v8669_v0  ;;  %v8990_v20 = vor.u32 %v10118_v4, %v8989_v16  ;;  %v8653_v23 = vld [vmem:[%s15475_s1 + $0x1248] sm:$0xf]  ;;  %v5472_v62 = vpop.f32.mrf.mxu0  ;;  %v10062_v61 = vld [vmem:[%s15475_s1 + $0x1334] sm:$0xf0] }
 0x229   :  { %v10110_v56 = vld [vmem:[%s15475_s1 + $0x14b4] sm:$0xf0]  ;;  %v9085_v57 = vld [vmem:[%s15475_s1 + $0x15a8] sm:$0xf] }
 0x22a   :  { %v10142_v58 = vld [vmem:[%s15475_s1 + $0x15b4] sm:$0xf0]  ;;  %v8621_v1 = vld [vmem:[%s15475_s1 + $0x1208] sm:$0xf]  ;;  %v8958_v53 = vor.u32 %v10110_v56, %v8957_v55 }
 0x22b   :  { %5723 = vmatpush.bf16.msrb.mxu0 %v8702_v25  ;;  %5736 = vmatpush.bf16.msrb.mxu1 %v8830_v60  ;;  %v10034_v25 = vld [vmem:[%s15475_s1 + $0x1254] sm:$0xf0]  ;;  %v8973_v60 = vld [vmem:[%s15475_s1 + $0x14c8] sm:$0xf] }
 0x22c   :  { %5701 = vmatpush.bf16.msra.mxu2 %v8382_v48  ;;  %5714 = vmatpush.bf16.msra.mxu3 %v8510_v51  ;;  %v8654_v47 = vor.u32 %v10034_v25, %v8653_v23  ;;  %v8974_v31 = vor.u32 %v10114_v39, %v8973_v60  ;;  %v8637_v48 = vld [vmem:[%s15475_s1 + $0x1228] sm:$0xf]  ;;  %v10026_v16 = vld [vmem:[%s15475_s1 + $0x1214] sm:$0xf0] }
 0x22d   :  { %v8765_v51 = vld [vmem:[%s15475_s1 + $0x1328] sm:$0xf]  ;;  %v8638_v0 = vor.u32 %v10030_v50, %v8637_v48  ;;  %v10058_v7 = vld [vmem:[%s15475_s1 + $0x1314] sm:$0xf0]  ;;  %v8622_v23 = vor.u32 %v10026_v16, %v8621_v1 }
 0x22e   :  { %v8766_v3 = vor.u32 %v10062_v61, %v8765_v51  ;;  %v8749_v4 = vld [vmem:[%s15475_s1 + $0x1308] sm:$0xf]  ;;  %v10106_v12 = vld [vmem:[%s15475_s1 + $0x1494] sm:$0xf0] }
 0x22f   :  { %5724 = vmatpush.bf16.msrb.mxu0 %v8686_v52  ;;  %5737 = vmatpush.bf16.msrb.mxu1 %v8814_v6  ;;  %v9102_v52 = vor.u32 %v10146_v63, %v9101_v43  ;;  %v5485_v6 = vpop.f32.mrf.mxu1  ;;  %v8941_v9 = vld [vmem:[%s15475_s1 + $0x1488] sm:$0xf]  ;;  %v10214_v34 = vld [vmem:[%s15475_s1 + $0x17f4] sm:$0xf0] }
 0x230   :  { %5702 = vmatpush.bf16.msra.mxu2 %v8366_v8  ;;  %5715 = vmatpush.bf16.msra.mxu3 %v8494_v2  ;;  %v9086_v8 = vor.u32 %v10142_v58, %v9085_v57  ;;  %v9069_v2 = vld [vmem:[%s15475_s1 + $0x1588] sm:$0xf]  ;;  %v8942_v21 = vor.u32 %v10106_v12, %v8941_v9  ;;  %v10102_v43 = vld [vmem:[%s15475_s1 + $0x1474] sm:$0xf0] }
 0x231   :  { %v9373_v25 = vld [vmem:[%s15475_s1 + $0x17e8] sm:$0xf]  ;;  %v10134_v48 = vld [vmem:[%s15475_s1 + $0x1574] sm:$0xf0] }
 0x232   :  { %v8925_v60 = vld [vmem:[%s15475_s1 + $0x1468] sm:$0xf]  ;;  %v10178_v51 = vld [vmem:[%s15475_s1 + $0x16d4] sm:$0xf0] }
 0x233   :  { %5725 = vmatpush.bf16.msrb.mxu0 %v8670_v29  ;;  %5738 = vmatpush.bf16.msrb.mxu1 %v8798_v17  ;;  %v10138_v29 = vld [vmem:[%s15475_s1 + $0x1594] sm:$0xf0]  ;;  %v9245_v17 = vld [vmem:[%s15475_s1 + $0x16e8] sm:$0xf]  ;;  %v8926_v55 = vor.u32 %v10102_v43, %v8925_v60 }
 0x234   :  { %5747 = vmatpush.bf16.msrb.mxu2 %v8990_v20  ;;  %5760 = vmatpush.bf16.msrb.mxu3 %v9118_v15  ;;  %v10182_v20 = vld [vmem:[%s15475_s1 + $0x16f4] sm:$0xf0]  ;;  %v8750_v15 = vor.u32 %v10058_v7, %v8749_v4  ;;  %v9070_v39 = vor.u32 %v10138_v29, %v9069_v2  ;;  %v9053_v63 = vld [vmem:[%s15475_s1 + $0x1568] sm:$0xf] }
 0x235   :  { %5703 = vmatmul.bf16.vlgmr.msra.gmra.mxu2 %v11384_v36  ;;  %5716 = vmatmul.bf16.vlgmr.msra.gmra.mxu3 %v11397_v22  ;;  %v9246_v62 = vor.u32 %v10182_v20, %v9245_v17  ;;  %v9229_v50 = vld [vmem:[%s15475_s1 + $0x16c8] sm:$0xf]  ;;  %v10210_v61 = vld [vmem:[%s15475_s1 + $0x17d4] sm:$0xf0]  ;;  %v9054_v57 = vor.u32 %v10134_v48, %v9053_v63 }
 0x236   :  { %v9230_v58 = vor.u32 %v10178_v51, %v9229_v50  ;;  %v8909_v6 = vld [vmem:[%s15475_s1 + $0x1448] sm:$0xf]  ;;  %v10130_v4 = vld [vmem:[%s15475_s1 + $0x1554] sm:$0xf0] }
 0x237   :  { %5726 = vmatpush.bf16.msrb.mxu0 %v8654_v47  ;;  %5739 = vmatpush.bf16.msrb.mxu1 %v8782_v54  ;;  %v10234_v47 = vld [vmem:[%s15476_s2] sm:$0xf]  ;;  %v9037_v1 = vld [vmem:[%s15475_s1 + $0x1548] sm:$0xf]  ;;  %v10206_v12 = vld [vmem:[%s15475_s1 + $0x17b4] sm:$0xf0] }
 0x238   :  { %5748 = vmatpush.bf16.msrb.mxu2 %v8974_v31  ;;  %5761 = vmatpush.bf16.msrb.mxu3 %v9102_v52  ;;  %v907_v54 = vperm.slane %v10234_v47, 2  ;;  %v9374_v31 = vor.u32 %v10214_v34, %v9373_v25  ;;  %v9357_v52 = vld [vmem:[%s15475_s1 + $0x17c8] sm:$0xf]  ;;  %v5496_v56 = vpop.f32.mrf.mxu2  ;;  %v9038_v17 = vor.u32 %v10130_v4, %v9037_v1  ;;  %v10094_v25 = vld [vmem:[%s15475_s1 + $0x1434] sm:$0xf0] }
 0x239   :  { %v9358_v16 = vor.u32 %v10210_v61, %v9357_v52  ;;  %v9213_v7 = vld [vmem:[%s15475_s1 + $0x16a8] sm:$0xf]  ;;  %v10202_v43 = vld [vmem:[%s15475_s1 + $0x1794] sm:$0xf0]  ;;  %v9476_v4 = vld [vmem:[%s15475_s1 + $0xec] sm:$0xf] }
 0x23a   :  { %v9341_v9 = vld [vmem:[%s15475_s1 + $0x17a8] sm:$0xf]  ;;  %v10090_v52 = vld [vmem:[%s15475_s1 + $0x1414] sm:$0xf0] }
 0x23b   :  { %5727 = vmatpush.bf16.msrb.mxu0 %v8638_v0  ;;  %5740 = vmatpush.bf16.msrb.mxu1 %v8766_v3  ;;  %v10098_v0 = vld [vmem:[%s15475_s1 + $0x1454] sm:$0xf0]  ;;  %v5497_v3 = vadd.f32 %v5496_v56, %v907_v54  ;;  %v9021_v34 = vld [vmem:[%s15475_s1 + $0x1528] sm:$0xf] }
 0x23c   :  { %5749 = vmatpush.bf16.msrb.mxu2 %v8958_v53  ;;  %5762 = vmatpush.bf16.msrb.mxu3 %v9086_v8  ;;  %v5509_v53 = vpop.f32.mrf.mxu3  ;;  %v10174_v8 = vld [vmem:[%s15475_s1 + $0x16b4] sm:$0xf0]  ;;  %v8910_v29 = vor.u32 %v10098_v0, %v8909_v6  ;;  %v9197_v60 = vld [vmem:[%s15475_s1 + $0x1688] sm:$0xf] }
 0x23d   :  { %v13931_v2 = vadd.f32 %v5509_v53, %v5497_v3  ;;  %v9214_v20 = vor.u32 %v10174_v8, %v9213_v7  ;;  %v8877_v54 = vld [vmem:[%s15475_s1 + $0x1408] sm:$0xf]  ;;  %v10166_v6 = vld [vmem:[%s15475_s1 + $0x1674] sm:$0xf0]  ;;  %v6431_v7 = vld [vmem:[%s15475_s1 + $0xf8] sm:$0xf0] }
 0x23e   :  { %v9005_v61 = vld [vmem:[%s15475_s1 + $0x1508] sm:$0xf]  ;;  %v10198_v1 = vld [vmem:[%s15475_s1 + $0x1774] sm:$0xf0] }
 0x23f   :  { %5728 = vmatpush.bf16.msrb.mxu0 %v8622_v23  ;;  %5741 = vmatpush.bf16.msrb.mxu1 %v8750_v15  ;;  %v8893_v23 = vld [vmem:[%s15475_s1 + $0x1428] sm:$0xf]  ;;  %v9342_v15 = vor.u32 %v10206_v12, %v9341_v9  ;;  %v13957_v63 = vpop.f32.mrf.mxu0  ;;  %v10230_v53 = vld [vmem:[%s15475_s1 + $0x1874] sm:$0xf0] }
 0x240   :  { %5750 = vmatpush.bf16.msrb.mxu2 %v8942_v21  ;;  %5763 = vmatpush.bf16.msrb.mxu3 %v9070_v39  ;;  %v10126_v21 = vld [vmem:[%s15475_s1 + $0x1534] sm:$0xf0]  ;;  %v8894_v47 = vor.u32 %v10094_v25, %v8893_v23  ;;  %v5498_v48 = vpop.f32.mrf.mxu2  ;;  %v9309_v0 = vld [vmem:[%s15475_s1 + $0x1768] sm:$0xf]  ;;  %v6434_v25 = vor.u32 %v9476_v4, %v6431_v7 }
 0x241   :  { %v10170_v39 = vld [vmem:[%s15475_s1 + $0x1694] sm:$0xf0]  ;;  %v9022_v50 = vor.u32 %v10126_v21, %v9021_v34  ;;  %v9437_v3 = vld [vmem:[%s15475_s1 + $0x1868] sm:$0xf]  ;;  %v9310_v12 = vor.u32 %v10198_v1, %v9309_v0 }
 0x242   :  { %5729 = vmatmul.bf16.vlgmr.msrb.gmra.mxu0 %v11395_v40  ;;  %5742 = vmatmul.bf16.vlgmr.msrb.gmra.mxu1 %v11405_v45  ;;  %v9198_v51 = vor.u32 %v10170_v39, %v9197_v60  ;;  %v9293_v23 = vld [vmem:[%s15475_s1 + $0x1748] sm:$0xf]  ;;  %v10194_v34 = vld [vmem:[%s15475_s1 + $0x1754] sm:$0xf0]  ;;  %v9472_v39 = vld [vmem:[%s15475_s1 + $0xcc] sm:$0xf] }
 0x243   :  { %5773 = vmatpush.bf16.msra.mxu0 %v9246_v62  ;;  %5786 = vmatpush.bf16.msra.mxu1 %v9374_v31  ;;  %v9325_v62 = vld [vmem:[%s15475_s1 + $0x1788] sm:$0xf]  ;;  %v13962_v31 = vpop.f32.mrf.mxu1  ;;  %v10226_v21 = vld [vmem:[%s15475_s1 + $0x1854] sm:$0xf0] }
 0x244   :  { %5751 = vmatpush.bf16.msrb.mxu2 %v8926_v55  ;;  %5764 = vmatpush.bf16.msrb.mxu3 %v9054_v57  ;;  %v10122_v55 = vld [vmem:[%s15475_s1 + $0x1514] sm:$0xf0]  ;;  %v5511_v56 = vpop.f32.mrf.mxu3  ;;  %v9326_v57 = vor.u32 %v10202_v43, %v9325_v62  ;;  %v6415_v62 = vld [vmem:[%s15475_s1 + $0xd8] sm:$0xf0]  ;;  %v9133_v1 = vld [vmem:[%s15475_s1 + $0x1608] sm:$0xf] }
 0x245   :  { %v9006_v8 = vor.u32 %v10122_v55, %v9005_v61  ;;  %v6418_v61 = vor.u32 %v9472_v39, %v6415_v62  ;;  %v10190_v55 = vld [vmem:[%s15475_s1 + $0x1734] sm:$0xf0]  ;;  %v9405_v56 = vld [vmem:[%s15475_s1 + $0x1828] sm:$0xf] }
 0x246   :  { %v9261_v4 = vld [vmem:[%s15475_s1 + $0x1708] sm:$0xf]  ;;  %v10186_v7 = vld [vmem:[%s15475_s1 + $0x1714] sm:$0xf0] }
 0x247   :  { %5774 = vmatpush.bf16.msra.mxu0 %v9230_v58  ;;  %5787 = vmatpush.bf16.msra.mxu1 %v9358_v16  ;;  %v9181_v58 = vld [vmem:[%s15475_s1 + $0x1668] sm:$0xf]  ;;  %v8878_v16 = vor.u32 %v10090_v52, %v8877_v54  ;;  %v5524_v60 = vpop.f32.mrf.mxu0  ;;  %v9294_v54 = vor.u32 %v10194_v34, %v9293_v23  ;;  %v9508_v23 = vld [vmem:[%s15475_s1 + $0x1ec] sm:$0xf]  ;;  %v6687_v34 = vld [vmem:[%s15475_s1 + $0x2f8] sm:$0xf0] }
 0x248   :  { %5752 = vmatpush.bf16.msrb.mxu2 %v8910_v29  ;;  %5765 = vmatpush.bf16.msrb.mxu3 %v9038_v17  ;;  %v9182_v9 = vor.u32 %v10166_v6, %v9181_v58  ;;  %v9438_v29 = vor.u32 %v10230_v53, %v9437_v3  ;;  %v9165_v17 = vld [vmem:[%s15475_s1 + $0x1648] sm:$0xf]  ;;  %v9468_v58 = vld [vmem:[%s15475_s1 + $0xac] sm:$0xf]  ;;  %v6399_v6 = vld [vmem:[%s15475_s1 + $0xb8] sm:$0xf0]  ;;  %v9262_v60 = vor.u32 %v10186_v7, %v9261_v4 }
 0x249   :  { %v9277_v52 = vld [vmem:[%s15475_s1 + $0x1728] sm:$0xf]  ;;  %v10154_v3 = vld [vmem:[%s15475_s1 + $0x1614] sm:$0xf0] }
 0x24a   :  { %v9278_v53 = vor.u32 %v10190_v55, %v9277_v52  ;;  %v9504_v52 = vld [vmem:[%s15475_s1 + $0x1cc] sm:$0xf]  ;;  %v6671_v55 = vld [vmem:[%s15475_s1 + $0x2d8] sm:$0xf0] }
 0x24b   :  { %5775 = vmatpush.bf16.msra.mxu0 %v9214_v20  ;;  %5788 = vmatpush.bf16.msra.mxu1 %v9342_v15  ;;  %v10162_v20 = vld [vmem:[%s15475_s1 + $0x1654] sm:$0xf0]  ;;  %v9421_v15 = vld [vmem:[%s15475_s1 + $0x1848] sm:$0xf]  ;;  %v5537_v43 = vpop.f32.mrf.mxu1 }
 0x24c   :  { %5753 = vmatpush.bf16.msrb.mxu2 %v8894_v47  ;;  %5766 = vmatpush.bf16.msrb.mxu3 %v9022_v50  ;;  %v9166_v47 = vor.u32 %v10162_v20, %v9165_v17  ;;  %v9422_v48 = vor.u32 %v10226_v21, %v9421_v15  ;;  %v9149_v50 = vld [vmem:[%s15475_s1 + $0x1628] sm:$0xf]  ;;  %v9464_v17 = vld [vmem:[%s15475_s1 + $0x8c] sm:$0xf]  ;;  %v6383_v20 = vld [vmem:[%s15475_s1 + $0x98] sm:$0xf0] }
 0x24d   :  { %v9572_v15 = vld [vmem:[%s15475_s1 + $0x3ec] sm:$0xf]  ;;  %v6815_v21 = vld [vmem:[%s15475_s1 + $0x3f8] sm:$0xf0]  ;;  %v6386_v43 = vor.u32 %v9464_v17, %v6383_v20 }
 0x24e   :  { %v9564_v17 = vld [vmem:[%s15475_s1 + $0x3ac] sm:$0xf]  ;;  %v6783_v20 = vld [vmem:[%s15475_s1 + $0x3b8] sm:$0xf0] }
 0x24f   :  { %5776 = vmatpush.bf16.msra.mxu0 %v9198_v51  ;;  %5789 = vmatpush.bf16.msra.mxu1 %v9326_v57  ;;  %v10158_v51 = vld [vmem:[%s15475_s1 + $0x1634] sm:$0xf0] }
 0x250   :  { %5754 = vmatpush.bf16.msrb.mxu2 %v8878_v16  ;;  %5767 = vmatpush.bf16.msrb.mxu3 %v9006_v8  ;;  %v10222_v57 = vld [vmem:[%s15475_s1 + $0x1834] sm:$0xf0]  ;;  %v9150_v0 = vor.u32 %v10158_v51, %v9149_v50  ;;  %v9389_v8 = vld [vmem:[%s15475_s1 + $0x1808] sm:$0xf]  ;;  %v6818_v51 = vor.u32 %v9572_v15, %v6815_v21  ;;  %v6786_v21 = vor.u32 %v9564_v17, %v6783_v20 }
 0x251   :  { %v9406_v16 = vor.u32 %v10222_v57, %v9405_v56  ;;  %v9568_v56 = vld [vmem:[%s15475_s1 + $0x3cc] sm:$0xf]  ;;  %v6799_v57 = vld [vmem:[%s15475_s1 + $0x3d8] sm:$0xf0] }
 0x252   :  { %v6802_v7 = vor.u32 %v9568_v56, %v6799_v57  ;;  %v6319_v56 = vld [vmem:[%s15475_s1 + $0x18] sm:$0xf0] }
 0x253   :  { %5777 = vmatpush.bf16.msra.mxu0 %v9182_v9  ;;  %5790 = vmatpush.bf16.msra.mxu1 %v9310_v12  ;;  %v6402_v9 = vor.u32 %v9468_v58, %v6399_v6  ;;  %v5523_v12 = vadd.f32 %v13957_v63, %v13931_v2  ;;  %v6559_v2 = vld [vmem:[%s15475_s1 + $0x1f8] sm:$0xf0]  ;;  %v9540_v63 = vld [vmem:[%s15475_s1 + $0x2ec] sm:$0xf] }
 0x254   :  { %5803 = vmatpush.bf16.msra.mxu2 %v9438_v29  ;;  %5812 = vmatpush.bf16.msra.mxu3 %v6434_v25  ;;  %v10218_v29 = vld [vmem:[%s15475_s1 + $0x1814] sm:$0xf0]  ;;  %v9134_v25 = vor.u32 %v10154_v3, %v9133_v1  ;;  %v6690_v50 = vor.u32 %v9540_v63, %v6687_v34  ;;  %v9456_v1 = vld [vmem:[%s15475_s1 + $0x4c] sm:$0xf]  ;;  %v6351_v3 = vld [vmem:[%s15475_s1 + $0x58] sm:$0xf0] }
 0x255   :  { %5755 = vmatmul.bf16.vlgmr.msrb.gmra.mxu2 %v11596_v5  ;;  %5768 = vmatmul.bf16.vlgmr.msrb.gmra.mxu3 %v11609_v11  ;;  %v9390_v39 = vor.u32 %v10218_v29, %v9389_v8  ;;  %v5536_v62 = vadd.f32 %v13962_v31, %v5523_v12  ;;  %v6543_v31 = vld [vmem:[%s15475_s1 + $0x1d8] sm:$0xf0]  ;;  %v9500_v8 = vld [vmem:[%s15475_s1 + $0x1ac] sm:$0xf] }
 0x256   :  { %v9532_v12 = vld [vmem:[%s15475_s1 + $0x2ac] sm:$0xf]  ;;  %v6655_v29 = vld [vmem:[%s15475_s1 + $0x2b8] sm:$0xf0] }
 0x257   :  { %5778 = vmatpush.bf16.msra.mxu0 %v9166_v47  ;;  %5791 = vmatpush.bf16.msra.mxu1 %v9294_v54  ;;  %v6562_v47 = vor.u32 %v9508_v23, %v6559_v2  ;;  %v9460_v54 = vld [vmem:[%s15475_s1 + $0x6c] sm:$0xf]  ;;  %v6354_v2 = vor.u32 %v9456_v1, %v6351_v3  ;;  %v6335_v34 = vld [vmem:[%s15475_s1 + $0x38] sm:$0xf0]  ;;  %v6658_v15 = vor.u32 %v9532_v12, %v6655_v29 }
 0x258   :  { %5804 = vmatpush.bf16.msra.mxu2 %v9422_v48  ;;  %5813 = vmatpush.bf16.msra.mxu3 %v6418_v61  ;;  %v6367_v48 = vld [vmem:[%s15475_s1 + $0x78] sm:$0xf0]  ;;  %v9536_v61 = vld [vmem:[%s15475_s1 + $0x2cc] sm:$0xf]  ;;  %v5548_v58 = vpop.f32.mrf.mxu2 }
 0x259   :  { %v6370_v6 = vor.u32 %v9460_v54, %v6367_v48  ;;  %v6674_v4 = vor.u32 %v9536_v61, %v6671_v55  ;;  %v9560_v54 = vld [vmem:[%s15475_s1 + $0x38c] sm:$0xf]  ;;  %v6767_v48 = vld [vmem:[%s15475_s1 + $0x398] sm:$0xf0] }
 0x25a   :  { %v9448_v55 = vld [vmem:[%s15475_s1 + $0xc] sm:$0xf]  ;;  %v6495_v3 = vld [vmem:[%s15475_s1 + $0x178] sm:$0xf0] }
 0x25b   :  { %5779 = vmatpush.bf16.msra.mxu0 %v9150_v0  ;;  %5792 = vmatpush.bf16.msra.mxu1 %v9278_v53  ;;  %v6546_v0 = vor.u32 %v9504_v52, %v6543_v31  ;;  %v5549_v53 = vadd.f32 %v5548_v58, %v5536_v62  ;;  %v9528_v62 = vld [vmem:[%s15475_s1 + $0x28c] sm:$0xf]  ;;  %v6322_v12 = vor.u32 %v9448_v55, %v6319_v56  ;;  %v6719_v56 = vld [vmem:[%s15475_s1 + $0x338] sm:$0xf0] }
 0x25c   :  { %5805 = vmatpush.bf16.msra.mxu2 %v9406_v16  ;;  %5814 = vmatpush.bf16.msra.mxu3 %v6402_v9  ;;  %v5561_v16 = vpop.f32.mrf.mxu3  ;;  %v6527_v9 = vld [vmem:[%s15475_s1 + $0x1b8] sm:$0xf0]  ;;  %v9492_v1 = vld [vmem:[%s15475_s1 + $0x16c] sm:$0xf] }
 0x25d   :  { %v5562_v23 = vadd.f32 %v5561_v16, %v5549_v53  ;;  %v6530_v63 = vor.u32 %v9500_v8, %v6527_v9  ;;  %v9524_v53 = vld [vmem:[%s15475_s1 + $0x26c] sm:$0xf]  ;;  %v6623_v16 = vld [vmem:[%s15475_s1 + $0x278] sm:$0xf0]  ;;  %v6498_v29 = vor.u32 %v9492_v1, %v6495_v3 }
 0x25e   :  { %v9604_v8 = vld [vmem:[%s15475_s1 + $0x4ec] sm:$0xf]  ;;  %v6943_v9 = vld [vmem:[%s15475_s1 + $0x4f8] sm:$0xf0]  ;;  %v6626_v17 = vor.u32 %v9524_v53, %v6623_v16 }
 0x25f   :  { %5780 = vmatpush.bf16.msra.mxu0 %v9134_v25  ;;  %5793 = vmatpush.bf16.msra.mxu1 %v9262_v60  ;;  %v9452_v25 = vld [vmem:[%s15475_s1 + $0x2c] sm:$0xf]  ;;  %v6447_v3 = vld [vmem:[%s15475_s1 + $0x118] sm:$0xf0] }
 0x260   :  { %5806 = vmatpush.bf16.msra.mxu2 %v9390_v39  ;;  %5815 = vmatpush.bf16.msra.mxu3 %v6386_v43  ;;  %v9496_v60 = vld [vmem:[%s15475_s1 + $0x18c] sm:$0xf]  ;;  %v6511_v39 = vld [vmem:[%s15475_s1 + $0x198] sm:$0xf0]  ;;  %v5574_v43 = vpop.f32.mrf.mxu0  ;;  %v5550_v52 = vpop.f32.mrf.mxu2  ;;  %v6338_v31 = vor.u32 %v9452_v25, %v6335_v34  ;;  %v6946_v25 = vor.u32 %v9604_v8, %v6943_v9 }
 0x261   :  { %v6514_v61 = vor.u32 %v9496_v60, %v6511_v39  ;;  %v6607_v34 = vld [vmem:[%s15475_s1 + $0x258] sm:$0xf0]  ;;  %v9600_v39 = vld [vmem:[%s15475_s1 + $0x4cc] sm:$0xf] }
 0x262   :  { %5781 = vmatmul.bf16.vlgmr.msra.gmra.mxu0 %v11607_v10  ;;  %5794 = vmatmul.bf16.vlgmr.msra.gmra.mxu1 %v11617_v14  ;;  %v9516_v52 = vld [vmem:[%s15475_s1 + $0x22c] sm:$0xf]  ;;  %v6703_v9 = vld [vmem:[%s15475_s1 + $0x318] sm:$0xf0] }
 0x263   :  { %5825 = vmatpush.bf16.msrb.mxu0 %v6562_v47  ;;  %5838 = vmatpush.bf16.msrb.mxu1 %v6690_v50  ;;  %v6639_v47 = vld [vmem:[%s15475_s1 + $0x298] sm:$0xf0]  ;;  %v5575_v50 = vadd.f32 %v5574_v43, %v5562_v23  ;;  %v9488_v23 = vld [vmem:[%s15475_s1 + $0x14c] sm:$0xf] }
 0x264   :  { %5851 = vmatpush.bf16.msrb.mxu2 %v6818_v51  ;;  %5816 = vmatpush.bf16.msra.mxu3 %v6370_v6  ;;  %v5587_v51 = vpop.f32.mrf.mxu1  ;;  %v5563_v57 = vpop.f32.mrf.mxu3  ;;  %v6642_v58 = vor.u32 %v9528_v62, %v6639_v47  ;;  %v6770_v6 = vor.u32 %v9560_v54, %v6767_v48  ;;  %v6927_v62 = vld [vmem:[%s15475_s1 + $0x4d8] sm:$0xf0]  ;;  %v9548_v55 = vld [vmem:[%s15475_s1 + $0x32c] sm:$0xf] }
 0x265   :  { %9445 = vmatmul.msk.bf16.vlgmr.msra.gmra.mxu2 %vm4833_vm0, %v11717_v49  ;;  %v9596_v57 = vld [vmem:[%s15475_s1 + $0x4ac] sm:$0xf]  ;;  %v6722_v16 = vor.u32 %v9548_v55, %v6719_v56 }
 0x266   :  { %v9480_v1 = vld [vmem:[%s15475_s1 + $0x10c] sm:$0xf] }
 0x267   :  { %5826 = vmatpush.bf16.msrb.mxu0 %v6546_v0  ;;  %5839 = vmatpush.bf16.msrb.mxu1 %v6674_v4  ;;  %v14174_v0 = vadd.f32 %v5587_v51, %v5575_v50  ;;  %v9556_v4 = vld [vmem:[%s15475_s1 + $0x36c] sm:$0xf]  ;;  %v6463_v51 = vld [vmem:[%s15475_s1 + $0x138] sm:$0xf0] }
 0x268   :  { %5852 = vmatpush.bf16.msrb.mxu2 %v6802_v7  ;;  %5817 = vmatpush.bf16.msra.mxu3 %v6354_v2  ;;  %v6751_v7 = vld [vmem:[%s15475_s1 + $0x378] sm:$0xf0]  ;;  %v5576_v60 = vpop.f32.mrf.mxu0  ;;  %v9484_v50 = vld [vmem:[%s15475_s1 + $0x12c] sm:$0xf] }
 0x269   :  { %v6754_v20 = vor.u32 %v9556_v4, %v6751_v7  ;;  %v6479_v2 = vld [vmem:[%s15475_s1 + $0x158] sm:$0xf0]  ;;  %v9512_v4 = vld [vmem:[%s15475_s1 + $0x20c] sm:$0xf] }
 0x26a   :  { %v6482_v47 = vor.u32 %v9488_v23, %v6479_v2  ;;  %v9544_v7 = vld [vmem:[%s15475_s1 + $0x30c] sm:$0xf]  ;;  %v6450_v2 = vor.u32 %v9480_v1, %v6447_v3  ;;  %v6863_v3 = vld [vmem:[%s15475_s1 + $0x458] sm:$0xf0] }
 0x26b   :  { %5827 = vmatpush.bf16.msrb.mxu0 %v6530_v63  ;;  %5840 = vmatpush.bf16.msrb.mxu1 %v6658_v15  ;;  %v9520_v63 = vld [vmem:[%s15475_s1 + $0x24c] sm:$0xf] }
 0x26c   :  { %5853 = vmatpush.bf16.msrb.mxu2 %v6786_v21  ;;  %5818 = vmatpush.bf16.msra.mxu3 %v6338_v31  ;;  %v9552_v15 = vld [vmem:[%s15475_s1 + $0x34c] sm:$0xf]  ;;  %v6735_v21 = vld [vmem:[%s15475_s1 + $0x358] sm:$0xf0]  ;;  %v5589_v43 = vpop.f32.mrf.mxu1  ;;  %v6610_v54 = vor.u32 %v9520_v63, %v6607_v34  ;;  %v6930_v31 = vor.u32 %v9600_v39, %v6927_v62 }
 0x26d   :  { %v6738_v48 = vor.u32 %v9552_v15, %v6735_v21  ;;  %v9668_v23 = vld [vmem:[%s15475_s1 + $0x6ec] sm:$0xf]  ;;  %v7199_v63 = vld [vmem:[%s15475_s1 + $0x6f8] sm:$0xf0]  ;;  %v6706_v21 = vor.u32 %v9544_v7, %v6703_v9 }
 0x26e   :  { %v7327_v34 = vld [vmem:[%s15475_s1 + $0x7f8] sm:$0xf0]  ;;  %v9588_v62 = vld [vmem:[%s15475_s1 + $0x46c] sm:$0xf] }
 0x26f   :  { %5828 = vmatpush.bf16.msrb.mxu0 %v6514_v61  ;;  %5841 = vmatpush.bf16.msrb.mxu1 %v6642_v58  ;;  %v6591_v61 = vld [vmem:[%s15475_s1 + $0x238] sm:$0xf0]  ;;  %v9584_v1 = vld [vmem:[%s15475_s1 + $0x44c] sm:$0xf] }
 0x270   :  { %5854 = vmatpush.bf16.msrb.mxu2 %v6770_v6  ;;  %5819 = vmatpush.bf16.msra.mxu3 %v6322_v12  ;;  %v6911_v58 = vld [vmem:[%s15475_s1 + $0x4b8] sm:$0xf0]  ;;  %v6466_v6 = vor.u32 %v9484_v50, %v6463_v51  ;;  %v6594_v53 = vor.u32 %v9516_v52, %v6591_v61  ;;  %v9592_v12 = vld [vmem:[%s15475_s1 + $0x48c] sm:$0xf] }
 0x271   :  { %v6914_v8 = vor.u32 %v9596_v57, %v6911_v58  ;;  %v6879_v43 = vld [vmem:[%s15475_s1 + $0x478] sm:$0xf0]  ;;  %v9664_v51 = vld [vmem:[%s15475_s1 + $0x6cc] sm:$0xf] }
 0x272   :  { %v7055_v50 = vld [vmem:[%s15475_s1 + $0x5d8] sm:$0xf0]  ;;  %v6882_v56 = vor.u32 %v9588_v62, %v6879_v43  ;;  %v9692_v9 = vld [vmem:[%s15475_s1 + $0x7ac] sm:$0xf] }
 0x273   :  { %5829 = vmatpush.bf16.msrb.mxu0 %v6498_v29  ;;  %5842 = vmatpush.bf16.msrb.mxu1 %v6626_v17  ;;  %v6895_v29 = vld [vmem:[%s15475_s1 + $0x498] sm:$0xf0]  ;;  %v9636_v17 = vld [vmem:[%s15475_s1 + $0x5ec] sm:$0xf] }
 0x274   :  { %5855 = vmatpush.bf16.msrb.mxu2 %v6754_v20  ;;  %5864 = vmatpush.bf16.msrb.mxu3 %v6946_v25  ;;  %v7071_v20 = vld [vmem:[%s15475_s1 + $0x5f8] sm:$0xf0]  ;;  %v9700_v25 = vld [vmem:[%s15475_s1 + $0x7ec] sm:$0xf]  ;;  %v6898_v60 = vor.u32 %v9592_v12, %v6895_v29  ;;  %v6866_v29 = vor.u32 %v9584_v1, %v6863_v3 }
 0x275   :  { %5820 = vmatmul.bf16.vlgmr.msra.gmra.mxu3 %v10607_v27  ;;  %v6575_v27 = vld [vmem:[%s15475_s1 + $0x218] sm:$0xf0]  ;;  %v7074_v39 = vor.u32 %v9636_v17, %v7071_v20  ;;  %v9580_v20 = vld [vmem:[%s15475_s1 + $0x42c] sm:$0xf] }
 0x276   :  { %v6578_v15 = vor.u32 %v9512_v4, %v6575_v27  ;;  %v7183_v52 = vld [vmem:[%s15475_s1 + $0x6d8] sm:$0xf0]  ;;  %v9628_v4 = vld [vmem:[%s15475_s1 + $0x5ac] sm:$0xf] }
 0x277   :  { %5830 = vmatpush.bf16.msrb.mxu0 %v6482_v47  ;;  %5843 = vmatpush.bf16.msrb.mxu1 %v6610_v54  ;;  %v7202_v47 = vor.u32 %v9668_v23, %v7199_v63  ;;  %v7330_v54 = vor.u32 %v9700_v25, %v7327_v34  ;;  %v7311_v61 = vld [vmem:[%s15475_s1 + $0x7d8] sm:$0xf0]  ;;  %v9660_v27 = vld [vmem:[%s15475_s1 + $0x6ac] sm:$0xf] }
 0x278   :  { %5856 = vmatpush.bf16.msrb.mxu2 %v6738_v48  ;;  %5865 = vmatpush.bf16.msrb.mxu3 %v6930_v31  ;;  %v9632_v48 = vld [vmem:[%s15475_s1 + $0x5cc] sm:$0xf]  ;;  %v5600_v55 = vpop.f32.mrf.mxu2  ;;  %v7295_v12 = vld [vmem:[%s15475_s1 + $0x7b8] sm:$0xf0] }
 0x279   :  { %v9696_v31 = vld [vmem:[%s15475_s1 + $0x7cc] sm:$0xf]  ;;  %v5601_v57 = vadd.f32 %v5600_v55, %v14174_v0  ;;  %v7058_v58 = vor.u32 %v9632_v48, %v7055_v50  ;;  %v7039_v0 = vld [vmem:[%s15475_s1 + $0x5b8] sm:$0xf0] }
 0x27a   :  { %v7042_v17 = vor.u32 %v9628_v4, %v7039_v0  ;;  %v6847_v23 = vld [vmem:[%s15475_s1 + $0x438] sm:$0xf0]  ;;  %v9656_v63 = vld [vmem:[%s15475_s1 + $0x68c] sm:$0xf] }
 0x27b   :  { %5831 = vmatpush.bf16.msrb.mxu0 %v6466_v6  ;;  %5844 = vmatpush.bf16.msrb.mxu1 %v6594_v53  ;;  %v5613_v6 = vpop.f32.mrf.mxu3  ;;  %v7186_v53 = vor.u32 %v9664_v51, %v7183_v52  ;;  %v7151_v34 = vld [vmem:[%s15475_s1 + $0x698] sm:$0xf0]  ;;  %v6850_v43 = vor.u32 %v9580_v20, %v6847_v23  ;;  %v9732_v1 = vld [vmem:[%s15475_s1 + $0x8ec] sm:$0xf] }
 0x27c   :  { %5857 = vmatpush.bf16.msrb.mxu2 %v6722_v16  ;;  %5866 = vmatpush.bf16.msrb.mxu3 %v6914_v8  ;;  %v7314_v16 = vor.u32 %v9696_v31, %v7311_v61  ;;  %v5614_v7 = vadd.f32 %v5613_v6, %v5601_v57  ;;  %v7167_v8 = vld [vmem:[%s15475_s1 + $0x6b8] sm:$0xf0]  ;;  %v7154_v51 = vor.u32 %v9656_v63, %v7151_v34  ;;  %v9620_v61 = vld [vmem:[%s15475_s1 + $0x56c] sm:$0xf] }
 0x27d   :  { %v6831_v48 = vld [vmem:[%s15475_s1 + $0x418] sm:$0xf0]  ;;  %v9728_v23 = vld [vmem:[%s15475_s1 + $0x8cc] sm:$0xf] }
 0x27e   :  { %v7007_v55 = vld [vmem:[%s15475_s1 + $0x578] sm:$0xf0] }
 0x27f   :  { %5832 = vmatpush.bf16.msrb.mxu0 %v6450_v2  ;;  %5845 = vmatpush.bf16.msrb.mxu1 %v6578_v15  ;;  %v7170_v2 = vor.u32 %v9660_v27, %v7167_v8  ;;  %v5626_v25 = vpop.f32.mrf.mxu0  ;;  %v9688_v15 = vld [vmem:[%s15475_s1 + $0x78c] sm:$0xf]  ;;  %v7135_v57 = vld [vmem:[%s15475_s1 + $0x678] sm:$0xf0] }
 0x280   :  { %5858 = vmatpush.bf16.msrb.mxu2 %v6706_v21  ;;  %5867 = vmatpush.bf16.msrb.mxu3 %v6898_v60  ;;  %v7279_v21 = vld [vmem:[%s15475_s1 + $0x798] sm:$0xf0]  ;;  %v5627_v60 = vadd.f32 %v5626_v25, %v5614_v7  ;;  %v5602_v62 = vpop.f32.mrf.mxu2  ;;  %v9616_v27 = vld [vmem:[%s15475_s1 + $0x54c] sm:$0xf] }
 0x281   :  { %v7282_v52 = vor.u32 %v9688_v15, %v7279_v21  ;;  %v7263_v6 = vld [vmem:[%s15475_s1 + $0x778] sm:$0xf0]  ;;  %v9648_v8 = vld [vmem:[%s15475_s1 + $0x64c] sm:$0xf] }
 0x282   :  { %5833 = vmatmul.bf16.vlgmr.msrb.gmra.mxu0 %v10617_v33  ;;  %5846 = vmatmul.bf16.vlgmr.msrb.gmra.mxu1 %v10605_v26  ;;  %v9624_v26 = vld [vmem:[%s15475_s1 + $0x58c] sm:$0xf]  ;;  %v7023_v33 = vld [vmem:[%s15475_s1 + $0x598] sm:$0xf0] }
 0x283   :  { %5877 = vmatpush.bf16.msra.mxu0 %v7074_v39  ;;  %5890 = vmatpush.bf16.msra.mxu1 %v7202_v47  ;;  %v5639_v39 = vpop.f32.mrf.mxu1  ;;  %v7026_v47 = vor.u32 %v9624_v26, %v7023_v33  ;;  %v5615_v50 = vpop.f32.mrf.mxu3  ;;  %v7455_v3 = vld [vmem:[%s15475_s1 + $0x8f8] sm:$0xf0]  ;;  %v9612_v25 = vld [vmem:[%s15475_s1 + $0x52c] sm:$0xf] }
 0x284   :  { %5903 = vmatpush.bf16.msra.mxu2 %v7330_v54  ;;  %5868 = vmatpush.bf16.msrb.mxu3 %v6882_v56  ;;  %v9576_v54 = vld [vmem:[%s15475_s1 + $0x40c] sm:$0xf]  ;;  %v14373_v31 = vadd.f32 %v5639_v39, %v5627_v60  ;;  %v6991_v7 = vld [vmem:[%s15475_s1 + $0x558] sm:$0xf0] }
 0x285   :  { %5859 = vmatmul.bf16.vlgmr.msrb.gmra.mxu2 %v10615_v32  ;;  %v7298_v32 = vor.u32 %v9692_v9, %v7295_v12  ;;  %v9652_v56 = vld [vmem:[%s15475_s1 + $0x66c] sm:$0xf]  ;;  %v7458_v9 = vor.u32 %v9732_v1, %v7455_v3  ;;  %v7119_v12 = vld [vmem:[%s15475_s1 + $0x658] sm:$0xf0]  ;;  %v6994_v26 = vor.u32 %v9616_v27, %v6991_v7 }
 0x286   :  { %v7138_v4 = vor.u32 %v9652_v56, %v7135_v57  ;;  %v7122_v33 = vor.u32 %v9648_v8, %v7119_v12  ;;  %v6975_v34 = vld [vmem:[%s15475_s1 + $0x538] sm:$0xf0]  ;;  %v9644_v15 = vld [vmem:[%s15475_s1 + $0x62c] sm:$0xf] }
 0x287   :  { %5878 = vmatpush.bf16.msra.mxu0 %v7058_v58  ;;  %5891 = vmatpush.bf16.msra.mxu1 %v7186_v53  ;;  %v9684_v58 = vld [vmem:[%s15475_s1 + $0x76c] sm:$0xf]  ;;  %v6834_v53 = vor.u32 %v9576_v54, %v6831_v48  ;;  %v5628_v20 = vpop.f32.mrf.mxu0  ;;  %v7103_v60 = vld [vmem:[%s15475_s1 + $0x638] sm:$0xf0]  ;;  %v6978_v54 = vor.u32 %v9612_v25, %v6975_v34 }
 0x288   :  { %5904 = vmatpush.bf16.msra.mxu2 %v7314_v16  ;;  %5869 = vmatpush.bf16.msrb.mxu3 %v6866_v29  ;;  %v7010_v16 = vor.u32 %v9620_v61, %v7007_v55  ;;  %v7266_v0 = vor.u32 %v9684_v58, %v7263_v6  ;;  %v9680_v29 = vld [vmem:[%s15475_s1 + $0x74c] sm:$0xf]  ;;  %v7231_v62 = vld [vmem:[%s15475_s1 + $0x738] sm:$0xf0] }
 0x289   :  { %v9676_v39 = vld [vmem:[%s15475_s1 + $0x72c] sm:$0xf]  ;;  %v6959_v50 = vld [vmem:[%s15475_s1 + $0x518] sm:$0xf0] }
 0x28a   :  { %v9608_v48 = vld [vmem:[%s15475_s1 + $0x50c] sm:$0xf]  ;;  %v7087_v61 = vld [vmem:[%s15475_s1 + $0x618] sm:$0xf0] }
 0x28b   :  { %5879 = vmatpush.bf16.msra.mxu0 %v7042_v17  ;;  %5892 = vmatpush.bf16.msra.mxu1 %v7170_v2  ;;  %v7247_v17 = vld [vmem:[%s15475_s1 + $0x758] sm:$0xf0]  ;;  %v9672_v55 = vld [vmem:[%s15475_s1 + $0x70c] sm:$0xf] }
 0x28c   :  { %5905 = vmatpush.bf16.msra.mxu2 %v7298_v32  ;;  %5870 = vmatpush.bf16.msrb.mxu3 %v6850_v43  ;;  %v7439_v2 = vld [vmem:[%s15475_s1 + $0x8d8] sm:$0xf0]  ;;  %v5641_v32 = vpop.f32.mrf.mxu1  ;;  %v7250_v63 = vor.u32 %v9680_v29, %v7247_v17  ;;  %v9724_v43 = vld [vmem:[%s15475_s1 + $0x8ac] sm:$0xf] }
 0x28d   :  { %v7442_v21 = vor.u32 %v9728_v23, %v7439_v2  ;;  %v7215_v57 = vld [vmem:[%s15475_s1 + $0x718] sm:$0xf0]  ;;  %v9720_v58 = vld [vmem:[%s15475_s1 + $0x88c] sm:$0xf] }
 0x28e   :  { %v7407_v6 = vld [vmem:[%s15475_s1 + $0x898] sm:$0xf0]  ;;  %v9764_v1 = vld [vmem:[%s15475_s1 + $0x9ec] sm:$0xf]  ;;  %v7218_v8 = vor.u32 %v9672_v55, %v7215_v57 }
 0x28f   :  { %5880 = vmatpush.bf16.msra.mxu0 %v7026_v47  ;;  %5893 = vmatpush.bf16.msra.mxu1 %v7154_v51  ;;  %v7423_v47 = vld [vmem:[%s15475_s1 + $0x8b8] sm:$0xf0]  ;;  %v7234_v51 = vor.u32 %v9676_v39, %v7231_v62  ;;  %v9716_v29 = vld [vmem:[%s15475_s1 + $0x86c] sm:$0xf] }
 0x290   :  { %5906 = vmatpush.bf16.msra.mxu2 %v7282_v52  ;;  %5871 = vmatpush.bf16.msrb.mxu3 %v6834_v53  ;;  %v9640_v52 = vld [vmem:[%s15475_s1 + $0x60c] sm:$0xf]  ;;  %v7426_v56 = vor.u32 %v9724_v43, %v7423_v47  ;;  %v7583_v3 = vld [vmem:[%s15475_s1 + $0x9f8] sm:$0xf0] }
 0x291   :  { %v9796_v53 = vld [vmem:[%s15475_s1 + $0xaec] sm:$0xf]  ;;  %v7839_v27 = vld [vmem:[%s15475_s1 + $0xbf8] sm:$0xf0]  ;;  %v7090_v7 = vor.u32 %v9640_v52, %v7087_v61  ;;  %v7586_v12 = vor.u32 %v9764_v1, %v7583_v3 }
 0x292   :  { %v7391_v17 = vld [vmem:[%s15475_s1 + $0x878] sm:$0xf0]  ;;  %v9760_v2 = vld [vmem:[%s15475_s1 + $0x9cc] sm:$0xf] }
 0x293   :  { %5881 = vmatpush.bf16.msra.mxu0 %v7010_v16  ;;  %5894 = vmatpush.bf16.msra.mxu1 %v7138_v4  ;;  %v6962_v16 = vor.u32 %v9608_v48, %v6959_v50  ;;  %v7711_v4 = vld [vmem:[%s15475_s1 + $0xaf8] sm:$0xf0]  ;;  %v9712_v62 = vld [vmem:[%s15475_s1 + $0x84c] sm:$0xf] }
 0x294   :  { %5907 = vmatpush.bf16.msra.mxu2 %v7266_v0  ;;  %5916 = vmatpush.bf16.msra.mxu3 %v7458_v9  ;;  %v9828_v0 = vld [vmem:[%s15475_s1 + $0xbec] sm:$0xf]  ;;  %v7410_v9 = vor.u32 %v9720_v58, %v7407_v6  ;;  %v7714_v20 = vor.u32 %v9796_v53, %v7711_v4  ;;  %v7567_v32 = vld [vmem:[%s15475_s1 + $0x9d8] sm:$0xf0] }
 0x295   :  { %5872 = vmatmul.bf16.vlgmr.msrb.gmra.mxu3 %v10751_v41  ;;  %v7106_v41 = vor.u32 %v9644_v15, %v7103_v60  ;;  %v7842_v23 = vor.u32 %v9828_v0, %v7839_v27  ;;  %v7823_v25 = vld [vmem:[%s15475_s1 + $0xbd8] sm:$0xf0]  ;;  %v7394_v15 = vor.u32 %v9716_v29, %v7391_v17  ;;  %v7570_v60 = vor.u32 %v9760_v2, %v7567_v32  ;;  %v9756_v48 = vld [vmem:[%s15475_s1 + $0x9ac] sm:$0xf] }
 0x296   :  { %v7375_v43 = vld [vmem:[%s15475_s1 + $0x858] sm:$0xf0]  ;;  %v9788_v50 = vld [vmem:[%s15475_s1 + $0xaac] sm:$0xf] }
 0x297   :  { %5882 = vmatpush.bf16.msra.mxu0 %v6994_v26  ;;  %5895 = vmatpush.bf16.msra.mxu1 %v7122_v33  ;;  %v9792_v26 = vld [vmem:[%s15475_s1 + $0xacc] sm:$0xf]  ;;  %v7695_v33 = vld [vmem:[%s15475_s1 + $0xad8] sm:$0xf0] }
 0x298   :  { %5908 = vmatpush.bf16.msra.mxu2 %v7250_v63  ;;  %5917 = vmatpush.bf16.msra.mxu3 %v7442_v21  ;;  %v9824_v63 = vld [vmem:[%s15475_s1 + $0xbcc] sm:$0xf]  ;;  %v5652_v34 = vpop.f32.mrf.mxu2  ;;  %v5665_v39 = vpop.f32.mrf.mxu3  ;;  %v7698_v47 = vor.u32 %v9792_v26, %v7695_v33  ;;  %v7807_v61 = vld [vmem:[%s15475_s1 + $0xbb8] sm:$0xf0] }
 0x299   :  { %v5653_v21 = vadd.f32 %v5652_v34, %v14373_v31  ;;  %v7551_v31 = vld [vmem:[%s15475_s1 + $0x9b8] sm:$0xf0]  ;;  %v9820_v52 = vld [vmem:[%s15475_s1 + $0xbac] sm:$0xf] }
 0x29a   :  { %v7554_v55 = vor.u32 %v9756_v48, %v7551_v31  ;;  %v7810_v58 = vor.u32 %v9820_v52, %v7807_v61  ;;  %v7535_v6 = vld [vmem:[%s15475_s1 + $0x998] sm:$0xf0]  ;;  %v9784_v1 = vld [vmem:[%s15475_s1 + $0xa8c] sm:$0xf] }
 0x29b   :  { %5883 = vmatpush.bf16.msra.mxu0 %v6978_v54  ;;  %5896 = vmatpush.bf16.msra.mxu1 %v7106_v41  ;;  %v7826_v54 = vor.u32 %v9824_v63, %v7823_v25  ;;  %v5666_v41 = vadd.f32 %v5665_v39, %v5653_v21  ;;  %v7663_v53 = vld [vmem:[%s15475_s1 + $0xa98] sm:$0xf0]  ;;  %v9748_v32 = vld [vmem:[%s15475_s1 + $0x96c] sm:$0xf] }
 0x29c   :  { %5909 = vmatpush.bf16.msra.mxu2 %v7234_v51  ;;  %5918 = vmatpush.bf16.msra.mxu3 %v7426_v56  ;;  %v7679_v51 = vld [vmem:[%s15475_s1 + $0xab8] sm:$0xf0]  ;;  %v9780_v33 = vld [vmem:[%s15475_s1 + $0xa6c] sm:$0xf] }
 0x29d   :  { %v7359_v56 = vld [vmem:[%s15475_s1 + $0x838] sm:$0xf0]  ;;  %v7682_v57 = vor.u32 %v9788_v50, %v7679_v51  ;;  %v9812_v25 = vld [vmem:[%s15475_s1 + $0xb6c] sm:$0xf] }
 0x29e   :  { %v7791_v4 = vld [vmem:[%s15475_s1 + $0xb98] sm:$0xf0]  ;;  %v9776_v48 = vld [vmem:[%s15475_s1 + $0xa4c] sm:$0xf] }
 0x29f   :  { %5884 = vmatpush.bf16.msra.mxu0 %v6962_v16  ;;  %5897 = vmatpush.bf16.msra.mxu1 %v7090_v7  ;;  %v5678_v3 = vpop.f32.mrf.mxu0  ;;  %v9816_v16 = vld [vmem:[%s15475_s1 + $0xb8c] sm:$0xf]  ;;  %v5691_v27 = vpop.f32.mrf.mxu1  ;;  %v7343_v29 = vld [vmem:[%s15475_s1 + $0x818] sm:$0xf0] }
 0x2a0   :  { %5910 = vmatpush.bf16.msra.mxu2 %v7218_v8  ;;  %5919 = vmatpush.bf16.msra.mxu3 %v7410_v9  ;;  %v5679_v0 = vadd.f32 %v5678_v3, %v5666_v41  ;;  %v5654_v7 = vpop.f32.mrf.mxu2  ;;  %v5667_v17 = vpop.f32.mrf.mxu3  ;;  %v7519_v26 = vld [vmem:[%s15475_s1 + $0x978] sm:$0xf0]  ;;  %v9808_v41 = vld [vmem:[%s15475_s1 + $0xb4c] sm:$0xf] }
 0x2a1   :  { %v7647_v63 = vld [vmem:[%s15475_s1 + $0xa78] sm:$0xf0]  ;;  %v7522_v39 = vor.u32 %v9748_v32, %v7519_v26  ;;  %v9856_v61 = vld [vmem:[%s15475_s1 + $0xccc] sm:$0xf] }
 0x2a2   :  { %5885 = vmatmul.bf16.vlgmr.msra.gmra.mxu0 %v10755_v44  ;;  %5898 = vmatmul.bf16.vlgmr.msra.gmra.mxu1 %v10743_v38  ;;  %v9708_v44 = vld [vmem:[%s15475_s1 + $0x82c] sm:$0xf]  ;;  %v14572_v2 = vadd.f32 %v5691_v27, %v5679_v0  ;;  %v7775_v34 = vld [vmem:[%s15475_s1 + $0xb78] sm:$0xf0] }
 0x2a3   :  { %5929 = vmatpush.bf16.msrb.mxu0 %v7586_v12  ;;  %5942 = vmatpush.bf16.msrb.mxu1 %v7714_v20  ;;  %v9752_v38 = vld [vmem:[%s15475_s1 + $0x98c] sm:$0xf]  ;;  %v7362_v8 = vor.u32 %v9708_v44, %v7359_v56  ;;  %v7666_v20 = vor.u32 %v9784_v1, %v7663_v53  ;;  %v7967_v21 = vld [vmem:[%s15475_s1 + $0xcf8] sm:$0xf0] }
 0x2a4   :  { %5955 = vmatpush.bf16.msrb.mxu2 %v7842_v23  ;;  %5920 = vmatpush.bf16.msra.mxu3 %v7394_v15  ;;  %v7538_v9 = vor.u32 %v9752_v38, %v7535_v6  ;;  %v9704_v12 = vld [vmem:[%s15475_s1 + $0x80c] sm:$0xf]  ;;  %v7794_v23 = vor.u32 %v9816_v16, %v7791_v4  ;;  %v7631_v50 = vld [vmem:[%s15475_s1 + $0xa58] sm:$0xf0] }
 0x2a5   :  { %5911 = vmatmul.bf16.vlgmr.msra.gmra.mxu2 %v10753_v42  ;;  %v7378_v42 = vor.u32 %v9712_v62, %v7375_v43  ;;  %v9860_v15 = vld [vmem:[%s15475_s1 + $0xcec] sm:$0xf]  ;;  %v7650_v62 = vor.u32 %v9780_v33, %v7647_v63  ;;  %v7778_v43 = vor.u32 %v9812_v25, %v7775_v34  ;;  %v7759_v51 = vld [vmem:[%s15475_s1 + $0xb58] sm:$0xf0]  ;;  %v7634_v56 = vor.u32 %v9776_v48, %v7631_v50 }
 0x2a6   :  { %v7970_v31 = vor.u32 %v9860_v15, %v7967_v21  ;;  %v7487_v38 = vld [vmem:[%s15475_s1 + $0x938] sm:$0xf0]  ;;  %v9772_v6 = vld [vmem:[%s15475_s1 + $0xa2c] sm:$0xf] }
 0x2a7   :  { %5930 = vmatpush.bf16.msrb.mxu0 %v7570_v60  ;;  %5943 = vmatpush.bf16.msrb.mxu1 %v7698_v47  ;;  %v7346_v60 = vor.u32 %v9704_v12, %v7343_v29  ;;  %v9744_v47 = vld [vmem:[%s15475_s1 + $0x94c] sm:$0xf]  ;;  %v5680_v52 = vpop.f32.mrf.mxu0  ;;  %v7615_v3 = vld [vmem:[%s15475_s1 + $0xa38] sm:$0xf0] }
 0x2a8   :  { %5956 = vmatpush.bf16.msrb.mxu2 %v7826_v54  ;;  %5921 = vmatpush.bf16.msra.mxu3 %v7378_v42  ;;  %v7503_v54 = vld [vmem:[%s15475_s1 + $0x958] sm:$0xf0]  ;;  %v9804_v53 = vld [vmem:[%s15475_s1 + $0xb2c] sm:$0xf] }
 0x2a9   :  { %v7951_v42 = vld [vmem:[%s15475_s1 + $0xcd8] sm:$0xf0]  ;;  %v7506_v44 = vor.u32 %v9744_v47, %v7503_v54  ;;  %v9852_v4 = vld [vmem:[%s15475_s1 + $0xcac] sm:$0xf] }
 0x2aa   :  { %v7954_v1 = vor.u32 %v9856_v61, %v7951_v42  ;;  %v7743_v16 = vld [vmem:[%s15475_s1 + $0xb38] sm:$0xf0]  ;;  %v9736_v7 = vld [vmem:[%s15475_s1 + $0x90c] sm:$0xf] }
 0x2ab   :  { %5931 = vmatpush.bf16.msrb.mxu0 %v7554_v55  ;;  %5944 = vmatpush.bf16.msrb.mxu1 %v7682_v57  ;;  %v5693_v55 = vpop.f32.mrf.mxu1  ;;  %v7762_v57 = vor.u32 %v9808_v41, %v7759_v51  ;;  %v7935_v0 = vld [vmem:[%s15475_s1 + $0xcb8] sm:$0xf0]  ;;  %v9768_v12 = vld [vmem:[%s15475_s1 + $0xa0c] sm:$0xf] }
 0x2ac   :  { %5957 = vmatpush.bf16.msrb.mxu2 %v7810_v58  ;;  %5922 = vmatpush.bf16.msra.mxu3 %v7362_v8  ;;  %v9740_v58 = vld [vmem:[%s15475_s1 + $0x92c] sm:$0xf]  ;;  %v7471_v8 = vld [vmem:[%s15475_s1 + $0x918] sm:$0xf0] }
 0x2ad   :  { %v7490_v27 = vor.u32 %v9740_v58, %v7487_v38  ;;  %v7599_v29 = vld [vmem:[%s15475_s1 + $0xa18] sm:$0xf0]  ;;  %v9800_v17 = vld [vmem:[%s15475_s1 + $0xb0c] sm:$0xf]  ;;  %v7474_v34 = vor.u32 %v9736_v7, %v7471_v8 }
 0x2ae   :  { %v9848_v32 = vld [vmem:[%s15475_s1 + $0xc8c] sm:$0xf]  ;;  %v7919_v26 = vld [vmem:[%s15475_s1 + $0xc98] sm:$0xf0] }
 0x2af   :  { %5932 = vmatpush.bf16.msrb.mxu0 %v7538_v9  ;;  %5945 = vmatpush.bf16.msrb.mxu1 %v7666_v20  ;;  %v7746_v9 = vor.u32 %v9804_v53, %v7743_v16  ;;  %v7938_v20 = vor.u32 %v9852_v4, %v7935_v0  ;;  %v9892_v33 = vld [vmem:[%s15475_s1 + $0xdec] sm:$0xf]  ;;  %v8095_v63 = vld [vmem:[%s15475_s1 + $0xdf8] sm:$0xf0] }
 0x2b0   :  { %5958 = vmatpush.bf16.msrb.mxu2 %v7794_v23  ;;  %5923 = vmatpush.bf16.msra.mxu3 %v7346_v60  ;;  %v7727_v23 = vld [vmem:[%s15475_s1 + $0xb18] sm:$0xf0]  ;;  %v9924_v25 = vld [vmem:[%s15475_s1 + $0xeec] sm:$0xf]  ;;  %v8098_v47 = vor.u32 %v9892_v33, %v8095_v63 }
 0x2b1   :  { %v8223_v15 = vld [vmem:[%s15475_s1 + $0xef8] sm:$0xf0]  ;;  %v9956_v21 = vld [vmem:[%s15475_s1 + $0xfec] sm:$0xf] }
 0x2b2   :  { %v8351_v60 = vld [vmem:[%s15475_s1 + $0xff8] sm:$0xf0]  ;;  %v9844_v54 = vld [vmem:[%s15475_s1 + $0xc6c] sm:$0xf] }
 0x2b3   :  { %5933 = vmatpush.bf16.msrb.mxu0 %v7522_v39  ;;  %5946 = vmatpush.bf16.msrb.mxu1 %v7650_v62  ;;  %v7602_v39 = vor.u32 %v9768_v12, %v7599_v29  ;;  %v7730_v62 = vor.u32 %v9800_v17, %v7727_v23  ;;  %v7903_v48 = vld [vmem:[%s15475_s1 + $0xc78] sm:$0xf0]  ;;  %v8354_v50 = vor.u32 %v9956_v21, %v8351_v60  ;;  %v9888_v41 = vld [vmem:[%s15475_s1 + $0xdcc] sm:$0xf] }
 0x2b4   :  { %5959 = vmatpush.bf16.msrb.mxu2 %v7778_v43  ;;  %5968 = vmatpush.bf16.msrb.mxu3 %v7970_v31  ;;  %v7922_v43 = vor.u32 %v9848_v32, %v7919_v26  ;;  %v8226_v31 = vor.u32 %v9924_v25, %v8223_v15  ;;  %v8079_v51 = vld [vmem:[%s15475_s1 + $0xdd8] sm:$0xf0]  ;;  %v9920_v52 = vld [vmem:[%s15475_s1 + $0xecc] sm:$0xf] }
 0x2b5   :  { %5924 = vmatmul.bf16.vlgmr.msra.gmra.mxu3 %v10951_v24  ;;  %v7618_v24 = vor.u32 %v9772_v6, %v7615_v3  ;;  %v8207_v61 = vld [vmem:[%s15475_s1 + $0xed8] sm:$0xf0]  ;;  %v9952_v42 = vld [vmem:[%s15475_s1 + $0xfcc] sm:$0xf]  ;;  %v8082_v58 = vor.u32 %v9888_v41, %v8079_v51 }
 0x2b6   :  { %v8335_v55 = vld [vmem:[%s15475_s1 + $0xfd8] sm:$0xf0]  ;;  %v9840_v6 = vld [vmem:[%s15475_s1 + $0xc4c] sm:$0xf]  ;;  %v8210_v3 = vor.u32 %v9920_v52, %v8207_v61 }
 0x2b7   :  { %5934 = vmatpush.bf16.msrb.mxu0 %v7506_v44  ;;  %5947 = vmatpush.bf16.msrb.mxu1 %v7634_v56  ;;  %v7906_v56 = vor.u32 %v9844_v54, %v7903_v48  ;;  %v8338_v53 = vor.u32 %v9952_v42, %v8335_v55  ;;  %v9884_v16 = vld [vmem:[%s15475_s1 + $0xdac] sm:$0xf]  ;;  %v8319_v8 = vld [vmem:[%s15475_s1 + $0xfb8] sm:$0xf0] }
 0x2b8   :  { %5960 = vmatpush.bf16.msrb.mxu2 %v7762_v57  ;;  %5969 = vmatpush.bf16.msrb.mxu3 %v7954_v1  ;;  %v5704_v44 = vpop.f32.mrf.mxu2  ;;  %v5717_v38 = vpop.f32.mrf.mxu3  ;;  %v7887_v1 = vld [vmem:[%s15475_s1 + $0xc58] sm:$0xf0]  ;;  %v9916_v4 = vld [vmem:[%s15475_s1 + $0xeac] sm:$0xf] }
 0x2b9   :  { %v5705_v57 = vadd.f32 %v5704_v44, %v14572_v2  ;;  %v8063_v2 = vld [vmem:[%s15475_s1 + $0xdb8] sm:$0xf0]  ;;  %v9948_v7 = vld [vmem:[%s15475_s1 + $0xfac] sm:$0xf] }
 0x2ba   :  { %v8322_v29 = vor.u32 %v9948_v7, %v8319_v8  ;;  %v8047_v17 = vld [vmem:[%s15475_s1 + $0xd98] sm:$0xf0]  ;;  %v9944_v26 = vld [vmem:[%s15475_s1 + $0xf8c] sm:$0xf] }
 0x2bb   :  { %5935 = vmatpush.bf16.msrb.mxu0 %v7490_v27  ;;  %5948 = vmatpush.bf16.msrb.mxu1 %v7618_v24  ;;  %v5718_v0 = vadd.f32 %v5717_v38, %v5705_v57  ;;  %v8191_v27 = vld [vmem:[%s15475_s1 + $0xeb8] sm:$0xf0]  ;;  %v8066_v24 = vor.u32 %v9884_v16, %v8063_v2  ;;  %v9832_v60 = vld [vmem:[%s15475_s1 + $0xc0c] sm:$0xf] }
 0x2bc   :  { %5961 = vmatpush.bf16.msrb.mxu2 %v7746_v9  ;;  %5970 = vmatpush.bf16.msrb.mxu3 %v7938_v20  ;;  %v7871_v9 = vld [vmem:[%s15475_s1 + $0xc38] sm:$0xf0]  ;;  %v8194_v12 = vor.u32 %v9916_v4, %v8191_v27  ;;  %v9912_v20 = vld [vmem:[%s15475_s1 + $0xe8c] sm:$0xf] }
 0x2bd   :  { %v8175_v32 = vld [vmem:[%s15475_s1 + $0xe98] sm:$0xf0]  ;;  %v9876_v48 = vld [vmem:[%s15475_s1 + $0xd6c] sm:$0xf] }
 0x2be   :  { %v8303_v33 = vld [vmem:[%s15475_s1 + $0xf98] sm:$0xf0]  ;;  %v9940_v51 = vld [vmem:[%s15475_s1 + $0xf6c] sm:$0xf] }
 0x2bf   :  { %5936 = vmatpush.bf16.msrb.mxu0 %v7474_v34  ;;  %5949 = vmatpush.bf16.msrb.mxu1 %v7602_v39  ;;  %v5730_v23 = vpop.f32.mrf.mxu0  ;;  %v5743_v25 = vpop.f32.mrf.mxu1  ;;  %v7855_v39 = vld [vmem:[%s15475_s1 + $0xc18] sm:$0xf0]  ;;  %v9988_v61 = vld [vmem:[%s15475_s1 + $0x10ec] sm:$0xf] }
 0x2c0   :  { %5962 = vmatpush.bf16.msrb.mxu2 %v7730_v62  ;;  %5971 = vmatpush.bf16.msrb.mxu3 %v7922_v43  ;;  %v5731_v63 = vadd.f32 %v5730_v23, %v5718_v0  ;;  %v5706_v34 = vpop.f32.mrf.mxu2  ;;  %v5719_v62 = vpop.f32.mrf.mxu3  ;;  %v8178_v43 = vor.u32 %v9912_v20, %v8175_v32  ;;  %v8159_v41 = vld [vmem:[%s15475_s1 + $0xe78] sm:$0xf0]  ;;  %v7858_v55 = vor.u32 %v9832_v60, %v7855_v39  ;;  %v9984_v4 = vld [vmem:[%s15475_s1 + $0x10cc] sm:$0xf] }
 0x2c1   :  { %v8287_v52 = vld [vmem:[%s15475_s1 + $0xf78] sm:$0xf0]  ;;  %v9980_v20 = vld [vmem:[%s15475_s1 + $0x10ac] sm:$0xf] }
 0x2c2   :  { %5937 = vmatmul.bf16.vlgmr.msrb.gmra.mxu0 %v10968_v18  ;;  %5950 = vmatmul.bf16.vlgmr.msrb.gmra.mxu1 %v10964_v30  ;;  %v7890_v18 = vor.u32 %v9840_v6, %v7887_v1  ;;  %v9880_v30 = vld [vmem:[%s15475_s1 + $0xd8c] sm:$0xf]  ;;  %v14771_v54 = vadd.f32 %v5743_v25, %v5731_v63  ;;  %v8479_v42 = vld [vmem:[%s15475_s1 + $0x10f8] sm:$0xf0]  ;;  %v8290_v57 = vor.u32 %v9940_v51, %v8287_v52 }
 0x2c3   :  { %5981 = vmatpush.bf16.msra.mxu0 %v8098_v47  ;;  %5994 = vmatpush.bf16.msra.mxu1 %v8226_v31  ;;  %v8050_v21 = vor.u32 %v9880_v30, %v8047_v17  ;;  %v8306_v47 = vor.u32 %v9944_v26, %v8303_v33  ;;  %v8031_v31 = vld [vmem:[%s15475_s1 + $0xd78] sm:$0xf0]  ;;  %v9904_v6 = vld [vmem:[%s15475_s1 + $0xe4c] sm:$0xf]  ;;  %v8482_v1 = vor.u32 %v9988_v61, %v8479_v42 }
 0x2c4   :  { %6007 = vmatpush.bf16.msra.mxu2 %v8354_v50  ;;  %5972 = vmatpush.bf16.msrb.mxu3 %v7906_v56  ;;  %v9908_v50 = vld [vmem:[%s15475_s1 + $0xe6c] sm:$0xf]  ;;  %v8034_v44 = vor.u32 %v9876_v48, %v8031_v31  ;;  %v8015_v38 = vld [vmem:[%s15475_s1 + $0xd58] sm:$0xf0] }
 0x2c5   :  { %5963 = vmatmul.bf16.vlgmr.msrb.gmra.mxu2 %v10978_v35  ;;  %v9836_v35 = vld [vmem:[%s15475_s1 + $0xc2c] sm:$0xf]  ;;  %v8162_v56 = vor.u32 %v9908_v50, %v8159_v41  ;;  %v8271_v16 = vld [vmem:[%s15475_s1 + $0xf58] sm:$0xf0] }
 0x2c6   :  { %v7874_v15 = vor.u32 %v9836_v35, %v7871_v9  ;;  %v8463_v0 = vld [vmem:[%s15475_s1 + $0x10d8] sm:$0xf0]  ;;  %v9900_v9 = vld [vmem:[%s15475_s1 + $0xe2c] sm:$0xf] }
 0x2c7   :  { %5982 = vmatpush.bf16.msra.mxu0 %v8082_v58  ;;  %5995 = vmatpush.bf16.msra.mxu1 %v8210_v3  ;;  %v9872_v58 = vld [vmem:[%s15475_s1 + $0xd4c] sm:$0xf]  ;;  %v8143_v3 = vld [vmem:[%s15475_s1 + $0xe58] sm:$0xf0]  ;;  %v5732_v2 = vpop.f32.mrf.mxu0  ;;  %v5745_v27 = vpop.f32.mrf.mxu1 }
 0x2c8   :  { %6008 = vmatpush.bf16.msra.mxu2 %v8338_v53  ;;  %5973 = vmatpush.bf16.msrb.mxu3 %v7890_v18  ;;  %v9936_v53 = vld [vmem:[%s15475_s1 + $0xf4c] sm:$0xf]  ;;  %v8018_v7 = vor.u32 %v9872_v58, %v8015_v38  ;;  %v8146_v8 = vor.u32 %v9904_v6, %v8143_v3  ;;  %v7999_v35 = vld [vmem:[%s15475_s1 + $0xd38] sm:$0xf0] }
 0x2c9   :  { %v8274_v18 = vor.u32 %v9936_v53, %v8271_v16  ;;  %v9932_v30 = vld [vmem:[%s15475_s1 + $0xf2c] sm:$0xf]  ;;  %v8255_v17 = vld [vmem:[%s15475_s1 + $0xf38] sm:$0xf0] }
 0x2ca   :  { %v8447_v23 = vld [vmem:[%s15475_s1 + $0x10b8] sm:$0xf0]  ;;  %v9864_v26 = vld [vmem:[%s15475_s1 + $0xd0c] sm:$0xf]  ;;  %v8258_v63 = vor.u32 %v9932_v30, %v8255_v17 }
 0x2cb   :  { %5983 = vmatpush.bf16.msra.mxu0 %v8066_v24  ;;  %5996 = vmatpush.bf16.msra.mxu1 %v8194_v12  ;;  %v9868_v24 = vld [vmem:[%s15475_s1 + $0xd2c] sm:$0xf]  ;;  %v8466_v12 = vor.u32 %v9984_v4, %v8463_v0  ;;  %v7983_v33 = vld [vmem:[%s15475_s1 + $0xd18] sm:$0xf0] }
 0x2cc   :  { %6009 = vmatpush.bf16.msra.mxu2 %v8322_v29  ;;  %5974 = vmatpush.bf16.msrb.mxu3 %v7874_v15  ;;  %v8127_v29 = vld [vmem:[%s15475_s1 + $0xe38] sm:$0xf0]  ;;  %v8002_v32 = vor.u32 %v9868_v24, %v7999_v35  ;;  %v9896_v25 = vld [vmem:[%s15475_s1 + $0xe0c] sm:$0xf]  ;;  %v7986_v31 = vor.u32 %v9864_v26, %v7983_v33 }
 0x2cd   :  { %v8111_v34 = vld [vmem:[%s15475_s1 + $0xe18] sm:$0xf0]  ;;  %v9928_v15 = vld [vmem:[%s15475_s1 + $0xf0c] sm:$0xf] }
 0x2ce   :  { %v8239_v60 = vld [vmem:[%s15475_s1 + $0xf18] sm:$0xf0]  ;;  %v9976_v39 = vld [vmem:[%s15475_s1 + $0x108c] sm:$0xf]  ;;  %v8114_v52 = vor.u32 %v9896_v25, %v8111_v34 }
 0x2cf   :  { %5984 = vmatpush.bf16.msra.mxu0 %v8050_v21  ;;  %5997 = vmatpush.bf16.msra.mxu1 %v8178_v43  ;;  %v8450_v21 = vor.u32 %v9980_v20, %v8447_v23  ;;  %v8431_v62 = vld [vmem:[%s15475_s1 + $0x1098] sm:$0xf0]  ;;  %v10020_v43 = vld [vmem:[%s15475_s1 + $0x11ec] sm:$0xf]  ;;  %v8242_v61 = vor.u32 %v9928_v15, %v8239_v60 }
 0x2d0   :  { %6010 = vmatpush.bf16.msra.mxu2 %v8306_v47  ;;  %5975 = vmatpush.bf16.msrb.mxu3 %v7858_v55  ;;  %v8607_v47 = vld [vmem:[%s15475_s1 + $0x11f8] sm:$0xf0]  ;;  %v10052_v48 = vld [vmem:[%s15475_s1 + $0x12ec] sm:$0xf]  ;;  %v8434_v42 = vor.u32 %v9976_v39, %v8431_v62 }
 0x2d1   :  { %v8735_v50 = vld [vmem:[%s15475_s1 + $0x12f8] sm:$0xf0]  ;;  %v10084_v41 = vld [vmem:[%s15475_s1 + $0x13ec] sm:$0xf]  ;;  %v8610_v55 = vor.u32 %v10020_v43, %v8607_v47 }
 0x2d2   :  { %v8863_v51 = vld [vmem:[%s15475_s1 + $0x13f8] sm:$0xf0]  ;;  %v10016_v38 = vld [vmem:[%s15475_s1 + $0x11cc] sm:$0xf] }
 0x2d3   :  { %5985 = vmatpush.bf16.msra.mxu0 %v8034_v44  ;;  %5998 = vmatpush.bf16.msra.mxu1 %v8162_v56  ;;  %v9972_v44 = vld [vmem:[%s15475_s1 + $0x106c] sm:$0xf]  ;;  %v8415_v56 = vld [vmem:[%s15475_s1 + $0x1078] sm:$0xf0]  ;;  %v8866_v58 = vor.u32 %v10084_v41, %v8863_v51 }
 0x2d4   :  { %6011 = vmatpush.bf16.msra.mxu2 %v8290_v57  ;;  %6020 = vmatpush.bf16.msra.mxu3 %v8482_v1  ;;  %v8738_v57 = vor.u32 %v10052_v48, %v8735_v50  ;;  %v8591_v6 = vld [vmem:[%s15475_s1 + $0x11d8] sm:$0xf0]  ;;  %v10048_v1 = vld [vmem:[%s15475_s1 + $0x12cc] sm:$0xf]  ;;  %v8418_v4 = vor.u32 %v9972_v44, %v8415_v56 }
 0x2d5   :  { %5976 = vmatmul.bf16.vlgmr.msrb.gmra.mxu3 %v11174_v28  ;;  %v8130_v28 = vor.u32 %v9900_v9, %v8127_v29  ;;  %v8719_v3 = vld [vmem:[%s15475_s1 + $0x12d8] sm:$0xf0]  ;;  %v10080_v53 = vld [vmem:[%s15475_s1 + $0x13cc] sm:$0xf]  ;;  %v8594_v27 = vor.u32 %v10016_v38, %v8591_v6 }
 0x2d6   :  { %v8847_v16 = vld [vmem:[%s15475_s1 + $0x13d8] sm:$0xf0]  ;;  %v8722_v24 = vor.u32 %v10048_v1, %v8719_v3  ;;  %v10012_v9 = vld [vmem:[%s15475_s1 + $0x11ac] sm:$0xf] }
 0x2d7   :  { %5986 = vmatpush.bf16.msra.mxu0 %v8018_v7  ;;  %5999 = vmatpush.bf16.msra.mxu1 %v8146_v8  ;;  %v9968_v8 = vld [vmem:[%s15475_s1 + $0x104c] sm:$0xf]  ;;  %v8850_v35 = vor.u32 %v10080_v53, %v8847_v16  ;;  %v8703_v30 = vld [vmem:[%s15475_s1 + $0x12b8] sm:$0xf0] }
 0x2d8   :  { %6012 = vmatpush.bf16.msra.mxu2 %v8274_v18  ;;  %6021 = vmatpush.bf16.msra.mxu3 %v8466_v12  ;;  %v5756_v2 = vpop.f32.mrf.mxu2  ;;  %v5769_v7 = vpop.f32.mrf.mxu3  ;;  %v8399_v18 = vld [vmem:[%s15475_s1 + $0x1058] sm:$0xf0]  ;;  %v10044_v12 = vld [vmem:[%s15475_s1 + $0x12ac] sm:$0xf] }
 0x2d9   :  { %v5757_v0 = vadd.f32 %v5756_v2, %v14771_v54  ;;  %v8575_v54 = vld [vmem:[%s15475_s1 + $0x11b8] sm:$0xf0]  ;;  %v10076_v17 = vld [vmem:[%s15475_s1 + $0x13ac] sm:$0xf]  ;;  %v8706_v26 = vor.u32 %v10044_v12, %v8703_v30 }
 0x2da   :  { %v8831_v20 = vld [vmem:[%s15475_s1 + $0x13b8] sm:$0xf0]  ;;  %v8578_v23 = vor.u32 %v10012_v9, %v8575_v54  ;;  %v10072_v34 = vld [vmem:[%s15475_s1 + $0x138c] sm:$0xf] }
 0x2db   :  { %5987 = vmatpush.bf16.msra.mxu0 %v8002_v32  ;;  %6000 = vmatpush.bf16.msra.mxu1 %v8130_v28  ;;  %v5770_v29 = vadd.f32 %v5769_v7, %v5757_v0  ;;  %v8383_v32 = vld [vmem:[%s15475_s1 + $0x1038] sm:$0xf0]  ;;  %v8834_v33 = vor.u32 %v10076_v17, %v8831_v20  ;;  %v9960_v48 = vld [vmem:[%s15475_s1 + $0x100c] sm:$0xf] }
 0x2dc   :  { %6013 = vmatpush.bf16.msra.mxu2 %v8258_v63  ;;  %6022 = vmatpush.bf16.msra.mxu3 %v8450_v21  ;;  %v8559_v28 = vld [vmem:[%s15475_s1 + $0x1198] sm:$0xf0]  ;;  %v10040_v63 = vld [vmem:[%s15475_s1 + $0x128c] sm:$0xf] }
 0x2dd   :  { %v8687_v25 = vld [vmem:[%s15475_s1 + $0x1298] sm:$0xf0]  ;;  %v10068_v56 = vld [vmem:[%s15475_s1 + $0x136c] sm:$0xf] }
 0x2de   :  { %v8815_v15 = vld [vmem:[%s15475_s1 + $0x1398] sm:$0xf0]  ;;  %v8690_v41 = vor.u32 %v10040_v63, %v8687_v25  ;;  %v10000_v16 = vld [vmem:[%s15475_s1 + $0x114c] sm:$0xf] }
 0x2df   :  { %5988 = vmatpush.bf16.msra.mxu0 %v7986_v31  ;;  %6001 = vmatpush.bf16.msra.mxu1 %v8114_v52  ;;  %v5782_v21 = vpop.f32.mrf.mxu0  ;;  %v5795_v47 = vpop.f32.mrf.mxu1  ;;  %v8367_v31 = vld [vmem:[%s15475_s1 + $0x1018] sm:$0xf0]  ;;  %v8818_v51 = vor.u32 %v10072_v34, %v8815_v15  ;;  %v10004_v52 = vld [vmem:[%s15475_s1 + $0x116c] sm:$0xf] }
 0x2e0   :  { %6014 = vmatpush.bf16.msra.mxu2 %v8242_v61  ;;  %6023 = vmatpush.bf16.msra.mxu3 %v8434_v42  ;;  %v5758_v60 = vpop.f32.mrf.mxu2  ;;  %v5783_v39 = vadd.f32 %v5782_v21, %v5770_v29  ;;  %v5771_v50 = vpop.f32.mrf.mxu3  ;;  %v8543_v61 = vld [vmem:[%s15475_s1 + $0x1178] sm:$0xf0]  ;;  %v10036_v42 = vld [vmem:[%s15475_s1 + $0x126c] sm:$0xf]  ;;  %v8370_v6 = vor.u32 %v9960_v48, %v8367_v31 }
 0x2e1   :  { %v8671_v44 = vld [vmem:[%s15475_s1 + $0x1278] sm:$0xf0]  ;;  %v8546_v1 = vor.u32 %v10004_v52, %v8543_v61  ;;  %v10064_v7 = vld [vmem:[%s15475_s1 + $0x134c] sm:$0xf] }
 0x2e2   :  { %5989 = vmatmul.bf16.vlgmr.msra.gmra.mxu0 %v11191_v59  ;;  %6002 = vmatmul.bf16.vlgmr.msra.gmra.mxu1 %v11187_v19  ;;  %v8402_v59 = vor.u32 %v9968_v8, %v8399_v18  ;;  %v10008_v19 = vld [vmem:[%s15475_s1 + $0x118c] sm:$0xf]  ;;  %v8991_v38 = vld [vmem:[%s15475_s1 + $0x14f8] sm:$0xf0]  ;;  %v8674_v3 = vor.u32 %v10036_v42, %v8671_v44 }
 0x2e3   :  { %6033 = vmatpush.bf16.msrb.mxu0 %v8610_v55  ;;  %6046 = vmatpush.bf16.msrb.mxu1 %v8738_v57  ;;  %v8562_v43 = vor.u32 %v10008_v19, %v8559_v28  ;;  %v5796_v55 = vadd.f32 %v5795_v47, %v5783_v39  ;;  %v8799_v57 = vld [vmem:[%s15475_s1 + $0x1378] sm:$0xf0]  ;;  %v10112_v18 = vld [vmem:[%s15475_s1 + $0x14cc] sm:$0xf] }
 0x2e4   :  { %6059 = vmatpush.bf16.msrb.mxu2 %v8866_v58  ;;  %6024 = vmatpush.bf16.msra.mxu3 %v8418_v4  ;;  %v10116_v58 = vld [vmem:[%s15475_s1 + $0x14ec] sm:$0xf]  ;;  %v8802_v53 = vor.u32 %v10068_v56, %v8799_v57  ;;  %v8527_v2 = vld [vmem:[%s15475_s1 + $0x1158] sm:$0xf0] }
 0x2e5   :  { %6015 = vmatmul.bf16.vlgmr.msra.gmra.mxu2 %v11201_v37  ;;  %v9964_v37 = vld [vmem:[%s15475_s1 + $0x102c] sm:$0xf]  ;;  %v8994_v0 = vor.u32 %v10116_v58, %v8991_v38  ;;  %v8783_v8 = vld [vmem:[%s15475_s1 + $0x1358] sm:$0xf0]  ;;  %v8530_v9 = vor.u32 %v10000_v16, %v8527_v2 }
 0x2e6   :  { %v8386_v62 = vor.u32 %v9964_v37, %v8383_v32  ;;  %v10032_v4 = vld [vmem:[%s15475_s1 + $0x124c] sm:$0xf]  ;;  %v8786_v30 = vor.u32 %v10064_v7, %v8783_v8  ;;  %v8511_v20 = vld [vmem:[%s15475_s1 + $0x1138] sm:$0xf0] }
 0x2e7   :  { %6034 = vmatpush.bf16.msrb.mxu0 %v8594_v27  ;;  %6047 = vmatpush.bf16.msrb.mxu1 %v8722_v24  ;;  %v8655_v27 = vld [vmem:[%s15475_s1 + $0x1258] sm:$0xf0]  ;;  %v5797_v54 = vpop.f32.mrf.mxu1  ;;  %v9996_v17 = vld [vmem:[%s15475_s1 + $0x112c] sm:$0xf] }
 0x2e8   :  { %6060 = vmatpush.bf16.msrb.mxu2 %v8850_v35  ;;  %6025 = vmatpush.bf16.msra.mxu3 %v8402_v59  ;;  %v8975_v24 = vld [vmem:[%s15475_s1 + $0x14d8] sm:$0xf0]  ;;  %v5784_v35 = vpop.f32.mrf.mxu0  ;;  %v5808_v12 = vpop.f32.mrf.mxu2  ;;  %v8658_v29 = vor.u32 %v10032_v4, %v8655_v27  ;;  %v10028_v59 = vld [vmem:[%s15475_s1 + $0x122c] sm:$0xf]  ;;  %v8514_v63 = vor.u32 %v9996_v17, %v8511_v20 }
 0x2e9   :  { %v8978_v37 = vor.u32 %v10112_v18, %v8975_v24  ;;  %v8639_v32 = vld [vmem:[%s15475_s1 + $0x1238] sm:$0xf0]  ;;  %v10108_v19 = vld [vmem:[%s15475_s1 + $0x14ac] sm:$0xf]  ;;  %v10235_v35 = vld [vmem:[%s15476_s2] sm:$0xf] }
 0x2ea   :  { %v8959_v28 = vld [vmem:[%s15475_s1 + $0x14b8] sm:$0xf0]  ;;  %v9992_v25 = vld [vmem:[%s15475_s1 + $0x110c] sm:$0xf] }
 0x2eb   :  { %6035 = vmatpush.bf16.msrb.mxu0 %v8578_v23  ;;  %6048 = vmatpush.bf16.msrb.mxu1 %v8706_v26  ;;  %v15027_v23 = vadd.f32 %v5808_v12, %v5796_v55  ;;  %v10060_v26 = vld [vmem:[%s15475_s1 + $0x132c] sm:$0xf]  ;;  %v8495_v34 = vld [vmem:[%s15475_s1 + $0x1118] sm:$0xf0] }
 0x2ec   :  { %6061 = vmatpush.bf16.msrb.mxu2 %v8834_v33  ;;  %6026 = vmatpush.bf16.msra.mxu3 %v8386_v62  ;;  %v8767_v33 = vld [vmem:[%s15475_s1 + $0x1338] sm:$0xf0]  ;;  %v10024_v21 = vld [vmem:[%s15475_s1 + $0x120c] sm:$0xf]  ;;  %v8962_v62 = vor.u32 %v10108_v19, %v8959_v28 }
 0x2ed   :  { %v8770_v15 = vor.u32 %v10060_v26, %v8767_v33  ;;  %v8623_v60 = vld [vmem:[%s15475_s1 + $0x1218] sm:$0xf0]  ;;  %v10056_v39 = vld [vmem:[%s15475_s1 + $0x130c] sm:$0xf] }
 0x2ee   :  { %v10104_v47 = vld [vmem:[%s15475_s1 + $0x148c] sm:$0xf]  ;;  %v8943_v48 = vld [vmem:[%s15475_s1 + $0x1498] sm:$0xf0]  ;;  %v8626_v55 = vor.u32 %v10024_v21, %v8623_v60 }
 0x2ef   :  { %6036 = vmatpush.bf16.msrb.mxu0 %v8562_v43  ;;  %6049 = vmatpush.bf16.msrb.mxu1 %v8690_v41  ;;  %v8751_v43 = vld [vmem:[%s15475_s1 + $0x1318] sm:$0xf0]  ;;  %v10148_v31 = vld [vmem:[%s15475_s1 + $0x15ec] sm:$0xf]  ;;  %v8946_v57 = vor.u32 %v10104_v47, %v8943_v48 }
 0x2f0   :  { %6062 = vmatpush.bf16.msrb.mxu2 %v8818_v51  ;;  %6027 = vmatpush.bf16.msra.mxu3 %v8370_v6  ;;  %v9119_v50 = vld [vmem:[%s15475_s1 + $0x15f8] sm:$0xf0]  ;;  %v10180_v41 = vld [vmem:[%s15475_s1 + $0x16ec] sm:$0xf]  ;;  %v8498_v51 = vor.u32 %v9992_v25, %v8495_v34  ;;  %v8754_v44 = vor.u32 %v10056_v39, %v8751_v43  ;;  %v5810_v56 = vpop.f32.mrf.mxu2 }
 0x2f1   :  { %v9247_v52 = vld [vmem:[%s15475_s1 + $0x16f8] sm:$0xf0]  ;;  %v10212_v61 = vld [vmem:[%s15475_s1 + $0x17ec] sm:$0xf]  ;;  %v9122_v58 = vor.u32 %v10148_v31, %v9119_v50 }
 0x2f2   :  { %v9375_v42 = vld [vmem:[%s15475_s1 + $0x17f8] sm:$0xf0]  ;;  %v10100_v38 = vld [vmem:[%s15475_s1 + $0x146c] sm:$0xf] }
 0x2f3   :  { %6037 = vmatpush.bf16.msrb.mxu0 %v8546_v1  ;;  %6050 = vmatpush.bf16.msrb.mxu1 %v8674_v3  ;;  %v8927_v6 = vld [vmem:[%s15475_s1 + $0x1478] sm:$0xf0]  ;;  %v9250_v1 = vor.u32 %v10180_v41, %v9247_v52  ;;  %v9378_v3 = vor.u32 %v10212_v61, %v9375_v42  ;;  %v10176_v2 = vld [vmem:[%s15475_s1 + $0x16cc] sm:$0xf] }
 0x2f4   :  { %6063 = vmatpush.bf16.msrb.mxu2 %v8802_v53  ;;  %6072 = vmatpush.bf16.msrb.mxu3 %v8994_v0  ;;  %v10144_v53 = vld [vmem:[%s15475_s1 + $0x15cc] sm:$0xf]  ;;  %v9103_v16 = vld [vmem:[%s15475_s1 + $0x15d8] sm:$0xf0]  ;;  %v8930_v7 = vor.u32 %v10100_v38, %v8927_v6 }
 0x2f5   :  { %6028 = vmatmul.bf16.vlgmr.msra.gmra.mxu3 %v11384_v36  ;;  %v8642_v36 = vor.u32 %v10028_v59, %v8639_v32  ;;  %v9231_v4 = vld [vmem:[%s15475_s1 + $0x16d8] sm:$0xf0]  ;;  %v10208_v0 = vld [vmem:[%s15475_s1 + $0x17cc] sm:$0xf]  ;;  %v9106_v8 = vor.u32 %v10144_v53, %v9103_v16 }
 0x2f6   :  { %v9359_v27 = vld [vmem:[%s15475_s1 + $0x17d8] sm:$0xf0]  ;;  %v10096_v18 = vld [vmem:[%s15475_s1 + $0x144c] sm:$0xf]  ;;  %v9234_v12 = vor.u32 %v10176_v2, %v9231_v4 }
 0x2f7   :  { %6038 = vmatpush.bf16.msrb.mxu0 %v8530_v9  ;;  %6051 = vmatpush.bf16.msrb.mxu1 %v8658_v29  ;;  %v8911_v24 = vld [vmem:[%s15475_s1 + $0x1458] sm:$0xf0]  ;;  %v908_v9 = vperm.slane %v10235_v35, 3  ;;  %v9362_v29 = vor.u32 %v10208_v0, %v9359_v27  ;;  %v10172_v20 = vld [vmem:[%s15475_s1 + $0x16ac] sm:$0xf] }
 0x2f8   :  { %6064 = vmatpush.bf16.msrb.mxu2 %v8786_v30  ;;  %6073 = vmatpush.bf16.msrb.mxu3 %v8978_v37  ;;  %v5821_v54 = vpop.f32.mrf.mxu3  ;;  %v10140_v30 = vld [vmem:[%s15475_s1 + $0x15ac] sm:$0xf]  ;;  %v9087_v17 = vld [vmem:[%s15475_s1 + $0x15b8] sm:$0xf0]  ;;  %v8914_v26 = vor.u32 %v10096_v18, %v8911_v24 }
 0x2f9   :  { %v9215_v59 = vld [vmem:[%s15475_s1 + $0x16b8] sm:$0xf0]  ;;  %v10204_v37 = vld [vmem:[%s15475_s1 + $0x17ac] sm:$0xf]  ;;  %v5822_v19 = vadd.f32 %v5821_v54, %v908_v9 }
 0x2fa   :  { %v9343_v32 = vld [vmem:[%s15475_s1 + $0x17b8] sm:$0xf0]  ;;  %v9218_v28 = vor.u32 %v10172_v20, %v9215_v59  ;;  %v10168_v34 = vld [vmem:[%s15475_s1 + $0x168c] sm:$0xf] }
 0x2fb   :  { %6039 = vmatpush.bf16.msrb.mxu0 %v8514_v63  ;;  %6052 = vmatpush.bf16.msrb.mxu1 %v8642_v36  ;;  %v8895_v33 = vld [vmem:[%s15475_s1 + $0x1438] sm:$0xf0]  ;;  %v9346_v63 = vor.u32 %v10204_v37, %v9343_v32  ;;  %v10088_v43 = vld [vmem:[%s15475_s1 + $0x140c] sm:$0xf] }
 0x2fc   :  { %6065 = vmatpush.bf16.msrb.mxu2 %v8770_v15  ;;  %6074 = vmatpush.bf16.msrb.mxu3 %v8962_v62  ;;  %v9071_v25 = vld [vmem:[%s15475_s1 + $0x1598] sm:$0xf0]  ;;  %v10200_v15 = vld [vmem:[%s15475_s1 + $0x178c] sm:$0xf] }
 0x2fd   :  { %v9199_v36 = vld [vmem:[%s15475_s1 + $0x1698] sm:$0xf0]  ;;  %v10132_v52 = vld [vmem:[%s15475_s1 + $0x156c] sm:$0xf] }
 0x2fe   :  { %v9327_v21 = vld [vmem:[%s15475_s1 + $0x1798] sm:$0xf0]  ;;  %v9202_v41 = vor.u32 %v10168_v34, %v9199_v36  ;;  %v10164_v42 = vld [vmem:[%s15475_s1 + $0x166c] sm:$0xf] }
 0x2ff   :  { %6040 = vmatpush.bf16.msrb.mxu0 %v8498_v51  ;;  %6053 = vmatpush.bf16.msrb.mxu1 %v8626_v55  ;;  %v5834_v60 = vpop.f32.mrf.mxu0  ;;  %v8879_v47 = vld [vmem:[%s15475_s1 + $0x1418] sm:$0xf0]  ;;  %v5847_v31 = vpop.f32.mrf.mxu1  ;;  %v9330_v51 = vor.u32 %v10200_v15, %v9327_v21  ;;  %v10128_v16 = vld [vmem:[%s15475_s1 + $0x154c] sm:$0xf] }
 0x300   :  { %6066 = vmatpush.bf16.msrb.mxu2 %v8754_v44  ;;  %6075 = vmatpush.bf16.msrb.mxu3 %v8946_v57  ;;  %v5835_v48 = vadd.f32 %v5834_v60, %v5822_v19  ;;  %v5823_v50 = vpop.f32.mrf.mxu3  ;;  %v9055_v61 = vld [vmem:[%s15475_s1 + $0x1578] sm:$0xf0]  ;;  %v10196_v44 = vld [vmem:[%s15475_s1 + $0x176c] sm:$0xf]  ;;  %v8882_v6 = vor.u32 %v10088_v43, %v8879_v47 }
 0x301   :  { %v9183_v55 = vld [vmem:[%s15475_s1 + $0x1678] sm:$0xf0]  ;;  %v10160_v4 = vld [vmem:[%s15475_s1 + $0x164c] sm:$0xf] }
 0x302   :  { %6041 = vmatmul.bf16.vlgmr.msrb.gmra.mxu0 %v11397_v22  ;;  %6054 = vmatmul.bf16.vlgmr.msrb.gmra.mxu1 %v11395_v40  ;;  %v9090_v22 = vor.u32 %v10140_v30, %v9087_v17  ;;  %v10136_v40 = vld [vmem:[%s15475_s1 + $0x158c] sm:$0xf]  ;;  %v9311_v56 = vld [vmem:[%s15475_s1 + $0x1778] sm:$0xf0]  ;;  %v5848_v57 = vadd.f32 %v5847_v31, %v5835_v48 }
 0x303   :  { %6085 = vmatpush.bf16.msra.mxu0 %v9122_v58  ;;  %6098 = vmatpush.bf16.msra.mxu1 %v9250_v1  ;;  %v9074_v62 = vor.u32 %v10136_v40, %v9071_v25  ;;  %v10228_v58 = vld [vmem:[%s15475_s1 + $0x186c] sm:$0xf]  ;;  %v9439_v38 = vld [vmem:[%s15475_s1 + $0x1878] sm:$0xf0]  ;;  %v9058_v1 = vor.u32 %v10132_v52, %v9055_v61  ;;  %v9314_v53 = vor.u32 %v10196_v44, %v9311_v56  ;;  %v6155_v61 = vld [vmem:[%s15477_s3 + $0x70] sm:$0xff] }
 0x304   :  { %6111 = vmatpush.bf16.msra.mxu2 %v9378_v3  ;;  %6076 = vmatpush.bf16.msrb.mxu3 %v8930_v7  ;;  %v9186_v3 = vor.u32 %v10164_v42, %v9183_v55  ;;  %v9039_v2 = vld [vmem:[%s15475_s1 + $0x1558] sm:$0xf0]  ;;  %v9442_v27 = vor.u32 %v10228_v58, %v9439_v38  ;;  %v10224_v35 = vld [vmem:[%s15475_s1 + $0x184c] sm:$0xf]  ;;  %v6171_v55 = vld [vmem:[%s15477_s3 + $0xf0] sm:$0xff] }
 0x305   :  { %6067 = vmatmul.bf16.vlgmr.msrb.gmra.mxu2 %v11405_v45  ;;  %v10092_v45 = vld [vmem:[%s15475_s1 + $0x142c] sm:$0xf]  ;;  %v9167_v7 = vld [vmem:[%s15475_s1 + $0x1658] sm:$0xf0]  ;;  %v6187_v44 = vld [vmem:[%s15477_s3 + $0x170] sm:$0xff] }
 0x306   :  { %v8898_v39 = vor.u32 %v10092_v45, %v8895_v33  ;;  %v9295_v18 = vld [vmem:[%s15475_s1 + $0x1758] sm:$0xf0]  ;;  %v9170_v30 = vor.u32 %v10160_v4, %v9167_v7  ;;  %v10124_v20 = vld [vmem:[%s15475_s1 + $0x152c] sm:$0xf] }
 0x307   :  { %6086 = vmatpush.bf16.msra.mxu0 %v9106_v8  ;;  %6099 = vmatpush.bf16.msra.mxu1 %v9234_v12  ;;  %v10192_v8 = vld [vmem:[%s15475_s1 + $0x174c] sm:$0xf]  ;;  %v9423_v9 = vld [vmem:[%s15475_s1 + $0x1858] sm:$0xf0]  ;;  %v5836_v54 = vpop.f32.mrf.mxu0  ;;  %v9042_v12 = vor.u32 %v10128_v16, %v9039_v2 }
 0x308   :  { %6112 = vmatpush.bf16.msra.mxu2 %v9362_v29  ;;  %6077 = vmatpush.bf16.msrb.mxu3 %v8914_v26  ;;  %v5860_v0 = vpop.f32.mrf.mxu2  ;;  %v5849_v29 = vpop.f32.mrf.mxu1  ;;  %v9298_v17 = vor.u32 %v10192_v8, %v9295_v18  ;;  %v9023_v59 = vld [vmem:[%s15475_s1 + $0x1538] sm:$0xf0]  ;;  %v10156_v37 = vld [vmem:[%s15475_s1 + $0x162c] sm:$0xf]  ;;  %v9426_v32 = vor.u32 %v10224_v35, %v9423_v9  ;;  %v6149_v35 = vld [vmem:[%s15477_s3 + $0x40] sm:$0xff] }
 0x309   :  { %v5861_v24 = vadd.f32 %v5860_v0, %v5848_v57  ;;  %v9151_v26 = vld [vmem:[%s15475_s1 + $0x1638] sm:$0xf0]  ;;  %v10220_v33 = vld [vmem:[%s15475_s1 + $0x182c] sm:$0xf]  ;;  %v6167_v0 = vld [vmem:[%s15477_s3 + $0xd0] sm:$0xff] }
 0x30a   :  { %v9279_v45 = vld [vmem:[%s15475_s1 + $0x1738] sm:$0xf0]  ;;  %v10120_v25 = vld [vmem:[%s15475_s1 + $0x150c] sm:$0xf]  ;;  %v6165_v9 = vld [vmem:[%s15477_s3 + $0xc0] sm:$0xff] }
 0x30b   :  { %6087 = vmatpush.bf16.msra.mxu0 %v9090_v22  ;;  %6100 = vmatpush.bf16.msra.mxu1 %v9218_v28  ;;  %v10188_v22 = vld [vmem:[%s15475_s1 + $0x172c] sm:$0xf]  ;;  %v9407_v19 = vld [vmem:[%s15475_s1 + $0x1838] sm:$0xf0]  ;;  %v9026_v28 = vor.u32 %v10124_v20, %v9023_v59  ;;  %v6181_v54 = vld [vmem:[%s15477_s3 + $0x140] sm:$0xff] }
 0x30c   :  { %6113 = vmatpush.bf16.msra.mxu2 %v9346_v63  ;;  %6078 = vmatpush.bf16.msrb.mxu3 %v8898_v39  ;;  %v9154_v63 = vor.u32 %v10156_v37, %v9151_v26  ;;  %v9282_v40 = vor.u32 %v10188_v22, %v9279_v45  ;;  %v10152_v34 = vld [vmem:[%s15475_s1 + $0x160c] sm:$0xf]  ;;  %v9410_v15 = vor.u32 %v10220_v33, %v9407_v19  ;;  %v9135_v21 = vld [vmem:[%s15475_s1 + $0x1618] sm:$0xf0]  ;;  %v6147_v37 = vld [vmem:[%s15477_s3 + $0x30] sm:$0xff] }
 0x30d   :  { %v10184_v60 = vld [vmem:[%s15475_s1 + $0x170c] sm:$0xf]  ;;  %v9263_v39 = vld [vmem:[%s15475_s1 + $0x1718] sm:$0xf0]  ;;  %v9138_v48 = vor.u32 %v10152_v34, %v9135_v21  ;;  %v6163_v26 = vld [vmem:[%s15477_s3 + $0xb0] sm:$0xff] }
 0x30e   :  { %v10216_v43 = vld [vmem:[%s15475_s1 + $0x180c] sm:$0xf]  ;;  %v9391_v47 = vld [vmem:[%s15475_s1 + $0x1818] sm:$0xf0]  ;;  %v9266_v31 = vor.u32 %v10184_v60, %v9263_v39  ;;  %v6179_v22 = vld [vmem:[%s15477_s3 + $0x130] sm:$0xff] }
 0x30f   :  { %6088 = vmatpush.bf16.msra.mxu0 %v9074_v62  ;;  %6101 = vmatpush.bf16.msra.mxu1 %v9202_v41  ;;  %v6156_v50 = vld [vmem:[%s15477_s3 + $0x78] sm:$0xff]  ;;  %v6154_v57 = vld [vmem:[%s15477_s3 + $0x68] sm:$0xff]  ;;  %v6159_v21 = vld [vmem:[%s15477_s3 + $0x90] sm:$0xff] }
 0x310   :  { %6114 = vmatpush.bf16.msra.mxu2 %v9330_v51  ;;  %6079 = vmatpush.bf16.msrb.mxu3 %v8882_v6  ;;  %v5862_v36 = vpop.f32.mrf.mxu2  ;;  %v6172_v41 = vld [vmem:[%s15477_s3 + $0xf8] sm:$0xff]  ;;  %v9394_v51 = vor.u32 %v10216_v43, %v9391_v47  ;;  %v6170_v58 = vld [vmem:[%s15477_s3 + $0xe8] sm:$0xff]  ;;  %v6175_v60 = vld [vmem:[%s15477_s3 + $0x110] sm:$0xff] }
 0x311   :  { %v6188_v52 = vld [vmem:[%s15477_s3 + $0x178] sm:$0xff]  ;;  %v6186_v38 = vld [vmem:[%s15477_s3 + $0x168] sm:$0xff]  ;;  %v6141_v47 = vld [vmem:[%s15477_s3] sm:$0xff] }
 0x312   :  { %v6152_v6 = vld [vmem:[%s15477_s3 + $0x58] sm:$0xff]  ;;  %v6150_v7 = vld [vmem:[%s15477_s3 + $0x48] sm:$0xff] }
 0x313   :  { %6089 = vmatpush.bf16.msra.mxu0 %v9058_v1  ;;  %6102 = vmatpush.bf16.msra.mxu1 %v9186_v3  ;;  %v6168_v1 = vld [vmem:[%s15477_s3 + $0xd8] sm:$0xff]  ;;  %v6166_v18 = vld [vmem:[%s15477_s3 + $0xc8] sm:$0xff] }
 0x314   :  { %6115 = vmatpush.bf16.msra.mxu2 %v9314_v53  ;;  %6128 = vmatpush.bf16.msra.mxu3 %v9442_v27  ;;  %v6151_v53 = vld [vmem:[%s15477_s3 + $0x50] sm:$0xff]  ;;  %v6148_v29 = vld [vmem:[%s15477_s3 + $0x38] sm:$0xff]  ;;  %v6146_v45 = vld [vmem:[%s15477_s3 + $0x28] sm:$0xff] }
 0x315   :  { %6080 = vmatmul.bf16.vlgmr.msrb.gmra.mxu3 %v11596_v5  ;;  %v9007_v5 = vld [vmem:[%s15475_s1 + $0x1518] sm:$0xf0]  ;;  %v6183_v27 = vld [vmem:[%s15477_s3 + $0x150] sm:$0xff]  ;;  %v6162_v33 = vld [vmem:[%s15477_s3 + $0xa8] sm:$0xff] }
 0x316   :  { %v9010_v62 = vor.u32 %v10120_v25, %v9007_v5  ;;  %v6180_v20 = vld [vmem:[%s15477_s3 + $0x138] sm:$0xff]  ;;  %v6178_v19 = vld [vmem:[%s15477_s3 + $0x128] sm:$0xff] }
 0x317   :  { %6090 = vmatpush.bf16.msra.mxu0 %v9042_v12  ;;  %6103 = vmatpush.bf16.msra.mxu1 %v9170_v30  ;;  %v6144_v5 = vld [vmem:[%s15477_s3 + $0x18] sm:$0xff]  ;;  %v6142_v39 = vld [vmem:[%s15477_s3 + $0x8] sm:$0xff] }
 0x318   :  { %6116 = vmatpush.bf16.msra.mxu2 %v9298_v17  ;;  %6129 = vmatpush.bf16.msra.mxu3 %v9426_v32  ;;  %v5873_v42 = vpop.f32.mrf.mxu3  ;;  %v6164_v17 = vld [vmem:[%s15477_s3 + $0xb8] sm:$0xff]  ;;  %v6174_v43 = vld [vmem:[%s15477_s3 + $0x108] sm:$0xff] }
 0x319   :  { %v5874_v56 = vadd.f32 %v5873_v42, %v5861_v24  ;;  %v6182_v24 = vld [vmem:[%s15477_s3 + $0x148] sm:$0xff]  ;;  %v6160_v34 = vld [vmem:[%s15477_s3 + $0x98] sm:$0xff] }
 0x31a   :  { %v6176_v36 = vld [vmem:[%s15477_s3 + $0x118] sm:$0xff] }
 0x31b   :  { %6091 = vmatpush.bf16.msra.mxu0 %v9026_v28  ;;  %6104 = vmatpush.bf16.msra.mxu1 %v9154_v63  ;;  %v6145_v28 = vld [vmem:[%s15477_s3 + $0x20] sm:$0xff] }
 0x31c   :  { %6117 = vmatpush.bf16.msra.mxu2 %v9282_v40  ;;  %6130 = vmatpush.bf16.msra.mxu3 %v9410_v15  ;;  %v6161_v63 = vld [vmem:[%s15477_s3 + $0xa0] sm:$0xff]  ;;  %v6143_v15 = vld [vmem:[%s15477_s3 + $0x10] sm:$0xff] }
 0x31d   :  { %v6177_v40 = vld [vmem:[%s15477_s3 + $0x120] sm:$0xff] }
 0x31f   :  { %6092 = vmatpush.bf16.msra.mxu0 %v9010_v62  ;;  %6105 = vmatpush.bf16.msra.mxu1 %v9138_v48  ;;  %v5886_v3 = vpop.f32.mrf.mxu0  ;;  %v5899_v2 = vpop.f32.mrf.mxu1  ;;  %v6158_v62 = vld [vmem:[%s15477_s3 + $0x88] sm:$0xff]  ;;  %v6157_v48 = vld [vmem:[%s15477_s3 + $0x80] sm:$0xff] }
 0x320   :  { %6118 = vmatpush.bf16.msra.mxu2 %v9266_v31  ;;  %6131 = vmatpush.bf16.msra.mxu3 %v9394_v51  ;;  %v5887_v16 = vadd.f32 %v5886_v3, %v5874_v56  ;;  %v5875_v4 = vpop.f32.mrf.mxu3  ;;  %v6173_v31 = vld [vmem:[%s15477_s3 + $0x100] sm:$0xff]  ;;  %v6138_v51 = vmax.f32 %v13790_v13, 0.0 }
 0x321   :  { %v6201_v4 = vld [vmem:[%s15477_s3 + $0x1e0] sm:$0xff] }
 0x322   :  { %6093 = vmatmul.bf16.vlgmr.msra.gmra.mxu0 %v11609_v11  ;;  %6106 = vmatmul.bf16.vlgmr.msra.gmra.mxu1 %v11607_v10  ;;  %v6153_v10 = vld [vmem:[%s15477_s3 + $0x60] sm:$0xff]  ;;  %v5900_v8 = vadd.f32 %v5899_v2, %v5887_v16 }
 0x323   :  { %6209 = vmatpush.msrb.mxu0 %v6156_v50  ;;  %6229 = vmatpush.msrb.mxu1 %v6172_v41  ;;  %v6169_v11 = vld [vmem:[%s15477_s3 + $0xe0] sm:$0xff]  ;;  %v6137_v41 = vmax.f32 %v12586_v46, 0.0 }
 0x324   :  { %6249 = vmatpush.msrb.mxu2 %v6188_v52 }
 0x325   :  { %6119 = vmatmul.bf16.vlgmr.msra.gmra.mxu2 %v11617_v14  ;;  %6210 = vmatpush.msrb.mxu0 %v6155_v61  ;;  %v6185_v14 = vld [vmem:[%s15477_s3 + $0x160] sm:$0xff]  ;;  %v6139_v61 = vmax.f32 %v15027_v23, 0.0  ;;  %v6204_v23 = vld [vmem:[%s15477_s3 + $0x1f8] sm:$0xff] }
 0x326   :  { %6230 = vmatpush.msrb.mxu1 %v6171_v55  ;;  %6250 = vmatpush.msrb.mxu2 %v6187_v44 }
 0x327   :  { %6211 = vmatpush.msrb.mxu0 %v6154_v57  ;;  %9446 = vmatmul.msk.bf16.vlgmr.msra.gmra.mxu3 %vm4833_vm0, %v11717_v49  ;;  %v6184_v49 = vld [vmem:[%s15477_s3 + $0x158] sm:$0xff]  ;;  %v5888_v59 = vpop.f32.mrf.mxu0  ;;  %v5901_v32 = vpop.f32.mrf.mxu1 }
 0x328   :  { %6231 = vmatpush.msrb.mxu1 %v6170_v58  ;;  %6251 = vmatpush.msrb.mxu2 %v6186_v38  ;;  %v5912_v12 = vpop.f32.mrf.mxu2  ;;  %v6192_v59 = vld [vmem:[%s15477_s3 + $0x198] sm:$0xff] }
 0x329   :  { %6212 = vmatpush.msrb.mxu0 %v6153_v10  ;;  %v5913_v30 = vadd.f32 %v5912_v12, %v5900_v8  ;;  %6269 = vmatpush.msrb.mxu3 %v6204_v23  ;;  %v6198_v8 = vld [vmem:[%s15477_s3 + $0x1c8] sm:$0xff] }
 0x32a   :  { %6232 = vmatpush.msrb.mxu1 %v6169_v11  ;;  %6252 = vmatpush.msrb.mxu2 %v6185_v14 }
 0x32b   :  { %6213 = vmatpush.msrb.mxu0 %v6152_v6 }
 0x32c   :  { %6233 = vmatpush.msrb.mxu1 %v6168_v1  ;;  %6253 = vmatpush.msrb.mxu2 %v6184_v49  ;;  %v6203_v49 = vld [vmem:[%s15477_s3 + $0x1f0] sm:$0xff] }
 0x32d   :  { %6214 = vmatpush.msrb.mxu0 %v6151_v53  ;;  %v6202_v53 = vld [vmem:[%s15477_s3 + $0x1e8] sm:$0xff]  ;;  %6270 = vmatpush.msrb.mxu3 %v6203_v49 }
 0x32e   :  { %6234 = vmatpush.msrb.mxu1 %v6167_v0  ;;  %6254 = vmatpush.msrb.mxu2 %v6183_v27  ;;  %v6200_v0 = vld [vmem:[%s15477_s3 + $0x1d8] sm:$0xff] }
 0x32f   :  { %6215 = vmatpush.msrb.mxu0 %v6150_v7  ;;  %6271 = vmatpush.msrb.mxu3 %v6202_v53  ;;  %v6199_v7 = vld [vmem:[%s15477_s3 + $0x1d0] sm:$0xff] }
 0x330   :  { %6235 = vmatpush.msrb.mxu1 %v6166_v18  ;;  %6255 = vmatpush.msrb.mxu2 %v6182_v24  ;;  %v5914_v25 = vpop.f32.mrf.mxu2  ;;  %v6197_v24 = vld [vmem:[%s15477_s3 + $0x1c0] sm:$0xff] }
 0x331   :  { %6216 = vmatpush.msrb.mxu0 %v6149_v35  ;;  %6272 = vmatpush.msrb.mxu3 %v6201_v4  ;;  %v6196_v35 = vld [vmem:[%s15477_s3 + $0x1b8] sm:$0xff] }
 0x332   :  { %6236 = vmatpush.msrb.mxu1 %v6165_v9  ;;  %6256 = vmatpush.msrb.mxu2 %v6181_v54 }
 0x333   :  { %6217 = vmatpush.msrb.mxu0 %v6148_v29  ;;  %6273 = vmatpush.msrb.mxu3 %v6200_v0  ;;  %v6195_v29 = vld [vmem:[%s15477_s3 + $0x1b0] sm:$0xff] }
 0x334   :  { %6237 = vmatpush.msrb.mxu1 %v6164_v17  ;;  %6257 = vmatpush.msrb.mxu2 %v6180_v20  ;;  %v6193_v17 = vld [vmem:[%s15477_s3 + $0x1a0] sm:$0xff] }
 0x335   :  { %6218 = vmatpush.msrb.mxu0 %v6147_v37  ;;  %6274 = vmatpush.msrb.mxu3 %v6199_v7 }
 0x336   :  { %6238 = vmatpush.msrb.mxu1 %v6163_v26  ;;  %6258 = vmatpush.msrb.mxu2 %v6179_v22  ;;  %v6191_v26 = vld [vmem:[%s15477_s3 + $0x190] sm:$0xff] }
 0x337   :  { %6219 = vmatpush.msrb.mxu0 %v6146_v45  ;;  %6275 = vmatpush.msrb.mxu3 %v6198_v8  ;;  %v6190_v45 = vld [vmem:[%s15477_s3 + $0x188] sm:$0xff] }
 0x338   :  { %6239 = vmatpush.msrb.mxu1 %v6162_v33  ;;  %6259 = vmatpush.msrb.mxu2 %v6178_v19  ;;  %v5925_v50 = vpop.f32.mrf.mxu3  ;;  %v6189_v33 = vld [vmem:[%s15477_s3 + $0x180] sm:$0xff] }
 0x339   :  { %6220 = vmatpush.msrb.mxu0 %v6145_v28  ;;  %v5926_v52 = vadd.f32 %v5925_v50, %v5913_v30  ;;  %6276 = vmatpush.msrb.mxu3 %v6197_v24  ;;  %v6194_v30 = vld [vmem:[%s15477_s3 + $0x1a8] sm:$0xff] }
 0x33a   :  { %6240 = vmatpush.msrb.mxu1 %v6161_v63  ;;  %6260 = vmatpush.msrb.mxu2 %v6177_v40 }
 0x33b   :  { %6221 = vmatpush.msrb.mxu0 %v6144_v5  ;;  %6277 = vmatpush.msrb.mxu3 %v6196_v35 }
 0x33c   :  { %6241 = vmatpush.msrb.mxu1 %v6160_v34  ;;  %6261 = vmatpush.msrb.mxu2 %v6176_v36 }
 0x33d   :  { %6222 = vmatpush.msrb.mxu0 %v6143_v15  ;;  %6278 = vmatpush.msrb.mxu3 %v6195_v29 }
 0x33e   :  { %6242 = vmatpush.msrb.mxu1 %v6159_v21  ;;  %6262 = vmatpush.msrb.mxu2 %v6175_v60 }
 0x33f   :  { %6223 = vmatpush.msrb.mxu0 %v6142_v39  ;;  %v5938_v42 = vpop.f32.mrf.mxu0  ;;  %v5951_v44 = vpop.f32.mrf.mxu1  ;;  %6279 = vmatpush.msrb.mxu3 %v6194_v30 }
 0x340   :  { %6243 = vmatpush.msrb.mxu1 %v6158_v62  ;;  %6263 = vmatpush.msrb.mxu2 %v6174_v43  ;;  %v5939_v55 = vadd.f32 %v5938_v42, %v5926_v52  ;;  %v5927_v56 = vpop.f32.mrf.mxu3 }
 0x341   :  { %6224 = vmatpush.msrb.mxu0 %v6141_v47  ;;  %6280 = vmatpush.msrb.mxu3 %v6193_v17 }
 0x342   :  { %6244 = vmatpush.msrb.mxu1 %v6157_v48  ;;  %6264 = vmatpush.msrb.mxu2 %v6173_v31  ;;  %v5952_v57 = vadd.f32 %v5951_v44, %v5939_v55  ;;  %v10232_v44 = vld [vmem:[%s15478_s4] ss:$0 sm:$0xff] }
 0x343   :  { %6225 = vmatmul.f32.vlgmr.msrb.gmra.mxu0 %v6137_v41  ;;  %6245 = vmatmul.f32.vlgmr.msrb.gmra.mxu1 %v6138_v51 }
 0x344   :  { %6265 = vmatmul.f32.vlgmr.msrb.gmra.mxu2 %v6139_v61  ;;  %6281 = vmatpush.msrb.mxu3 %v6192_v59 }
 0x346   :  { %6282 = vmatpush.msrb.mxu3 %v6191_v26 }
 0x347   :  { %v5940_v10 = vpop.f32.mrf.mxu0  ;;  %v5953_v46 = vpop.f32.mrf.mxu1 }
 0x348   :  { %v5964_v58 = vpop.f32.mrf.mxu2  ;;  %6283 = vmatpush.msrb.mxu3 %v6190_v45 }
 0x349   :  { %v5965_v38 = vadd.f32 %v5964_v58, %v5952_v57 }
 0x34a   :  { %6284 = vmatpush.msrb.mxu3 %v6189_v33 }
 0x350   :  { %v5966_v11 = vpop.f32.mrf.mxu2 }
 0x358   :  { %v5977_v13 = vpop.f32.mrf.mxu3 }
 0x359   :  { %v5978_v22 = vadd.f32 %v5977_v13, %v5965_v38 }
 0x35f   :  { %v5990_v14 = vpop.f32.mrf.mxu0  ;;  %v6003_v6 = vpop.f32.mrf.mxu1 }
 0x360   :  { %v5979_v1 = vpop.f32.mrf.mxu3  ;;  %v5991_v19 = vadd.f32 %v5990_v14, %v5978_v22 }
 0x362   :  { %v6004_v63 = vadd.f32 %v6003_v6, %v5991_v19 }
 0x367   :  { %v5992_v16 = vpop.f32.mrf.mxu0  ;;  %v6005_v2 = vpop.f32.mrf.mxu1 }
 0x368   :  { %v6016_v3 = vpop.f32.mrf.mxu2 }
 0x369   :  { %v6017_v40 = vadd.f32 %v6016_v3, %v6004_v63 }
 0x370   :  { %v6018_v27 = vpop.f32.mrf.mxu2 }
 0x378   :  { %v6029_v18 = vpop.f32.mrf.mxu3 }
 0x379   :  { %v6030_v25 = vadd.f32 %v6029_v18, %v6017_v40 }
 0x37f   :  { %v6042_v9 = vpop.f32.mrf.mxu0  ;;  %v6055_v54 = vpop.f32.mrf.mxu1 }
 0x380   :  { %v6031_v12 = vpop.f32.mrf.mxu3  ;;  %v6043_v5 = vadd.f32 %v6042_v9, %v6030_v25 }
 0x382   :  { %v6056_v36 = vadd.f32 %v6055_v54, %v6043_v5 }
 0x387   :  { %v6044_v37 = vpop.f32.mrf.mxu0  ;;  %v6057_v32 = vpop.f32.mrf.mxu1 }
 0x388   :  { %v6068_v20 = vpop.f32.mrf.mxu2 }
 0x389   :  { %v6069_v15 = vadd.f32 %v6068_v20, %v6056_v36 }
 0x390   :  { %v6070_v28 = vpop.f32.mrf.mxu2 }
 0x398   :  { %v6081_v34 = vpop.f32.mrf.mxu3 }
 0x399   :  { %v6082_v21 = vadd.f32 %v6081_v34, %v6069_v15 }
 0x39f   :  { %v6094_v60 = vpop.f32.mrf.mxu0  ;;  %v6107_v39 = vpop.f32.mrf.mxu1 }
 0x3a0   :  { %v6083_v62 = vpop.f32.mrf.mxu3  ;;  %v6095_v43 = vadd.f32 %v6094_v60, %v6082_v21 }
 0x3a2   :  { %v6108_v47 = vadd.f32 %v6107_v39, %v6095_v43 }
 0x3a7   :  { %v6096_v50 = vpop.f32.mrf.mxu0  ;;  %v6109_v41 = vpop.f32.mrf.mxu1 }
 0x3a8   :  { %v6120_v48 = vpop.f32.mrf.mxu2 }
 0x3a9   :  { %v6121_v31 = vadd.f32 %v6120_v48, %v6108_v47 }
 0x3aa   :  { %v6133_v51 = vpop.f32.mrf.mxu3 }
 0x3ab   :  { %v6134_v52 = vadd.f32 %v6133_v51, %v6121_v31 }
 0x3ad   :  { %v6140_v61 = vmax.f32 %v6134_v52, 0.0 }
 0x3af   :  { %6285 = vmatmul.f32.vlgmr.msrb.gmra.mxu3 %v6140_v61 }
 0x3b0   :  { %v6122_v42 = vpop.f32.mrf.mxu2 }
 0x3b2   :  { %v6135_v55 = vpop.f32.mrf.mxu3 }
 0x3c0   :  { %v6226_v56 = vpop.f32.mrf.mxu0  ;;  %v6246_v58 = vpop.f32.mrf.mxu1 }
 0x3c1   :  { %v6227_v57 = vadd.f32 %v10232_v44, %v6226_v56 }
 0x3c3   :  { %v6247_v10 = vadd.f32 %v6246_v58, %v6227_v57 }
 0x3c7   :  { %v6266_v38 = vpop.f32.mrf.mxu2 }
 0x3c8   :  { %v6267_v46 = vadd.f32 %v6266_v38, %v6247_v10 }
 0x432   :  { %v6286_v11 = vpop.f32.mrf.mxu3 }
 0x433   :  { %v6287_v13 = vadd.f32 %v6286_v11, %v6267_v46 }
 0x435   :  { %6290 = vst.msk [vmem:[#allocation2] sm:$0x3] %vm6289_vm1, %v6287_v13 }
 0x436   :  { %6301 = dma.vmem_to_hbm [thread:$0]  %s6297_s19, 32, %s6299_s21, [#allocation3]  }
 0x437   :  { %10260 = dma.done.wait [#allocation3], 32  }
 0x438   :  { %10261 = vsyncadd [#allocation3], 4294967264 }
 0x439   :  { %6306 = vsyncpa [#allocation3], 1 }

</bundles_post_ra>
